<compile_context>
chip_gen: v6e
topology: v6e:2x2x1
jax: 0.10.0
libtpu: 0.0.40
codegen_flags: <defaults>
</compile_context>

<pallas_src>
import numpy as np

import jax
import jax.numpy as jnp
from jax.experimental import pallas as pl
from jax.experimental.pallas import tpu as pltpu

EPS = 1e-5
NEG_SLOPE = 0.01

# Static geometry for a 28x28 input (MNIST-style DCGAN discriminator).
OH1 = OW1 = 15   # conv1: 1->32,  k3, s2, p2
OH2 = OW2 = 7    # conv2: 32->64, k3, s2, p0
OH3 = OW3 = 3    # conv3: 64->128,k3, s2, p0
OC1, OC2, OC3 = 32, 64, 128


def _pad8(n):
    return ((n + 7) // 8) * 8


# ------------------------------ kernel pieces ------------------------------ #
def _bn_lrelu(y, gamma, beta, m_true):
    """Single-pass training-mode BatchNorm (biased var) + LeakyReLU(0.01).

    Rows >= m_true of `y` are exactly zero, so they do not perturb the sums;
    statistics are divided by the true row count `m_true`.
    """
    inv_m = 1.0 / float(m_true)
    mean = jnp.sum(y, axis=0, keepdims=True) * inv_m
    msq = jnp.sum(y * y, axis=0, keepdims=True) * inv_m
    var = jnp.maximum(msq - mean * mean, 0.0)
    scale = gamma * jax.lax.rsqrt(var + EPS)
    shift = beta - mean * scale
    out = y * scale + shift
    return jnp.where(out >= 0.0, out, NEG_SLOPE * out)


def _conv_taps(g_ref, x, w_ref):
    """y = sum_tap (G_tap @ x) @ W_tap  -- all MXU matmuls, accumulate in f32."""
    acc = None
    for t in range(9):
        p = jnp.dot(g_ref[t], x, preferred_element_type=jnp.float32)
        z = jnp.dot(p, w_ref[t], preferred_element_type=jnp.float32)
        acc = z if acc is None else acc + z
    return acc


def _make_fused_kernel(m1, m2, m3):
    def kernel(p1_ref, w1_ref, g1_ref, b1_ref,
               g2sel_ref, w2_ref, g2_ref, b2_ref,
               g3sel_ref, w3_ref, g3_ref, b3_ref,
               wfc_ref, sfc_ref, o_ref):
        # conv1 (im2col matmul) + BN1 + LeakyReLU
        y1 = jnp.dot(p1_ref[...], w1_ref[...], preferred_element_type=jnp.float32)
        a1 = _bn_lrelu(y1, g1_ref[...], b1_ref[...], m1)

        # conv2 + BN2 + LeakyReLU (activations never leave VMEM)
        y2 = _conv_taps(g2sel_ref, a1, w2_ref)
        a2 = _bn_lrelu(y2, g2_ref[...], b2_ref[...], m2)

        # conv3 + BN3 + LeakyReLU
        y3 = _conv_taps(g3sel_ref, a2, w3_ref)
        a3 = _bn_lrelu(y3, g3_ref[...], b3_ref[...], m3)

        # fc: 3x3 conv over the 3x3 map == full (h, w, c) reduce per sample.
        prod = a3 * wfc_ref[...]                                      # (M3p, 128)
        per_sample = jnp.dot(sfc_ref[...], prod,
                             preferred_element_type=jnp.float32)      # (Np, 128)
        logits = jnp.sum(per_sample, axis=1, keepdims=True)           # (Np, 1)
        probs = jax.nn.sigmoid(logits)
        # Lane-dense (8,128) store; wrapper slices out [:N, :1].
        o_ref[...] = jnp.broadcast_to(probs, o_ref.shape)
    return kernel


# --------------------------- constant preparation --------------------------- #
def build_constants(n):
    """0/1 selection matrices (per-tap strided row gather) and fc summation."""
    m1, m2, m3 = n * OH1 * OW1, n * OH2 * OW2, n * OH3 * OW3
    m1p, m2p, m3p, npad = _pad8(m1), _pad8(m2), _pad8(m3), _pad8(n)

    g2 = np.zeros((9, m2p, m1p), np.float32)
    for b in range(n):
        for oh in range(OH2):
            for ow in range(OW2):
                r = b * OH2 * OW2 + oh * OW2 + ow
                for kh in range(3):
                    for kw in range(3):
                        c = b * OH1 * OW1 + (2 * oh + kh) * OW1 + (2 * ow + kw)
                        g2[kh * 3 + kw, r, c] = 1.0

    g3 = np.zeros((9, m3p, m2p), np.float32)
    for b in range(n):
        for oh in range(OH3):
            for ow in range(OW3):
                r = b * OH3 * OW3 + oh * OW3 + ow
                for kh in range(3):
                    for kw in range(3):
                        c = b * OH2 * OW2 + (2 * oh + kh) * OW2 + (2 * ow + kw)
                        g3[kh * 3 + kw, r, c] = 1.0

    sfc = np.zeros((npad, m3p), np.float32)
    for b in range(n):
        for p in range(9):
            sfc[b, b * 9 + p] = 1.0

    return {"g2sel": jnp.asarray(g2), "g3sel": jnp.asarray(g3),
            "sfc": jnp.asarray(sfc)}


def _prep_conv_w(w_oihw):
    """(OC, IC, 3, 3) -> (9, IC, OC), tap index = kh*3 + kw."""
    oc, ic, kh, kw = w_oihw.shape
    return jnp.transpose(w_oihw, (2, 3, 1, 0)).reshape(kh * kw, ic, oc)


def init_raw_params(key):
    ks = jax.random.split(key, 8)
    return {
        "w1": 0.05 * jax.random.normal(ks[0], (OC1, 1, 3, 3), jnp.float32),
        "g1": 1.0 + 0.1 * jax.random.normal(ks[1], (OC1,), jnp.float32),
        "b1": 0.1 * jax.random.normal(ks[2], (OC1,), jnp.float32),
        "w2": 0.05 * jax.random.normal(ks[3], (OC2, OC1, 3, 3), jnp.float32),
        "g2": 1.0 + 0.1 * jax.random.normal(ks[4], (OC2,), jnp.float32),
        "b2": 0.1 * jax.random.normal(ks[5], (OC2,), jnp.float32),
        "w3": 0.05 * jax.random.normal(ks[6], (OC3, OC2, 3, 3), jnp.float32),
        "g3": jnp.ones((OC3,), jnp.float32),
        "b3": jnp.zeros((OC3,), jnp.float32),
        "wfc": 0.05 * jax.random.normal(ks[7], (1, OC3, 3, 3), jnp.float32),
    }


def prep_params(raw, n):
    """Convert PyTorch-layout params into kernel-friendly layouts."""
    m3, m3p = n * OH3 * OW3, _pad8(n * OH3 * OW3)
    w9 = jnp.transpose(raw["wfc"], (2, 3, 1, 0)).reshape(9, OC3)   # row = kh*3+kw
    wfc_rows = jnp.pad(jnp.tile(w9, (n, 1)), ((0, m3p - m3), (0, 0)))  # (M3p, 128)
    return {
        "w1": _prep_conv_w(raw["w1"]).reshape(9, OC1),   # IC=1 -> (9, 32)
        "g1": raw["g1"].reshape(1, OC1), "b1": raw["b1"].reshape(1, OC1),
        "w2": _prep_conv_w(raw["w2"]),                   # (9, 32, 64)
        "g2": raw["g2"].reshape(1, OC2), "b2": raw["b2"].reshape(1, OC2),
        "w3": _prep_conv_w(raw["w3"]),                   # (9, 64, 128)
        "g3": raw["g3"].reshape(1, OC3), "b3": raw["b3"].reshape(1, OC3),
        "wfc_rows": wfc_rows,
    }


# -------------------------------- forward ---------------------------------- #
def dcgan_discriminator_forward(x_nchw, params, consts):
    n = x_nchw.shape[0]
    m1, m2, m3 = n * OH1 * OW1, n * OH2 * OW2, n * OH3 * OW3
    m1p, npad = _pad8(m1), _pad8(n)

    # Layer-1 im2col on the raw HBM input (only plain-JAX glue; IC=1, ~16 KB).
    xp = jnp.pad(x_nchw, ((0, 0), (0, 0), (2, 2), (2, 2)))[:, 0]   # (n, 32, 32)
    cols = []
    for kh in range(3):
        for kw in range(3):
            cols.append(xp[:, kh:kh + 2 * OH1:2, kw:kw + 2 * OW1:2])  # (n,15,15)
    patches = jnp.stack(cols, axis=-1).reshape(m1, 9)
    patches = jnp.pad(patches, ((0, m1p - m1), (0, 0)))              # (m1p, 9)

    kernel = _make_fused_kernel(m1, m2, m3)
    vmem = lambda: pl.BlockSpec(memory_space=pltpu.MemorySpace.VMEM)
    out = pl.pallas_call(
        kernel,
        out_shape=jax.ShapeDtypeStruct((npad, 128), jnp.float32),
        in_specs=[vmem() for _ in range(14)],
        out_specs=vmem(),
    )(patches,
      params["w1"], params["g1"], params["b1"],
      consts["g2sel"], params["w2"], params["g2"], params["b2"],
      consts["g3sel"], params["w3"], params["g3"], params["b3"],
      params["wfc_rows"], consts["sfc"])
    return out[:n, :1]


# ------------------------- pure-JAX reference check ------------------------- #
def _reference_forward(x, raw):
    hp = jax.lax.Precision.HIGHEST

    def conv(h, w, stride, pad):
        return jax.lax.conv_general_dilated(
            h, w, window_strides=(stride, stride),
            padding=((pad, pad), (pad, pad)),
            dimension_numbers=("NCHW", "OIHW", "NCHW"), precision=hp)

    def bn_lrelu(h, gamma, beta):
        mean = jnp.mean(h, axis=(0, 2, 3), keepdims=True)
        var = jnp.mean((h - mean) ** 2, axis=(0, 2, 3), keepdims=True)
        hn = (h - mean) * jax.lax.rsqrt(var + EPS)
        hn = hn * gamma.reshape(1, -1, 1, 1) + beta.reshape(1, -1, 1, 1)
        return jnp.where(hn >= 0.0, hn, NEG_SLOPE * hn)

    h = bn_lrelu(conv(x, raw["w1"], 2, 2), raw["g1"], raw["b1"])
    h = bn_lrelu(conv(h, raw["w2"], 2, 0), raw["g2"], raw["b2"])
    h = bn_lrelu(conv(h, raw["w3"], 2, 0), raw["g3"], raw["b3"])
    h = jax.nn.sigmoid(conv(h, raw["wfc"], 1, 0))
    return h[:, :, 0, 0]   # squeeze(-1) twice -> (N, 1)


if __name__ == "__main__":
    N = 2
    key = jax.random.PRNGKey(0)
    k_x, k_p = jax.random.split(key)
    x = jax.random.normal(k_x, (N, 1, 28, 28), jnp.float32)

    raw = init_raw_params(k_p)
    params = prep_params(raw, N)
    consts = build_constants(N)

    fwd = jax.jit(dcgan_discriminator_forward)
    out = jax.block_until_ready(fwd(x, params, consts))

    assert out.shape == (N, 1), out.shape
    assert bool(jnp.all(jnp.isfinite(out)))

    ref = jax.block_until_ready(jax.jit(_reference_forward)(x, raw))
    max_err = float(jnp.max(jnp.abs(out - ref)))
    assert max_err < 2e-3, f"mismatch vs reference: {max_err}"

    print("KERNEL_OK")
</pallas_src>

<mosaic_0001>
module attributes {stable_mosaic.version = 11 : i64} {
  func.func @kernel(%arg0: memref<456x9xf32, #tpu.memory_space<vmem>>, %arg1: memref<9x32xf32, #tpu.memory_space<vmem>>, %arg2: memref<1x32xf32, #tpu.memory_space<vmem>>, %arg3: memref<1x32xf32, #tpu.memory_space<vmem>>, %arg4: memref<9x104x456xf32, #tpu.memory_space<vmem>>, %arg5: memref<9x32x64xf32, #tpu.memory_space<vmem>>, %arg6: memref<1x64xf32, #tpu.memory_space<vmem>>, %arg7: memref<1x64xf32, #tpu.memory_space<vmem>>, %arg8: memref<9x24x104xf32, #tpu.memory_space<vmem>>, %arg9: memref<9x64x128xf32, #tpu.memory_space<vmem>>, %arg10: memref<1x128xf32, #tpu.memory_space<vmem>>, %arg11: memref<1x128xf32, #tpu.memory_space<vmem>>, %arg12: memref<24x128xf32, #tpu.memory_space<vmem>>, %arg13: memref<8x24xf32, #tpu.memory_space<vmem>>, %arg14: memref<8x128xf32, #tpu.memory_space<vmem>>) attributes {dimension_semantics = [], scalar_prefetch = 0 : i64, scratch_operands = 0 : i64, tpu.core_type = #tpu.core_type<tc>} {
    %c0 = arith.constant 0 : index
    %c0_0 = arith.constant 0 : index
    %0 = vector.load %arg0[%c0, %c0_0] : memref<456x9xf32, #tpu.memory_space<vmem>>, vector<456x9xf32>
    %c0_1 = arith.constant 0 : index
    %c0_2 = arith.constant 0 : index
    %1 = vector.load %arg1[%c0_1, %c0_2] : memref<9x32xf32, #tpu.memory_space<vmem>>, vector<9x32xf32>
    %cst = arith.constant dense<0.000000e+00> : vector<456x32xf32>
    %2 = tpu.matmul %0, %1, %cst {dimension_numbers = #tpu.dot_dimension_numbers<[1], [0], [0], [1], [0, 0, 1, 1], [], []>} : vector<456x9xf32>, vector<9x32xf32>, vector<456x32xf32> -> vector<456x32xf32>
    %c0_3 = arith.constant 0 : index
    %c0_4 = arith.constant 0 : index
    %3 = vector.load %arg2[%c0_3, %c0_4] : memref<1x32xf32, #tpu.memory_space<vmem>>, vector<1x32xf32>
    %c0_5 = arith.constant 0 : index
    %c0_6 = arith.constant 0 : index
    %4 = vector.load %arg3[%c0_5, %c0_6] : memref<1x32xf32, #tpu.memory_space<vmem>>, vector<1x32xf32>
    %cst_7 = arith.constant dense<0.000000e+00> : vector<32xf32>
    %5 = vector.multi_reduction <add>, %2, %cst_7 [0] : vector<456x32xf32> to vector<32xf32>
    %6 = vector.shape_cast %5 : vector<32xf32> to vector<1x32xf32>
    %cst_8 = arith.constant 0.00222222228 : f32
    %7 = vector.broadcast %cst_8 : f32 to vector<1x32xf32>
    %8 = arith.mulf %6, %7 : vector<1x32xf32>
    %9 = arith.mulf %2, %2 : vector<456x32xf32>
    %cst_9 = arith.constant dense<0.000000e+00> : vector<32xf32>
    %10 = vector.multi_reduction <add>, %9, %cst_9 [0] : vector<456x32xf32> to vector<32xf32>
    %11 = vector.shape_cast %10 : vector<32xf32> to vector<1x32xf32>
    %cst_10 = arith.constant 0.00222222228 : f32
    %12 = vector.broadcast %cst_10 : f32 to vector<1x32xf32>
    %13 = arith.mulf %11, %12 : vector<1x32xf32>
    %14 = arith.mulf %8, %8 : vector<1x32xf32>
    %15 = arith.subf %13, %14 : vector<1x32xf32>
    %cst_11 = arith.constant 0.000000e+00 : f32
    %16 = vector.broadcast %cst_11 : f32 to vector<1x32xf32>
    %17 = arith.maximumf %15, %16 : vector<1x32xf32>
    %cst_12 = arith.constant 9.99999974E-6 : f32
    %18 = vector.broadcast %cst_12 : f32 to vector<1x32xf32>
    %19 = arith.addf %17, %18 : vector<1x32xf32>
    %20 = math.rsqrt %19 : vector<1x32xf32>
    %21 = arith.mulf %3, %20 : vector<1x32xf32>
    %22 = arith.mulf %8, %21 : vector<1x32xf32>
    %23 = arith.subf %4, %22 : vector<1x32xf32>
    %24 = vector.broadcast %21 : vector<1x32xf32> to vector<456x32xf32>
    %25 = arith.mulf %2, %24 : vector<456x32xf32>
    %26 = vector.broadcast %23 : vector<1x32xf32> to vector<456x32xf32>
    %27 = arith.addf %25, %26 : vector<456x32xf32>
    %cst_13 = arith.constant 0.000000e+00 : f32
    %28 = vector.broadcast %cst_13 : f32 to vector<456x32xf32>
    %29 = arith.cmpf oge, %27, %28 : vector<456x32xf32>
    %cst_14 = arith.constant 0.00999999977 : f32
    %30 = vector.broadcast %cst_14 : f32 to vector<456x32xf32>
    %31 = arith.mulf %30, %27 : vector<456x32xf32>
    %32 = arith.select %29, %27, %31 : vector<456x32xi1>, vector<456x32xf32>
    %c0_15 = arith.constant 0 : index
    %c0_16 = arith.constant 0 : index
    %c0_17 = arith.constant 0 : index
    %33 = vector.load %arg4[%c0_15, %c0_16, %c0_17] : memref<9x104x456xf32, #tpu.memory_space<vmem>>, vector<1x104x456xf32>
    %34 = vector.shape_cast %33 : vector<1x104x456xf32> to vector<104x456xf32>
    %cst_18 = arith.constant dense<0.000000e+00> : vector<104x32xf32>
    %35 = tpu.matmul %34, %32, %cst_18 {dimension_numbers = #tpu.dot_dimension_numbers<[1], [0], [0], [1], [0, 0, 1, 1], [], []>} : vector<104x456xf32>, vector<456x32xf32>, vector<104x32xf32> -> vector<104x32xf32>
    %c0_19 = arith.constant 0 : index
    %c0_20 = arith.constant 0 : index
    %c0_21 = arith.constant 0 : index
    %36 = vector.load %arg5[%c0_19, %c0_20, %c0_21] : memref<9x32x64xf32, #tpu.memory_space<vmem>>, vector<1x32x64xf32>
    %37 = vector.shape_cast %36 : vector<1x32x64xf32> to vector<32x64xf32>
    %cst_22 = arith.constant dense<0.000000e+00> : vector<104x64xf32>
    %38 = tpu.matmul %35, %37, %cst_22 {dimension_numbers = #tpu.dot_dimension_numbers<[1], [0], [0], [1], [0, 0, 1, 1], [], []>} : vector<104x32xf32>, vector<32x64xf32>, vector<104x64xf32> -> vector<104x64xf32>
    %c1 = arith.constant 1 : index
    %c0_23 = arith.constant 0 : index
    %c0_24 = arith.constant 0 : index
    %39 = vector.load %arg4[%c1, %c0_23, %c0_24] : memref<9x104x456xf32, #tpu.memory_space<vmem>>, vector<1x104x456xf32>
    %40 = vector.shape_cast %39 : vector<1x104x456xf32> to vector<104x456xf32>
    %cst_25 = arith.constant dense<0.000000e+00> : vector<104x32xf32>
    %41 = tpu.matmul %40, %32, %cst_25 {dimension_numbers = #tpu.dot_dimension_numbers<[1], [0], [0], [1], [0, 0, 1, 1], [], []>} : vector<104x456xf32>, vector<456x32xf32>, vector<104x32xf32> -> vector<104x32xf32>
    %c1_26 = arith.constant 1 : index
    %c0_27 = arith.constant 0 : index
    %c0_28 = arith.constant 0 : index
    %42 = vector.load %arg5[%c1_26, %c0_27, %c0_28] : memref<9x32x64xf32, #tpu.memory_space<vmem>>, vector<1x32x64xf32>
    %43 = vector.shape_cast %42 : vector<1x32x64xf32> to vector<32x64xf32>
    %cst_29 = arith.constant dense<0.000000e+00> : vector<104x64xf32>
    %44 = tpu.matmul %41, %43, %cst_29 {dimension_numbers = #tpu.dot_dimension_numbers<[1], [0], [0], [1], [0, 0, 1, 1], [], []>} : vector<104x32xf32>, vector<32x64xf32>, vector<104x64xf32> -> vector<104x64xf32>
    %45 = arith.addf %38, %44 : vector<104x64xf32>
    %c2 = arith.constant 2 : index
    %c0_30 = arith.constant 0 : index
    %c0_31 = arith.constant 0 : index
    %46 = vector.load %arg4[%c2, %c0_30, %c0_31] : memref<9x104x456xf32, #tpu.memory_space<vmem>>, vector<1x104x456xf32>
    %47 = vector.shape_cast %46 : vector<1x104x456xf32> to vector<104x456xf32>
    %cst_32 = arith.constant dense<0.000000e+00> : vector<104x32xf32>
    %48 = tpu.matmul %47, %32, %cst_32 {dimension_numbers = #tpu.dot_dimension_numbers<[1], [0], [0], [1], [0, 0, 1, 1], [], []>} : vector<104x456xf32>, vector<456x32xf32>, vector<104x32xf32> -> vector<104x32xf32>
    %c2_33 = arith.constant 2 : index
    %c0_34 = arith.constant 0 : index
    %c0_35 = arith.constant 0 : index
    %49 = vector.load %arg5[%c2_33, %c0_34, %c0_35] : memref<9x32x64xf32, #tpu.memory_space<vmem>>, vector<1x32x64xf32>
    %50 = vector.shape_cast %49 : vector<1x32x64xf32> to vector<32x64xf32>
    %cst_36 = arith.constant dense<0.000000e+00> : vector<104x64xf32>
    %51 = tpu.matmul %48, %50, %cst_36 {dimension_numbers = #tpu.dot_dimension_numbers<[1], [0], [0], [1], [0, 0, 1, 1], [], []>} : vector<104x32xf32>, vector<32x64xf32>, vector<104x64xf32> -> vector<104x64xf32>
    %52 = arith.addf %45, %51 : vector<104x64xf32>
    %c3 = arith.constant 3 : index
    %c0_37 = arith.constant 0 : index
    %c0_38 = arith.constant 0 : index
    %53 = vector.load %arg4[%c3, %c0_37, %c0_38] : memref<9x104x456xf32, #tpu.memory_space<vmem>>, vector<1x104x456xf32>
    %54 = vector.shape_cast %53 : vector<1x104x456xf32> to vector<104x456xf32>
    %cst_39 = arith.constant dense<0.000000e+00> : vector<104x32xf32>
    %55 = tpu.matmul %54, %32, %cst_39 {dimension_numbers = #tpu.dot_dimension_numbers<[1], [0], [0], [1], [0, 0, 1, 1], [], []>} : vector<104x456xf32>, vector<456x32xf32>, vector<104x32xf32> -> vector<104x32xf32>
    %c3_40 = arith.constant 3 : index
    %c0_41 = arith.constant 0 : index
    %c0_42 = arith.constant 0 : index
    %56 = vector.load %arg5[%c3_40, %c0_41, %c0_42] : memref<9x32x64xf32, #tpu.memory_space<vmem>>, vector<1x32x64xf32>
    %57 = vector.shape_cast %56 : vector<1x32x64xf32> to vector<32x64xf32>
    %cst_43 = arith.constant dense<0.000000e+00> : vector<104x64xf32>
    %58 = tpu.matmul %55, %57, %cst_43 {dimension_numbers = #tpu.dot_dimension_numbers<[1], [0], [0], [1], [0, 0, 1, 1], [], []>} : vector<104x32xf32>, vector<32x64xf32>, vector<104x64xf32> -> vector<104x64xf32>
    %59 = arith.addf %52, %58 : vector<104x64xf32>
    %c4 = arith.constant 4 : index
    %c0_44 = arith.constant 0 : index
    %c0_45 = arith.constant 0 : index
    %60 = vector.load %arg4[%c4, %c0_44, %c0_45] : memref<9x104x456xf32, #tpu.memory_space<vmem>>, vector<1x104x456xf32>
    %61 = vector.shape_cast %60 : vector<1x104x456xf32> to vector<104x456xf32>
    %cst_46 = arith.constant dense<0.000000e+00> : vector<104x32xf32>
    %62 = tpu.matmul %61, %32, %cst_46 {dimension_numbers = #tpu.dot_dimension_numbers<[1], [0], [0], [1], [0, 0, 1, 1], [], []>} : vector<104x456xf32>, vector<456x32xf32>, vector<104x32xf32> -> vector<104x32xf32>
    %c4_47 = arith.constant 4 : index
    %c0_48 = arith.constant 0 : index
    %c0_49 = arith.constant 0 : index
    %63 = vector.load %arg5[%c4_47, %c0_48, %c0_49] : memref<9x32x64xf32, #tpu.memory_space<vmem>>, vector<1x32x64xf32>
    %64 = vector.shape_cast %63 : vector<1x32x64xf32> to vector<32x64xf32>
    %cst_50 = arith.constant dense<0.000000e+00> : vector<104x64xf32>
    %65 = tpu.matmul %62, %64, %cst_50 {dimension_numbers = #tpu.dot_dimension_numbers<[1], [0], [0], [1], [0, 0, 1, 1], [], []>} : vector<104x32xf32>, vector<32x64xf32>, vector<104x64xf32> -> vector<104x64xf32>
    %66 = arith.addf %59, %65 : vector<104x64xf32>
    %c5 = arith.constant 5 : index
    %c0_51 = arith.constant 0 : index
    %c0_52 = arith.constant 0 : index
    %67 = vector.load %arg4[%c5, %c0_51, %c0_52] : memref<9x104x456xf32, #tpu.memory_space<vmem>>, vector<1x104x456xf32>
    %68 = vector.shape_cast %67 : vector<1x104x456xf32> to vector<104x456xf32>
    %cst_53 = arith.constant dense<0.000000e+00> : vector<104x32xf32>
    %69 = tpu.matmul %68, %32, %cst_53 {dimension_numbers = #tpu.dot_dimension_numbers<[1], [0], [0], [1], [0, 0, 1, 1], [], []>} : vector<104x456xf32>, vector<456x32xf32>, vector<104x32xf32> -> vector<104x32xf32>
    %c5_54 = arith.constant 5 : index
    %c0_55 = arith.constant 0 : index
    %c0_56 = arith.constant 0 : index
    %70 = vector.load %arg5[%c5_54, %c0_55, %c0_56] : memref<9x32x64xf32, #tpu.memory_space<vmem>>, vector<1x32x64xf32>
    %71 = vector.shape_cast %70 : vector<1x32x64xf32> to vector<32x64xf32>
    %cst_57 = arith.constant dense<0.000000e+00> : vector<104x64xf32>
    %72 = tpu.matmul %69, %71, %cst_57 {dimension_numbers = #tpu.dot_dimension_numbers<[1], [0], [0], [1], [0, 0, 1, 1], [], []>} : vector<104x32xf32>, vector<32x64xf32>, vector<104x64xf32> -> vector<104x64xf32>
    %73 = arith.addf %66, %72 : vector<104x64xf32>
    %c6 = arith.constant 6 : index
    %c0_58 = arith.constant 0 : index
    %c0_59 = arith.constant 0 : index
    %74 = vector.load %arg4[%c6, %c0_58, %c0_59] : memref<9x104x456xf32, #tpu.memory_space<vmem>>, vector<1x104x456xf32>
    %75 = vector.shape_cast %74 : vector<1x104x456xf32> to vector<104x456xf32>
    %cst_60 = arith.constant dense<0.000000e+00> : vector<104x32xf32>
    %76 = tpu.matmul %75, %32, %cst_60 {dimension_numbers = #tpu.dot_dimension_numbers<[1], [0], [0], [1], [0, 0, 1, 1], [], []>} : vector<104x456xf32>, vector<456x32xf32>, vector<104x32xf32> -> vector<104x32xf32>
    %c6_61 = arith.constant 6 : index
    %c0_62 = arith.constant 0 : index
    %c0_63 = arith.constant 0 : index
    %77 = vector.load %arg5[%c6_61, %c0_62, %c0_63] : memref<9x32x64xf32, #tpu.memory_space<vmem>>, vector<1x32x64xf32>
    %78 = vector.shape_cast %77 : vector<1x32x64xf32> to vector<32x64xf32>
    %cst_64 = arith.constant dense<0.000000e+00> : vector<104x64xf32>
    %79 = tpu.matmul %76, %78, %cst_64 {dimension_numbers = #tpu.dot_dimension_numbers<[1], [0], [0], [1], [0, 0, 1, 1], [], []>} : vector<104x32xf32>, vector<32x64xf32>, vector<104x64xf32> -> vector<104x64xf32>
    %80 = arith.addf %73, %79 : vector<104x64xf32>
    %c7 = arith.constant 7 : index
    %c0_65 = arith.constant 0 : index
    %c0_66 = arith.constant 0 : index
    %81 = vector.load %arg4[%c7, %c0_65, %c0_66] : memref<9x104x456xf32, #tpu.memory_space<vmem>>, vector<1x104x456xf32>
    %82 = vector.shape_cast %81 : vector<1x104x456xf32> to vector<104x456xf32>
    %cst_67 = arith.constant dense<0.000000e+00> : vector<104x32xf32>
    %83 = tpu.matmul %82, %32, %cst_67 {dimension_numbers = #tpu.dot_dimension_numbers<[1], [0], [0], [1], [0, 0, 1, 1], [], []>} : vector<104x456xf32>, vector<456x32xf32>, vector<104x32xf32> -> vector<104x32xf32>
    %c7_68 = arith.constant 7 : index
    %c0_69 = arith.constant 0 : index
    %c0_70 = arith.constant 0 : index
    %84 = vector.load %arg5[%c7_68, %c0_69, %c0_70] : memref<9x32x64xf32, #tpu.memory_space<vmem>>, vector<1x32x64xf32>
    %85 = vector.shape_cast %84 : vector<1x32x64xf32> to vector<32x64xf32>
    %cst_71 = arith.constant dense<0.000000e+00> : vector<104x64xf32>
    %86 = tpu.matmul %83, %85, %cst_71 {dimension_numbers = #tpu.dot_dimension_numbers<[1], [0], [0], [1], [0, 0, 1, 1], [], []>} : vector<104x32xf32>, vector<32x64xf32>, vector<104x64xf32> -> vector<104x64xf32>
    %87 = arith.addf %80, %86 : vector<104x64xf32>
    %c8 = arith.constant 8 : index
    %c0_72 = arith.constant 0 : index
    %c0_73 = arith.constant 0 : index
    %88 = vector.load %arg4[%c8, %c0_72, %c0_73] : memref<9x104x456xf32, #tpu.memory_space<vmem>>, vector<1x104x456xf32>
    %89 = vector.shape_cast %88 : vector<1x104x456xf32> to vector<104x456xf32>
    %cst_74 = arith.constant dense<0.000000e+00> : vector<104x32xf32>
    %90 = tpu.matmul %89, %32, %cst_74 {dimension_numbers = #tpu.dot_dimension_numbers<[1], [0], [0], [1], [0, 0, 1, 1], [], []>} : vector<104x456xf32>, vector<456x32xf32>, vector<104x32xf32> -> vector<104x32xf32>
    %c8_75 = arith.constant 8 : index
    %c0_76 = arith.constant 0 : index
    %c0_77 = arith.constant 0 : index
    %91 = vector.load %arg5[%c8_75, %c0_76, %c0_77] : memref<9x32x64xf32, #tpu.memory_space<vmem>>, vector<1x32x64xf32>
    %92 = vector.shape_cast %91 : vector<1x32x64xf32> to vector<32x64xf32>
    %cst_78 = arith.constant dense<0.000000e+00> : vector<104x64xf32>
    %93 = tpu.matmul %90, %92, %cst_78 {dimension_numbers = #tpu.dot_dimension_numbers<[1], [0], [0], [1], [0, 0, 1, 1], [], []>} : vector<104x32xf32>, vector<32x64xf32>, vector<104x64xf32> -> vector<104x64xf32>
    %94 = arith.addf %87, %93 : vector<104x64xf32>
    %c0_79 = arith.constant 0 : index
    %c0_80 = arith.constant 0 : index
    %95 = vector.load %arg6[%c0_79, %c0_80] : memref<1x64xf32, #tpu.memory_space<vmem>>, vector<1x64xf32>
    %c0_81 = arith.constant 0 : index
    %c0_82 = arith.constant 0 : index
    %96 = vector.load %arg7[%c0_81, %c0_82] : memref<1x64xf32, #tpu.memory_space<vmem>>, vector<1x64xf32>
    %cst_83 = arith.constant dense<0.000000e+00> : vector<64xf32>
    %97 = vector.multi_reduction <add>, %94, %cst_83 [0] : vector<104x64xf32> to vector<64xf32>
    %98 = vector.shape_cast %97 : vector<64xf32> to vector<1x64xf32>
    %cst_84 = arith.constant 0.0102040814 : f32
    %99 = vector.broadcast %cst_84 : f32 to vector<1x64xf32>
    %100 = arith.mulf %98, %99 : vector<1x64xf32>
    %101 = arith.mulf %94, %94 : vector<104x64xf32>
    %cst_85 = arith.constant dense<0.000000e+00> : vector<64xf32>
    %102 = vector.multi_reduction <add>, %101, %cst_85 [0] : vector<104x64xf32> to vector<64xf32>
    %103 = vector.shape_cast %102 : vector<64xf32> to vector<1x64xf32>
    %cst_86 = arith.constant 0.0102040814 : f32
    %104 = vector.broadcast %cst_86 : f32 to vector<1x64xf32>
    %105 = arith.mulf %103, %104 : vector<1x64xf32>
    %106 = arith.mulf %100, %100 : vector<1x64xf32>
    %107 = arith.subf %105, %106 : vector<1x64xf32>
    %cst_87 = arith.constant 0.000000e+00 : f32
    %108 = vector.broadcast %cst_87 : f32 to vector<1x64xf32>
    %109 = arith.maximumf %107, %108 : vector<1x64xf32>
    %cst_88 = arith.constant 9.99999974E-6 : f32
    %110 = vector.broadcast %cst_88 : f32 to vector<1x64xf32>
    %111 = arith.addf %109, %110 : vector<1x64xf32>
    %112 = math.rsqrt %111 : vector<1x64xf32>
    %113 = arith.mulf %95, %112 : vector<1x64xf32>
    %114 = arith.mulf %100, %113 : vector<1x64xf32>
    %115 = arith.subf %96, %114 : vector<1x64xf32>
    %116 = vector.broadcast %113 : vector<1x64xf32> to vector<104x64xf32>
    %117 = arith.mulf %94, %116 : vector<104x64xf32>
    %118 = vector.broadcast %115 : vector<1x64xf32> to vector<104x64xf32>
    %119 = arith.addf %117, %118 : vector<104x64xf32>
    %cst_89 = arith.constant 0.000000e+00 : f32
    %120 = vector.broadcast %cst_89 : f32 to vector<104x64xf32>
    %121 = arith.cmpf oge, %119, %120 : vector<104x64xf32>
    %cst_90 = arith.constant 0.00999999977 : f32
    %122 = vector.broadcast %cst_90 : f32 to vector<104x64xf32>
    %123 = arith.mulf %122, %119 : vector<104x64xf32>
    %124 = arith.select %121, %119, %123 : vector<104x64xi1>, vector<104x64xf32>
    %c0_91 = arith.constant 0 : index
    %c0_92 = arith.constant 0 : index
    %c0_93 = arith.constant 0 : index
    %125 = vector.load %arg8[%c0_91, %c0_92, %c0_93] : memref<9x24x104xf32, #tpu.memory_space<vmem>>, vector<1x24x104xf32>
    %126 = vector.shape_cast %125 : vector<1x24x104xf32> to vector<24x104xf32>
    %cst_94 = arith.constant dense<0.000000e+00> : vector<24x64xf32>
    %127 = tpu.matmul %126, %124, %cst_94 {dimension_numbers = #tpu.dot_dimension_numbers<[1], [0], [0], [1], [0, 0, 1, 1], [], []>} : vector<24x104xf32>, vector<104x64xf32>, vector<24x64xf32> -> vector<24x64xf32>
    %c0_95 = arith.constant 0 : index
    %c0_96 = arith.constant 0 : index
    %c0_97 = arith.constant 0 : index
    %128 = vector.load %arg9[%c0_95, %c0_96, %c0_97] : memref<9x64x128xf32, #tpu.memory_space<vmem>>, vector<1x64x128xf32>
    %129 = vector.shape_cast %128 : vector<1x64x128xf32> to vector<64x128xf32>
    %cst_98 = arith.constant dense<0.000000e+00> : vector<24x128xf32>
    %130 = tpu.matmul %127, %129, %cst_98 {dimension_numbers = #tpu.dot_dimension_numbers<[1], [0], [0], [1], [0, 0, 1, 1], [], []>} : vector<24x64xf32>, vector<64x128xf32>, vector<24x128xf32> -> vector<24x128xf32>
    %c1_99 = arith.constant 1 : index
    %c0_100 = arith.constant 0 : index
    %c0_101 = arith.constant 0 : index
    %131 = vector.load %arg8[%c1_99, %c0_100, %c0_101] : memref<9x24x104xf32, #tpu.memory_space<vmem>>, vector<1x24x104xf32>
    %132 = vector.shape_cast %131 : vector<1x24x104xf32> to vector<24x104xf32>
    %cst_102 = arith.constant dense<0.000000e+00> : vector<24x64xf32>
    %133 = tpu.matmul %132, %124, %cst_102 {dimension_numbers = #tpu.dot_dimension_numbers<[1], [0], [0], [1], [0, 0, 1, 1], [], []>} : vector<24x104xf32>, vector<104x64xf32>, vector<24x64xf32> -> vector<24x64xf32>
    %c1_103 = arith.constant 1 : index
    %c0_104 = arith.constant 0 : index
    %c0_105 = arith.constant 0 : index
    %134 = vector.load %arg9[%c1_103, %c0_104, %c0_105] : memref<9x64x128xf32, #tpu.memory_space<vmem>>, vector<1x64x128xf32>
    %135 = vector.shape_cast %134 : vector<1x64x128xf32> to vector<64x128xf32>
    %cst_106 = arith.constant dense<0.000000e+00> : vector<24x128xf32>
    %136 = tpu.matmul %133, %135, %cst_106 {dimension_numbers = #tpu.dot_dimension_numbers<[1], [0], [0], [1], [0, 0, 1, 1], [], []>} : vector<24x64xf32>, vector<64x128xf32>, vector<24x128xf32> -> vector<24x128xf32>
    %137 = arith.addf %130, %136 : vector<24x128xf32>
    %c2_107 = arith.constant 2 : index
    %c0_108 = arith.constant 0 : index
    %c0_109 = arith.constant 0 : index
    %138 = vector.load %arg8[%c2_107, %c0_108, %c0_109] : memref<9x24x104xf32, #tpu.memory_space<vmem>>, vector<1x24x104xf32>
    %139 = vector.shape_cast %138 : vector<1x24x104xf32> to vector<24x104xf32>
    %cst_110 = arith.constant dense<0.000000e+00> : vector<24x64xf32>
    %140 = tpu.matmul %139, %124, %cst_110 {dimension_numbers = #tpu.dot_dimension_numbers<[1], [0], [0], [1], [0, 0, 1, 1], [], []>} : vector<24x104xf32>, vector<104x64xf32>, vector<24x64xf32> -> vector<24x64xf32>
    %c2_111 = arith.constant 2 : index
    %c0_112 = arith.constant 0 : index
    %c0_113 = arith.constant 0 : index
    %141 = vector.load %arg9[%c2_111, %c0_112, %c0_113] : memref<9x64x128xf32, #tpu.memory_space<vmem>>, vector<1x64x128xf32>
    %142 = vector.shape_cast %141 : vector<1x64x128xf32> to vector<64x128xf32>
    %cst_114 = arith.constant dense<0.000000e+00> : vector<24x128xf32>
    %143 = tpu.matmul %140, %142, %cst_114 {dimension_numbers = #tpu.dot_dimension_numbers<[1], [0], [0], [1], [0, 0, 1, 1], [], []>} : vector<24x64xf32>, vector<64x128xf32>, vector<24x128xf32> -> vector<24x128xf32>
    %144 = arith.addf %137, %143 : vector<24x128xf32>
    %c3_115 = arith.constant 3 : index
    %c0_116 = arith.constant 0 : index
    %c0_117 = arith.constant 0 : index
    %145 = vector.load %arg8[%c3_115, %c0_116, %c0_117] : memref<9x24x104xf32, #tpu.memory_space<vmem>>, vector<1x24x104xf32>
    %146 = vector.shape_cast %145 : vector<1x24x104xf32> to vector<24x104xf32>
    %cst_118 = arith.constant dense<0.000000e+00> : vector<24x64xf32>
    %147 = tpu.matmul %146, %124, %cst_118 {dimension_numbers = #tpu.dot_dimension_numbers<[1], [0], [0], [1], [0, 0, 1, 1], [], []>} : vector<24x104xf32>, vector<104x64xf32>, vector<24x64xf32> -> vector<24x64xf32>
    %c3_119 = arith.constant 3 : index
    %c0_120 = arith.constant 0 : index
    %c0_121 = arith.constant 0 : index
    %148 = vector.load %arg9[%c3_119, %c0_120, %c0_121] : memref<9x64x128xf32, #tpu.memory_space<vmem>>, vector<1x64x128xf32>
    %149 = vector.shape_cast %148 : vector<1x64x128xf32> to vector<64x128xf32>
    %cst_122 = arith.constant dense<0.000000e+00> : vector<24x128xf32>
    %150 = tpu.matmul %147, %149, %cst_122 {dimension_numbers = #tpu.dot_dimension_numbers<[1], [0], [0], [1], [0, 0, 1, 1], [], []>} : vector<24x64xf32>, vector<64x128xf32>, vector<24x128xf32> -> vector<24x128xf32>
    %151 = arith.addf %144, %150 : vector<24x128xf32>
    %c4_123 = arith.constant 4 : index
    %c0_124 = arith.constant 0 : index
    %c0_125 = arith.constant 0 : index
    %152 = vector.load %arg8[%c4_123, %c0_124, %c0_125] : memref<9x24x104xf32, #tpu.memory_space<vmem>>, vector<1x24x104xf32>
    %153 = vector.shape_cast %152 : vector<1x24x104xf32> to vector<24x104xf32>
    %cst_126 = arith.constant dense<0.000000e+00> : vector<24x64xf32>
    %154 = tpu.matmul %153, %124, %cst_126 {dimension_numbers = #tpu.dot_dimension_numbers<[1], [0], [0], [1], [0, 0, 1, 1], [], []>} : vector<24x104xf32>, vector<104x64xf32>, vector<24x64xf32> -> vector<24x64xf32>
    %c4_127 = arith.constant 4 : index
    %c0_128 = arith.constant 0 : index
    %c0_129 = arith.constant 0 : index
    %155 = vector.load %arg9[%c4_127, %c0_128, %c0_129] : memref<9x64x128xf32, #tpu.memory_space<vmem>>, vector<1x64x128xf32>
    %156 = vector.shape_cast %155 : vector<1x64x128xf32> to vector<64x128xf32>
    %cst_130 = arith.constant dense<0.000000e+00> : vector<24x128xf32>
    %157 = tpu.matmul %154, %156, %cst_130 {dimension_numbers = #tpu.dot_dimension_numbers<[1], [0], [0], [1], [0, 0, 1, 1], [], []>} : vector<24x64xf32>, vector<64x128xf32>, vector<24x128xf32> -> vector<24x128xf32>
    %158 = arith.addf %151, %157 : vector<24x128xf32>
    %c5_131 = arith.constant 5 : index
    %c0_132 = arith.constant 0 : index
    %c0_133 = arith.constant 0 : index
    %159 = vector.load %arg8[%c5_131, %c0_132, %c0_133] : memref<9x24x104xf32, #tpu.memory_space<vmem>>, vector<1x24x104xf32>
    %160 = vector.shape_cast %159 : vector<1x24x104xf32> to vector<24x104xf32>
    %cst_134 = arith.constant dense<0.000000e+00> : vector<24x64xf32>
    %161 = tpu.matmul %160, %124, %cst_134 {dimension_numbers = #tpu.dot_dimension_numbers<[1], [0], [0], [1], [0, 0, 1, 1], [], []>} : vector<24x104xf32>, vector<104x64xf32>, vector<24x64xf32> -> vector<24x64xf32>
    %c5_135 = arith.constant 5 : index
    %c0_136 = arith.constant 0 : index
    %c0_137 = arith.constant 0 : index
    %162 = vector.load %arg9[%c5_135, %c0_136, %c0_137] : memref<9x64x128xf32, #tpu.memory_space<vmem>>, vector<1x64x128xf32>
    %163 = vector.shape_cast %162 : vector<1x64x128xf32> to vector<64x128xf32>
    %cst_138 = arith.constant dense<0.000000e+00> : vector<24x128xf32>
    %164 = tpu.matmul %161, %163, %cst_138 {dimension_numbers = #tpu.dot_dimension_numbers<[1], [0], [0], [1], [0, 0, 1, 1], [], []>} : vector<24x64xf32>, vector<64x128xf32>, vector<24x128xf32> -> vector<24x128xf32>
    %165 = arith.addf %158, %164 : vector<24x128xf32>
    %c6_139 = arith.constant 6 : index
    %c0_140 = arith.constant 0 : index
    %c0_141 = arith.constant 0 : index
    %166 = vector.load %arg8[%c6_139, %c0_140, %c0_141] : memref<9x24x104xf32, #tpu.memory_space<vmem>>, vector<1x24x104xf32>
    %167 = vector.shape_cast %166 : vector<1x24x104xf32> to vector<24x104xf32>
    %cst_142 = arith.constant dense<0.000000e+00> : vector<24x64xf32>
    %168 = tpu.matmul %167, %124, %cst_142 {dimension_numbers = #tpu.dot_dimension_numbers<[1], [0], [0], [1], [0, 0, 1, 1], [], []>} : vector<24x104xf32>, vector<104x64xf32>, vector<24x64xf32> -> vector<24x64xf32>
    %c6_143 = arith.constant 6 : index
    %c0_144 = arith.constant 0 : index
    %c0_145 = arith.constant 0 : index
    %169 = vector.load %arg9[%c6_143, %c0_144, %c0_145] : memref<9x64x128xf32, #tpu.memory_space<vmem>>, vector<1x64x128xf32>
    %170 = vector.shape_cast %169 : vector<1x64x128xf32> to vector<64x128xf32>
    %cst_146 = arith.constant dense<0.000000e+00> : vector<24x128xf32>
    %171 = tpu.matmul %168, %170, %cst_146 {dimension_numbers = #tpu.dot_dimension_numbers<[1], [0], [0], [1], [0, 0, 1, 1], [], []>} : vector<24x64xf32>, vector<64x128xf32>, vector<24x128xf32> -> vector<24x128xf32>
    %172 = arith.addf %165, %171 : vector<24x128xf32>
    %c7_147 = arith.constant 7 : index
    %c0_148 = arith.constant 0 : index
    %c0_149 = arith.constant 0 : index
    %173 = vector.load %arg8[%c7_147, %c0_148, %c0_149] : memref<9x24x104xf32, #tpu.memory_space<vmem>>, vector<1x24x104xf32>
    %174 = vector.shape_cast %173 : vector<1x24x104xf32> to vector<24x104xf32>
    %cst_150 = arith.constant dense<0.000000e+00> : vector<24x64xf32>
    %175 = tpu.matmul %174, %124, %cst_150 {dimension_numbers = #tpu.dot_dimension_numbers<[1], [0], [0], [1], [0, 0, 1, 1], [], []>} : vector<24x104xf32>, vector<104x64xf32>, vector<24x64xf32> -> vector<24x64xf32>
    %c7_151 = arith.constant 7 : index
    %c0_152 = arith.constant 0 : index
    %c0_153 = arith.constant 0 : index
    %176 = vector.load %arg9[%c7_151, %c0_152, %c0_153] : memref<9x64x128xf32, #tpu.memory_space<vmem>>, vector<1x64x128xf32>
    %177 = vector.shape_cast %176 : vector<1x64x128xf32> to vector<64x128xf32>
    %cst_154 = arith.constant dense<0.000000e+00> : vector<24x128xf32>
    %178 = tpu.matmul %175, %177, %cst_154 {dimension_numbers = #tpu.dot_dimension_numbers<[1], [0], [0], [1], [0, 0, 1, 1], [], []>} : vector<24x64xf32>, vector<64x128xf32>, vector<24x128xf32> -> vector<24x128xf32>
    %179 = arith.addf %172, %178 : vector<24x128xf32>
    %c8_155 = arith.constant 8 : index
    %c0_156 = arith.constant 0 : index
    %c0_157 = arith.constant 0 : index
    %180 = vector.load %arg8[%c8_155, %c0_156, %c0_157] : memref<9x24x104xf32, #tpu.memory_space<vmem>>, vector<1x24x104xf32>
    %181 = vector.shape_cast %180 : vector<1x24x104xf32> to vector<24x104xf32>
    %cst_158 = arith.constant dense<0.000000e+00> : vector<24x64xf32>
    %182 = tpu.matmul %181, %124, %cst_158 {dimension_numbers = #tpu.dot_dimension_numbers<[1], [0], [0], [1], [0, 0, 1, 1], [], []>} : vector<24x104xf32>, vector<104x64xf32>, vector<24x64xf32> -> vector<24x64xf32>
    %c8_159 = arith.constant 8 : index
    %c0_160 = arith.constant 0 : index
    %c0_161 = arith.constant 0 : index
    %183 = vector.load %arg9[%c8_159, %c0_160, %c0_161] : memref<9x64x128xf32, #tpu.memory_space<vmem>>, vector<1x64x128xf32>
    %184 = vector.shape_cast %183 : vector<1x64x128xf32> to vector<64x128xf32>
    %cst_162 = arith.constant dense<0.000000e+00> : vector<24x128xf32>
    %185 = tpu.matmul %182, %184, %cst_162 {dimension_numbers = #tpu.dot_dimension_numbers<[1], [0], [0], [1], [0, 0, 1, 1], [], []>} : vector<24x64xf32>, vector<64x128xf32>, vector<24x128xf32> -> vector<24x128xf32>
    %186 = arith.addf %179, %185 : vector<24x128xf32>
    %c0_163 = arith.constant 0 : index
    %c0_164 = arith.constant 0 : index
    %187 = vector.load %arg10[%c0_163, %c0_164] : memref<1x128xf32, #tpu.memory_space<vmem>>, vector<1x128xf32>
    %c0_165 = arith.constant 0 : index
    %c0_166 = arith.constant 0 : index
    %188 = vector.load %arg11[%c0_165, %c0_166] : memref<1x128xf32, #tpu.memory_space<vmem>>, vector<1x128xf32>
    %cst_167 = arith.constant dense<0.000000e+00> : vector<128xf32>
    %189 = vector.multi_reduction <add>, %186, %cst_167 [0] : vector<24x128xf32> to vector<128xf32>
    %190 = vector.shape_cast %189 : vector<128xf32> to vector<1x128xf32>
    %cst_168 = arith.constant 0.055555556 : f32
    %191 = vector.broadcast %cst_168 : f32 to vector<1x128xf32>
    %192 = arith.mulf %190, %191 : vector<1x128xf32>
    %193 = arith.mulf %186, %186 : vector<24x128xf32>
    %cst_169 = arith.constant dense<0.000000e+00> : vector<128xf32>
    %194 = vector.multi_reduction <add>, %193, %cst_169 [0] : vector<24x128xf32> to vector<128xf32>
    %195 = vector.shape_cast %194 : vector<128xf32> to vector<1x128xf32>
    %cst_170 = arith.constant 0.055555556 : f32
    %196 = vector.broadcast %cst_170 : f32 to vector<1x128xf32>
    %197 = arith.mulf %195, %196 : vector<1x128xf32>
    %198 = arith.mulf %192, %192 : vector<1x128xf32>
    %199 = arith.subf %197, %198 : vector<1x128xf32>
    %cst_171 = arith.constant 0.000000e+00 : f32
    %200 = vector.broadcast %cst_171 : f32 to vector<1x128xf32>
    %201 = arith.maximumf %199, %200 : vector<1x128xf32>
    %cst_172 = arith.constant 9.99999974E-6 : f32
    %202 = vector.broadcast %cst_172 : f32 to vector<1x128xf32>
    %203 = arith.addf %201, %202 : vector<1x128xf32>
    %204 = math.rsqrt %203 : vector<1x128xf32>
    %205 = arith.mulf %187, %204 : vector<1x128xf32>
    %206 = arith.mulf %192, %205 : vector<1x128xf32>
    %207 = arith.subf %188, %206 : vector<1x128xf32>
    %208 = vector.broadcast %205 : vector<1x128xf32> to vector<24x128xf32>
    %209 = arith.mulf %186, %208 : vector<24x128xf32>
    %210 = vector.broadcast %207 : vector<1x128xf32> to vector<24x128xf32>
    %211 = arith.addf %209, %210 : vector<24x128xf32>
    %cst_173 = arith.constant 0.000000e+00 : f32
    %212 = vector.broadcast %cst_173 : f32 to vector<24x128xf32>
    %213 = arith.cmpf oge, %211, %212 : vector<24x128xf32>
    %cst_174 = arith.constant 0.00999999977 : f32
    %214 = vector.broadcast %cst_174 : f32 to vector<24x128xf32>
    %215 = arith.mulf %214, %211 : vector<24x128xf32>
    %216 = arith.select %213, %211, %215 : vector<24x128xi1>, vector<24x128xf32>
    %c0_175 = arith.constant 0 : index
    %c0_176 = arith.constant 0 : index
    %217 = vector.load %arg12[%c0_175, %c0_176] : memref<24x128xf32, #tpu.memory_space<vmem>>, vector<24x128xf32>
    %218 = arith.mulf %216, %217 : vector<24x128xf32>
    %c0_177 = arith.constant 0 : index
    %c0_178 = arith.constant 0 : index
    %219 = vector.load %arg13[%c0_177, %c0_178] : memref<8x24xf32, #tpu.memory_space<vmem>>, vector<8x24xf32>
    %cst_179 = arith.constant dense<0.000000e+00> : vector<8x128xf32>
    %220 = tpu.matmul %219, %218, %cst_179 {dimension_numbers = #tpu.dot_dimension_numbers<[1], [0], [0], [1], [0, 0, 1, 1], [], []>} : vector<8x24xf32>, vector<24x128xf32>, vector<8x128xf32> -> vector<8x128xf32>
    %cst_180 = arith.constant dense<0.000000e+00> : vector<8xf32>
    %221 = vector.multi_reduction <add>, %220, %cst_180 [1] : vector<8x128xf32> to vector<8xf32>
    %222 = vector.shape_cast %221 : vector<8xf32> to vector<8x1xf32>
    %223 = arith.negf %222 : vector<8x1xf32>
    %224 = math.exp %223 : vector<8x1xf32>
    %cst_181 = arith.constant 1.000000e+00 : f32
    %225 = vector.broadcast %cst_181 : f32 to vector<8x1xf32>
    %226 = arith.addf %225, %224 : vector<8x1xf32>
    %227 = arith.divf %225, %226 : vector<8x1xf32>
    %228 = vector.shape_cast %227 : vector<8x1xf32> to vector<8x1xf32>
    %229 = vector.broadcast %228 : vector<8x1xf32> to vector<8x128xf32>
    %c0_182 = arith.constant 0 : index
    %c0_183 = arith.constant 0 : index
    %230 = vector.load %arg14[%c0_182, %c0_183] : memref<8x128xf32, #tpu.memory_space<vmem>>, vector<8x128xf32>
    tpu.vector_store %arg14[%c0_182, %c0_183], %229 {strides = array<i32>} : memref<8x128xf32, #tpu.memory_space<vmem>>, vector<8x128xf32>,
    return
  }
}

</mosaic_0001>

<bundles_post_ra>
// kernel: dcgan_discriminator_forward.1
= control target key start
LH: loop header
LB: loop body
LE: loop exit
PB: predicated region body
PF: predicated region fallthrough
CT: control target
= control target key end

     0   :  { %19 = vsyncpa [#allocation3], 0  ;;  %s14969_s0 = inlined_call_operand.vmem [shape: f32[456,9], index: 0, kind: input, shape index: {}]   ;;  %s14970_s1 = inlined_call_operand.hbm [shape: f32[9,32], index: 1, kind: input, shape index: {}]   ;;  %s14971_s2 = inlined_call_operand.hbm [shape: f32[1,32], index: 2, kind: input, shape index: {}]   ;;  %s14972_s3 = inlined_call_operand.hbm [shape: f32[1,32], index: 3, kind: input, shape index: {}]   ;;  %s14973_s4 = inlined_call_operand.hbm [shape: f32[9,104,456], index: 4, kind: input, shape index: {}]   ;;  %s14974_s5 = inlined_call_operand.hbm [shape: f32[9,32,64], index: 5, kind: input, shape index: {}]   ;;  %s14975_s6 = inlined_call_operand.hbm [shape: f32[1,64], index: 6, kind: input, shape index: {}]   ;;  %s14976_s7 = inlined_call_operand.hbm [shape: f32[1,64], index: 7, kind: input, shape index: {}]   ;;  %s14977_s8 = inlined_call_operand.hbm [shape: f32[9,24,104], index: 8, kind: input, shape index: {}]   ;;  %s14978_s9 = inlined_call_operand.hbm [shape: f32[9,64,128], index: 9, kind: input, shape index: {}]   ;;  %s14979_s10 = inlined_call_operand.hbm [shape: f32[1,128], index: 10, kind: input, shape index: {}]   ;;  %s14980_s11 = inlined_call_operand.hbm [shape: f32[1,128], index: 11, kind: input, shape index: {}]   ;;  %s14981_s12 = inlined_call_operand.hbm [shape: f32[24,128], index: 12, kind: input, shape index: {}]   ;;  %s14982_s13 = inlined_call_operand.hbm [shape: f32[8,24], index: 13, kind: input, shape index: {}]   ;;  %s14983_s14 = inlined_call_operand.vmem [shape: f32[8,128], index: 14, kind: output, shape index: {}]  }
   0x1   :  { %20 = vsyncpa [#allocation5], 0 }
   0x2   :  { %21 = vsyncpa [#allocation8], 0 }
   0x3   :  { %22 = vsyncpa [#allocation11], 0 }
   0x4   :  { %23 = vsyncpa [#allocation14], 0 }
   0x5   :  { %24 = vsyncpa [#allocation17], 0 }
   0x6   :  { %25 = vsyncpa [#allocation20], 0  ;;  %s11182_s29 = smov [#allocation4]   ;;  %s11183_s15 = smov [#allocation7]  }
   0x7   :  { %s46_s30 = sshll.u32 %s11182_s29, 4  ;;  %s65_s16 = sshll.u32 %s11183_s15, 4  ;;  %s47_s30 = int_to_ptr.vmem [resolvable:$true] %s46_s30  ;;  %s66_s16 = int_to_ptr.vmem [resolvable:$true] %s65_s16 }
   0x8   :  { %s10916_s17 = scalar_lea.vmem %s47_s30, 16  ;;  %s10920_s18 = scalar_lea.vmem %s47_s30, 32 }
   0x9   :  { %p10917_p0 = scmp.ne.s32.totalorder %s47_s30, %s10916_s17  ;;  %p10921_p1 = scmp.lt.s32.totalorder %s47_s30, %s47_s30 }
   0xa   :  { %p10922_p2 = scmp.lt.s32.totalorder %s10920_s18, %s10916_s17 }
   0xc   :  { %p10923_p3 = por %p10922_p2, %p10921_p1 }
   0xe   :  { %p10924_p4 = pnand %p10923_p3, %p10917_p0 }
  0x10   :  { %10927 = shalt.err (!%p10924_p4)
}
  0x11   :  { %49 = dma.hbm_to_vmem [thread:$0]  %s14971_s2, 16, %s47_s30, [#allocation5]  }
  0x12   :  { %s10936_s21 = scalar_lea.vmem %s66_s16, 59904  ;;  %p10941_p6 = scmp.lt.s32.totalorder %s66_s16, %s66_s16 }
  0x13   :  { %p10937_p5 = scmp.ne.s32.totalorder %s66_s16, %s10936_s21  ;;  %p10942_p7 = scmp.lt.s32.totalorder %s10936_s21, %s10936_s21 }
  0x15   :  { %p10943_p8 = por %p10942_p7, %p10941_p6 }
  0x17   :  { %p10944_p9 = pnand %p10943_p8, %p10937_p5 }
  0x19   :  { %10947 = shalt.err (!%p10944_p9)
}
  0x1a   :  { %s11184_s22 = smov 512   ;;  %s11185_s23 = smov 32  }
  0x1b   :  { %71 = dma.hbm_to_vmem [thread:$0]  %s14973_s4, 59904, %s66_s16, [#allocation8], %s11184_s22, %s11184_s22, %s11185_s23  }
  0x1c   :  { %s11186_s26 = smov [#allocation10]  }
  0x1d   :  { %s90_s27 = sshll.u32 %s11186_s26, 4  ;;  %s91_s27 = int_to_ptr.vmem [resolvable:$true] %s90_s27 }
  0x1e   :  { %s10956_s28 = scalar_lea.vmem %s91_s27, 16  ;;  %s10960_s29 = scalar_lea.vmem %s91_s27, 32 }
  0x1f   :  { %p10957_p10 = scmp.ne.s32.totalorder %s91_s27, %s10956_s28  ;;  %p10961_p11 = scmp.lt.s32.totalorder %s91_s27, %s91_s27 }
  0x20   :  { %p10962_p12 = scmp.lt.s32.totalorder %s10960_s29, %s10956_s28 }
  0x22   :  { %p10963_p13 = por %p10962_p12, %p10961_p11 }
  0x24   :  { %p10964_p0 = pnand %p10963_p13, %p10957_p10 }
  0x26   :  { %10967 = shalt.err (!%p10964_p0)
}
  0x27   :  { %93 = dma.hbm_to_vmem [thread:$0]  %s14975_s6, 16, %s91_s27, [#allocation11]  }
  0x28   :  { %s11187_s15 = smov [#allocation13]   ;;  %s11188_s18 = smov [#allocation16]  }
  0x29   :  { %s109_s17 = sshll.u32 %s11187_s15, 4  ;;  %s134_s4 = sshll.u32 %s11188_s18, 4  ;;  %s110_s17 = int_to_ptr.vmem [resolvable:$true] %s109_s17  ;;  %s135_s4 = int_to_ptr.vmem [resolvable:$true] %s134_s4 }
  0x2a   :  { %s10976_s16 = scalar_lea.vmem %s110_s17, 3456  ;;  %p10981_p2 = scmp.lt.s32.totalorder %s110_s17, %s110_s17 }
  0x2b   :  { %p10977_p1 = scmp.ne.s32.totalorder %s110_s17, %s10976_s16  ;;  %p10982_p3 = scmp.lt.s32.totalorder %s10976_s16, %s10976_s16 }
  0x2d   :  { %p10983_p4 = por %p10982_p3, %p10981_p2 }
  0x2f   :  { %p10984_p5 = pnand %p10983_p4, %p10977_p1 }
  0x31   :  { %10987 = shalt.err (!%p10984_p5)
}
  0x32   :  { %s11189_s19 = smov 128   ;;  %s11190_s20 = smov 8  }
  0x33   :  { %115 = dma.hbm_to_vmem [thread:$0]  %s14977_s8, 3456, %s110_s17, [#allocation14], %s11189_s19, %s11189_s19, %s11190_s20  }
  0x34   :  { %s10996_s6 = scalar_lea.vmem %s135_s4, 16  ;;  %s11000_s23 = scalar_lea.vmem %s135_s4, 32 }
  0x35   :  { %p10997_p6 = scmp.ne.s32.totalorder %s135_s4, %s10996_s6  ;;  %p11001_p7 = scmp.lt.s32.totalorder %s135_s4, %s135_s4 }
  0x36   :  { %p11002_p8 = scmp.lt.s32.totalorder %s11000_s23, %s10996_s6 }
  0x38   :  { %p11003_p9 = por %p11002_p8, %p11001_p7 }
  0x3a   :  { %p11004_p10 = pnand %p11003_p9, %p10997_p6 }
  0x3c   :  { %11007 = shalt.err (!%p11004_p10)
}
  0x3d   :  { %137 = dma.hbm_to_vmem [thread:$0]  %s14979_s10, 16, %s135_s4, [#allocation17]  }
  0x3e   :  { %s11191_s26 = smov [#allocation19]   ;;  %s11192_s28 = smov [#allocation2]  }
  0x3f   :  { %s153_s27 = sshll.u32 %s11191_s26, 4  ;;  %s33_s29 = sshll.u32 %s11192_s28, 4  ;;  %s154_s27 = int_to_ptr.vmem [resolvable:$true] %s153_s27  ;;  %s34_s29 = int_to_ptr.vmem [resolvable:$true] %s33_s29 }
  0x40   :  { %s11016_s2 = scalar_lea.vmem %s154_s27, 384  ;;  %p11021_p12 = scmp.lt.s32.totalorder %s154_s27, %s154_s27 }
  0x41   :  { %p11017_p11 = scmp.ne.s32.totalorder %s154_s27, %s11016_s2  ;;  %p11022_p13 = scmp.lt.s32.totalorder %s11016_s2, %s11016_s2 }
  0x43   :  { %p11023_p0 = por %p11022_p13, %p11021_p12 }
  0x45   :  { %p11024_p1 = pnand %p11023_p0, %p11017_p11 }
  0x47   :  { %11027 = shalt.err (!%p11024_p1)
}
  0x48   :  { %159 = dma.hbm_to_vmem [thread:$0]  %s14981_s12, 384, %s154_s27, [#allocation20], %s11189_s19, %s11189_s19, %s11190_s20  }
  0x49   :  { %s11036_s10 = scalar_lea.vmem %s34_s29, 256  ;;  %p11041_p3 = scmp.lt.s32.totalorder %s34_s29, %s34_s29 }
  0x4a   :  { %p11037_p2 = scmp.ne.s32.totalorder %s34_s29, %s11036_s10  ;;  %p11042_p4 = scmp.lt.s32.totalorder %s11036_s10, %s11036_s10 }
  0x4c   :  { %p11043_p5 = por %p11042_p4, %p11041_p3 }
  0x4e   :  { %p11044_p6 = pnand %p11043_p5, %p11037_p2 }
  0x50   :  { %11047 = shalt.err (!%p11044_p6)
}
  0x51   :  { %39 = dma.hbm_to_vmem [thread:$0]  %s14970_s1, 256, %s34_s29, [#allocation3], %s11189_s19, %s11189_s19, %s11190_s20  }
  0x52   :  { %s11193_s18 = smov [#allocation6]   ;;  %s11194_s16 = smov [#allocation9]  }
  0x53   :  { %s56_s4 = sshll.u32 %s11193_s18, 4  ;;  %s77_s12 = sshll.u32 %s11194_s16, 4  ;;  %s57_s4 = int_to_ptr.vmem [resolvable:$true] %s56_s4  ;;  %s78_s12 = int_to_ptr.vmem [resolvable:$true] %s77_s12 }
  0x54   :  { %s11056_s21 = scalar_lea.vmem %s57_s4, 16  ;;  %s11060_s22 = scalar_lea.vmem %s57_s4, 32 }
  0x55   :  { %p11057_p7 = scmp.ne.s32.totalorder %s57_s4, %s11056_s21  ;;  %p11061_p8 = scmp.lt.s32.totalorder %s57_s4, %s57_s4 }
  0x56   :  { %p11062_p9 = scmp.lt.s32.totalorder %s11060_s22, %s11056_s21 }
  0x58   :  { %p11063_p10 = por %p11062_p9, %p11061_p8 }
  0x5a   :  { %p11064_p11 = pnand %p11063_p10, %p11057_p7 }
  0x5c   :  { %11067 = shalt.err (!%p11064_p11)
}
  0x5d   :  { %59 = dma.hbm_to_vmem [thread:$0]  %s14972_s3, 16, %s57_s4, [#allocation5]  }
  0x5e   :  { %s11076_s24 = scalar_lea.vmem %s78_s12, 4608  ;;  %p11081_p13 = scmp.lt.s32.totalorder %s78_s12, %s78_s12 }
  0x5f   :  { %p11077_p12 = scmp.ne.s32.totalorder %s78_s12, %s11076_s24  ;;  %p11082_p0 = scmp.lt.s32.totalorder %s11076_s24, %s11076_s24 }
  0x61   :  { %p11083_p1 = por %p11082_p0, %p11081_p13 }
  0x63   :  { %p11084_p2 = pnand %p11083_p1, %p11077_p12 }
  0x65   :  { %11087 = shalt.err (!%p11084_p2)
}
  0x66   :  { %83 = dma.hbm_to_vmem [thread:$0]  %s14974_s5, 4608, %s78_s12, [#allocation8], %s11189_s19, %s11189_s19, %s11190_s20  }
  0x67   :  { %s11195_s26 = smov [#allocation12]   ;;  %s11196_s28 = smov [#allocation15]  }
  0x68   :  { %s100_s27 = sshll.u32 %s11195_s26, 4  ;;  %s121_s3 = sshll.u32 %s11196_s28, 4  ;;  %s101_s27 = int_to_ptr.vmem [resolvable:$true] %s100_s27  ;;  %s122_s3 = int_to_ptr.vmem [resolvable:$true] %s121_s3 }
  0x69   :  { %s11096_s29 = scalar_lea.vmem %s101_s27, 16  ;;  %s11100_s2 = scalar_lea.vmem %s101_s27, 32 }
  0x6a   :  { %p11097_p3 = scmp.ne.s32.totalorder %s101_s27, %s11096_s29  ;;  %p11101_p4 = scmp.lt.s32.totalorder %s101_s27, %s101_s27 }
  0x6b   :  { %p11102_p5 = scmp.lt.s32.totalorder %s11100_s2, %s11096_s29 }
  0x6d   :  { %p11103_p6 = por %p11102_p5, %p11101_p4 }
  0x6f   :  { %p11104_p7 = pnand %p11103_p6, %p11097_p3 }
  0x71   :  { %11107 = shalt.err (!%p11104_p7)
}
  0x72   :  { %103 = dma.hbm_to_vmem [thread:$0]  %s14976_s7, 16, %s101_s27, [#allocation11]  }
  0x73   :  { %s11116_s10 = scalar_lea.vmem %s122_s3, 9216  ;;  %p11121_p9 = scmp.lt.s32.totalorder %s122_s3, %s122_s3 }
  0x74   :  { %p11117_p8 = scmp.ne.s32.totalorder %s122_s3, %s11116_s10  ;;  %p11122_p10 = scmp.lt.s32.totalorder %s11116_s10, %s11116_s10 }
  0x76   :  { %p11123_p11 = por %p11122_p10, %p11121_p9 }
  0x78   :  { %p11124_p12 = pnand %p11123_p11, %p11117_p8 }
  0x7a   :  { %11127 = shalt.err (!%p11124_p12)
}
  0x7b   :  { %127 = dma.hbm_to_vmem [thread:$0]  %s14978_s9, 9216, %s122_s3, [#allocation14], %s11189_s19, %s11189_s19, %s11190_s20  }
  0x7c   :  { %s11197_s17 = smov [#allocation18]   ;;  %s11198_s4 = smov [#allocation21]  }
  0x7d   :  { %s144_s18 = sshll.u32 %s11197_s17, 4  ;;  %s166_s7 = sshll.u32 %s11198_s4, 4  ;;  %s145_s18 = int_to_ptr.vmem [resolvable:$true] %s144_s18  ;;  %s167_s7 = int_to_ptr.vmem [resolvable:$true] %s166_s7 }
  0x7e   :  { %s11136_s16 = scalar_lea.vmem %s145_s18, 16  ;;  %s11140_s12 = scalar_lea.vmem %s145_s18, 32 }
  0x7f   :  { %p11137_p13 = scmp.ne.s32.totalorder %s145_s18, %s11136_s16  ;;  %p11141_p0 = scmp.lt.s32.totalorder %s145_s18, %s145_s18 }
  0x80   :  { %p11142_p1 = scmp.lt.s32.totalorder %s11140_s12, %s11136_s16 }
  0x82   :  { %p11143_p2 = por %p11142_p1, %p11141_p0 }
  0x84   :  { %p11144_p3 = pnand %p11143_p2, %p11137_p13 }
  0x86   :  { %11147 = shalt.err (!%p11144_p3)
}
  0x87   :  { %147 = dma.hbm_to_vmem [thread:$0]  %s14980_s11, 16, %s145_s18, [#allocation17]  }
  0x88   :  { %s11156_s6 = scalar_lea.vmem %s167_s7, 128  ;;  %p11161_p5 = scmp.lt.s32.totalorder %s167_s7, %s167_s7 }
  0x89   :  { %p11157_p4 = scmp.ne.s32.totalorder %s167_s7, %s11156_s6  ;;  %p11162_p6 = scmp.lt.s32.totalorder %s11156_s6, %s11156_s6 }
  0x8b   :  { %p11163_p7 = por %p11162_p6, %p11161_p5 }
  0x8d   :  { %p11164_p8 = pnand %p11163_p7, %p11157_p4 }
  0x8f   :  { %11167 = shalt.err (!%p11164_p8)
}
  0x90   :  { %169 = dma.hbm_to_vmem [thread:$0]  %s14982_s13, 128, %s167_s7, [#allocation20]  }
  0x91   :  { %11168 = dma.done.wait [#allocation3], 256  }
  0x92   :  { %11169 = vsyncadd [#allocation3], 4294967040 }
  0x93   :  { %11170 = dma.done.wait [#allocation5], 32  }
  0x94   :  { %11171 = vsyncadd [#allocation5], 4294967264 }
  0x95   :  { %11172 = dma.done.wait [#allocation8], 64512  }
  0x96   :  { %11173 = vsyncadd [#allocation8], 4294902784 }
  0x97   :  { %11174 = dma.done.wait [#allocation11], 32  }
  0x98   :  { %11175 = vsyncadd [#allocation11], 4294967264 }
  0x99   :  { %11176 = dma.done.wait [#allocation14], 12672  }
  0x9a   :  { %11177 = vsyncadd [#allocation14], 4294954624 }
  0x9b   :  { %11178 = dma.done.wait [#allocation17], 32  }
  0x9c   :  { %11179 = vsyncadd [#allocation17], 4294967264 }
  0x9d   :  { %11180 = dma.done.wait [#allocation20], 512  }
  0x9e   :  { %11181 = vsyncadd [#allocation20], 4294966784  ;;  %v14984_v0 = vmov 0.0   ;;  %vm11200_vm0 = vmmov 0   ;;  %vm440_vm1 = vcmask 1040384   ;;  %v266_v2 = vld [vmem:[#allocation2] sm:$0xff] }
  0x9f   :  { %9732 = vmatprep.subr.mxu0 %v14984_v0  ;;  %9736 = vmatprep.mubr.msk.f32.mxu0 %vm11200_vm0, %v14984_v0  ;;  %v267_v1 = vld [vmem:[#allocation2 + $0x8] sm:$0x1]  ;;  %v209_v3 = vld [vmem:[%s14969_s0] sm:$0xff]  ;;  %vm268_vm2 = vcmask 72704   ;;  %v211_v5 = vld [vmem:[%s14969_s0 + $0x10] sm:$0xff]  ;;  %vm796_vm3 = vcmask 261120  }
  0xa0   :  { %9733 = vmatpush3.msk.msra.mxu0 %vm440_vm1, %v267_v1  ;;  %v210_v4 = vld [vmem:[%s14969_s0 + $0x8] sm:$0xff]  ;;  %v212_v6 = vld [vmem:[%s14969_s0 + $0x18] sm:$0xff]  ;;  %v213_v7 = vld [vmem:[%s14969_s0 + $0x20] sm:$0xff] }
  0xa1   :  { %9734 = vmatprep.subr.mxu0 %v14984_v0  ;;  %v214_v8 = vld [vmem:[%s14969_s0 + $0x28] sm:$0xff]  ;;  %v215_v9 = vld [vmem:[%s14969_s0 + $0x30] sm:$0xff]  ;;  %v216_v10 = vld [vmem:[%s14969_s0 + $0x38] sm:$0xff] }
  0xa2   :  { %9735 = vmatpush3.msra.mxu0 %v266_v2  ;;  %v217_v11 = vld [vmem:[%s14969_s0 + $0x40] sm:$0xff]  ;;  %v218_v12 = vld [vmem:[%s14969_s0 + $0x48] sm:$0xff]  ;;  %v219_v13 = vld [vmem:[%s14969_s0 + $0x50] sm:$0xff] }
  0xa3   :  { %9737 = vmatmul.mubr.msk.f32.vlgmr.msra.gmra.mxu0 %vm268_vm2, %v209_v3  ;;  %9907 = vmatprep.subr.mxu0 %v14984_v0  ;;  %v220_v14 = vld [vmem:[%s14969_s0 + $0x58] sm:$0xff]  ;;  %v221_v15 = vld [vmem:[%s14969_s0 + $0x60] sm:$0xff]  ;;  %v222_v16 = vld [vmem:[%s14969_s0 + $0x68] sm:$0xff] }
  0xa4   :  { %9739 = vmatprep.mubr.msk.f32.mxu0 %vm11200_vm0, %v14984_v0  ;;  %v223_v17 = vld [vmem:[%s14969_s0 + $0x70] sm:$0xff]  ;;  %v224_v18 = vld [vmem:[%s14969_s0 + $0x78] sm:$0xff]  ;;  %v225_v19 = vld [vmem:[%s14969_s0 + $0x80] sm:$0xff] }
  0xa5   :  { %v226_v20 = vld [vmem:[%s14969_s0 + $0x88] sm:$0xff]  ;;  %v227_v21 = vld [vmem:[%s14969_s0 + $0x90] sm:$0xff]  ;;  %v228_v22 = vld [vmem:[%s14969_s0 + $0x98] sm:$0xff] }
  0xa6   :  { %v229_v23 = vld [vmem:[%s14969_s0 + $0xa0] sm:$0xff]  ;;  %v230_v24 = vld [vmem:[%s14969_s0 + $0xa8] sm:$0xff]  ;;  %v231_v25 = vld [vmem:[%s14969_s0 + $0xb0] sm:$0xff] }
  0xa7   :  { %9740 = vmatmul.mubr.msk.f32.gmra.mxu0 %vm268_vm2, %v210_v4  ;;  %v232_v26 = vld [vmem:[%s14969_s0 + $0xb8] sm:$0xff]  ;;  %v233_v27 = vld [vmem:[%s14969_s0 + $0xc0] sm:$0xff]  ;;  %v234_v28 = vld [vmem:[%s14969_s0 + $0xc8] sm:$0xff] }
  0xa8   :  { %9742 = vmatprep.mubr.msk.f32.mxu0 %vm11200_vm0, %v14984_v0  ;;  %v235_v29 = vld [vmem:[%s14969_s0 + $0xd0] sm:$0xff]  ;;  %v236_v30 = vld [vmem:[%s14969_s0 + $0xd8] sm:$0xff]  ;;  %v237_v31 = vld [vmem:[%s14969_s0 + $0xe0] sm:$0xff] }
  0xa9   :  { %v238_v32 = vld [vmem:[%s14969_s0 + $0xe8] sm:$0xff]  ;;  %v239_v33 = vld [vmem:[%s14969_s0 + $0xf0] sm:$0xff]  ;;  %v240_v34 = vld [vmem:[%s14969_s0 + $0xf8] sm:$0xff] }
  0xaa   :  { %v241_v35 = vld [vmem:[%s14969_s0 + $0x100] sm:$0xff]  ;;  %v242_v36 = vld [vmem:[%s14969_s0 + $0x108] sm:$0xff]  ;;  %v243_v37 = vld [vmem:[%s14969_s0 + $0x110] sm:$0xff] }
  0xab   :  { %9743 = vmatmul.mubr.msk.f32.gmra.mxu0 %vm268_vm2, %v211_v5  ;;  %v244_v38 = vld [vmem:[%s14969_s0 + $0x118] sm:$0xff]  ;;  %v245_v39 = vld [vmem:[%s14969_s0 + $0x120] sm:$0xff]  ;;  %v246_v40 = vld [vmem:[%s14969_s0 + $0x128] sm:$0xff] }
  0xac   :  { %9745 = vmatprep.mubr.msk.f32.mxu0 %vm11200_vm0, %v14984_v0  ;;  %v247_v41 = vld [vmem:[%s14969_s0 + $0x130] sm:$0xff]  ;;  %v248_v42 = vld [vmem:[%s14969_s0 + $0x138] sm:$0xff]  ;;  %v249_v43 = vld [vmem:[%s14969_s0 + $0x140] sm:$0xff] }
  0xad   :  { %v250_v44 = vld [vmem:[%s14969_s0 + $0x148] sm:$0xff]  ;;  %v251_v45 = vld [vmem:[%s14969_s0 + $0x150] sm:$0xff]  ;;  %v252_v46 = vld [vmem:[%s14969_s0 + $0x158] sm:$0xff] }
  0xae   :  { %v253_v47 = vld [vmem:[%s14969_s0 + $0x160] sm:$0xff]  ;;  %v254_v48 = vld [vmem:[%s14969_s0 + $0x168] sm:$0xff]  ;;  %v255_v49 = vld [vmem:[%s14969_s0 + $0x170] sm:$0xff] }
  0xaf   :  { %9746 = vmatmul.mubr.msk.f32.gmra.mxu0 %vm268_vm2, %v212_v6  ;;  %v256_v50 = vld [vmem:[%s14969_s0 + $0x178] sm:$0xff]  ;;  %v257_v51 = vld [vmem:[%s14969_s0 + $0x180] sm:$0xff]  ;;  %v258_v53 = vld [vmem:[%s14969_s0 + $0x188] sm:$0xff] }
  0xb0   :  { %9748 = vmatprep.mubr.msk.f32.mxu0 %vm11200_vm0, %v14984_v0  ;;  %v259_v56 = vld [vmem:[%s14969_s0 + $0x190] sm:$0xff]  ;;  %v260_v59 = vld [vmem:[%s14969_s0 + $0x198] sm:$0xff]  ;;  %v261_v62 = vld [vmem:[%s14969_s0 + $0x1a0] sm:$0xff] }
  0xb1   :  { %v262_v2 = vld [vmem:[%s14969_s0 + $0x1a8] sm:$0xff]  ;;  %v263_v5 = vld [vmem:[%s14969_s0 + $0x1b0] sm:$0xff] }
  0xb3   :  { %9749 = vmatmul.mubr.msk.f32.gmra.mxu0 %vm268_vm2, %v213_v7 }
  0xb4   :  { %9751 = vmatprep.mubr.msk.f32.mxu0 %vm11200_vm0, %v14984_v0 }
  0xb7   :  { %9752 = vmatmul.mubr.msk.f32.gmra.mxu0 %vm268_vm2, %v214_v8  ;;  %v264_v8 = vld [vmem:[%s14969_s0 + $0x1b8] sm:$0xff] }
  0xb8   :  { %9754 = vmatprep.mubr.msk.f32.mxu0 %vm11200_vm0, %v14984_v0 }
  0xbb   :  { %9755 = vmatmul.mubr.msk.f32.gmra.mxu0 %vm268_vm2, %v215_v9 }
  0xbc   :  { %9757 = vmatprep.mubr.msk.f32.mxu0 %vm11200_vm0, %v14984_v0 }
  0xbf   :  { %9758 = vmatmul.mubr.msk.f32.gmra.mxu0 %vm268_vm2, %v216_v10 }
  0xc0   :  { %9760 = vmatprep.mubr.msk.f32.mxu0 %vm11200_vm0, %v14984_v0 }
  0xc3   :  { %9761 = vmatmul.mubr.msk.f32.gmra.mxu0 %vm268_vm2, %v217_v11  ;;  %v265_v11 = vld [vmem:[%s14969_s0 + $0x1c0] sm:$0xff] }
  0xc4   :  { %9763 = vmatprep.mubr.msk.f32.mxu0 %vm11200_vm0, %v14984_v0 }
  0xc7   :  { %9764 = vmatmul.mubr.msk.f32.gmra.mxu0 %vm268_vm2, %v218_v12 }
  0xc8   :  { %9766 = vmatprep.mubr.msk.f32.mxu0 %vm11200_vm0, %v14984_v0 }
  0xcb   :  { %9767 = vmatmul.mubr.msk.f32.gmra.mxu0 %vm268_vm2, %v219_v13 }
  0xcc   :  { %9769 = vmatprep.mubr.msk.f32.mxu0 %vm11200_vm0, %v14984_v0 }
  0xcf   :  { %9770 = vmatmul.mubr.msk.f32.gmra.mxu0 %vm268_vm2, %v220_v14 }
  0xd0   :  { %9772 = vmatprep.mubr.msk.f32.mxu0 %vm11200_vm0, %v14984_v0 }
  0xd3   :  { %9773 = vmatmul.mubr.msk.f32.gmra.mxu0 %vm268_vm2, %v221_v15 }
  0xd4   :  { %9775 = vmatprep.mubr.msk.f32.mxu0 %vm11200_vm0, %v14984_v0 }
  0xd7   :  { %9776 = vmatmul.mubr.msk.f32.gmra.mxu0 %vm268_vm2, %v222_v16 }
  0xd8   :  { %9778 = vmatprep.mubr.msk.f32.mxu0 %vm11200_vm0, %v14984_v0 }
  0xdb   :  { %9779 = vmatmul.mubr.msk.f32.gmra.mxu0 %vm268_vm2, %v223_v17 }
  0xdc   :  { %9781 = vmatprep.mubr.msk.f32.mxu0 %vm11200_vm0, %v14984_v0 }
  0xdf   :  { %9782 = vmatmul.mubr.msk.f32.gmra.mxu0 %vm268_vm2, %v224_v18 }
  0xe0   :  { %9784 = vmatprep.mubr.msk.f32.mxu0 %vm11200_vm0, %v14984_v0 }
  0xe3   :  { %9785 = vmatmul.mubr.msk.f32.gmra.mxu0 %vm268_vm2, %v225_v19 }
  0xe4   :  { %9787 = vmatprep.mubr.msk.f32.mxu0 %vm11200_vm0, %v14984_v0 }
  0xe7   :  { %9788 = vmatmul.mubr.msk.f32.gmra.mxu0 %vm268_vm2, %v226_v20 }
  0xe8   :  { %9790 = vmatprep.mubr.msk.f32.mxu0 %vm11200_vm0, %v14984_v0 }
  0xeb   :  { %9791 = vmatmul.mubr.msk.f32.gmra.mxu0 %vm268_vm2, %v227_v21 }
  0xec   :  { %9793 = vmatprep.mubr.msk.f32.mxu0 %vm11200_vm0, %v14984_v0 }
  0xef   :  { %9794 = vmatmul.mubr.msk.f32.gmra.mxu0 %vm268_vm2, %v228_v22 }
  0xf0   :  { %9796 = vmatprep.mubr.msk.f32.mxu0 %vm11200_vm0, %v14984_v0 }
  0xf3   :  { %9797 = vmatmul.mubr.msk.f32.gmra.mxu0 %vm268_vm2, %v229_v23 }
  0xf4   :  { %9799 = vmatprep.mubr.msk.f32.mxu0 %vm11200_vm0, %v14984_v0 }
  0xf7   :  { %9800 = vmatmul.mubr.msk.f32.gmra.mxu0 %vm268_vm2, %v230_v24 }
  0xf8   :  { %9802 = vmatprep.mubr.msk.f32.mxu0 %vm11200_vm0, %v14984_v0 }
  0xfb   :  { %9803 = vmatmul.mubr.msk.f32.gmra.mxu0 %vm268_vm2, %v231_v25 }
  0xfc   :  { %9805 = vmatprep.mubr.msk.f32.mxu0 %vm11200_vm0, %v14984_v0 }
  0xff   :  { %9806 = vmatmul.mubr.msk.f32.gmra.mxu0 %vm268_vm2, %v232_v26 }
 0x100   :  { %9808 = vmatprep.mubr.msk.f32.mxu0 %vm11200_vm0, %v14984_v0 }
 0x103   :  { %9809 = vmatmul.mubr.msk.f32.gmra.mxu0 %vm268_vm2, %v233_v27 }
 0x104   :  { %9811 = vmatprep.mubr.msk.f32.mxu0 %vm11200_vm0, %v14984_v0 }
 0x107   :  { %9812 = vmatmul.mubr.msk.f32.gmra.mxu0 %vm268_vm2, %v234_v28 }
 0x108   :  { %9814 = vmatprep.mubr.msk.f32.mxu0 %vm11200_vm0, %v14984_v0 }
 0x10b   :  { %9815 = vmatmul.mubr.msk.f32.gmra.mxu0 %vm268_vm2, %v235_v29 }
 0x10c   :  { %9817 = vmatprep.mubr.msk.f32.mxu0 %vm11200_vm0, %v14984_v0 }
 0x10f   :  { %9818 = vmatmul.mubr.msk.f32.gmra.mxu0 %vm268_vm2, %v236_v30 }
 0x110   :  { %9820 = vmatprep.mubr.msk.f32.mxu0 %vm11200_vm0, %v14984_v0 }
 0x113   :  { %9821 = vmatmul.mubr.msk.f32.gmra.mxu0 %vm268_vm2, %v237_v31 }
 0x114   :  { %9823 = vmatprep.mubr.msk.f32.mxu0 %vm11200_vm0, %v14984_v0 }
 0x117   :  { %9824 = vmatmul.mubr.msk.f32.gmra.mxu0 %vm268_vm2, %v238_v32 }
 0x118   :  { %9826 = vmatprep.mubr.msk.f32.mxu0 %vm11200_vm0, %v14984_v0 }
 0x11b   :  { %9827 = vmatmul.mubr.msk.f32.gmra.mxu0 %vm268_vm2, %v239_v33 }
 0x11c   :  { %9829 = vmatprep.mubr.msk.f32.mxu0 %vm11200_vm0, %v14984_v0 }
 0x11f   :  { %9830 = vmatmul.mubr.msk.f32.gmra.mxu0 %vm268_vm2, %v240_v34 }
 0x120   :  { %9832 = vmatprep.mubr.msk.f32.mxu0 %vm11200_vm0, %v14984_v0 }
 0x123   :  { %9833 = vmatmul.mubr.msk.f32.gmra.mxu0 %vm268_vm2, %v241_v35 }
 0x124   :  { %9835 = vmatprep.mubr.msk.f32.mxu0 %vm11200_vm0, %v14984_v0 }
 0x127   :  { %9836 = vmatmul.mubr.msk.f32.gmra.mxu0 %vm268_vm2, %v242_v36 }
 0x128   :  { %9838 = vmatprep.mubr.msk.f32.mxu0 %vm11200_vm0, %v14984_v0 }
 0x12b   :  { %9839 = vmatmul.mubr.msk.f32.gmra.mxu0 %vm268_vm2, %v243_v37 }
 0x12c   :  { %9841 = vmatprep.mubr.msk.f32.mxu0 %vm11200_vm0, %v14984_v0 }
 0x12f   :  { %9842 = vmatmul.mubr.msk.f32.gmra.mxu0 %vm268_vm2, %v244_v38 }
 0x130   :  { %9844 = vmatprep.mubr.msk.f32.mxu0 %vm11200_vm0, %v14984_v0 }
 0x133   :  { %9845 = vmatmul.mubr.msk.f32.gmra.mxu0 %vm268_vm2, %v245_v39 }
 0x134   :  { %9847 = vmatprep.mubr.msk.f32.mxu0 %vm11200_vm0, %v14984_v0 }
 0x137   :  { %9848 = vmatmul.mubr.msk.f32.gmra.mxu0 %vm268_vm2, %v246_v40 }
 0x138   :  { %9850 = vmatprep.mubr.msk.f32.mxu0 %vm11200_vm0, %v14984_v0 }
 0x13b   :  { %9851 = vmatmul.mubr.msk.f32.gmra.mxu0 %vm268_vm2, %v247_v41 }
 0x13c   :  { %9853 = vmatprep.mubr.msk.f32.mxu0 %vm11200_vm0, %v14984_v0 }
 0x13f   :  { %9854 = vmatmul.mubr.msk.f32.gmra.mxu0 %vm268_vm2, %v248_v42 }
 0x140   :  { %9856 = vmatprep.mubr.msk.f32.mxu0 %vm11200_vm0, %v14984_v0 }
 0x143   :  { %9857 = vmatmul.mubr.msk.f32.gmra.mxu0 %vm268_vm2, %v249_v43 }
 0x144   :  { %9859 = vmatprep.mubr.msk.f32.mxu0 %vm11200_vm0, %v14984_v0 }
 0x147   :  { %9860 = vmatmul.mubr.msk.f32.gmra.mxu0 %vm268_vm2, %v250_v44 }
 0x148   :  { %9862 = vmatprep.mubr.msk.f32.mxu0 %vm11200_vm0, %v14984_v0 }
 0x14b   :  { %9863 = vmatmul.mubr.msk.f32.gmra.mxu0 %vm268_vm2, %v251_v45 }
 0x14c   :  { %9865 = vmatprep.mubr.msk.f32.mxu0 %vm11200_vm0, %v14984_v0 }
 0x14f   :  { %9866 = vmatmul.mubr.msk.f32.gmra.mxu0 %vm268_vm2, %v252_v46 }
 0x150   :  { %9868 = vmatprep.mubr.msk.f32.mxu0 %vm11200_vm0, %v14984_v0 }
 0x153   :  { %9869 = vmatmul.mubr.msk.f32.gmra.mxu0 %vm268_vm2, %v253_v47 }
 0x154   :  { %9871 = vmatprep.mubr.msk.f32.mxu0 %vm11200_vm0, %v14984_v0 }
 0x157   :  { %9872 = vmatmul.mubr.msk.f32.gmra.mxu0 %vm268_vm2, %v254_v48 }
 0x158   :  { %9874 = vmatprep.mubr.msk.f32.mxu0 %vm11200_vm0, %v14984_v0 }
 0x15b   :  { %9875 = vmatmul.mubr.msk.f32.gmra.mxu0 %vm268_vm2, %v255_v49 }
 0x15c   :  { %9877 = vmatprep.mubr.msk.f32.mxu0 %vm11200_vm0, %v14984_v0 }
 0x15f   :  { %9878 = vmatmul.mubr.msk.f32.gmra.mxu0 %vm268_vm2, %v256_v50 }
 0x160   :  { %9880 = vmatprep.mubr.msk.f32.mxu0 %vm11200_vm0, %v14984_v0 }
 0x163   :  { %v11626_v52 = vpop.f32.mrf.mxu0  ;;  %9881 = vmatmul.mubr.msk.f32.gmra.mxu0 %vm268_vm2, %v257_v51 }
 0x164   :  { %9883 = vmatprep.mubr.msk.f32.mxu0 %vm11200_vm0, %v14984_v0 }
 0x165   :  { %v9738_v54 = vpop.f32.mrf.mxu0 }
 0x167   :  { %v11634_v55 = vpop.f32.mrf.mxu0  ;;  %9884 = vmatmul.mubr.msk.f32.gmra.mxu0 %vm268_vm2, %v258_v53 }
 0x168   :  { %9886 = vmatprep.mubr.msk.f32.mxu0 %vm11200_vm0, %v14984_v0  ;;  %v918_v54 = vmul.f32 %v11634_v55, %v11634_v55 }
 0x169   :  { %v9741_v57 = vpop.f32.mrf.mxu0 }
 0x16a   :  { %v917_v57 = vmul.f32 %v11626_v52, %v11626_v52 }
 0x16b   :  { %v11642_v58 = vpop.f32.mrf.mxu0  ;;  %9887 = vmatmul.mubr.msk.f32.gmra.mxu0 %vm268_vm2, %v259_v56 }
 0x16c   :  { %9889 = vmatprep.mubr.msk.f32.mxu0 %vm11200_vm0, %v14984_v0 }
 0x16d   :  { %v9744_v60 = vpop.f32.mrf.mxu0 }
 0x16e   :  { %v919_v60 = vmul.f32 %v11642_v58, %v11642_v58 }
 0x16f   :  { %v11650_v61 = vpop.f32.mrf.mxu0  ;;  %9890 = vmatmul.mubr.msk.f32.gmra.mxu0 %vm268_vm2, %v260_v59  ;;  %v798_v59 = vsel %vm796_vm3, %v11634_v55, 0.0 }
 0x170   :  { %9892 = vmatprep.mubr.msk.f32.mxu0 %vm11200_vm0, %v14984_v0 }
 0x171   :  { %v9747_v63 = vpop.f32.mrf.mxu0 }
 0x172   :  { %v797_v63 = vsel %vm796_vm3, %v11626_v52, 0.0 }
 0x173   :  { %v11658_v1 = vpop.f32.mrf.mxu0  ;;  %9893 = vmatmul.mubr.msk.f32.gmra.mxu0 %vm268_vm2, %v261_v62 }
 0x174   :  { %9895 = vmatprep.mubr.msk.f32.mxu0 %vm11200_vm0, %v14984_v0 }
 0x175   :  { %v9750_v3 = vpop.f32.mrf.mxu0 }
 0x176   :  { %v800_v3 = vsel %vm796_vm3, %v11642_v58, 0.0 }
 0x177   :  { %v11666_v4 = vpop.f32.mrf.mxu0  ;;  %9896 = vmatmul.mubr.msk.f32.gmra.mxu0 %vm268_vm2, %v262_v2  ;;  %v975_v2 = vsel %vm796_vm3, %v918_v54, 0.0 }
 0x178   :  { %9898 = vmatprep.mubr.msk.f32.mxu0 %vm11200_vm0, %v14984_v0 }
 0x179   :  { %v9753_v6 = vpop.f32.mrf.mxu0 }
 0x17a   :  { %v799_v6 = vadd.f32 %v798_v59, %v797_v63 }
 0x17b   :  { %v11674_v7 = vpop.f32.mrf.mxu0  ;;  %9899 = vmatmul.mubr.msk.f32.gmra.mxu0 %vm268_vm2, %v263_v5  ;;  %v920_v5 = vmul.f32 %v11650_v61, %v11650_v61 }
 0x17c   :  { %9901 = vmatprep.mubr.msk.f32.mxu0 %vm11200_vm0, %v14984_v0 }
 0x17d   :  { %v9756_v9 = vpop.f32.mrf.mxu0 }
 0x17e   :  { %v974_v9 = vsel %vm796_vm3, %v917_v57, 0.0 }
 0x17f   :  { %v11682_v10 = vpop.f32.mrf.mxu0  ;;  %9902 = vmatmul.mubr.msk.f32.gmra.mxu0 %vm268_vm2, %v264_v8 }
 0x180   :  { %9904 = vmatprep.mubr.msk.f32.mxu0 %vm11200_vm0, %v14984_v0 }
 0x181   :  { %v9759_v12 = vpop.f32.mrf.mxu0 }
 0x182   :  { %v802_v12 = vsel %vm796_vm3, %v11650_v61, 0.0 }
 0x183   :  { %v11690_v13 = vpop.f32.mrf.mxu0  ;;  %9905 = vmatmul.mubr.msk.f32.gmra.mxu0 %vm268_vm2, %v265_v11  ;;  %v977_v11 = vsel %vm796_vm3, %v919_v60, 0.0  ;;  %v810_v60 = vsel %vm796_vm3, %v11682_v10, 0.0 }
 0x184   :  { %9915 = vmatprep.mubr.msk.f32.mxu0 %vm11200_vm0, %v14984_v0 }
 0x185   :  { %v9762_v14 = vpop.f32.mrf.mxu0 }
 0x186   :  { %v921_v14 = vmul.f32 %v11658_v1, %v11658_v1 }
 0x187   :  { %v11695_v15 = vpop.f32.mrf.mxu0 }
 0x189   :  { %v9765_v16 = vpop.f32.mrf.mxu0 }
 0x18a   :  { %v976_v16 = vadd.f32 %v975_v2, %v974_v9  ;;  %v926_v9 = vmul.f32 %v11695_v15, %v11695_v15 }
 0x18b   :  { %v11697_v17 = vpop.f32.mrf.mxu0 }
 0x18d   :  { %v9768_v18 = vpop.f32.mrf.mxu0 }
 0x18e   :  { %v801_v18 = vadd.f32 %v800_v3, %v799_v6  ;;  %v812_v6 = vsel %vm796_vm3, %v11690_v13, 0.0 }
 0x18f   :  { %v11699_v19 = vpop.f32.mrf.mxu0 }
 0x191   :  { %v9771_v20 = vpop.f32.mrf.mxu0 }
 0x193   :  { %v11701_v21 = vpop.f32.mrf.mxu0 }
 0x195   :  { %v9774_v22 = vpop.f32.mrf.mxu0 }
 0x196   :  { %v979_v22 = vsel %vm796_vm3, %v920_v5, 0.0 }
 0x197   :  { %v11703_v23 = vpop.f32.mrf.mxu0 }
 0x199   :  { %v9777_v24 = vpop.f32.mrf.mxu0 }
 0x19a   :  { %v804_v24 = vsel %vm796_vm3, %v11658_v1, 0.0 }
 0x19b   :  { %v11705_v25 = vpop.f32.mrf.mxu0 }
 0x19d   :  { %v9780_v26 = vpop.f32.mrf.mxu0 }
 0x19e   :  { %v922_v26 = vmul.f32 %v11666_v4, %v11666_v4 }
 0x19f   :  { %v11707_v27 = vpop.f32.mrf.mxu0 }
 0x1a1   :  { %v9783_v28 = vpop.f32.mrf.mxu0 }
 0x1a2   :  { %v978_v28 = vadd.f32 %v977_v11, %v976_v16 }
 0x1a3   :  { %v11709_v29 = vpop.f32.mrf.mxu0 }
 0x1a5   :  { %v9786_v30 = vpop.f32.mrf.mxu0 }
 0x1a6   :  { %v803_v30 = vadd.f32 %v802_v12, %v801_v18  ;;  %v814_v18 = vsel %vm796_vm3, %v11695_v15, 0.0 }
 0x1a7   :  { %v11711_v31 = vpop.f32.mrf.mxu0 }
 0x1a9   :  { %v9789_v32 = vpop.f32.mrf.mxu0 }
 0x1ab   :  { %v11713_v33 = vpop.f32.mrf.mxu0 }
 0x1ad   :  { %v9792_v34 = vpop.f32.mrf.mxu0 }
 0x1ae   :  { %v981_v34 = vsel %vm796_vm3, %v921_v14, 0.0 }
 0x1af   :  { %v11715_v35 = vpop.f32.mrf.mxu0 }
 0x1b1   :  { %v9795_v36 = vpop.f32.mrf.mxu0 }
 0x1b2   :  { %v806_v36 = vsel %vm796_vm3, %v11666_v4, 0.0 }
 0x1b3   :  { %v11717_v37 = vpop.f32.mrf.mxu0 }
 0x1b5   :  { %v9798_v38 = vpop.f32.mrf.mxu0 }
 0x1b6   :  { %v923_v38 = vmul.f32 %v11674_v7, %v11674_v7 }
 0x1b7   :  { %v11719_v39 = vpop.f32.mrf.mxu0 }
 0x1b8   :  { %v985_v59 = vsel %vm796_vm3, %v923_v38, 0.0 }
 0x1b9   :  { %v9801_v40 = vpop.f32.mrf.mxu0 }
 0x1ba   :  { %v980_v40 = vadd.f32 %v979_v22, %v978_v28  ;;  %v991_v28 = vsel %vm796_vm3, %v926_v9, 0.0 }
 0x1bb   :  { %v11721_v41 = vpop.f32.mrf.mxu0 }
 0x1bd   :  { %v9804_v42 = vpop.f32.mrf.mxu0 }
 0x1be   :  { %v805_v42 = vadd.f32 %v804_v24, %v803_v30  ;;  %v816_v30 = vsel %vm796_vm3, %v11697_v17, 0.0 }
 0x1bf   :  { %v11723_v43 = vpop.f32.mrf.mxu0 }
 0x1c0   :  { %v807_v54 = vadd.f32 %v806_v36, %v805_v42 }
 0x1c1   :  { %v9807_v44 = vpop.f32.mrf.mxu0 }
 0x1c3   :  { %v11725_v45 = vpop.f32.mrf.mxu0 }
 0x1c5   :  { %v9810_v46 = vpop.f32.mrf.mxu0 }
 0x1c6   :  { %v983_v46 = vsel %vm796_vm3, %v922_v26, 0.0 }
 0x1c7   :  { %v11727_v47 = vpop.f32.mrf.mxu0 }
 0x1c9   :  { %v9813_v48 = vpop.f32.mrf.mxu0 }
 0x1ca   :  { %v808_v48 = vsel %vm796_vm3, %v11674_v7, 0.0 }
 0x1cb   :  { %v11729_v49 = vpop.f32.mrf.mxu0  ;;  %v809_v2 = vadd.f32 %v808_v48, %v807_v54 }
 0x1cc   :  { %15146 = vst [vmem:[#allocation29_spill] sm:$0xff] %v11729_v49 }
 0x1cd   :  { %v9816_v50 = vpop.f32.mrf.mxu0  ;;  %v811_v12 = vadd.f32 %v810_v60, %v809_v2  ;;  %v930_v60 = vmul.f32 %v11703_v23, %v11703_v23 }
 0x1ce   :  { %v924_v50 = vmul.f32 %v11682_v10, %v11682_v10 }
 0x1cf   :  { %v11731_v51 = vpop.f32.mrf.mxu0  ;;  %v813_v24 = vadd.f32 %v812_v6, %v811_v12  ;;  %v931_v6 = vmul.f32 %v11705_v25, %v11705_v25 }
 0x1d0   :  { %v987_v5 = vsel %vm796_vm3, %v924_v50, 0.0 }
 0x1d1   :  { %v9819_v53 = vpop.f32.mrf.mxu0  ;;  %v815_v38 = vadd.f32 %v814_v18, %v813_v24  ;;  %v824_v18 = vsel %vm796_vm3, %v11705_v25, 0.0 }
 0x1d2   :  { %v982_v53 = vadd.f32 %v981_v34, %v980_v40  ;;  %v928_v34 = vmul.f32 %v11699_v19, %v11699_v19 }
 0x1d3   :  { %v11735_v56 = vpop.f32.mrf.mxu0  ;;  %v817_v50 = vadd.f32 %v816_v30, %v815_v38  ;;  %v826_v30 = vsel %vm796_vm3, %v11707_v27, 0.0 }
 0x1d4   :  { %v984_v63 = vadd.f32 %v983_v46, %v982_v53  ;;  %v929_v46 = vmul.f32 %v11701_v21, %v11701_v21  ;;  %v995_v54 = vsel %vm796_vm3, %v928_v34, 0.0  ;;  %v933_v34 = vmul.f32 %v11709_v29, %v11709_v29 }
 0x1d5   :  { %v9822_v62 = vpop.f32.mrf.mxu0 }
 0x1d6   :  { %v925_v62 = vmul.f32 %v11690_v13, %v11690_v13  ;;  %v986_v11 = vadd.f32 %v985_v59, %v984_v63  ;;  %v820_v59 = vsel %vm796_vm3, %v11701_v21, 0.0 }
 0x1d7   :  { %v11750_v8 = vpop.f32.mrf.mxu0 }
 0x1d8   :  { %v989_v16 = vsel %vm796_vm3, %v925_v62, 0.0  ;;  %v988_v22 = vadd.f32 %v987_v5, %v986_v11  ;;  %v822_v5 = vsel %vm796_vm3, %v11703_v23, 0.0 }
 0x1d9   :  { %v9825_v20 = vpop.f32.mrf.mxu0 }
 0x1da   :  { %v927_v20 = vmul.f32 %v11697_v17, %v11697_v17  ;;  %v990_v36 = vadd.f32 %v989_v16, %v988_v22  ;;  %v999_v16 = vsel %vm796_vm3, %v930_v60, 0.0  ;;  %v830_v60 = vsel %vm796_vm3, %v11711_v31, 0.0 }
 0x1db   :  { %v11763_v32 = vpop.f32.mrf.mxu0 }
 0x1dc   :  { %v993_v42 = vsel %vm796_vm3, %v927_v20, 0.0  ;;  %v992_v48 = vadd.f32 %v991_v28, %v990_v36  ;;  %v932_v20 = vmul.f32 %v11707_v27, %v11707_v27  ;;  %v1001_v28 = vsel %vm796_vm3, %v931_v6, 0.0 }
 0x1dd   :  { %v9828_v44 = vpop.f32.mrf.mxu0 }
 0x1de   :  { %v818_v44 = vsel %vm796_vm3, %v11699_v19, 0.0  ;;  %v994_v62 = vadd.f32 %v993_v42, %v992_v48  ;;  %v934_v48 = vmul.f32 %v11711_v31, %v11711_v31 }
 0x1df   :  { %v11775_v57 = vpop.f32.mrf.mxu0  ;;  %v819_v63 = vadd.f32 %v818_v44, %v817_v50  ;;  %v1003_v44 = vsel %vm796_vm3, %v932_v20, 0.0 }
 0x1e0   :  { %v996_v9 = vadd.f32 %v995_v54, %v994_v62  ;;  %v935_v62 = vmul.f32 %v11713_v33, %v11713_v33  ;;  %v1007_v6 = vsel %vm796_vm3, %v934_v48, 0.0 }
 0x1e1   :  { %v9831_v3 = vpop.f32.mrf.mxu0  ;;  %v821_v11 = vadd.f32 %v820_v59, %v819_v63  ;;  %v1005_v59 = vsel %vm796_vm3, %v933_v34, 0.0 }
 0x1e2   :  { %v997_v3 = vsel %vm796_vm3, %v929_v46, 0.0  ;;  %v828_v46 = vsel %vm796_vm3, %v11709_v29, 0.0  ;;  %v1009_v20 = vsel %vm796_vm3, %v935_v62, 0.0 }
 0x1e3   :  { %v11787_v14 = vpop.f32.mrf.mxu0  ;;  %v998_v22 = vadd.f32 %v997_v3, %v996_v9  ;;  %v823_v24 = vadd.f32 %v822_v5, %v821_v11  ;;  %v832_v9 = vsel %vm796_vm3, %v11713_v33, 0.0  ;;  %v936_v11 = vmul.f32 %v11715_v35, %v11715_v35 }
 0x1e5   :  { %v9834_v26 = vpop.f32.mrf.mxu0  ;;  %v1000_v36 = vadd.f32 %v999_v16, %v998_v22  ;;  %v825_v38 = vadd.f32 %v824_v18, %v823_v24  ;;  %v834_v22 = vsel %vm796_vm3, %v11715_v35, 0.0  ;;  %v937_v24 = vmul.f32 %v11717_v37, %v11717_v37 }
 0x1e7   :  { %v11799_v40 = vpop.f32.mrf.mxu0  ;;  %v1002_v50 = vadd.f32 %v1001_v28, %v1000_v36  ;;  %v1011_v36 = vsel %vm796_vm3, %v936_v11, 0.0 }
 0x1e8   :  { %15147 = vst [vmem:[#allocation30_spill] sm:$0xff] %v11799_v40 }
 0x1e9   :  { %v9837_v53 = vpop.f32.mrf.mxu0  ;;  %v1004_v63 = vadd.f32 %v1003_v44, %v1002_v50  ;;  %v1013_v50 = vsel %vm796_vm3, %v937_v24, 0.0 }
 0x1ea   :  { %v827_v53 = vadd.f32 %v826_v30, %v825_v38  ;;  %v836_v38 = vsel %vm796_vm3, %v11717_v37, 0.0 }
 0x1eb   :  { %v11811_v2 = vpop.f32.mrf.mxu0 }
 0x1ec   :  { %15148 = vst [vmem:[#allocation31_spill] sm:$0xff] %v11811_v2  ;;  %v829_v3 = vadd.f32 %v828_v46, %v827_v53  ;;  %v838_v53 = vsel %vm796_vm3, %v11719_v39, 0.0 }
 0x1ed   :  { %v9840_v12 = vpop.f32.mrf.mxu0 }
 0x1ee   :  { %v1006_v12 = vadd.f32 %v1005_v59, %v1004_v63  ;;  %v831_v16 = vadd.f32 %v830_v60, %v829_v3  ;;  %v939_v59 = vmul.f32 %v11721_v41, %v11721_v41 }
 0x1ef   :  { %v11823_v26 = vpop.f32.mrf.mxu0 }
 0x1f0   :  { %15149 = vst [vmem:[#allocation32_spill] sm:$0xff] %v11823_v26  ;;  %v1008_v28 = vadd.f32 %v1007_v6, %v1006_v12  ;;  %v833_v30 = vadd.f32 %v832_v9, %v831_v16  ;;  %v940_v6 = vmul.f32 %v11723_v43, %v11723_v43  ;;  %v1017_v16 = vsel %vm796_vm3, %v939_v59, 0.0 }
 0x1f1   :  { %v9843_v42 = vpop.f32.mrf.mxu0  ;;  %v943_v59 = vmul.f32 %v11729_v49, %v11729_v49  ;;  %v866_v0 = vsel %vm796_vm3, %v11823_v26, 0.0 }
 0x1f2   :  { %v938_v42 = vmul.f32 %v11719_v39, %v11719_v39  ;;  %v1010_v44 = vadd.f32 %v1009_v20, %v1008_v28  ;;  %v835_v46 = vadd.f32 %v834_v22, %v833_v30  ;;  %v842_v20 = vsel %vm796_vm3, %v11723_v43, 0.0 }
 0x1f3   :  { %v11835_v54 = vpop.f32.mrf.mxu0  ;;  %v941_v22 = vmul.f32 %v11725_v45, %v11725_v45 }
 0x1f4   :  { %15150 = vst [vmem:[#allocation33_spill] sm:$0xff] %v11835_v54  ;;  %v1012_v60 = vadd.f32 %v1011_v36, %v1010_v44  ;;  %v837_v62 = vadd.f32 %v836_v38, %v835_v46  ;;  %v1015_v3 = vsel %vm796_vm3, %v938_v42, 0.0  ;;  %v844_v36 = vsel %vm796_vm3, %v11725_v45, 0.0 }
 0x1f5   :  { %v9846_v5 = vpop.f32.mrf.mxu0  ;;  %v942_v38 = vmul.f32 %v11727_v47, %v11727_v47 }
 0x1f6   :  { %v840_v5 = vsel %vm796_vm3, %v11721_v41, 0.0  ;;  %v1014_v9 = vadd.f32 %v1013_v50, %v1012_v60  ;;  %v839_v11 = vadd.f32 %v838_v53, %v837_v62  ;;  %v1021_v50 = vsel %vm796_vm3, %v941_v22, 0.0 }
 0x1f7   :  { %v11847_v18 = vpop.f32.mrf.mxu0  ;;  %v846_v53 = vsel %vm796_vm3, %v11727_v47, 0.0  ;;  %v850_v22 = vsel %vm796_vm3, %v11731_v51, 0.0 }
 0x1f8   :  { %15151 = vst [vmem:[#allocation34_spill] sm:$0xff] %v11847_v18  ;;  %v1016_v24 = vadd.f32 %v1015_v3, %v1014_v9  ;;  %v841_v28 = vadd.f32 %v840_v5, %v839_v11  ;;  %v1023_v3 = vsel %vm796_vm3, %v942_v38, 0.0  ;;  %v848_v5 = vsel %vm796_vm3, %v11729_v49, 0.0 }
 0x1f9   :  { %v9849_v34 = vpop.f32.mrf.mxu0  ;;  %v852_v38 = vsel %vm796_vm3, %v11735_v56, 0.0 }
 0x1fa   :  { %v1019_v34 = vsel %vm796_vm3, %v940_v6, 0.0  ;;  %v1018_v42 = vadd.f32 %v1017_v16, %v1016_v24  ;;  %v843_v44 = vadd.f32 %v842_v20, %v841_v28  ;;  %v944_v6 = vmul.f32 %v11731_v51, %v11731_v51 }
 0x1fb   :  { %v11859_v48 = vpop.f32.mrf.mxu0  ;;  %v1025_v20 = vsel %vm796_vm3, %v943_v59, 0.0  ;;  %v945_v24 = vmul.f32 %v11735_v56, %v11735_v56 }
 0x1fc   :  { %15152 = vst [vmem:[#allocation35_spill] sm:$0xff] %v11859_v48  ;;  %v1020_v60 = vadd.f32 %v1019_v34, %v1018_v42  ;;  %v845_v62 = vadd.f32 %v844_v36, %v843_v44  ;;  %v1027_v36 = vsel %vm796_vm3, %v944_v6, 0.0  ;;  %v946_v42 = vmul.f32 %v11750_v8, %v11750_v8 }
 0x1fd   :  { %v9852_v63 = vpop.f32.mrf.mxu0  ;;  %v1029_v59 = vsel %vm796_vm3, %v945_v24, 0.0 }
 0x1fe   :  { %v1022_v9 = vadd.f32 %v1021_v50, %v1020_v60  ;;  %v847_v11 = vadd.f32 %v846_v53, %v845_v62  ;;  %v854_v60 = vsel %vm796_vm3, %v11750_v8, 0.0  ;;  %v947_v62 = vmul.f32 %v11763_v32, %v11763_v32 }
 0x1ff   :  { %v11871_v12 = vpop.f32.mrf.mxu0  ;;  %v1031_v6 = vsel %vm796_vm3, %v946_v42, 0.0 }
 0x200   :  { %15153 = vst [vmem:[#allocation36_spill] sm:$0xff] %v11871_v12  ;;  %v1024_v28 = vadd.f32 %v1023_v3, %v1022_v9  ;;  %v856_v9 = vsel %vm796_vm3, %v11763_v32, 0.0 }
 0x201   :  { %v9855_v30 = vpop.f32.mrf.mxu0 }
 0x202   :  { %v849_v30 = vadd.f32 %v848_v5, %v847_v11  ;;  %v1026_v44 = vadd.f32 %v1025_v20, %v1024_v28  ;;  %v948_v11 = vmul.f32 %v11775_v57, %v11775_v57  ;;  %v1033_v28 = vsel %vm796_vm3, %v947_v62, 0.0 }
 0x203   :  { %v11883_v46 = vpop.f32.mrf.mxu0 }
 0x204   :  { %15154 = vst [vmem:[#allocation37_spill] sm:$0xff] %v11883_v46  ;;  %v851_v50 = vadd.f32 %v850_v22, %v849_v30  ;;  %v858_v30 = vsel %vm796_vm3, %v11775_v57, 0.0 }
 0x205   :  { %v9858_v63 = vpop.f32.mrf.mxu0 }
 0x206   :  { %v1028_v63 = vadd.f32 %v1027_v36, %v1026_v44  ;;  %v853_v3 = vadd.f32 %v852_v38, %v851_v50  ;;  %v1035_v44 = vsel %vm796_vm3, %v948_v11, 0.0  ;;  %v860_v50 = vsel %vm796_vm3, %v11787_v14, 0.0 }
 0x207   :  { %v11895_v16 = vpop.f32.mrf.mxu0 }
 0x208   :  { %15155 = vst [vmem:[#allocation38_spill] sm:$0xff] %v11895_v16  ;;  %v1030_v20 = vadd.f32 %v1029_v59, %v1028_v63  ;;  %v855_v22 = vadd.f32 %v854_v60, %v853_v3  ;;  %v950_v59 = vmul.f32 %v11799_v40, %v11799_v40 }
 0x209   :  { %v9861_v34 = vpop.f32.mrf.mxu0 }
 0x20a   :  { %v949_v34 = vmul.f32 %v11787_v14, %v11787_v14  ;;  %v1032_v36 = vadd.f32 %v1031_v6, %v1030_v20  ;;  %v857_v38 = vadd.f32 %v856_v9, %v855_v22  ;;  %v951_v6 = vmul.f32 %v11811_v2, %v11811_v2 }
 0x20b   :  { %v11907_v53 = vpop.f32.mrf.mxu0  ;;  %v1039_v22 = vsel %vm796_vm3, %v950_v59, 0.0 }
 0x20c   :  { %15156 = vst [vmem:[#allocation39_spill] sm:$0xff] %v11907_v53  ;;  %v1034_v60 = vadd.f32 %v1033_v28, %v1032_v36  ;;  %v859_v63 = vadd.f32 %v858_v30, %v857_v38  ;;  %v1037_v3 = vsel %vm796_vm3, %v949_v34, 0.0  ;;  %v952_v28 = vmul.f32 %v11823_v26, %v11823_v26 }
 0x20d   :  { %v9864_v5 = vpop.f32.mrf.mxu0  ;;  %v1041_v38 = vsel %vm796_vm3, %v951_v6, 0.0  ;;  %v878_v26 = vsel %vm796_vm3, %v11895_v16, 0.0 }
 0x20e   :  { %v862_v5 = vsel %vm796_vm3, %v11799_v40, 0.0  ;;  %v1036_v9 = vadd.f32 %v1035_v44, %v1034_v60  ;;  %v861_v11 = vadd.f32 %v860_v50, %v859_v63  ;;  %v953_v44 = vmul.f32 %v11835_v54, %v11835_v54 }
 0x20f   :  { %v11919_v24 = vpop.f32.mrf.mxu0  ;;  %v1043_v63 = vsel %vm796_vm3, %v952_v28, 0.0  ;;  %v870_v40 = vsel %vm796_vm3, %v11847_v18, 0.0 }
 0x210   :  { %15157 = vst [vmem:[#allocation40_spill] sm:$0xff] %v11919_v24  ;;  %v1038_v30 = vadd.f32 %v1037_v3, %v1036_v9  ;;  %v863_v36 = vadd.f32 %v862_v5, %v861_v11  ;;  %v954_v3 = vmul.f32 %v11847_v18, %v11847_v18  ;;  %v1045_v11 = vsel %vm796_vm3, %v953_v44, 0.0 }
 0x211   :  { %v9867_v42 = vpop.f32.mrf.mxu0 }
 0x212   :  { %v864_v42 = vsel %vm796_vm3, %v11811_v2, 0.0  ;;  %v1040_v50 = vadd.f32 %v1039_v22, %v1038_v30  ;;  %v955_v22 = vmul.f32 %v11859_v48, %v11859_v48  ;;  %v874_v2 = vsel %vm796_vm3, %v11871_v12, 0.0 }
 0x213   :  { %v11931_v62 = vpop.f32.mrf.mxu0  ;;  %v865_v59 = vadd.f32 %v864_v42, %v863_v36  ;;  %v1047_v36 = vsel %vm796_vm3, %v954_v3, 0.0 }
 0x214   :  { %15158 = vst [vmem:[#allocation41_spill] sm:$0xff] %v11931_v62  ;;  %v1042_v5 = vadd.f32 %v1041_v38, %v1040_v50 }
 0x215   :  { %v9870_v20 = vpop.f32.mrf.mxu0  ;;  %v867_v9 = vadd.f32 %v866_v0, %v865_v59  ;;  %v956_v0 = vmul.f32 %v11871_v12, %v11871_v12  ;;  %v1049_v59 = vsel %vm796_vm3, %v955_v22, 0.0 }
 0x216   :  { %v868_v20 = vsel %vm796_vm3, %v11835_v54, 0.0  ;;  %v1044_v42 = vadd.f32 %v1043_v63, %v1042_v5  ;;  %v957_v63 = vmul.f32 %v11883_v46, %v11883_v46  ;;  %v882_v54 = vsel %vm796_vm3, %v11919_v24, 0.0 }
 0x217   :  { %v11943_v34 = vpop.f32.mrf.mxu0  ;;  %v869_v28 = vadd.f32 %v868_v20, %v867_v9  ;;  %v1051_v9 = vsel %vm796_vm3, %v956_v0, 0.0 }
 0x218   :  { %15159 = vst [vmem:[#allocation42_spill] sm:$0xff] %v11943_v34  ;;  %v1046_v38 = vadd.f32 %v1045_v11, %v1044_v42 }
 0x219   :  { %v9873_v60 = vpop.f32.mrf.mxu0  ;;  %v871_v50 = vadd.f32 %v870_v40, %v869_v28  ;;  %v958_v40 = vmul.f32 %v11895_v16, %v11895_v16  ;;  %v1053_v28 = vsel %vm796_vm3, %v957_v63, 0.0 }
 0x21a   :  { %v872_v60 = vsel %vm796_vm3, %v11859_v48, 0.0  ;;  %v1048_v20 = vadd.f32 %v1047_v36, %v1046_v38  ;;  %v959_v36 = vmul.f32 %v11907_v53, %v11907_v53 }
 0x21b   :  { %v11955_v6 = vpop.f32.mrf.mxu0  ;;  %v873_v3 = vadd.f32 %v872_v60, %v871_v50  ;;  %v1055_v50 = vsel %vm796_vm3, %v958_v40, 0.0 }
 0x21c   :  { %15160 = vst [vmem:[#allocation43_spill] sm:$0xff] %v11955_v6  ;;  %v1050_v11 = vadd.f32 %v1049_v59, %v1048_v20 }
 0x21d   :  { %v9876_v30 = vpop.f32.mrf.mxu0  ;;  %v875_v42 = vadd.f32 %v874_v2, %v873_v3  ;;  %v960_v2 = vmul.f32 %v11919_v24, %v11919_v24  ;;  %v1057_v3 = vsel %vm796_vm3, %v959_v36, 0.0  ;;  %v15162_v36 = vmov 0.0  }
 0x21e   :  { %v876_v30 = vsel %vm796_vm3, %v11883_v46, 0.0  ;;  %v1052_v60 = vadd.f32 %v1051_v9, %v1050_v11  ;;  %v961_v9 = vmul.f32 %v11931_v62, %v11931_v62  ;;  %v2109_v46 = vld [vmem:[#allocation9 + $0x28] sm:$0xff] }
 0x21f   :  { %v11967_v44 = vpop.f32.mrf.mxu0  ;;  %v877_v0 = vadd.f32 %v876_v30, %v875_v42  ;;  %v2111_v30 = vld [vmem:[#allocation9 + $0x38] sm:$0xff] }
 0x220   :  { %15161 = vst [vmem:[#allocation44_spill] sm:$0xff] %v11967_v44  ;;  %v1054_v59 = vadd.f32 %v1053_v28, %v1052_v60  ;;  %9908 = vmatpush3.msra.mxu0 %v2111_v30  ;;  %v962_v28 = vmul.f32 %v11943_v34, %v11943_v34  ;;  %v1061_v48 = vsel %vm796_vm3, %v961_v9, 0.0  ;;  %v890_v12 = vsel %vm796_vm3, %v11967_v44, 0.0 }
 0x221   :  { %v9879_v5 = vpop.f32.mrf.mxu0  ;;  %v879_v20 = vadd.f32 %v878_v26, %v877_v0  ;;  %v884_v26 = vsel %vm796_vm3, %v11931_v62, 0.0  ;;  %9909 = vmatprep.subr.mxu0 %v15162_v36 }
 0x222   :  { %v880_v5 = vsel %vm796_vm3, %v11907_v53, 0.0  ;;  %v1056_v40 = vadd.f32 %v1055_v50, %v1054_v59  ;;  %v886_v50 = vsel %vm796_vm3, %v11943_v34, 0.0  ;;  %v1063_v30 = vsel %vm796_vm3, %v962_v28, 0.0 }
 0x223   :  { %v11979_v22 = vpop.f32.mrf.mxu0  ;;  %v881_v11 = vadd.f32 %v880_v5, %v879_v20  ;;  %v963_v5 = vmul.f32 %v11955_v6, %v11955_v6 }
 0x224   :  { %v1058_v60 = vadd.f32 %v1057_v3, %v1056_v40 }
 0x225   :  { %v9882_v38 = vpop.f32.mrf.mxu0  ;;  %v883_v0 = vadd.f32 %v882_v54, %v881_v11  ;;  %v964_v54 = vmul.f32 %v11967_v44, %v11967_v44  ;;  %v1065_v11 = vsel %vm796_vm3, %v963_v5, 0.0 }
 0x226   :  { %v1059_v38 = vsel %vm796_vm3, %v960_v2, 0.0 }
 0x227   :  { %v11991_v63 = vpop.f32.mrf.mxu0  ;;  %v1060_v2 = vadd.f32 %v1059_v38, %v1058_v60  ;;  %v885_v59 = vadd.f32 %v884_v26, %v883_v0  ;;  %v965_v38 = vmul.f32 %v11979_v22, %v11979_v22  ;;  %v2110_v0 = vld [vmem:[#allocation9 + $0x30] sm:$0xff] }
 0x228   :  { %9910 = vmatpush3.msra.mxu0 %v2110_v0 }
 0x229   :  { %v9885_v42 = vpop.f32.mrf.mxu0  ;;  %v1062_v3 = vadd.f32 %v1061_v48, %v1060_v2  ;;  %v887_v40 = vadd.f32 %v886_v50, %v885_v59  ;;  %v892_v48 = vsel %vm796_vm3, %v11979_v22, 0.0  ;;  %v966_v50 = vmul.f32 %v11991_v63, %v11991_v63  ;;  %9911 = vmatprep.subr.mxu0 %v15162_v36 }
 0x22a   :  { %v888_v42 = vsel %vm796_vm3, %v11955_v6, 0.0  ;;  %9912 = vmatpush3.msra.mxu0 %v2109_v46 }
 0x22b   :  { %v12004_v18 = vpop.f32.mrf.mxu0  ;;  %v1064_v26 = vadd.f32 %v1063_v30, %v1062_v3  ;;  %v889_v28 = vadd.f32 %v888_v42, %v887_v40  ;;  %v1069_v30 = vsel %vm796_vm3, %v965_v38, 0.0  ;;  %v894_v42 = vsel %vm796_vm3, %v11991_v63, 0.0  ;;  %9913 = vmatprep.subr.mxu0 %v15162_v36 }
 0x22d   :  { %v9888_v20 = vpop.f32.mrf.mxu0  ;;  %v1066_v5 = vadd.f32 %v1065_v11, %v1064_v26  ;;  %v891_v2 = vadd.f32 %v890_v12, %v889_v28  ;;  %v2108_v12 = vld [vmem:[#allocation9 + $0x20] sm:$0xff]  ;;  %v1071_v11 = vsel %vm796_vm3, %v966_v50, 0.0  ;;  %v896_v26 = vsel %vm796_vm3, %v12004_v18, 0.0 }
 0x22e   :  { %v1067_v20 = vsel %vm796_vm3, %v964_v54, 0.0  ;;  %v967_v54 = vmul.f32 %v12004_v18, %v12004_v18  ;;  %9914 = vmatpush3.msra.mxu0 %v2108_v12 }
 0x22f   :  { %v12016_v9 = vpop.f32.mrf.mxu0  ;;  %v1068_v3 = vadd.f32 %v1067_v20, %v1066_v5  ;;  %v893_v40 = vadd.f32 %v892_v48, %v891_v2 }
 0x230   :  { %v968_v38 = vmul.f32 %v12016_v9, %v12016_v9  ;;  %v1073_v46 = vsel %vm796_vm3, %v967_v54, 0.0  ;;  %v898_v20 = vsel %vm796_vm3, %v12016_v9, 0.0 }
 0x231   :  { %v9891_v60 = vpop.f32.mrf.mxu0  ;;  %v1070_v28 = vadd.f32 %v1069_v30, %v1068_v3  ;;  %v895_v0 = vadd.f32 %v894_v42, %v893_v40 }
 0x233   :  { %v12028_v59 = vpop.f32.mrf.mxu0  ;;  %v1072_v50 = vadd.f32 %v1071_v11, %v1070_v28  ;;  %v897_v5 = vadd.f32 %v896_v26, %v895_v0 }
 0x234   :  { %v969_v48 = vmul.f32 %v12028_v59, %v12028_v59  ;;  %v900_v12 = vsel %vm796_vm3, %v12028_v59, 0.0 }
 0x235   :  { %v9894_v60 = vpop.f32.mrf.mxu0  ;;  %v1074_v42 = vadd.f32 %v1073_v46, %v1072_v50  ;;  %v899_v3 = vadd.f32 %v898_v20, %v897_v5 }
 0x236   :  { %v1075_v60 = vsel %vm796_vm3, %v968_v38, 0.0  ;;  %v1077_v40 = vsel %vm796_vm3, %v969_v48, 0.0 }
 0x237   :  { %v12042_v16 = vpop.f32.mrf.mxu0  ;;  %v1076_v26 = vadd.f32 %v1075_v60, %v1074_v42  ;;  %v901_v38 = vadd.f32 %v900_v12, %v899_v3 }
 0x238   :  { %v970_v30 = vmul.f32 %v12042_v16, %v12042_v16  ;;  %v902_v36 = vsel %vm796_vm3, %v12042_v16, 0.0 }
 0x239   :  { %v9897_v2 = vpop.f32.mrf.mxu0  ;;  %v1078_v46 = vadd.f32 %v1077_v40, %v1076_v26  ;;  %v903_v20 = vadd.f32 %v902_v36, %v901_v38 }
 0x23a   :  { %v1079_v0 = vsel %vm796_vm3, %v970_v30, 0.0 }
 0x23b   :  { %v12054_v54 = vpop.f32.mrf.mxu0  ;;  %v1080_v24 = vadd.f32 %v1079_v0, %v1078_v46 }
 0x23c   :  { %v971_v11 = vmul.f32 %v12054_v54, %v12054_v54  ;;  %v904_v2 = vsel %vm796_vm3, %v12054_v54, 0.0 }
 0x23d   :  { %v9900_v28 = vpop.f32.mrf.mxu0  ;;  %v905_v62 = vadd.f32 %v904_v2, %v903_v20 }
 0x23e   :  { %v1081_v5 = vsel %vm796_vm3, %v971_v11, 0.0 }
 0x23f   :  { %v785_v50 = vpop.f32.mrf.mxu0  ;;  %v1082_v12 = vadd.f32 %v1081_v5, %v1080_v24  ;;  %v1400_v5 = vld [vmem:[#allocation7 + $0x8] sm:$0xff] }
 0x240   :  { %v906_v48 = vsel %vm796_vm3, %v785_v50, 0.0  ;;  %v972_v53 = vmul.f32 %v785_v50, %v785_v50  ;;  %1555 = vmatprep.mubr.f32.mxu1 %v1400_v5 }
 0x241   :  { %v9903_v34 = vpop.f32.mrf.mxu0  ;;  %v907_v42 = vadd.f32 %v906_v48, %v905_v62 }
 0x242   :  { %v1083_v60 = vsel %vm796_vm3, %v972_v53, 0.0 }
 0x243   :  { %v790_v3 = vpop.f32.mrf.mxu0  ;;  %v1084_v6 = vadd.f32 %v1083_v60, %v1082_v12 }
 0x244   :  { %v908_v30 = vsel %vm796_vm3, %v790_v3, 0.0  ;;  %v973_v28 = vmul.f32 %v790_v3, %v790_v3 }
 0x245   :  { %v909_v40 = vadd.f32 %v908_v30, %v907_v42  ;;  %v9906_v36 = vpop.f32.mrf.mxu0 }
 0x246   :  { %v1085_v26 = vsel %vm796_vm3, %v973_v28, 0.0 }
 0x247   :  { %v910_v11 = vrot.slane %v909_v40, 4  ;;  %v1086_v38 = vadd.f32 %v1085_v26, %v1084_v6  ;;  %v1103_v6 = vlaneseq  ;;  %v794_v26 = vld [vmem:[#allocation4] sm:$0x1] }
 0x249   :  { %v911_v44 = vadd.f32 %v910_v11, %v909_v40  ;;  %v1087_v49 = vrot.slane %v1086_v38, 4  ;;  %v1104_v40 = vshrl.u32 %v1103_v6, 7 }
 0x24b   :  { %v912_v0 = vrot.slane %v911_v44, 2  ;;  %v1088_v2 = vadd.f32 %v1087_v49, %v1086_v38  ;;  %v12069_v49 = vsub.s32 0, %v1104_v40  ;;  %v795_v38 = vld [vmem:[#allocation6] sm:$0x1] }
 0x24d   :  { %v913_v34 = vadd.f32 %v912_v0, %v911_v44  ;;  %v1089_v46 = vrot.slane %v1088_v2, 2  ;;  %15163 = vst [vmem:[#allocation45_spill] sm:$0xff] %v12069_v49 }
 0x24f   :  { %v914_v53 = vrot.slane %v913_v34, 1  ;;  %v1090_v24 = vadd.f32 %v1089_v46, %v1088_v2 }
 0x251   :  { %v915_v62 = vadd.f32 %v914_v53, %v913_v34  ;;  %v1091_v20 = vrot.slane %v1090_v24, 1 }
 0x253   :  { %v916_v48 = vmul.f32 0.0022222223, %v915_v62  ;;  %v1092_v60 = vadd.f32 %v1091_v20, %v1090_v24 }
 0x255   :  { %v1093_v12 = vmul.f32 0.0022222223, %v1092_v60  ;;  %v1094_v42 = vmul.f32 %v916_v48, %v916_v48 }
 0x257   :  { %v1095_v30 = vsub.f32 %v1093_v12, %v1094_v42 }
 0x259   :  { %v1096_v28 = vmax.f32 %v1095_v30, 0.0 }
 0x25b   :  { %v1097_v36 = vadd.f32 1e-05, %v1096_v28 }
 0x25d   :  { %10898 = vrsqrt.f32 %v1097_v36 }
 0x26a   :  { %v10899_v44 = vpop.eup %10898 }
 0x26b   :  { %v1099_v11 = vmul.f32 %v10899_v44, %v794_v26 }
 0x26d   :  { %v1100_v0 = vmul.f32 %v1099_v11, %v916_v48  ;;  %v12072_v2 = vrot.slane %v1099_v11, %v12069_v49 }
 0x26f   :  { %v1101_v34 = vsub.f32 %v795_v38, %v1100_v0  ;;  %v1164_v46 = vmul.f32 %v12072_v2, %v790_v3  ;;  %v1163_v62 = vmul.f32 %v12072_v2, %v785_v50  ;;  %v1140_v20 = vmul.f32 %v12072_v2, %v11787_v14 }
 0x270   :  { %v1156_v48 = vmul.f32 %v12072_v2, %v11979_v22  ;;  %v1157_v3 = vmul.f32 %v12072_v2, %v11991_v63  ;;  %v1158_v60 = vmul.f32 %v12072_v2, %v12004_v18  ;;  %v1159_v12 = vmul.f32 %v12072_v2, %v12016_v9 }
 0x271   :  { %v12076_v53 = vrot.slane %v1101_v34, %v12069_v49  ;;  %v1160_v50 = vmul.f32 %v12072_v2, %v12028_v59  ;;  %v1161_v14 = vmul.f32 %v12072_v2, %v12042_v16  ;;  %v1162_v42 = vmul.f32 %v12072_v2, %v12054_v54 }
 0x272   :  { %v12127_v28 = vmul.f32 %v12072_v2, %v11626_v52  ;;  %v12131_v36 = vmul.f32 %v12072_v2, %v11634_v55  ;;  %v12135_v6 = vmul.f32 %v12072_v2, %v11642_v58  ;;  %v12139_v40 = vmul.f32 %v12072_v2, %v11650_v61 }
 0x273   :  { %v12079_v24 = vadd.f32 %v12076_v53, %v1164_v46  ;;  %v12085_v5 = vadd.f32 %v12076_v53, %v1140_v20  ;;  %v12102_v22 = vadd.f32 %v12076_v53, %v1156_v48  ;;  %v12105_v63 = vadd.f32 %v12076_v53, %v1157_v3 }
 0x274   :  { %v12108_v18 = vadd.f32 %v12076_v53, %v1158_v60  ;;  %v12111_v9 = vadd.f32 %v12076_v53, %v1159_v12  ;;  %v12114_v59 = vadd.f32 %v12076_v53, %v1160_v50  ;;  %v12117_v16 = vadd.f32 %v12076_v53, %v1161_v14 }
 0x275   :  { %v12120_v54 = vadd.f32 %v12076_v53, %v1162_v42  ;;  %v12123_v30 = vadd.f32 %v12076_v53, %v1163_v62  ;;  %v12143_v26 = vmul.f32 %v12072_v2, %v11658_v1  ;;  %v12147_v52 = vmul.f32 %v12072_v2, %v11666_v4 }
 0x276   :  { %v1123_v55 = vmul.f32 %v12072_v2, %v11707_v27  ;;  %v1139_v44 = vmul.f32 %v12072_v2, %v11775_v57  ;;  %v12155_v58 = vmul.f32 %v12072_v2, %v11674_v7  ;;  %v12159_v61 = vmul.f32 %v12072_v2, %v11682_v10 }
 0x277   :  { %v12163_v1 = vmul.f32 %v12072_v2, %v11690_v13  ;;  %v1117_v4 = vmul.f32 %v12072_v2, %v11695_v15  ;;  %v1118_v27 = vmul.f32 %v12072_v2, %v11697_v17  ;;  %v1119_v57 = vmul.f32 %v12072_v2, %v11699_v19 }
 0x278   :  { %v1186_v7 = vadd.f32 %v12076_v53, %v1123_v55  ;;  %v1202_v11 = vadd.f32 %v12076_v53, %v1139_v44  ;;  %v1120_v10 = vmul.f32 %v12072_v2, %v11701_v21  ;;  %v1121_v13 = vmul.f32 %v12072_v2, %v11703_v23 }
 0x279   :  { %v1122_v38 = vmul.f32 %v12072_v2, %v11705_v25  ;;  %v1138_v15 = vmul.f32 %v12072_v2, %v11763_v32  ;;  %v12183_v17 = vmul.f32 %v12072_v2, %v11709_v29  ;;  %v12187_v19 = vmul.f32 %v12072_v2, %v11711_v31 }
 0x27a   :  { %v12191_v21 = vmul.f32 %v12072_v2, %v11713_v33  ;;  %v12195_v23 = vmul.f32 %v12072_v2, %v11715_v35  ;;  %v12199_v25 = vmul.f32 %v12072_v2, %v11717_v37  ;;  %v12203_v29 = vmul.f32 %v12072_v2, %v11719_v39 }
 0x27b   :  { %v1137_v31 = vmul.f32 %v12072_v2, %v11750_v8  ;;  %v1201_v32 = vadd.f32 %v12076_v53, %v1138_v15  ;;  %v12210_v33 = vmul.f32 %v12072_v2, %v11721_v41  ;;  %v1185_v35 = vadd.f32 %v12076_v53, %v1122_v38 }
 0x27c   :  { %v1300_v0 = vmul.f32 0.01, %v1186_v7  ;;  %v1316_v34 = vmul.f32 0.01, %v1202_v11  ;;  %v1136_v37 = vmul.f32 %v12072_v2, %v11735_v56  ;;  %vm1243_vm4 = vcmp.ge.f32.partialorder %v1186_v7, 0.0 }
 0x27d   :  { %v1200_v46 = vadd.f32 %v12076_v53, %v1137_v31  ;;  %vm1259_vm5 = vcmp.ge.f32.partialorder %v1202_v11, 0.0  ;;  %v1131_v39 = vmul.f32 %v12072_v2, %v11723_v43  ;;  %v1132_v8 = vmul.f32 %v12072_v2, %v11725_v45  ;;  %v15165_v45 = vld [vmem:[#allocation29_spill] sm:$0xff] }
 0x27e   :  { %v1133_v41 = vmul.f32 %v12072_v2, %v11727_v47  ;;  %v1184_v62 = vadd.f32 %v12076_v53, %v1121_v13  ;;  %v1135_v20 = vmul.f32 %v12072_v2, %v11731_v51  ;;  %v1183_v56 = vadd.f32 %v12076_v53, %v1120_v10  ;;  %v15166_v51 = vld [vmem:[#allocation44_spill] sm:$0xff] }
 0x27f   :  { %v1199_v48 = vadd.f32 %v12076_v53, %v1136_v37  ;;  %v1315_v3 = vmul.f32 0.01, %v1201_v32  ;;  %vm1258_vm6 = vcmp.ge.f32.partialorder %v1201_v32, 0.0  ;;  %v1299_v60 = vmul.f32 0.01, %v1185_v35 }
 0x280   :  { %v12227_v12 = vsel %vm1243_vm4, %v1186_v7, %v1300_v0  ;;  %v12229_v43 = vsel %vm1259_vm5, %v1202_v11, %v1316_v34  ;;  %v1134_v50 = vmul.f32 %v12072_v2, %v15165_v45  ;;  %v1198_v47 = vadd.f32 %v12076_v53, %v1135_v20 }
 0x281   :  { %15164 = vst [vmem:[#allocation46_spill] sm:$0xff] %v12229_v43  ;;  %vm1242_vm7 = vcmp.ge.f32.partialorder %v1185_v35, 0.0  ;;  %v1314_v14 = vmul.f32 0.01, %v1200_v46  ;;  %8693 = vmatprep.subr.mxu1 %v12229_v43  ;;  %v12237_v42 = vmul.f32 %v12072_v2, %v15166_v51  ;;  %v1182_v55 = vadd.f32 %v12076_v53, %v1119_v57  ;;  %8869 = vmatprep.subr.mxu0 %v12229_v43 }
 0x282   :  { %vm1257_vm8 = vcmp.ge.f32.partialorder %v1200_v46, 0.0  ;;  %v1298_v44 = vmul.f32 0.01, %v1184_v62  ;;  %v1197_v7 = vadd.f32 %v12076_v53, %v1134_v50  ;;  %vm1241_vm9 = vcmp.ge.f32.partialorder %v1184_v62, 0.0  ;;  %8694 = vmatpush3.msra.mxu1 %v12227_v12 }
 0x283   :  { %v1313_v11 = vmul.f32 0.01, %v1199_v48  ;;  %v12243_v10 = vsel %vm1258_vm6, %v1201_v32, %v1315_v3  ;;  %v1181_v13 = vadd.f32 %v12076_v53, %v1118_v27  ;;  %vm1256_vm10 = vcmp.ge.f32.partialorder %v1199_v48, 0.0 }
 0x284   :  { %v1297_v38 = vmul.f32 0.01, %v1183_v56  ;;  %v12248_v15 = vsel %vm1242_vm7, %v1185_v35, %v1299_v60  ;;  %8695 = vmatprep.subr.mxu1 %v12243_v10  ;;  %v1196_v57 = vadd.f32 %v12076_v53, %v1133_v41  ;;  %vm1240_vm11 = vcmp.ge.f32.partialorder %v1183_v56, 0.0 }
 0x285   :  { %15167 = vst [vmem:[#allocation29_spill] sm:$0xff] %v12248_v15  ;;  %v1312_v31 = vmul.f32 0.01, %v1198_v47  ;;  %v12253_v0 = vsel %vm1257_vm8, %v1200_v46, %v1314_v14  ;;  %8696 = vmatpush3.msra.mxu1 %v12248_v15  ;;  %v1180_v32 = vadd.f32 %v12076_v53, %v1117_v4  ;;  %vm1255_vm12 = vcmp.ge.f32.partialorder %v1198_v47, 0.0 }
 0x286   :  { %15168 = vst [vmem:[#allocation44_spill] sm:$0xff] %v12253_v0  ;;  %v1296_v27 = vmul.f32 0.01, %v1182_v55  ;;  %v12258_v34 = vsel %vm1241_vm9, %v1184_v62, %v1298_v44  ;;  %8697 = vmatprep.subr.mxu1 %v12253_v0  ;;  %v1195_v35 = vadd.f32 %v12076_v53, %v1132_v8  ;;  %vm1239_vm13 = vcmp.ge.f32.partialorder %v1182_v55, 0.0 }
 0x287   :  { %15169 = vst [vmem:[#allocation47_spill] sm:$0xff] %v12258_v34  ;;  %v1311_v37 = vmul.f32 0.01, %v1197_v7  ;;  %v12263_v41 = vsel %vm1256_vm10, %v1199_v48, %v1313_v11  ;;  %8698 = vmatpush3.msra.mxu1 %v12258_v34  ;;  %v1179_v46 = vadd.f32 %v12076_v53, %v12163_v1  ;;  %vm1254_vm14 = vcmp.ge.f32.partialorder %v1197_v7, 0.0 }
 0x288   :  { %15170 = vst [vmem:[#allocation48_spill] sm:$0xff] %v12263_v41  ;;  %v1295_v4 = vmul.f32 0.01, %v1181_v13  ;;  %v12269_v20 = vsel %vm1240_vm11, %v1183_v56, %v1297_v38  ;;  %8699 = vmatprep.subr.mxu1 %v12263_v41  ;;  %v1194_v62 = vadd.f32 %v12076_v53, %v1131_v39  ;;  %vm1238_vm15 = vcmp.ge.f32.partialorder %v1181_v13, 0.0 }
 0x289   :  { %15171 = vst [vmem:[#allocation49_spill] sm:$0xff] %v12269_v20  ;;  %v1310_v8 = vmul.f32 0.01, %v1196_v57  ;;  %v12274_v3 = vsel %vm1255_vm12, %v1198_v47, %v1312_v31  ;;  %8700 = vmatpush3.msra.mxu1 %v12269_v20  ;;  %v1178_v48 = vadd.f32 %v12076_v53, %v12159_v61  ;;  %vm1253_vm1 = vcmp.ge.f32.partialorder %v1196_v57, 0.0 }
 0x28a   :  { %15172 = vst [vmem:[#allocation50_spill] sm:$0xff] %v12274_v3  ;;  %v1294_v1 = vmul.f32 0.01, %v1180_v32  ;;  %v12280_v60 = vsel %vm1239_vm13, %v1182_v55, %v1296_v27  ;;  %8701 = vmatprep.subr.mxu1 %v12274_v3  ;;  %v1193_v39 = vadd.f32 %v12076_v53, %v12210_v33  ;;  %vm1237_vm2 = vcmp.ge.f32.partialorder %v1180_v32, 0.0 }
 0x28b   :  { %15173 = vst [vmem:[#allocation51_spill] sm:$0xff] %v12280_v60  ;;  %v1309_v56 = vmul.f32 0.01, %v1195_v35  ;;  %v12286_v45 = vsel %vm1254_vm14, %v1197_v7, %v1311_v37  ;;  %8702 = vmatpush3.msra.mxu1 %v12280_v60  ;;  %v1177_v61 = vadd.f32 %v12076_v53, %v12155_v58  ;;  %vm1252_vm4 = vcmp.ge.f32.partialorder %v1195_v35, 0.0 }
 0x28c   :  { %15174 = vst [vmem:[#allocation52_spill] sm:$0xff] %v12286_v45  ;;  %v1293_v50 = vmul.f32 0.01, %v1179_v46  ;;  %v12292_v47 = vsel %vm1238_vm15, %v1181_v13, %v1295_v4  ;;  %8703 = vmatprep.subr.mxu1 %v12286_v45  ;;  %v1192_v33 = vadd.f32 %v12076_v53, %v12203_v29  ;;  %vm1236_vm5 = vcmp.ge.f32.partialorder %v1179_v46, 0.0 }
 0x28d   :  { %15175 = vst [vmem:[#allocation53_spill] sm:$0xff] %v12292_v47  ;;  %v1308_v14 = vmul.f32 0.01, %v1194_v62  ;;  %v12298_v51 = vsel %vm1253_vm1, %v1196_v57, %v1310_v8  ;;  %8704 = vmatpush3.msra.mxu1 %v12292_v47  ;;  %v1176_v58 = vadd.f32 %v12076_v53, %v12147_v52  ;;  %vm1251_vm6 = vcmp.ge.f32.partialorder %v1194_v62, 0.0 }
 0x28e   :  { %15176 = vst [vmem:[#allocation54_spill] sm:$0xff] %v12298_v51  ;;  %v1292_v55 = vmul.f32 0.01, %v1178_v48  ;;  %v12304_v44 = vsel %vm1237_vm2, %v1180_v32, %v1294_v1  ;;  %8705 = vmatprep.subr.mxu1 %v12298_v51  ;;  %v1191_v29 = vadd.f32 %v12076_v53, %v12199_v25  ;;  %vm1235_vm7 = vcmp.ge.f32.partialorder %v1178_v48, 0.0 }
 0x28f   :  { %15177 = vst [vmem:[#allocation55_spill] sm:$0xff] %v12304_v44  ;;  %v1307_v7 = vmul.f32 0.01, %v1193_v39  ;;  %v12310_v11 = vsel %vm1252_vm4, %v1195_v35, %v1309_v56  ;;  %8706 = vmatpush3.msra.mxu1 %v12304_v44  ;;  %v1175_v52 = vadd.f32 %v12076_v53, %v12143_v26  ;;  %vm1250_vm8 = vcmp.ge.f32.partialorder %v1193_v39, 0.0 }
 0x290   :  { %15178 = vst [vmem:[#allocation56_spill] sm:$0xff] %v12310_v11  ;;  %v1291_v13 = vmul.f32 0.01, %v1177_v61  ;;  %v12316_v38 = vsel %vm1236_vm5, %v1179_v46, %v1293_v50  ;;  %8707 = vmatprep.subr.mxu1 %v12310_v11  ;;  %v1190_v25 = vadd.f32 %v12076_v53, %v12195_v23  ;;  %vm1234_vm9 = vcmp.ge.f32.partialorder %v1177_v61, 0.0 }
 0x291   :  { %15179 = vst [vmem:[#allocation57_spill] sm:$0xff] %v12316_v38  ;;  %v1306_v57 = vmul.f32 0.01, %v1192_v33  ;;  %v12322_v31 = vsel %vm1251_vm6, %v1194_v62, %v1308_v14  ;;  %8708 = vmatpush3.msra.mxu1 %v12316_v38  ;;  %v1174_v26 = vadd.f32 %v12076_v53, %v12139_v40  ;;  %vm1249_vm10 = vcmp.ge.f32.partialorder %v1192_v33, 0.0 }
 0x292   :  { %15180 = vst [vmem:[#allocation58_spill] sm:$0xff] %v12322_v31  ;;  %v1290_v32 = vmul.f32 0.01, %v1176_v58  ;;  %v12328_v27 = vsel %vm1235_vm7, %v1178_v48, %v1292_v55  ;;  %8709 = vmatprep.subr.mxu1 %v12322_v31  ;;  %v1189_v23 = vadd.f32 %v12076_v53, %v12191_v21  ;;  %vm1233_vm11 = vcmp.ge.f32.partialorder %v1176_v58, 0.0 }
 0x293   :  { %15181 = vst [vmem:[#allocation59_spill] sm:$0xff] %v12328_v27  ;;  %v1305_v35 = vmul.f32 0.01, %v1191_v29  ;;  %v12334_v37 = vsel %vm1250_vm8, %v1193_v39, %v1307_v7  ;;  %8710 = vmatpush3.msra.mxu1 %v12328_v27  ;;  %v1173_v40 = vadd.f32 %v12076_v53, %v12135_v6  ;;  %vm1248_vm12 = vcmp.ge.f32.partialorder %v1191_v29, 0.0  ;;  %v15191_v7 = vld [vmem:[#allocation42_spill] sm:$0xff] }
 0x294   :  { %15182 = vst [vmem:[#allocation60_spill] sm:$0xff] %v12334_v37  ;;  %v1289_v46 = vmul.f32 0.01, %v1175_v52  ;;  %v12340_v4 = vsel %vm1234_vm9, %v1177_v61, %v1291_v13  ;;  %8711 = vmatprep.subr.mxu1 %v12334_v37  ;;  %v1188_v21 = vadd.f32 %v12076_v53, %v12187_v19  ;;  %vm1232_vm13 = vcmp.ge.f32.partialorder %v1175_v52, 0.0 }
 0x295   :  { %15183 = vst [vmem:[#allocation61_spill] sm:$0xff] %v12340_v4  ;;  %v1304_v62 = vmul.f32 0.01, %v1190_v25  ;;  %v12346_v8 = vsel %vm1249_vm10, %v1192_v33, %v1306_v57  ;;  %8712 = vmatpush3.msra.mxu1 %v12340_v4  ;;  %v1172_v6 = vadd.f32 %v12076_v53, %v12131_v36  ;;  %vm1247_vm14 = vcmp.ge.f32.partialorder %v1190_v25, 0.0  ;;  %v15188_v33 = vld [vmem:[#allocation43_spill] sm:$0xff] }
 0x296   :  { %15184 = vst [vmem:[#allocation62_spill] sm:$0xff] %v12346_v8  ;;  %v1288_v48 = vmul.f32 0.01, %v1174_v26  ;;  %v12352_v1 = vsel %vm1233_vm11, %v1176_v58, %v1290_v32  ;;  %8713 = vmatprep.subr.mxu1 %v12346_v8  ;;  %v1187_v19 = vadd.f32 %v12076_v53, %v12183_v17  ;;  %vm1231_vm15 = vcmp.ge.f32.partialorder %v1174_v26, 0.0 }
 0x297   :  { %15185 = vst [vmem:[#allocation63_spill] sm:$0xff] %v12352_v1  ;;  %v1303_v39 = vmul.f32 0.01, %v1189_v23  ;;  %v12358_v56 = vsel %vm1248_vm12, %v1191_v29, %v1305_v35  ;;  %8714 = vmatpush3.msra.mxu1 %v12352_v1  ;;  %v1171_v36 = vadd.f32 %v12076_v53, %v12127_v28  ;;  %vm1246_vm1 = vcmp.ge.f32.partialorder %v1189_v23, 0.0  ;;  %v15195_v35 = vld [vmem:[#allocation41_spill] sm:$0xff] }
 0x298   :  { %15186 = vst [vmem:[#allocation64_spill] sm:$0xff] %v12358_v56  ;;  %v1287_v61 = vmul.f32 0.01, %v1173_v40  ;;  %v12364_v50 = vsel %vm1232_vm13, %v1175_v52, %v1289_v46  ;;  %8715 = vmatprep.subr.mxu1 %v12358_v56  ;;  %v1154_v17 = vmul.f32 %v12072_v2, %v15188_v33  ;;  %vm1230_vm2 = vcmp.ge.f32.partialorder %v1173_v40, 0.0 }
 0x299   :  { %15187 = vst [vmem:[#allocation65_spill] sm:$0xff] %v12364_v50  ;;  %v1302_v14 = vmul.f32 0.01, %v1188_v21  ;;  %v12370_v58 = vsel %vm1247_vm14, %v1190_v25, %v1304_v62  ;;  %8716 = vmatpush3.msra.mxu1 %v12364_v50  ;;  %v1218_v28 = vadd.f32 %v12076_v53, %v12237_v42  ;;  %vm1245_vm4 = vcmp.ge.f32.partialorder %v1188_v21, 0.0 }
 0x29a   :  { %15189 = vst [vmem:[#allocation43_spill] sm:$0xff] %v12370_v58  ;;  %v1286_v55 = vmul.f32 0.01, %v1172_v6  ;;  %v12376_v29 = vsel %vm1231_vm15, %v1174_v26, %v1288_v48  ;;  %8717 = vmatprep.subr.mxu1 %v12370_v58  ;;  %v1153_v52 = vmul.f32 %v12072_v2, %v15191_v7  ;;  %vm1229_vm5 = vcmp.ge.f32.partialorder %v1172_v6, 0.0 }
 0x29b   :  { %15190 = vst [vmem:[#allocation66_spill] sm:$0xff] %v12376_v29  ;;  %v1301_v13 = vmul.f32 0.01, %v1187_v19  ;;  %v12382_v25 = vsel %vm1246_vm1, %v1189_v23, %v1303_v39  ;;  %8718 = vmatpush3.msra.mxu1 %v12376_v29  ;;  %v1217_v57 = vadd.f32 %v12076_v53, %v1154_v17  ;;  %vm1244_vm6 = vcmp.ge.f32.partialorder %v1187_v19, 0.0  ;;  %v1399_v39 = vld [vmem:[#allocation7] sm:$0xff] }
 0x29c   :  { %15192 = vst [vmem:[#allocation42_spill] sm:$0xff] %v12382_v25  ;;  %v1285_v42 = vmul.f32 0.01, %v1171_v36  ;;  %v12387_v32 = vsel %vm1230_vm2, %v1173_v40, %v1287_v61  ;;  %8719 = vmatprep.subr.mxu1 %v12382_v25  ;;  %vm1228_vm7 = vcmp.ge.f32.partialorder %v1171_v36, 0.0  ;;  %v12390_v26 = vsel %vm1245_vm4, %v1188_v21, %v1302_v14  ;;  %v15198_v21 = vld [vmem:[#allocation40_spill] sm:$0xff] }
 0x29d   :  { %15193 = vst [vmem:[#allocation67_spill] sm:$0xff] %v12387_v32  ;;  %15194 = vst [vmem:[#allocation68_spill] sm:$0xff] %v12390_v26  ;;  %8720 = vmatpush3.msra.mxu1 %v12387_v32  ;;  %v1152_v23 = vmul.f32 %v12072_v2, %v15195_v35  ;;  %v1216_v46 = vadd.f32 %v12076_v53, %v1153_v52  ;;  %v1332_v62 = vmul.f32 0.01, %v1218_v28  ;;  %vm1275_vm8 = vcmp.ge.f32.partialorder %v1218_v28, 0.0 }
 0x29e   :  { %v12396_v48 = vsel %vm1229_vm5, %v1172_v6, %v1286_v55  ;;  %8721 = vmatprep.subr.mxu1 %v12390_v26  ;;  %v12399_v40 = vsel %vm1244_vm6, %v1187_v19, %v1301_v13  ;;  %v1151_v61 = vmul.f32 %v12072_v2, %v15198_v21  ;;  %v1331_v17 = vmul.f32 0.01, %v1217_v57  ;;  %v1404_v6 = vld [vmem:[#allocation7 + $0x28] sm:$0xff]  ;;  %v15200_v55 = vld [vmem:[#allocation39_spill] sm:$0xff] }
 0x29f   :  { %15196 = vst [vmem:[#allocation41_spill] sm:$0xff] %v12396_v48  ;;  %15197 = vst [vmem:[#allocation69_spill] sm:$0xff] %v12399_v40  ;;  %8722 = vmatpush3.msra.mxu1 %v12396_v48  ;;  %v1215_v33 = vadd.f32 %v12076_v53, %v1152_v23  ;;  %v12405_v14 = vsel %vm1228_vm7, %v1171_v36, %v1285_v42  ;;  %vm1274_vm9 = vcmp.ge.f32.partialorder %v1217_v57, 0.0  ;;  %v1330_v52 = vmul.f32 0.01, %v1216_v46  ;;  %v1403_v36 = vld [vmem:[#allocation7 + $0x20] sm:$0xff] }
 0x2a0   :  { %15199 = vst [vmem:[#allocation40_spill] sm:$0xff] %v12405_v14  ;;  %8723 = vmatprep.subr.mxu1 %v12399_v40  ;;  %v1150_v19 = vmul.f32 %v12072_v2, %v15200_v55  ;;  %v1214_v7 = vadd.f32 %v12076_v53, %v1151_v61  ;;  %v12412_v13 = vsel %vm1275_vm8, %v1218_v28, %v1332_v62  ;;  %v15202_v35 = vmov 0.0   ;;  %v15203_v42 = vld [vmem:[#allocation38_spill] sm:$0xff]  ;;  %v15205_v62 = vld [vmem:[#allocation37_spill] sm:$0xff] }
 0x2a1   :  { %8724 = vmatpush3.msra.mxu1 %v12405_v14  ;;  %15201 = vst [vmem:[#allocation39_spill] sm:$0xff] %v12412_v13  ;;  %vm1273_vm10 = vcmp.ge.f32.partialorder %v1216_v46, 0.0  ;;  %v1149_v23 = vmul.f32 %v12072_v2, %v15203_v42  ;;  %v1329_v49 = vmul.f32 0.01, %v1215_v33  ;;  %v12419_v55 = vsel %vm1274_vm9, %v1217_v57, %v1331_v17  ;;  %v1408_v28 = vld [vmem:[#allocation7 + $0x48] sm:$0xff]  ;;  %v1407_v57 = vld [vmem:[#allocation7 + $0x40] sm:$0xff] }
 0x2a2   :  { %1556 = vmatmul.mubr.f32.vlgmr.msra.gmra.mxu1 %v1399_v39  ;;  %1621 = vmatprep.subr.mxu1 %v15202_v35  ;;  %v1213_v21 = vadd.f32 %v12076_v53, %v1150_v19  ;;  %15204 = vst [vmem:[#allocation38_spill] sm:$0xff] %v12419_v55  ;;  %vm1272_vm11 = vcmp.ge.f32.partialorder %v1215_v33, 0.0  ;;  %v1148_v39 = vmul.f32 %v12072_v2, %v15205_v62  ;;  %vm1271_vm12 = vcmp.ge.f32.partialorder %v1214_v7, 0.0  ;;  %v15207_v17 = vld [vmem:[#allocation36_spill] sm:$0xff] }
 0x2a3   :  { %1622 = vmatpush1.msra.mxu1 %v12412_v13  ;;  %1560 = vmatprep.mubr.f32.mxu1 %v1404_v6  ;;  %v1212_v61 = vadd.f32 %v12076_v53, %v1149_v23  ;;  %v1328_v6 = vmul.f32 0.01, %v1214_v7  ;;  %v12426_v13 = vsel %vm1273_vm10, %v1216_v46, %v1330_v52  ;;  %v1147_v19 = vmul.f32 %v12072_v2, %v15207_v17  ;;  %v1412_v46 = vld [vmem:[#allocation7 + $0x68] sm:$0xff]  ;;  %v15209_v52 = vld [vmem:[#allocation35_spill] sm:$0xff] }
 0x2a4   :  { %1623 = vmatprep.subr.mxu1 %v15202_v35  ;;  %15206 = vst [vmem:[#allocation37_spill] sm:$0xff] %v12426_v13  ;;  %v1211_v42 = vadd.f32 %v12076_v53, %v1148_v39  ;;  %v12433_v62 = vsel %vm1272_vm11, %v1215_v33, %v1329_v49  ;;  %vm1270_vm13 = vcmp.ge.f32.partialorder %v1213_v21, 0.0  ;;  %v1411_v49 = vld [vmem:[#allocation7 + $0x60] sm:$0xff]  ;;  %v15211_v33 = vld [vmem:[#allocation34_spill] sm:$0xff]  ;;  %vm1260_vm9 = vcmp.ge.f32.partialorder %v12085_v5, 0.0 }
 0x2a5   :  { %1624 = vmatpush1.msra.mxu1 %v12419_v55  ;;  %v1327_v55 = vmul.f32 0.01, %v1213_v21  ;;  %15208 = vst [vmem:[#allocation36_spill] sm:$0xff] %v12433_v62  ;;  %v1210_v23 = vadd.f32 %v12076_v53, %v1147_v19  ;;  %vm1269_vm14 = vcmp.ge.f32.partialorder %v1212_v61, 0.0  ;;  %v1145_v39 = vmul.f32 %v12072_v2, %v15211_v33 }
 0x2a6   :  { %1561 = vmatmul.mubr.f32.gmra.mxu1 %v1403_v36  ;;  %1625 = vmatprep.subr.mxu1 %v15202_v35  ;;  %v1146_v36 = vmul.f32 %v12072_v2, %v15209_v52  ;;  %vm1268_vm15 = vcmp.ge.f32.partialorder %v1211_v42, 0.0  ;;  %vm1284_vm10 = vcmp.ge.f32.partialorder %v12079_v24, 0.0  ;;  %vm1283_vm11 = vcmp.ge.f32.partialorder %v12123_v30, 0.0 }
 0x2a7   :  { %1626 = vmatpush1.msra.mxu1 %v12426_v13  ;;  %1565 = vmatprep.mubr.f32.mxu1 %v1408_v28  ;;  %v1326_v28 = vmul.f32 0.01, %v1212_v61  ;;  %v12440_v13 = vsel %vm1271_vm12, %v1214_v7, %v1328_v6  ;;  %v12447_v52 = vsel %vm1270_vm13, %v1213_v21, %v1327_v55  ;;  %v1416_v7 = vld [vmem:[#allocation7 + $0x88] sm:$0xff]  ;;  %v15213_v6 = vld [vmem:[#allocation33_spill] sm:$0xff]  ;;  %v1208_v19 = vadd.f32 %v12076_v53, %v1145_v39  ;;  %v15215_v55 = vld [vmem:[#allocation32_spill] sm:$0xff] }
 0x2a8   :  { %1627 = vmatprep.subr.mxu1 %v15202_v35  ;;  %15210 = vst [vmem:[#allocation35_spill] sm:$0xff] %v12440_v13  ;;  %v1209_v17 = vadd.f32 %v12076_v53, %v1146_v36  ;;  %15212 = vst [vmem:[#allocation34_spill] sm:$0xff] %v12447_v52  ;;  %vm1267_vm1 = vcmp.ge.f32.partialorder %v1210_v23, 0.0  ;;  %v1415_v21 = vld [vmem:[#allocation7 + $0x80] sm:$0xff]  ;;  %v1143_v36 = vmul.f32 %v12072_v2, %v15215_v55  ;;  %vm1282_vm12 = vcmp.ge.f32.partialorder %v12120_v54, 0.0 }
 0x2a9   :  { %1628 = vmatpush1.msra.mxu1 %v12433_v62  ;;  %v1325_v62 = vmul.f32 0.01, %v1211_v42  ;;  %vm1265_vm4 = vcmp.ge.f32.partialorder %v1208_v19, 0.0  ;;  %vm1281_vm13 = vcmp.ge.f32.partialorder %v12117_v16, 0.0 }
 0x2aa   :  { %1566 = vmatmul.mubr.f32.gmra.mxu1 %v1407_v57  ;;  %1629 = vmatprep.subr.mxu1 %v15202_v35  ;;  %v1144_v57 = vmul.f32 %v12072_v2, %v15213_v6  ;;  %vm1266_vm2 = vcmp.ge.f32.partialorder %v1209_v17, 0.0  ;;  %v1206_v39 = vadd.f32 %v12076_v53, %v1143_v36 }
 0x2ab   :  { %1630 = vmatpush1.msra.mxu1 %v12440_v13  ;;  %1570 = vmatprep.mubr.f32.mxu1 %v1412_v46  ;;  %v1324_v46 = vmul.f32 0.01, %v1210_v23  ;;  %v12454_v13 = vsel %vm1269_vm14, %v1212_v61, %v1326_v28  ;;  %v12461_v6 = vsel %vm1268_vm15, %v1211_v42, %v1325_v62  ;;  %v1420_v61 = vld [vmem:[#allocation7 + $0xa8] sm:$0xff]  ;;  %v15217_v28 = vld [vmem:[#allocation31_spill] sm:$0xff]  ;;  %v1419_v42 = vld [vmem:[#allocation7 + $0xa0] sm:$0xff]  ;;  %vm1280_vm14 = vcmp.ge.f32.partialorder %v12114_v59, 0.0 }
 0x2ac   :  { %1631 = vmatprep.subr.mxu1 %v15202_v35  ;;  %15214 = vst [vmem:[#allocation33_spill] sm:$0xff] %v12454_v13  ;;  %v1207_v33 = vadd.f32 %v12076_v53, %v1144_v57  ;;  %15216 = vst [vmem:[#allocation32_spill] sm:$0xff] %v12461_v6  ;;  %v15219_v62 = vld [vmem:[#allocation30_spill] sm:$0xff]  ;;  %vm1263_vm6 = vcmp.ge.f32.partialorder %v1206_v39, 0.0  ;;  %vm1279_vm15 = vcmp.ge.f32.partialorder %v12111_v9, 0.0 }
 0x2ad   :  { %1632 = vmatpush1.msra.mxu1 %v12447_v52  ;;  %v1323_v52 = vmul.f32 0.01, %v1209_v17  ;;  %v1141_v57 = vmul.f32 %v12072_v2, %v15219_v62  ;;  %v1431_v62 = vld [vmem:[#allocation7 + $0x100] sm:$0xff] }
 0x2ae   :  { %1571 = vmatmul.mubr.f32.gmra.mxu1 %v1411_v49  ;;  %1633 = vmatprep.subr.mxu1 %v15202_v35  ;;  %v1142_v49 = vmul.f32 %v12072_v2, %v15217_v28  ;;  %vm1264_vm5 = vcmp.ge.f32.partialorder %v1207_v33, 0.0  ;;  %v1423_v2 = vld [vmem:[#allocation7 + $0xc0] sm:$0xff] }
 0x2af   :  { %1634 = vmatpush1.msra.mxu1 %v12454_v13  ;;  %1575 = vmatprep.mubr.f32.mxu1 %v1416_v7  ;;  %v1322_v7 = vmul.f32 0.01, %v1208_v19  ;;  %v12468_v13 = vsel %vm1267_vm1, %v1210_v23, %v1324_v46  ;;  %v12475_v28 = vsel %vm1266_vm2, %v1209_v17, %v1323_v52  ;;  %v1424_v23 = vld [vmem:[#allocation7 + $0xc8] sm:$0xff]  ;;  %v1204_v46 = vadd.f32 %v12076_v53, %v1141_v57 }
 0x2b0   :  { %1635 = vmatprep.subr.mxu1 %v15202_v35  ;;  %15218 = vst [vmem:[#allocation31_spill] sm:$0xff] %v12468_v13  ;;  %v1205_v55 = vadd.f32 %v12076_v53, %v1142_v49  ;;  %15220 = vst [vmem:[#allocation30_spill] sm:$0xff] %v12475_v28  ;;  %v1427_v49 = vld [vmem:[#allocation7 + $0xe0] sm:$0xff]  ;;  %v1340_v57 = vmul.f32 0.01, %v12123_v30  ;;  %vm1278_vm1 = vcmp.ge.f32.partialorder %v12108_v18, 0.0 }
 0x2b1   :  { %1636 = vmatpush1.msra.mxu1 %v12461_v6  ;;  %v1321_v6 = vmul.f32 0.01, %v1207_v33  ;;  %v12480_v36 = vsel %vm1265_vm4, %v1208_v19, %v1322_v7  ;;  %v1318_v53 = vmul.f32 0.01, %v1204_v46  ;;  %vm1261_vm8 = vcmp.ge.f32.partialorder %v1204_v46, 0.0  ;;  %v1432_v7 = vld [vmem:[#allocation7 + $0x108] sm:$0xff] }
 0x2b2   :  { %1576 = vmatmul.mubr.f32.gmra.mxu1 %v1415_v21  ;;  %1637 = vmatprep.subr.mxu1 %v15202_v35  ;;  %v1320_v21 = vmul.f32 0.01, %v1206_v39  ;;  %15221 = vst [vmem:[#allocation70_spill] sm:$0xff] %v12480_v36  ;;  %v1319_v17 = vmul.f32 0.01, %v1205_v55  ;;  %vm1262_vm7 = vcmp.ge.f32.partialorder %v1205_v55, 0.0 }
 0x2b3   :  { %1638 = vmatpush1.msra.mxu1 %v12468_v13  ;;  %1580 = vmatprep.mubr.f32.mxu1 %v1420_v61  ;;  %v12484_v52 = vsel %vm1264_vm5, %v1207_v33, %v1321_v6  ;;  %v1428_v61 = vld [vmem:[#allocation7 + $0xe8] sm:$0xff]  ;;  %v1317_v33 = vmul.f32 0.01, %v12085_v5  ;;  %vm1277_vm2 = vcmp.ge.f32.partialorder %v12105_v63, 0.0  ;;  %vm1276_vm4 = vcmp.ge.f32.partialorder %v12102_v22, 0.0 }
 0x2b4   :  { %1639 = vmatprep.subr.mxu1 %v15202_v35  ;;  %15222 = vst [vmem:[#allocation71_spill] sm:$0xff] %v12484_v52  ;;  %v12488_v19 = vsel %vm1263_vm6, %v1206_v39, %v1320_v21  ;;  %v12493_v6 = vsel %vm1262_vm7, %v1205_v55, %v1319_v17  ;;  %v1341_v39 = vmul.f32 0.01, %v12079_v24  ;;  %v1339_v21 = vmul.f32 0.01, %v12120_v54 }
 0x2b5   :  { %1640 = vmatpush1.msra.mxu1 %v12475_v28  ;;  %15223 = vst [vmem:[#allocation72_spill] sm:$0xff] %v12488_v19  ;;  %15224 = vst [vmem:[#allocation73_spill] sm:$0xff] %v12493_v6  ;;  %v12506_v55 = vsel %vm1260_vm9, %v12085_v5, %v1317_v33  ;;  %v1435_v5 = vld [vmem:[#allocation7 + $0x120] sm:$0xff]  ;;  %v12520_v17 = vsel %vm1283_vm11, %v12123_v30, %v1340_v57  ;;  %vm1451_vm5 = vcmask 588800  }
 0x2b6   :  { %1581 = vmatmul.mubr.f32.gmra.mxu1 %v1419_v42  ;;  %1641 = vmatprep.subr.mxu1 %v15202_v35  ;;  %v12499_v42 = vsel %vm1261_vm8, %v1204_v46, %v1318_v53  ;;  %15226 = vst [vmem:[#allocation75_spill] sm:$0xff] %v12506_v55  ;;  %v12512_v46 = vsel %vm1284_vm10, %v12079_v24, %v1341_v39  ;;  %15228 = vst [vmem:[#allocation77_spill] sm:$0xff] %v12520_v17  ;;  %v1440_v24 = vld [vmem:[#allocation7 + $0x148] sm:$0xff]  ;;  %v1439_v30 = vld [vmem:[#allocation7 + $0x140] sm:$0xff] }
 0x2b7   :  { %1642 = vmatpush1.msra.mxu1 %v12480_v36  ;;  %1585 = vmatprep.mubr.f32.mxu1 %v1424_v23  ;;  %15225 = vst [vmem:[#allocation74_spill] sm:$0xff] %v12499_v42  ;;  %v1436_v23 = vld [vmem:[#allocation7 + $0x128] sm:$0xff]  ;;  %15227 = vst [vmem:[#allocation76_spill] sm:$0xff] %v12512_v46  ;;  %v12527_v53 = vsel %vm1282_vm12, %v12120_v54, %v1339_v21  ;;  %v1335_v54 = vmul.f32 0.01, %v12108_v18 }
 0x2b8   :  { %1643 = vmatprep.subr.mxu1 %v15202_v35  ;;  %15229 = vst [vmem:[#allocation78_spill] sm:$0xff] %v12527_v53 }
 0x2b9   :  { %1644 = vmatpush1.msra.mxu1 %v12484_v52  ;;  %v12555_v21 = vsel %vm1278_vm1, %v12108_v18, %v1335_v54  ;;  %v1418_v54 = vld [vmem:[#allocation7 + $0x98] sm:$0xff] }
 0x2ba   :  { %1586 = vmatmul.mubr.f32.gmra.mxu1 %v1423_v2  ;;  %1645 = vmatprep.subr.mxu1 %v15202_v35  ;;  %v1338_v2 = vmul.f32 0.01, %v12117_v16  ;;  %15233 = vst [vmem:[#allocation82_spill] sm:$0xff] %v12555_v21 }
 0x2bb   :  { %1646 = vmatpush1.msra.mxu1 %v12488_v19  ;;  %1590 = vmatprep.mubr.f32.mxu1 %v1428_v61  ;;  %v1337_v61 = vmul.f32 0.01, %v12114_v59 }
 0x2bc   :  { %1647 = vmatprep.subr.mxu1 %v15202_v35  ;;  %v12534_v33 = vsel %vm1281_vm13, %v12117_v16, %v1338_v2  ;;  %v1443_v16 = vld [vmem:[#allocation7 + $0x160] sm:$0xff]  ;;  %v1402_v2 = vld [vmem:[#allocation7 + $0x18] sm:$0xff] }
 0x2bd   :  { %1648 = vmatpush1.msra.mxu1 %v12493_v6  ;;  %15230 = vst [vmem:[#allocation79_spill] sm:$0xff] %v12534_v33  ;;  %v12541_v39 = vsel %vm1280_vm14, %v12114_v59, %v1337_v61  ;;  %v1333_v59 = vmul.f32 0.01, %v12102_v22  ;;  %v1405_v61 = vld [vmem:[#allocation7 + $0x30] sm:$0xff] }
 0x2be   :  { %1591 = vmatmul.mubr.f32.gmra.mxu1 %v1427_v49  ;;  %1649 = vmatprep.subr.mxu1 %v15202_v35  ;;  %v1336_v49 = vmul.f32 0.01, %v12111_v9  ;;  %15231 = vst [vmem:[#allocation80_spill] sm:$0xff] %v12541_v39 }
 0x2bf   :  { %1650 = vmatpush1.msra.mxu1 %v12499_v42  ;;  %1595 = vmatprep.mubr.f32.mxu1 %v1432_v7  ;;  %v1444_v7 = vld [vmem:[#allocation7 + $0x168] sm:$0xff]  ;;  %v12566_v18 = vsel %vm1276_vm4, %v12102_v22, %v1333_v59  ;;  %v1410_v22 = vld [vmem:[#allocation7 + $0x58] sm:$0xff] }
 0x2c0   :  { %1651 = vmatprep.subr.mxu1 %v15202_v35  ;;  %v12548_v57 = vsel %vm1279_vm15, %v12111_v9, %v1336_v49  ;;  %v1447_v9 = vld [vmem:[#allocation7 + $0x180] sm:$0xff]  ;;  %15235 = vst [vmem:[#allocation84_spill] sm:$0xff] %v12566_v18  ;;  %v1414_v49 = vld [vmem:[#allocation7 + $0x78] sm:$0xff] }
 0x2c1   :  { %1652 = vmatpush1.msra.mxu1 %v12506_v55  ;;  %15232 = vst [vmem:[#allocation81_spill] sm:$0xff] %v12548_v57  ;;  %v1426_v59 = vld [vmem:[#allocation7 + $0xd8] sm:$0xff] }
 0x2c2   :  { %1596 = vmatmul.mubr.f32.gmra.mxu1 %v1431_v62  ;;  %1667 = vmatprep.subr.mxu1 %v15202_v35  ;;  %v1334_v62 = vmul.f32 0.01, %v12105_v63 }
 0x2c3   :  { %1668 = vmatpush2.msra.mxu1 %v12512_v46  ;;  %1600 = vmatprep.mubr.f32.mxu1 %v1436_v23  ;;  %v1448_v23 = vld [vmem:[#allocation7 + $0x188] sm:$0xff] }
 0x2c4   :  { %1669 = vmatprep.subr.mxu1 %v15202_v35 }
 0x2c5   :  { %1670 = vmatpush2.msra.mxu1 %v12520_v17 }
 0x2c6   :  { %1601 = vmatmul.mubr.f32.gmra.mxu1 %v1435_v5  ;;  %1671 = vmatprep.subr.mxu1 %v15202_v35  ;;  %v12561_v5 = vsel %vm1277_vm2, %v12105_v63, %v1334_v62  ;;  %v1406_v63 = vld [vmem:[#allocation7 + $0x38] sm:$0xff] }
 0x2c7   :  { %1672 = vmatpush2.msra.mxu1 %v12527_v53  ;;  %1605 = vmatprep.mubr.f32.mxu1 %v1440_v24  ;;  %15234 = vst [vmem:[#allocation83_spill] sm:$0xff] %v12561_v5  ;;  %v1401_v24 = vld [vmem:[#allocation7 + $0x10] sm:$0xff]  ;;  %v1422_v62 = vld [vmem:[#allocation7 + $0xb8] sm:$0xff] }
 0x2c8   :  { %1673 = vmatprep.subr.mxu1 %v15202_v35 }
 0x2c9   :  { %1674 = vmatpush2.msra.mxu1 %v12534_v33 }
 0x2ca   :  { %1606 = vmatmul.mubr.f32.gmra.mxu1 %v1439_v30  ;;  %1675 = vmatprep.subr.mxu1 %v15202_v35  ;;  %v1409_v30 = vld [vmem:[#allocation7 + $0x50] sm:$0xff] }
 0x2cb   :  { %1676 = vmatpush2.msra.mxu1 %v12541_v39  ;;  %1610 = vmatprep.mubr.f32.mxu1 %v1444_v7  ;;  %v1413_v7 = vld [vmem:[#allocation7 + $0x70] sm:$0xff] }
 0x2cc   :  { %1677 = vmatprep.subr.mxu1 %v15202_v35 }
 0x2cd   :  { %1678 = vmatpush2.msra.mxu1 %v12548_v57 }
 0x2ce   :  { %1611 = vmatmul.mubr.f32.gmra.mxu1 %v1443_v16  ;;  %1679 = vmatprep.subr.mxu1 %v15202_v35  ;;  %v1417_v16 = vld [vmem:[#allocation7 + $0x90] sm:$0xff] }
 0x2cf   :  { %1680 = vmatpush2.msra.mxu1 %v12555_v21  ;;  %1615 = vmatprep.mubr.f32.mxu1 %v1448_v23  ;;  %v1421_v23 = vld [vmem:[#allocation7 + $0xb0] sm:$0xff] }
 0x2d0   :  { %1681 = vmatprep.subr.mxu1 %v15202_v35 }
 0x2d1   :  { %1682 = vmatpush2.msra.mxu1 %v12561_v5 }
 0x2d2   :  { %1616 = vmatmul.mubr.f32.gmra.mxu1 %v1447_v9  ;;  %1683 = vmatprep.subr.mxu1 %v15202_v35  ;;  %v1425_v9 = vld [vmem:[#allocation7 + $0xd0] sm:$0xff] }
 0x2d3   :  { %1684 = vmatpush2.msra.mxu1 %v12566_v18  ;;  %8344 = vmatprep.mubr.msk.f32.mxu1 %vm1451_vm5, %v1402_v2  ;;  %v1430_v2 = vld [vmem:[#allocation7 + $0xf8] sm:$0xff] }
 0x2d4   :  { %8764 = vmatprep.subr.mxu1 %v12229_v43 }
 0x2d6   :  { %1686 = vmatmul.mubr.f32.vlgmr.msra.gmra.mxu1 %v1401_v24  ;;  %v1429_v24 = vld [vmem:[#allocation7 + $0xf0] sm:$0xff] }
 0x2d7   :  { %8765 = vmatpush3.msra.mxu1 %v12227_v12  ;;  %8345 = vmatprep.mubr.msk.f32.mxu1 %vm1451_vm5, %v1406_v63  ;;  %v1434_v63 = vld [vmem:[#allocation7 + $0x118] sm:$0xff] }
 0x2d8   :  { %8766 = vmatprep.subr.mxu1 %v12243_v10 }
 0x2d9   :  { %8767 = vmatpush3.msra.mxu1 %v12248_v15 }
 0x2da   :  { %8768 = vmatprep.subr.mxu1 %v12253_v0  ;;  %1691 = vmatmul.mubr.f32.gmra.mxu1 %v1405_v61  ;;  %v1433_v61 = vld [vmem:[#allocation7 + $0x110] sm:$0xff] }
 0x2db   :  { %8769 = vmatpush3.msra.mxu1 %v12258_v34  ;;  %8346 = vmatprep.mubr.msk.f32.mxu1 %vm1451_vm5, %v1410_v22  ;;  %v1438_v22 = vld [vmem:[#allocation7 + $0x138] sm:$0xff] }
 0x2dc   :  { %8770 = vmatprep.subr.mxu1 %v12263_v41 }
 0x2dd   :  { %8771 = vmatpush3.msra.mxu1 %v12269_v20 }
 0x2de   :  { %8772 = vmatprep.subr.mxu1 %v12274_v3  ;;  %1696 = vmatmul.mubr.f32.gmra.mxu1 %v1409_v30  ;;  %v1437_v30 = vld [vmem:[#allocation7 + $0x130] sm:$0xff] }
 0x2df   :  { %8773 = vmatpush3.msra.mxu1 %v12280_v60  ;;  %8347 = vmatprep.mubr.msk.f32.mxu1 %vm1451_vm5, %v1414_v49  ;;  %v1442_v49 = vld [vmem:[#allocation7 + $0x158] sm:$0xff] }
 0x2e0   :  { %8774 = vmatprep.subr.mxu1 %v12286_v45 }
 0x2e1   :  { %8775 = vmatpush3.msra.mxu1 %v12292_v47 }
 0x2e2   :  { %8776 = vmatprep.subr.mxu1 %v12298_v51  ;;  %1701 = vmatmul.mubr.f32.gmra.mxu1 %v1413_v7  ;;  %v1441_v7 = vld [vmem:[#allocation7 + $0x150] sm:$0xff] }
 0x2e3   :  { %8777 = vmatpush3.msra.mxu1 %v12304_v44  ;;  %8348 = vmatprep.mubr.msk.f32.mxu1 %vm1451_vm5, %v1418_v54  ;;  %v1446_v54 = vld [vmem:[#allocation7 + $0x178] sm:$0xff] }
 0x2e4   :  { %8778 = vmatprep.subr.mxu1 %v12310_v11 }
 0x2e5   :  { %8779 = vmatpush3.msra.mxu1 %v12316_v38 }
 0x2e6   :  { %8780 = vmatprep.subr.mxu1 %v12322_v31  ;;  %1706 = vmatmul.mubr.f32.gmra.mxu1 %v1417_v16  ;;  %v1445_v16 = vld [vmem:[#allocation7 + $0x170] sm:$0xff] }
 0x2e7   :  { %8781 = vmatpush3.msra.mxu1 %v12328_v27  ;;  %8349 = vmatprep.mubr.msk.f32.mxu1 %vm1451_vm5, %v1422_v62  ;;  %v1450_v62 = vld [vmem:[#allocation7 + $0x198] sm:$0xff] }
 0x2e8   :  { %8782 = vmatprep.subr.mxu1 %v12334_v37 }
 0x2e9   :  { %8783 = vmatpush3.msra.mxu1 %v12340_v4 }
 0x2ea   :  { %8784 = vmatprep.subr.mxu1 %v12346_v8  ;;  %1711 = vmatmul.mubr.f32.gmra.mxu1 %v1421_v23  ;;  %v1449_v23 = vld [vmem:[#allocation7 + $0x190] sm:$0xff] }
 0x2eb   :  { %8785 = vmatpush3.msra.mxu1 %v12352_v1  ;;  %8350 = vmatprep.mubr.msk.f32.mxu1 %vm1451_vm5, %v1426_v59  ;;  %v1757_v59 = vld [vmem:[#allocation7 + $0x1a8] sm:$0xff] }
 0x2ec   :  { %8786 = vmatprep.subr.mxu1 %v12358_v56 }
 0x2ed   :  { %8787 = vmatpush3.msra.mxu1 %v12364_v50 }
 0x2ee   :  { %8788 = vmatprep.subr.mxu1 %v12370_v58  ;;  %1716 = vmatmul.mubr.f32.gmra.mxu1 %v1425_v9  ;;  %v1756_v9 = vld [vmem:[#allocation7 + $0x1a0] sm:$0xff] }
 0x2ef   :  { %8789 = vmatpush3.msra.mxu1 %v12376_v29  ;;  %8351 = vmatprep.mubr.msk.f32.mxu1 %vm1451_vm5, %v1430_v2  ;;  %v1761_v2 = vld [vmem:[#allocation7 + $0x1c8] sm:$0xff] }
 0x2f0   :  { %8790 = vmatprep.subr.mxu1 %v12382_v25  ;;  %v1807_v25 = vld [vmem:[#allocation7 + $0x338] sm:$0xff] }
 0x2f1   :  { %8791 = vmatpush3.msra.mxu1 %v12387_v32  ;;  %v1803_v32 = vld [vmem:[#allocation7 + $0x318] sm:$0xff] }
 0x2f2   :  { %8792 = vmatprep.subr.mxu1 %v12390_v26  ;;  %1721 = vmatmul.mubr.f32.gmra.mxu1 %v1429_v24  ;;  %v15236_v24 = vld [vmem:[#allocation39_spill] sm:$0xff]  ;;  %v1771_v26 = vld [vmem:[#allocation7 + $0x218] sm:$0xff] }
 0x2f3   :  { %8793 = vmatpush3.msra.mxu1 %v12396_v48  ;;  %8352 = vmatprep.mubr.msk.f32.mxu1 %vm1451_vm5, %v1434_v63  ;;  %v1760_v63 = vld [vmem:[#allocation7 + $0x1c0] sm:$0xff]  ;;  %v1752_v48 = vld [vmem:[#allocation9 + $0x8] sm:$0xff] }
 0x2f4   :  { %8794 = vmatprep.subr.mxu1 %v12399_v40  ;;  %v1767_v40 = vld [vmem:[#allocation7 + $0x1f8] sm:$0xff] }
 0x2f5   :  { %8795 = vmatpush3.msra.mxu1 %v12405_v14  ;;  %v1762_v14 = vld [vmem:[#allocation7 + $0x1d0] sm:$0xff] }
 0x2f6   :  { %1726 = vmatmul.mubr.f32.gmra.mxu1 %v1433_v61  ;;  %1977 = vmatprep.subr.mxu1 %v15202_v35  ;;  %v1765_v61 = vld [vmem:[#allocation7 + $0x1e8] sm:$0xff] }
 0x2f7   :  { %8353 = vmatprep.mubr.msk.f32.mxu1 %vm1451_vm5, %v1438_v22  ;;  %v15237_v22 = vld [vmem:[#allocation38_spill] sm:$0xff] }
 0x2fa   :  { %1731 = vmatmul.mubr.f32.gmra.mxu1 %v1437_v30  ;;  %v15238_v30 = vld [vmem:[#allocation37_spill] sm:$0xff] }
 0x2fb   :  { %8354 = vmatprep.mubr.msk.f32.mxu1 %vm1451_vm5, %v1442_v49  ;;  %v1764_v49 = vld [vmem:[#allocation7 + $0x1e0] sm:$0xff] }
 0x2fe   :  { %1736 = vmatmul.mubr.f32.gmra.mxu1 %v1441_v7  ;;  %v1769_v7 = vld [vmem:[#allocation7 + $0x208] sm:$0xff] }
 0x2ff   :  { %8355 = vmatprep.mubr.msk.f32.mxu1 %vm1451_vm5, %v1446_v54  ;;  %v15239_v54 = vld [vmem:[#allocation36_spill] sm:$0xff] }
 0x302   :  { %1741 = vmatmul.mubr.f32.gmra.mxu1 %v1445_v16  ;;  %v15240_v16 = vld [vmem:[#allocation35_spill] sm:$0xff] }
 0x303   :  { %8356 = vmatprep.mubr.msk.f32.mxu1 %vm1451_vm5, %v1450_v62  ;;  %v1768_v62 = vld [vmem:[#allocation7 + $0x200] sm:$0xff] }
 0x306   :  { %1746 = vmatmul.mubr.f32.gmra.mxu1 %v1449_v23  ;;  %v1773_v23 = vld [vmem:[#allocation7 + $0x228] sm:$0xff] }
 0x307   :  { %1911 = vmatprep.mubr.f32.mxu1 %v1757_v59  ;;  %v15241_v59 = vld [vmem:[#allocation34_spill] sm:$0xff] }
 0x30a   :  { %1912 = vmatmul.mubr.f32.vlgmr.msra.gmra.mxu1 %v1756_v9  ;;  %v15242_v9 = vld [vmem:[#allocation33_spill] sm:$0xff] }
 0x30b   :  { %1978 = vmatpush1.msra.mxu1 %v15236_v24  ;;  %1916 = vmatprep.mubr.f32.mxu1 %v1761_v2  ;;  %v1772_v2 = vld [vmem:[#allocation7 + $0x220] sm:$0xff] }
 0x30c   :  { %1979 = vmatprep.subr.mxu1 %v15202_v35 }
 0x30d   :  { %1980 = vmatpush1.msra.mxu1 %v15237_v22 }
 0x30e   :  { %1981 = vmatprep.subr.mxu1 %v15202_v35  ;;  %1917 = vmatmul.mubr.f32.gmra.mxu1 %v1760_v63  ;;  %v1777_v63 = vld [vmem:[#allocation7 + $0x248] sm:$0xff] }
 0x30f   :  { %1982 = vmatpush1.msra.mxu1 %v15238_v30  ;;  %1921 = vmatprep.mubr.f32.mxu1 %v1765_v61  ;;  %v15243_v61 = vld [vmem:[#allocation32_spill] sm:$0xff] }
 0x310   :  { %1983 = vmatprep.subr.mxu1 %v15202_v35 }
 0x311   :  { %1984 = vmatpush1.msra.mxu1 %v15239_v54 }
 0x312   :  { %1985 = vmatprep.subr.mxu1 %v15202_v35  ;;  %1922 = vmatmul.mubr.f32.gmra.mxu1 %v1764_v49  ;;  %v1776_v49 = vld [vmem:[#allocation7 + $0x240] sm:$0xff] }
 0x313   :  { %1986 = vmatpush1.msra.mxu1 %v15240_v16  ;;  %1926 = vmatprep.mubr.f32.mxu1 %v1769_v7  ;;  %v1781_v7 = vld [vmem:[#allocation7 + $0x268] sm:$0xff] }
 0x314   :  { %1987 = vmatprep.subr.mxu1 %v15202_v35 }
 0x315   :  { %1988 = vmatpush1.msra.mxu1 %v15241_v59 }
 0x316   :  { %1989 = vmatprep.subr.mxu1 %v15202_v35  ;;  %1927 = vmatmul.mubr.f32.gmra.mxu1 %v1768_v62  ;;  %v1780_v62 = vld [vmem:[#allocation7 + $0x260] sm:$0xff] }
 0x317   :  { %1990 = vmatpush1.msra.mxu1 %v15242_v9  ;;  %1931 = vmatprep.mubr.f32.mxu1 %v1773_v23  ;;  %v1785_v23 = vld [vmem:[#allocation7 + $0x288] sm:$0xff] }
 0x318   :  { %1991 = vmatprep.subr.mxu1 %v15202_v35 }
 0x319   :  { %1992 = vmatpush1.msra.mxu1 %v15243_v61 }
 0x31a   :  { %1993 = vmatprep.subr.mxu1 %v15202_v35  ;;  %1932 = vmatmul.mubr.f32.gmra.mxu1 %v1772_v2  ;;  %v1784_v2 = vld [vmem:[#allocation7 + $0x280] sm:$0xff] }
 0x31b   :  { %1994 = vmatpush1.msra.mxu1 %v12468_v13  ;;  %1936 = vmatprep.mubr.f32.mxu1 %v1777_v63  ;;  %v1789_v63 = vld [vmem:[#allocation7 + $0x2a8] sm:$0xff] }
 0x31c   :  { %1995 = vmatprep.subr.mxu1 %v15202_v35 }
 0x31d   :  { %1996 = vmatpush1.msra.mxu1 %v12475_v28 }
 0x31e   :  { %1997 = vmatprep.subr.mxu1 %v15202_v35  ;;  %1937 = vmatmul.mubr.f32.gmra.mxu1 %v1776_v49  ;;  %v1788_v49 = vld [vmem:[#allocation7 + $0x2a0] sm:$0xff] }
 0x31f   :  { %1998 = vmatpush1.msra.mxu1 %v12480_v36  ;;  %1941 = vmatprep.mubr.f32.mxu1 %v1781_v7  ;;  %v1793_v7 = vld [vmem:[#allocation7 + $0x2c8] sm:$0xff] }
 0x320   :  { %1999 = vmatprep.subr.mxu1 %v15202_v35 }
 0x321   :  { %2000 = vmatpush1.msra.mxu1 %v12484_v52 }
 0x322   :  { %2001 = vmatprep.subr.mxu1 %v15202_v35  ;;  %1942 = vmatmul.mubr.f32.gmra.mxu1 %v1780_v62  ;;  %v1792_v62 = vld [vmem:[#allocation7 + $0x2c0] sm:$0xff] }
 0x323   :  { %2002 = vmatpush1.msra.mxu1 %v12488_v19  ;;  %1946 = vmatprep.mubr.f32.mxu1 %v1785_v23  ;;  %v1797_v23 = vld [vmem:[#allocation7 + $0x2e8] sm:$0xff] }
 0x324   :  { %2003 = vmatprep.subr.mxu1 %v15202_v35 }
 0x325   :  { %2004 = vmatpush1.msra.mxu1 %v12493_v6 }
 0x326   :  { %2005 = vmatprep.subr.mxu1 %v15202_v35  ;;  %1947 = vmatmul.mubr.f32.gmra.mxu1 %v1784_v2  ;;  %v1796_v2 = vld [vmem:[#allocation7 + $0x2e0] sm:$0xff] }
 0x327   :  { %2006 = vmatpush1.msra.mxu1 %v12499_v42  ;;  %1951 = vmatprep.mubr.f32.mxu1 %v1789_v63  ;;  %v1801_v63 = vld [vmem:[#allocation7 + $0x308] sm:$0xff] }
 0x328   :  { %2007 = vmatprep.subr.mxu1 %v15202_v35 }
 0x329   :  { %2008 = vmatpush1.msra.mxu1 %v12506_v55 }
 0x32a   :  { %2023 = vmatprep.subr.mxu1 %v15202_v35  ;;  %1952 = vmatmul.mubr.f32.gmra.mxu1 %v1788_v49  ;;  %v1800_v49 = vld [vmem:[#allocation7 + $0x300] sm:$0xff] }
 0x32b   :  { %2024 = vmatpush2.msra.mxu1 %v12512_v46  ;;  %1956 = vmatprep.mubr.f32.mxu1 %v1793_v7  ;;  %v1805_v7 = vld [vmem:[#allocation7 + $0x328] sm:$0xff] }
 0x32c   :  { %2025 = vmatprep.subr.mxu1 %v15202_v35 }
 0x32d   :  { %2026 = vmatpush2.msra.mxu1 %v12520_v17 }
 0x32e   :  { %2027 = vmatprep.subr.mxu1 %v15202_v35  ;;  %1957 = vmatmul.mubr.f32.gmra.mxu1 %v1792_v62  ;;  %v1804_v62 = vld [vmem:[#allocation7 + $0x320] sm:$0xff] }
 0x32f   :  { %2028 = vmatpush2.msra.mxu1 %v12527_v53  ;;  %1961 = vmatprep.mubr.f32.mxu1 %v1797_v23  ;;  %v1759_v23 = vld [vmem:[#allocation7 + $0x1b8] sm:$0xff] }
 0x330   :  { %2029 = vmatprep.subr.mxu1 %v15202_v35 }
 0x331   :  { %2030 = vmatpush2.msra.mxu1 %v12534_v33 }
 0x332   :  { %2031 = vmatprep.subr.mxu1 %v15202_v35  ;;  %1962 = vmatmul.mubr.f32.gmra.mxu1 %v1796_v2  ;;  %v1758_v2 = vld [vmem:[#allocation7 + $0x1b0] sm:$0xff] }
 0x333   :  { %2032 = vmatpush2.msra.mxu1 %v12541_v39  ;;  %1966 = vmatprep.mubr.f32.mxu1 %v1801_v63  ;;  %v1763_v63 = vld [vmem:[#allocation7 + $0x1d8] sm:$0xff] }
 0x334   :  { %2033 = vmatprep.subr.mxu1 %v15202_v35 }
 0x335   :  { %2034 = vmatpush2.msra.mxu1 %v12548_v57 }
 0x336   :  { %2035 = vmatprep.subr.mxu1 %v15202_v35  ;;  %1967 = vmatmul.mubr.f32.gmra.mxu1 %v1800_v49  ;;  %v1754_v49 = vld [vmem:[#allocation9 + $0x18] sm:$0xff] }
 0x337   :  { %2036 = vmatpush2.msra.mxu1 %v12555_v21  ;;  %1971 = vmatprep.mubr.f32.mxu1 %v1805_v7  ;;  %v1753_v7 = vld [vmem:[#allocation9 + $0x10] sm:$0xff] }
 0x338   :  { %2037 = vmatprep.subr.mxu1 %v15202_v35 }
 0x339   :  { %2038 = vmatpush2.msra.mxu1 %v12561_v5 }
 0x33a   :  { %2039 = vmatprep.subr.mxu1 %v15202_v35  ;;  %1972 = vmatmul.mubr.f32.gmra.mxu1 %v1804_v62  ;;  %v1751_v62 = vld [vmem:[#allocation9] sm:$0xff] }
 0x33b   :  { %2040 = vmatpush2.msra.mxu1 %v12566_v18  ;;  %8357 = vmatprep.mubr.msk.f32.mxu1 %vm1451_vm5, %v1759_v23  ;;  %v1766_v23 = vld [vmem:[#allocation7 + $0x1f0] sm:$0xff] }
 0x33c   :  { %9954 = vmatprep.subr.mxu1 %v15202_v35 }
 0x33e   :  { %2042 = vmatmul.mubr.f32.vlgmr.msra.gmra.mxu1 %v1758_v2  ;;  %v1770_v2 = vld [vmem:[#allocation7 + $0x210] sm:$0xff] }
 0x33f   :  { %8358 = vmatprep.mubr.msk.f32.mxu1 %vm1451_vm5, %v1763_v63  ;;  %9955 = vmatpush3.msra.mxu1 %v1754_v49  ;;  %v1775_v63 = vld [vmem:[#allocation7 + $0x238] sm:$0xff] }
 0x340   :  { %9956 = vmatprep.subr.mxu1 %v15202_v35  ;;  %v1779_v49 = vld [vmem:[#allocation7 + $0x258] sm:$0xff] }
 0x341   :  { %9957 = vmatpush3.msra.mxu1 %v1753_v7  ;;  %v1782_v7 = vld [vmem:[#allocation7 + $0x270] sm:$0xff] }
 0x342   :  { %2047 = vmatmul.mubr.f32.gmra.mxu1 %v1762_v14  ;;  %9958 = vmatprep.subr.mxu1 %v15202_v35  ;;  %v1774_v14 = vld [vmem:[#allocation7 + $0x230] sm:$0xff] }
 0x343   :  { %8359 = vmatprep.mubr.msk.f32.mxu1 %vm1451_vm5, %v1767_v40  ;;  %9959 = vmatpush3.msra.mxu1 %v1752_v48  ;;  %v1778_v48 = vld [vmem:[#allocation7 + $0x250] sm:$0xff]  ;;  %v1783_v40 = vld [vmem:[#allocation7 + $0x278] sm:$0xff] }
 0x344   :  { %9960 = vmatprep.subr.mxu1 %v15202_v35 }
 0x345   :  { %9961 = vmatpush3.msra.mxu1 %v1751_v62  ;;  %v1787_v62 = vld [vmem:[#allocation7 + $0x298] sm:$0xff] }
 0x346   :  { %2052 = vmatmul.mubr.f32.gmra.mxu1 %v1766_v23  ;;  %2672 = vmatprep.subr.mxu1 %v15202_v35  ;;  %v1791_v23 = vld [vmem:[#allocation7 + $0x2b8] sm:$0xff] }
 0x347   :  { %8360 = vmatprep.mubr.msk.f32.mxu1 %vm1451_vm5, %v1771_v26  ;;  %v1786_v26 = vld [vmem:[#allocation7 + $0x290] sm:$0xff] }
 0x34a   :  { %2057 = vmatmul.mubr.f32.gmra.mxu1 %v1770_v2  ;;  %v1790_v2 = vld [vmem:[#allocation7 + $0x2b0] sm:$0xff] }
 0x34b   :  { %8361 = vmatprep.mubr.msk.f32.mxu1 %vm1451_vm5, %v1775_v63  ;;  %v1795_v63 = vld [vmem:[#allocation7 + $0x2d8] sm:$0xff] }
 0x34e   :  { %2062 = vmatmul.mubr.f32.gmra.mxu1 %v1774_v14  ;;  %v1794_v14 = vld [vmem:[#allocation7 + $0x2d0] sm:$0xff] }
 0x34f   :  { %8362 = vmatprep.mubr.msk.f32.mxu1 %vm1451_vm5, %v1779_v49  ;;  %v1799_v49 = vld [vmem:[#allocation7 + $0x2f8] sm:$0xff] }
 0x352   :  { %2067 = vmatmul.mubr.f32.gmra.mxu1 %v1778_v48 }
 0x353   :  { %8363 = vmatprep.mubr.msk.f32.mxu1 %vm1451_vm5, %v1783_v40  ;;  %v1798_v40 = vld [vmem:[#allocation7 + $0x2f0] sm:$0xff] }
 0x356   :  { %2072 = vmatmul.mubr.f32.gmra.mxu1 %v1782_v7 }
 0x357   :  { %8364 = vmatprep.mubr.msk.f32.mxu1 %vm1451_vm5, %v1787_v62 }
 0x35a   :  { %2077 = vmatmul.mubr.f32.gmra.mxu1 %v1786_v26  ;;  %v1802_v26 = vld [vmem:[#allocation7 + $0x310] sm:$0xff] }
 0x35b   :  { %8365 = vmatprep.mubr.msk.f32.mxu1 %vm1451_vm5, %v1791_v23 }
 0x35e   :  { %2082 = vmatmul.mubr.f32.gmra.mxu1 %v1790_v2  ;;  %v1806_v2 = vld [vmem:[#allocation7 + $0x330] sm:$0xff] }
 0x35f   :  { %8366 = vmatprep.mubr.msk.f32.mxu1 %vm1451_vm5, %v1795_v63 }
 0x362   :  { %v8725_v48 = vpop.f32.mrf.mxu1  ;;  %2087 = vmatmul.mubr.f32.gmra.mxu1 %v1794_v14 }
 0x363   :  { %8367 = vmatprep.mubr.msk.f32.mxu1 %vm1451_vm5, %v1799_v49 }
 0x364   :  { %v8726_v7 = vpop.f32.mrf.mxu1 }
 0x365   :  { %v8727_v47 = vadd.f32 %v8726_v7, %v8725_v48 }
 0x366   :  { %v8728_v62 = vpop.f32.mrf.mxu1  ;;  %2092 = vmatmul.mubr.f32.gmra.mxu1 %v1798_v40 }
 0x367   :  { %8368 = vmatprep.mubr.msk.f32.mxu1 %vm1451_vm5, %v1803_v32 }
 0x368   :  { %v8729_v23 = vpop.f32.mrf.mxu1 }
 0x369   :  { %v8730_v20 = vadd.f32 %v8729_v23, %v8728_v62 }
 0x36a   :  { %v8731_v29 = vpop.f32.mrf.mxu1  ;;  %2097 = vmatmul.mubr.f32.gmra.mxu1 %v1802_v26 }
 0x36b   :  { %8369 = vmatprep.mubr.msk.f32.mxu1 %vm1451_vm5, %v1807_v25 }
 0x36c   :  { %v8732_v63 = vpop.f32.mrf.mxu1 }
 0x36d   :  { %v8733_v15 = vadd.f32 %v8732_v63, %v8731_v29 }
 0x36e   :  { %v8734_v58 = vpop.f32.mrf.mxu1  ;;  %2102 = vmatmul.mubr.f32.gmra.mxu1 %v1806_v2 }
 0x36f   :  { %9962 = vmatprep.mubr.msk.f32.mxu1 %vm11200_vm0, %v15202_v35 }
 0x370   :  { %v8735_v14 = vpop.f32.mrf.mxu1 }
 0x372   :  { %v8737_v49 = vpop.f32.mrf.mxu1 }
 0x374   :  { %v8738_v50 = vpop.f32.mrf.mxu1 }
 0x376   :  { %v8740_v40 = vpop.f32.mrf.mxu1 }
 0x378   :  { %v8741_v56 = vpop.f32.mrf.mxu1 }
 0x379   :  { %v8742_v48 = vadd.f32 %v8741_v56, %v8740_v40 }
 0x37a   :  { %v12685_v32 = vpop.f32.mrf.mxu1 }
 0x37c   :  { %v12687_v1 = vpop.f32.mrf.mxu1 }
 0x37d   :  { %v8745_v23 = vadd.f32 %v12687_v1, %v12685_v32 }
 0x37e   :  { %v12689_v8 = vpop.f32.mrf.mxu1 }
 0x380   :  { %v12691_v26 = vpop.f32.mrf.mxu1 }
 0x382   :  { %v12693_v25 = vpop.f32.mrf.mxu1 }
 0x384   :  { %v12695_v4 = vpop.f32.mrf.mxu1 }
 0x386   :  { %v12697_v2 = vpop.f32.mrf.mxu1 }
 0x388   :  { %v12699_v37 = vpop.f32.mrf.mxu1 }
 0x38a   :  { %v12701_v27 = vpop.f32.mrf.mxu1 }
 0x38c   :  { %v12703_v31 = vpop.f32.mrf.mxu1 }
 0x38e   :  { %v12705_v38 = vpop.f32.mrf.mxu1 }
 0x390   :  { %v12707_v11 = vpop.f32.mrf.mxu1 }
 0x392   :  { %v12709_v44 = vpop.f32.mrf.mxu1 }
 0x394   :  { %v12711_v51 = vpop.f32.mrf.mxu1 }
 0x396   :  { %v1687_v45 = vpop.f32.mrf.mxu1 }
 0x397   :  { %v1688_v60 = vadd.f32 %v8727_v47, %v1687_v45  ;;  %v8739_v45 = vadd.f32 %v8738_v50, %v8737_v49  ;;  %v8748_v49 = vadd.f32 %v12691_v26, %v12689_v8 }
 0x398   :  { %v1689_v3 = vpop.f32.mrf.mxu1 }
 0x399   :  { %9963 = vmatmul.mubr.msk.f32.vlgmr.msra.gmra.mxu1 %vm796_vm3, %v1688_v60 }
 0x39a   :  { %2673 = vmatpush1.msra.mxu1 %v15236_v24  ;;  %v1692_v41 = vpop.f32.mrf.mxu1  ;;  %9965 = vmatprep.mubr.msk.f32.mxu1 %vm11200_vm0, %v15202_v35 }
 0x39b   :  { %v1693_v34 = vadd.f32 %v8730_v20, %v1692_v41  ;;  %2674 = vmatprep.subr.mxu1 %v15202_v35  ;;  %v8736_v20 = vadd.f32 %v8735_v14, %v8734_v58 }
 0x39c   :  { %2675 = vmatpush1.msra.mxu1 %v15237_v22  ;;  %v1694_v0 = vpop.f32.mrf.mxu1 }
 0x39d   :  { %2676 = vmatprep.subr.mxu1 %v15202_v35  ;;  %9966 = vmatmul.mubr.msk.f32.gmra.mxu1 %vm796_vm3, %v1693_v34 }
 0x39e   :  { %2677 = vmatpush1.msra.mxu1 %v15238_v30  ;;  %v1697_v3 = vpop.f32.mrf.mxu1  ;;  %9968 = vmatprep.mubr.msk.f32.mxu1 %vm11200_vm0, %v15202_v35 }
 0x39f   :  { %v1698_v60 = vadd.f32 %v8733_v15, %v1697_v3  ;;  %2678 = vmatprep.subr.mxu1 %v15202_v35  ;;  %v8751_v3 = vadd.f32 %v12695_v4, %v12693_v25 }
 0x3a0   :  { %2679 = vmatpush1.msra.mxu1 %v15239_v54  ;;  %v1699_v41 = vpop.f32.mrf.mxu1  ;;  %v2497_v54 = vld [vmem:[#allocation7 + $0x4b0] sm:$0xff] }
 0x3a1   :  { %2680 = vmatprep.subr.mxu1 %v15202_v35  ;;  %9969 = vmatmul.mubr.msk.f32.gmra.mxu1 %vm796_vm3, %v1698_v60  ;;  %v8754_v41 = vadd.f32 %v12699_v37, %v12697_v2 }
 0x3a2   :  { %2681 = vmatpush1.msra.mxu1 %v15240_v16  ;;  %v1702_v0 = vpop.f32.mrf.mxu1  ;;  %9971 = vmatprep.mubr.msk.f32.mxu1 %vm11200_vm0, %v15202_v35 }
 0x3a3   :  { %v1703_v34 = vadd.f32 %v8736_v20, %v1702_v0  ;;  %2682 = vmatprep.subr.mxu1 %v15202_v35  ;;  %v8757_v0 = vadd.f32 %v12703_v31, %v12701_v27 }
 0x3a4   :  { %2683 = vmatpush1.msra.mxu1 %v15241_v59  ;;  %v1704_v15 = vpop.f32.mrf.mxu1  ;;  %v2498_v59 = vld [vmem:[#allocation7 + $0x4b8] sm:$0xff] }
 0x3a5   :  { %2684 = vmatprep.subr.mxu1 %v15202_v35  ;;  %9972 = vmatmul.mubr.msk.f32.gmra.mxu1 %vm796_vm3, %v1703_v34  ;;  %v8760_v15 = vadd.f32 %v12707_v11, %v12705_v38 }
 0x3a6   :  { %2685 = vmatpush1.msra.mxu1 %v15242_v9  ;;  %v1707_v47 = vpop.f32.mrf.mxu1  ;;  %9974 = vmatprep.mubr.msk.f32.mxu1 %vm11200_vm0, %v15202_v35  ;;  %v2493_v9 = vld [vmem:[#allocation7 + $0x490] sm:$0xff] }
 0x3a7   :  { %v1708_v58 = vadd.f32 %v8739_v45, %v1707_v47  ;;  %2686 = vmatprep.subr.mxu1 %v15202_v35  ;;  %v8763_v47 = vadd.f32 %v12711_v51, %v12709_v44  ;;  %v2453_v44 = vld [vmem:[#allocation7 + $0x350] sm:$0xff] }
 0x3a8   :  { %2687 = vmatpush1.msra.mxu1 %v15243_v61  ;;  %v1709_v29 = vpop.f32.mrf.mxu1 }
 0x3a9   :  { %2688 = vmatprep.subr.mxu1 %v15202_v35  ;;  %9975 = vmatmul.mubr.msk.f32.gmra.mxu1 %vm796_vm3, %v1708_v58  ;;  %v2454_v58 = vld [vmem:[#allocation7 + $0x358] sm:$0xff] }
 0x3aa   :  { %2689 = vmatpush1.msra.mxu1 %v12468_v13  ;;  %v1712_v50 = vpop.f32.mrf.mxu1  ;;  %9977 = vmatprep.mubr.msk.f32.mxu1 %vm11200_vm0, %v15202_v35  ;;  %v2494_v13 = vld [vmem:[#allocation7 + $0x498] sm:$0xff] }
 0x3ab   :  { %v1713_v7 = vadd.f32 %v8742_v48, %v1712_v50  ;;  %2690 = vmatprep.subr.mxu1 %v15202_v35  ;;  %v2458_v48 = vld [vmem:[#allocation7 + $0x378] sm:$0xff] }
 0x3ac   :  { %2691 = vmatpush1.msra.mxu1 %v12475_v28  ;;  %v1714_v62 = vpop.f32.mrf.mxu1 }
 0x3ad   :  { %2692 = vmatprep.subr.mxu1 %v15202_v35  ;;  %9978 = vmatmul.mubr.msk.f32.gmra.mxu1 %vm796_vm3, %v1713_v7  ;;  %v2457_v62 = vld [vmem:[#allocation7 + $0x370] sm:$0xff] }
 0x3ae   :  { %2693 = vmatpush1.msra.mxu1 %v12480_v36  ;;  %v1717_v56 = vpop.f32.mrf.mxu1  ;;  %9980 = vmatprep.mubr.msk.f32.mxu1 %vm11200_vm0, %v15202_v35 }
 0x3af   :  { %v1718_v63 = vadd.f32 %v8745_v23, %v1717_v56  ;;  %2694 = vmatprep.subr.mxu1 %v15202_v35  ;;  %v2462_v23 = vld [vmem:[#allocation7 + $0x398] sm:$0xff]  ;;  %v15244_v56 = vld [vmem:[#allocation29_spill] sm:$0xff] }
 0x3b0   :  { %2695 = vmatpush1.msra.mxu1 %v12484_v52  ;;  %v1719_v14 = vpop.f32.mrf.mxu1  ;;  %v15272_v52 = vld [vmem:[#allocation40_spill] sm:$0xff] }
 0x3b1   :  { %2696 = vmatprep.subr.mxu1 %v15202_v35  ;;  %9981 = vmatmul.mubr.msk.f32.gmra.mxu1 %vm796_vm3, %v1718_v63  ;;  %v15245_v14 = vld [vmem:[#allocation44_spill] sm:$0xff] }
 0x3b2   :  { %2697 = vmatpush1.msra.mxu1 %v12488_v19  ;;  %v1722_v1 = vpop.f32.mrf.mxu1  ;;  %9983 = vmatprep.mubr.msk.f32.mxu1 %vm11200_vm0, %v15202_v35  ;;  %v15271_v19 = vld [vmem:[#allocation69_spill] sm:$0xff] }
 0x3b3   :  { %v1723_v40 = vadd.f32 %v8748_v49, %v1722_v1  ;;  %2698 = vmatprep.subr.mxu1 %v15202_v35  ;;  %v15246_v49 = vld [vmem:[#allocation47_spill] sm:$0xff] }
 0x3b4   :  { %2699 = vmatpush1.msra.mxu1 %v12493_v6  ;;  %v1724_v32 = vpop.f32.mrf.mxu1  ;;  %v2485_v6 = vld [vmem:[#allocation7 + $0x450] sm:$0xff] }
 0x3b5   :  { %2700 = vmatprep.subr.mxu1 %v15202_v35  ;;  %9984 = vmatmul.mubr.msk.f32.gmra.mxu1 %vm796_vm3, %v1723_v40  ;;  %v2461_v40 = vld [vmem:[#allocation7 + $0x390] sm:$0xff]  ;;  %v15247_v32 = vld [vmem:[#allocation48_spill] sm:$0xff] }
 0x3b6   :  { %2701 = vmatpush1.msra.mxu1 %v12499_v42  ;;  %v1727_v8 = vpop.f32.mrf.mxu1  ;;  %9986 = vmatprep.mubr.msk.f32.mxu1 %vm11200_vm0, %v15202_v35  ;;  %v15270_v42 = vld [vmem:[#allocation41_spill] sm:$0xff] }
 0x3b7   :  { %v1728_v26 = vadd.f32 %v8751_v3, %v1727_v8  ;;  %2702 = vmatprep.subr.mxu1 %v15202_v35  ;;  %v2466_v3 = vld [vmem:[#allocation7 + $0x3b8] sm:$0xff]  ;;  %v15248_v8 = vld [vmem:[#allocation49_spill] sm:$0xff] }
 0x3b8   :  { %2703 = vmatpush1.msra.mxu1 %v12506_v55  ;;  %v1729_v60 = vpop.f32.mrf.mxu1  ;;  %v15269_v55 = vld [vmem:[#allocation68_spill] sm:$0xff] }
 0x3b9   :  { %2718 = vmatprep.subr.mxu1 %v15202_v35  ;;  %9987 = vmatmul.mubr.msk.f32.gmra.mxu1 %vm796_vm3, %v1728_v26  ;;  %v15249_v60 = vld [vmem:[#allocation50_spill] sm:$0xff] }
 0x3ba   :  { %2719 = vmatpush2.msra.mxu1 %v12512_v46  ;;  %v1732_v4 = vpop.f32.mrf.mxu1  ;;  %9989 = vmatprep.mubr.msk.f32.mxu1 %vm11200_vm0, %v15202_v35 }
 0x3bb   :  { %v1733_v25 = vadd.f32 %v8754_v41, %v1732_v4  ;;  %2720 = vmatprep.subr.mxu1 %v15202_v35  ;;  %v15250_v41 = vld [vmem:[#allocation51_spill] sm:$0xff] }
 0x3bc   :  { %2721 = vmatpush2.msra.mxu1 %v12520_v17  ;;  %v1734_v20 = vpop.f32.mrf.mxu1  ;;  %v15268_v17 = vld [vmem:[#allocation67_spill] sm:$0xff] }
 0x3bd   :  { %2722 = vmatprep.subr.mxu1 %v15202_v35  ;;  %9990 = vmatmul.mubr.msk.f32.gmra.mxu1 %vm796_vm3, %v1733_v25  ;;  %v2465_v25 = vld [vmem:[#allocation7 + $0x3b0] sm:$0xff]  ;;  %v15251_v20 = vld [vmem:[#allocation52_spill] sm:$0xff] }
 0x3be   :  { %2723 = vmatpush2.msra.mxu1 %v12527_v53  ;;  %v1737_v37 = vpop.f32.mrf.mxu1  ;;  %9992 = vmatprep.mubr.msk.f32.mxu1 %vm11200_vm0, %v15202_v35  ;;  %v15267_v53 = vld [vmem:[#allocation42_spill] sm:$0xff] }
 0x3bf   :  { %v1738_v2 = vadd.f32 %v8757_v0, %v1737_v37  ;;  %2724 = vmatprep.subr.mxu1 %v15202_v35  ;;  %v2470_v0 = vld [vmem:[#allocation7 + $0x3d8] sm:$0xff]  ;;  %v15252_v37 = vld [vmem:[#allocation53_spill] sm:$0xff] }
 0x3c0   :  { %2725 = vmatpush2.msra.mxu1 %v12534_v33  ;;  %v1739_v34 = vpop.f32.mrf.mxu1  ;;  %v2481_v33 = vld [vmem:[#allocation7 + $0x430] sm:$0xff] }
 0x3c1   :  { %2726 = vmatprep.subr.mxu1 %v15202_v35  ;;  %9993 = vmatmul.mubr.msk.f32.gmra.mxu1 %vm796_vm3, %v1738_v2  ;;  %v15253_v34 = vld [vmem:[#allocation54_spill] sm:$0xff] }
 0x3c2   :  { %2727 = vmatpush2.msra.mxu1 %v12541_v39  ;;  %v1742_v31 = vpop.f32.mrf.mxu1  ;;  %9995 = vmatprep.mubr.msk.f32.mxu1 %vm11200_vm0, %v15202_v35  ;;  %v15266_v39 = vld [vmem:[#allocation66_spill] sm:$0xff] }
 0x3c3   :  { %v1743_v27 = vadd.f32 %v8760_v15, %v1742_v31  ;;  %2728 = vmatprep.subr.mxu1 %v15202_v35  ;;  %v15254_v15 = vld [vmem:[#allocation55_spill] sm:$0xff] }
 0x3c4   :  { %2729 = vmatpush2.msra.mxu1 %v12548_v57  ;;  %v1744_v45 = vpop.f32.mrf.mxu1  ;;  %v15265_v57 = vld [vmem:[#allocation43_spill] sm:$0xff] }
 0x3c5   :  { %2730 = vmatprep.subr.mxu1 %v15202_v35  ;;  %9996 = vmatmul.mubr.msk.f32.gmra.mxu1 %vm796_vm3, %v1743_v27  ;;  %v2469_v27 = vld [vmem:[#allocation7 + $0x3d0] sm:$0xff]  ;;  %v15255_v45 = vld [vmem:[#allocation56_spill] sm:$0xff] }
 0x3c6   :  { %2731 = vmatpush2.msra.mxu1 %v12555_v21  ;;  %v1747_v11 = vpop.f32.mrf.mxu1  ;;  %9998 = vmatprep.mubr.msk.f32.mxu1 %vm11200_vm0, %v15202_v35 }
 0x3c7   :  { %v1748_v38 = vadd.f32 %v8763_v47, %v1747_v11  ;;  %2732 = vmatprep.subr.mxu1 %v15202_v35  ;;  %v2474_v47 = vld [vmem:[#allocation7 + $0x3f8] sm:$0xff]  ;;  %v15256_v11 = vld [vmem:[#allocation57_spill] sm:$0xff] }
 0x3c8   :  { %2733 = vmatpush2.msra.mxu1 %v12561_v5  ;;  %v1749_v29 = vpop.f32.mrf.mxu1  ;;  %v15264_v5 = vld [vmem:[#allocation65_spill] sm:$0xff] }
 0x3c9   :  { %2734 = vmatprep.subr.mxu1 %v15202_v35  ;;  %9999 = vmatmul.mubr.msk.f32.gmra.mxu1 %vm796_vm3, %v1748_v38  ;;  %v15258_v29 = vld [vmem:[#allocation59_spill] sm:$0xff] }
 0x3ca   :  { %2735 = vmatpush2.msra.mxu1 %v12566_v18  ;;  %v12813_v51 = vpop.f32.mrf.mxu1  ;;  %8396 = vmatprep.mubr.msk.f32.mxu1 %vm1451_vm5, %v2454_v58  ;;  %v15257_v58 = vld [vmem:[#allocation58_spill] sm:$0xff]  ;;  %v15263_v18 = vld [vmem:[#allocation64_spill] sm:$0xff] }
 0x3cb   :  { %8957 = vmatprep.subr.mxu1 %v12229_v43  ;;  %v2477_v43 = vld [vmem:[#allocation7 + $0x410] sm:$0xff] }
 0x3cc   :  { %v12817_v50 = vpop.f32.mrf.mxu1 }
 0x3cd   :  { %2737 = vmatmul.mubr.f32.vlgmr.msra.gmra.mxu1 %v2453_v44  ;;  %v8798_v24 = vadd.f32 %v12817_v50, %v12813_v51 }
 0x3ce   :  { %8958 = vmatpush3.msra.mxu1 %v12227_v12  ;;  %v12820_v7 = vpop.f32.mrf.mxu1  ;;  %8397 = vmatprep.mubr.msk.f32.mxu1 %vm1451_vm5, %v2458_v48  ;;  %v2473_v48 = vld [vmem:[#allocation7 + $0x3f0] sm:$0xff] }
 0x3cf   :  { %8959 = vmatprep.subr.mxu1 %v12243_v10 }
 0x3d0   :  { %8960 = vmatpush3.msra.mxu1 %v15244_v56  ;;  %v12825_v63 = vpop.f32.mrf.mxu1 }
 0x3d1   :  { %8961 = vmatprep.subr.mxu1 %v15245_v14  ;;  %2742 = vmatmul.mubr.f32.gmra.mxu1 %v2457_v62  ;;  %v15259_v62 = vld [vmem:[#allocation60_spill] sm:$0xff] }
 0x3d2   :  { %8962 = vmatpush3.msra.mxu1 %v15246_v49  ;;  %v12829_v1 = vpop.f32.mrf.mxu1  ;;  %8398 = vmatprep.mubr.msk.f32.mxu1 %vm1451_vm5, %v2462_v23  ;;  %v2478_v23 = vld [vmem:[#allocation7 + $0x418] sm:$0xff] }
 0x3d3   :  { %8963 = vmatprep.subr.mxu1 %v15247_v32 }
 0x3d4   :  { %8964 = vmatpush3.msra.mxu1 %v15248_v8  ;;  %v12834_v26 = vpop.f32.mrf.mxu1 }
 0x3d5   :  { %8965 = vmatprep.subr.mxu1 %v15249_v60  ;;  %2747 = vmatmul.mubr.f32.gmra.mxu1 %v2461_v40  ;;  %v15260_v40 = vld [vmem:[#allocation61_spill] sm:$0xff] }
 0x3d6   :  { %8966 = vmatpush3.msra.mxu1 %v15250_v41  ;;  %v12838_v4 = vpop.f32.mrf.mxu1  ;;  %8399 = vmatprep.mubr.msk.f32.mxu1 %vm1451_vm5, %v2466_v3 }
 0x3d7   :  { %8967 = vmatprep.subr.mxu1 %v15251_v20 }
 0x3d8   :  { %8968 = vmatpush3.msra.mxu1 %v15252_v37  ;;  %v12843_v2 = vpop.f32.mrf.mxu1 }
 0x3d9   :  { %8969 = vmatprep.subr.mxu1 %v15253_v34  ;;  %2752 = vmatmul.mubr.f32.gmra.mxu1 %v2465_v25  ;;  %v15261_v25 = vld [vmem:[#allocation62_spill] sm:$0xff] }
 0x3da   :  { %8970 = vmatpush3.msra.mxu1 %v15254_v15  ;;  %v12847_v31 = vpop.f32.mrf.mxu1  ;;  %8400 = vmatprep.mubr.msk.f32.mxu1 %vm1451_vm5, %v2470_v0  ;;  %v15262_v0 = vld [vmem:[#allocation63_spill] sm:$0xff] }
 0x3db   :  { %8971 = vmatprep.subr.mxu1 %v15255_v45 }
 0x3dc   :  { %8972 = vmatpush3.msra.mxu1 %v15256_v11  ;;  %v12852_v38 = vpop.f32.mrf.mxu1 }
 0x3dd   :  { %8973 = vmatprep.subr.mxu1 %v15257_v58  ;;  %2757 = vmatmul.mubr.f32.gmra.mxu1 %v2469_v27 }
 0x3de   :  { %8974 = vmatpush3.msra.mxu1 %v15258_v29  ;;  %v12856_v44 = vpop.f32.mrf.mxu1  ;;  %8401 = vmatprep.mubr.msk.f32.mxu1 %vm1451_vm5, %v2474_v47  ;;  %v2482_v47 = vld [vmem:[#allocation7 + $0x438] sm:$0xff] }
 0x3df   :  { %8975 = vmatprep.subr.mxu1 %v15259_v62 }
 0x3e0   :  { %8976 = vmatpush3.msra.mxu1 %v15260_v40  ;;  %v12861_v3 = vpop.f32.mrf.mxu1 }
 0x3e1   :  { %8977 = vmatprep.subr.mxu1 %v15261_v25  ;;  %2762 = vmatmul.mubr.f32.gmra.mxu1 %v2473_v48 }
 0x3e2   :  { %8978 = vmatpush3.msra.mxu1 %v15262_v0  ;;  %v12865_v27 = vpop.f32.mrf.mxu1  ;;  %8402 = vmatprep.mubr.msk.f32.mxu1 %vm1451_vm5, %v2478_v23  ;;  %v2486_v23 = vld [vmem:[#allocation7 + $0x458] sm:$0xff] }
 0x3e3   :  { %8979 = vmatprep.subr.mxu1 %v15263_v18 }
 0x3e4   :  { %8980 = vmatpush3.msra.mxu1 %v15264_v5  ;;  %v12870_v21 = vpop.f32.mrf.mxu1 }
 0x3e5   :  { %8981 = vmatprep.subr.mxu1 %v15265_v57  ;;  %2767 = vmatmul.mubr.f32.gmra.mxu1 %v2477_v43 }
 0x3e6   :  { %8982 = vmatpush3.msra.mxu1 %v15266_v39  ;;  %v12874_v48 = vpop.f32.mrf.mxu1  ;;  %8403 = vmatprep.mubr.msk.f32.mxu1 %vm1451_vm5, %v2482_v47  ;;  %v2490_v47 = vld [vmem:[#allocation7 + $0x478] sm:$0xff] }
 0x3e7   :  { %8983 = vmatprep.subr.mxu1 %v15267_v53 }
 0x3e8   :  { %8984 = vmatpush3.msra.mxu1 %v15268_v17  ;;  %v12879_v46 = vpop.f32.mrf.mxu1 }
 0x3e9   :  { %8985 = vmatprep.subr.mxu1 %v15269_v55  ;;  %2772 = vmatmul.mubr.f32.gmra.mxu1 %v2481_v33  ;;  %v2489_v33 = vld [vmem:[#allocation7 + $0x470] sm:$0xff] }
 0x3ea   :  { %8986 = vmatpush3.msra.mxu1 %v15270_v42  ;;  %v12883_v43 = vpop.f32.mrf.mxu1  ;;  %8404 = vmatprep.mubr.msk.f32.mxu1 %vm1451_vm5, %v2486_v23 }
 0x3eb   :  { %8987 = vmatprep.subr.mxu1 %v15271_v19 }
 0x3ec   :  { %8988 = vmatpush3.msra.mxu1 %v15272_v52  ;;  %v12888_v36 = vpop.f32.mrf.mxu1 }
 0x3ed   :  { %2777 = vmatmul.mubr.f32.gmra.mxu1 %v2485_v6  ;;  %10048 = vmatprep.subr.mxu1 %v15202_v35 }
 0x3ee   :  { %v12891_v28 = vpop.f32.mrf.mxu1  ;;  %8405 = vmatprep.mubr.msk.f32.mxu1 %vm1451_vm5, %v2490_v47  ;;  %v2502_v47 = vld [vmem:[#allocation7 + $0x4d8] sm:$0xff] }
 0x3f0   :  { %v12894_v61 = vpop.f32.mrf.mxu1 }
 0x3f1   :  { %2782 = vmatmul.mubr.f32.gmra.mxu1 %v2489_v33  ;;  %v2501_v33 = vld [vmem:[#allocation7 + $0x4d0] sm:$0xff] }
 0x3f2   :  { %v12896_v23 = vpop.f32.mrf.mxu1  ;;  %8406 = vmatprep.mubr.msk.f32.mxu1 %vm1451_vm5, %v2494_v13 }
 0x3f4   :  { %v12899_v16 = vpop.f32.mrf.mxu1 }
 0x3f5   :  { %15273 = vst [vmem:[#allocation29_spill] sm:$0xff] %v12899_v16  ;;  %2787 = vmatmul.mubr.f32.gmra.mxu1 %v2493_v9 }
 0x3f6   :  { %v12901_v6 = vpop.f32.mrf.mxu1  ;;  %8407 = vmatprep.mubr.msk.f32.mxu1 %vm1451_vm5, %v2498_v59  ;;  %v8801_v59 = vadd.f32 %v12825_v63, %v12820_v7  ;;  %v8807_v63 = vadd.f32 %v12843_v2, %v12838_v4 }
 0x3f7   :  { %15274 = vst [vmem:[#allocation44_spill] sm:$0xff] %v12901_v6 }
 0x3f8   :  { %v12904_v30 = vpop.f32.mrf.mxu1 }
 0x3f9   :  { %2792 = vmatmul.mubr.f32.gmra.mxu1 %v2497_v54 }
 0x3fa   :  { %v12906_v22 = vpop.f32.mrf.mxu1  ;;  %8408 = vmatprep.mubr.msk.f32.mxu1 %vm1451_vm5, %v2502_v47 }
 0x3fc   :  { %v12909_v13 = vpop.f32.mrf.mxu1 }
 0x3fd   :  { %2797 = vmatmul.mubr.f32.gmra.mxu1 %v2501_v33  ;;  %v8810_v33 = vadd.f32 %v12852_v38, %v12847_v31 }
 0x3fe   :  { %v2043_v9 = vpop.f32.mrf.mxu1 }
 0x3ff   :  { %v2044_v6 = vadd.f32 %v8798_v24, %v2043_v9  ;;  %v8804_v24 = vadd.f32 %v12834_v26, %v12829_v1 }
 0x400   :  { %v2045_v16 = vpop.f32.mrf.mxu1 }
 0x401   :  { %9916 = vmatmul.mubr.msk.f32.vlgmr.msra.gmra.mxu0 %vm796_vm3, %v2044_v6 }
 0x402   :  { %8870 = vmatpush3.msra.mxu0 %v12227_v12  ;;  %v2048_v54 = vpop.f32.mrf.mxu1  ;;  %9918 = vmatprep.mubr.msk.f32.mxu0 %vm11200_vm0, %v15202_v35 }
 0x403   :  { %v2049_v47 = vadd.f32 %v8801_v59, %v2048_v54  ;;  %8871 = vmatprep.subr.mxu0 %v12243_v10  ;;  %v8813_v59 = vadd.f32 %v12861_v3, %v12856_v44 }
 0x404   :  { %8872 = vmatpush3.msra.mxu0 %v15244_v56  ;;  %v2050_v51 = vpop.f32.mrf.mxu1 }
 0x405   :  { %8873 = vmatprep.subr.mxu0 %v15245_v14  ;;  %9919 = vmatmul.mubr.msk.f32.gmra.mxu0 %vm796_vm3, %v2049_v47  ;;  %v8816_v47 = vadd.f32 %v12870_v21, %v12865_v27 }
 0x406   :  { %8874 = vmatpush3.msra.mxu0 %v15246_v49  ;;  %v2053_v16 = vpop.f32.mrf.mxu1  ;;  %9921 = vmatprep.mubr.msk.f32.mxu0 %vm11200_vm0, %v15202_v35 }
 0x407   :  { %v2054_v50 = vadd.f32 %v8804_v24, %v2053_v16  ;;  %8875 = vmatprep.subr.mxu0 %v15247_v32  ;;  %v8819_v24 = vadd.f32 %v12879_v46, %v12874_v48 }
 0x408   :  { %8876 = vmatpush3.msra.mxu0 %v15248_v8  ;;  %v2055_v7 = vpop.f32.mrf.mxu1 }
 0x409   :  { %8877 = vmatprep.subr.mxu0 %v15249_v60  ;;  %9922 = vmatmul.mubr.msk.f32.gmra.mxu0 %vm796_vm3, %v2054_v50  ;;  %v8822_v50 = vadd.f32 %v12888_v36, %v12883_v43 }
 0x40a   :  { %8878 = vmatpush3.msra.mxu0 %v15250_v41  ;;  %v2058_v1 = vpop.f32.mrf.mxu1  ;;  %9924 = vmatprep.mubr.msk.f32.mxu0 %vm11200_vm0, %v15202_v35 }
 0x40b   :  { %v2059_v26 = vadd.f32 %v8807_v63, %v2058_v1  ;;  %8879 = vmatprep.subr.mxu0 %v15251_v20  ;;  %v8825_v63 = vadd.f32 %v12894_v61, %v12891_v28 }
 0x40c   :  { %8880 = vmatpush3.msra.mxu0 %v15252_v37  ;;  %v2060_v6 = vpop.f32.mrf.mxu1 }
 0x40d   :  { %8881 = vmatprep.subr.mxu0 %v15253_v34  ;;  %9925 = vmatmul.mubr.msk.f32.gmra.mxu0 %vm796_vm3, %v2059_v26  ;;  %v15275_v26 = vld [vmem:[#allocation29_spill] sm:$0xff] }
 0x40e   :  { %8882 = vmatpush3.msra.mxu0 %v15254_v15  ;;  %v2063_v4 = vpop.f32.mrf.mxu1  ;;  %9927 = vmatprep.mubr.msk.f32.mxu0 %vm11200_vm0, %v15202_v35  ;;  %v8828_v6 = vadd.f32 %v15275_v26, %v12896_v23  ;;  %v8834_v23 = vadd.f32 %v12909_v13, %v12906_v22  ;;  %v2459_v22 = vld [vmem:[#allocation7 + $0x380] sm:$0xff]  ;;  %v2464_v13 = vld [vmem:[#allocation7 + $0x3a8] sm:$0xff] }
 0x40f   :  { %v2064_v2 = vadd.f32 %v8810_v33, %v2063_v4  ;;  %8883 = vmatprep.subr.mxu0 %v15255_v45  ;;  %v15276_v4 = vld [vmem:[#allocation44_spill] sm:$0xff]  ;;  %v2488_v26 = vld [vmem:[#allocation7 + $0x468] sm:$0xff] }
 0x410   :  { %8884 = vmatpush3.msra.mxu0 %v15256_v11  ;;  %v2065_v9 = vpop.f32.mrf.mxu1 }
 0x411   :  { %8885 = vmatprep.subr.mxu0 %v15257_v58  ;;  %9928 = vmatmul.mubr.msk.f32.gmra.mxu0 %vm796_vm3, %v2064_v2  ;;  %v8831_v2 = vadd.f32 %v12904_v30, %v15276_v4 }
 0x412   :  { %8886 = vmatpush3.msra.mxu0 %v15258_v29  ;;  %v2068_v31 = vpop.f32.mrf.mxu1  ;;  %9930 = vmatprep.mubr.msk.f32.mxu0 %vm11200_vm0, %v15202_v35 }
 0x413   :  { %v2069_v38 = vadd.f32 %v8813_v59, %v2068_v31  ;;  %8887 = vmatprep.subr.mxu0 %v15259_v62 }
 0x414   :  { %8888 = vmatpush3.msra.mxu0 %v15260_v40  ;;  %v2070_v54 = vpop.f32.mrf.mxu1 }
 0x415   :  { %8889 = vmatprep.subr.mxu0 %v15261_v25  ;;  %9931 = vmatmul.mubr.msk.f32.gmra.mxu0 %vm796_vm3, %v2069_v38 }
 0x416   :  { %8890 = vmatpush3.msra.mxu0 %v15262_v0  ;;  %v2073_v44 = vpop.f32.mrf.mxu1  ;;  %9933 = vmatprep.mubr.msk.f32.mxu0 %vm11200_vm0, %v15202_v35 }
 0x417   :  { %v2074_v3 = vadd.f32 %v8816_v47, %v2073_v44  ;;  %8891 = vmatprep.subr.mxu0 %v15263_v18  ;;  %v2452_v47 = vld [vmem:[#allocation7 + $0x348] sm:$0xff]  ;;  %v2451_v44 = vld [vmem:[#allocation7 + $0x340] sm:$0xff] }
 0x418   :  { %8892 = vmatpush3.msra.mxu0 %v15264_v5  ;;  %v2075_v51 = vpop.f32.mrf.mxu1 }
 0x419   :  { %8893 = vmatprep.subr.mxu0 %v15265_v57  ;;  %9934 = vmatmul.mubr.msk.f32.gmra.mxu0 %vm796_vm3, %v2074_v3  ;;  %v2456_v3 = vld [vmem:[#allocation7 + $0x368] sm:$0xff]  ;;  %v2455_v51 = vld [vmem:[#allocation7 + $0x360] sm:$0xff] }
 0x41a   :  { %8894 = vmatpush3.msra.mxu0 %v15266_v39  ;;  %v2078_v21 = vpop.f32.mrf.mxu1  ;;  %9936 = vmatprep.mubr.msk.f32.mxu0 %vm11200_vm0, %v15202_v35 }
 0x41b   :  { %v2079_v27 = vadd.f32 %v8819_v24, %v2078_v21  ;;  %8895 = vmatprep.subr.mxu0 %v15267_v53  ;;  %v2460_v24 = vld [vmem:[#allocation7 + $0x388] sm:$0xff]  ;;  %v2463_v21 = vld [vmem:[#allocation7 + $0x3a0] sm:$0xff] }
 0x41c   :  { %8896 = vmatpush3.msra.mxu0 %v15268_v17  ;;  %v2080_v16 = vpop.f32.mrf.mxu1 }
 0x41d   :  { %8897 = vmatprep.subr.mxu0 %v15269_v55  ;;  %9937 = vmatmul.mubr.msk.f32.gmra.mxu0 %vm796_vm3, %v2079_v27  ;;  %v2468_v27 = vld [vmem:[#allocation7 + $0x3c8] sm:$0xff]  ;;  %v2467_v16 = vld [vmem:[#allocation7 + $0x3c0] sm:$0xff] }
 0x41e   :  { %8898 = vmatpush3.msra.mxu0 %v15270_v42  ;;  %v2083_v46 = vpop.f32.mrf.mxu1  ;;  %9939 = vmatprep.mubr.msk.f32.mxu0 %vm11200_vm0, %v15202_v35 }
 0x41f   :  { %v2084_v48 = vadd.f32 %v8822_v50, %v2083_v46  ;;  %8899 = vmatprep.subr.mxu0 %v15271_v19  ;;  %v2472_v50 = vld [vmem:[#allocation7 + $0x3e8] sm:$0xff]  ;;  %v2471_v46 = vld [vmem:[#allocation7 + $0x3e0] sm:$0xff] }
 0x420   :  { %8900 = vmatpush3.msra.mxu0 %v15272_v52  ;;  %v2085_v7 = vpop.f32.mrf.mxu1 }
 0x421   :  { %9940 = vmatmul.mubr.msk.f32.gmra.mxu0 %vm796_vm3, %v2084_v48  ;;  %10001 = vmatprep.subr.mxu0 %v15202_v35  ;;  %v2476_v48 = vld [vmem:[#allocation7 + $0x408] sm:$0xff]  ;;  %v2475_v7 = vld [vmem:[#allocation7 + $0x400] sm:$0xff] }
 0x422   :  { %v2088_v36 = vpop.f32.mrf.mxu1  ;;  %9942 = vmatprep.mubr.msk.f32.mxu0 %vm11200_vm0, %v15202_v35 }
 0x423   :  { %v2089_v43 = vadd.f32 %v8825_v63, %v2088_v36  ;;  %v2480_v63 = vld [vmem:[#allocation7 + $0x428] sm:$0xff]  ;;  %v2479_v36 = vld [vmem:[#allocation7 + $0x420] sm:$0xff] }
 0x424   :  { %v2090_v1 = vpop.f32.mrf.mxu1 }
 0x425   :  { %9943 = vmatmul.mubr.msk.f32.gmra.mxu0 %vm796_vm3, %v2089_v43  ;;  %v2484_v43 = vld [vmem:[#allocation7 + $0x448] sm:$0xff]  ;;  %v2483_v1 = vld [vmem:[#allocation7 + $0x440] sm:$0xff] }
 0x426   :  { %v2093_v33 = vpop.f32.mrf.mxu1  ;;  %9945 = vmatprep.mubr.msk.f32.mxu0 %vm11200_vm0, %v15202_v35 }
 0x427   :  { %v2094_v28 = vadd.f32 %v8828_v6, %v2093_v33  ;;  %v2487_v6 = vld [vmem:[#allocation7 + $0x460] sm:$0xff]  ;;  %v2492_v33 = vld [vmem:[#allocation7 + $0x488] sm:$0xff] }
 0x428   :  { %v2095_v61 = vpop.f32.mrf.mxu1 }
 0x429   :  { %9946 = vmatmul.mubr.msk.f32.gmra.mxu0 %vm796_vm3, %v2094_v28  ;;  %v2491_v61 = vld [vmem:[#allocation7 + $0x480] sm:$0xff] }
 0x42a   :  { %v2098_v9 = vpop.f32.mrf.mxu1  ;;  %9948 = vmatprep.mubr.msk.f32.mxu0 %vm11200_vm0, %v15202_v35 }
 0x42b   :  { %v2099_v59 = vadd.f32 %v8831_v2, %v2098_v9  ;;  %v2496_v2 = vld [vmem:[#allocation7 + $0x4a8] sm:$0xff] }
 0x42c   :  { %v2100_v31 = vpop.f32.mrf.mxu1 }
 0x42d   :  { %9949 = vmatmul.mubr.msk.f32.gmra.mxu0 %vm796_vm3, %v2099_v59  ;;  %v2495_v59 = vld [vmem:[#allocation7 + $0x4a0] sm:$0xff] }
 0x42e   :  { %v2103_v38 = vpop.f32.mrf.mxu1  ;;  %9951 = vmatprep.mubr.msk.f32.mxu0 %vm11200_vm0, %v15202_v35 }
 0x42f   :  { %v2104_v54 = vadd.f32 %v8834_v23, %v2103_v38  ;;  %v2500_v23 = vld [vmem:[#allocation7 + $0x4c8] sm:$0xff] }
 0x430   :  { %v2105_v30 = vpop.f32.mrf.mxu1 }
 0x431   :  { %9952 = vmatmul.mubr.msk.f32.gmra.mxu0 %vm796_vm3, %v2104_v54  ;;  %v2499_v54 = vld [vmem:[#allocation7 + $0x4c0] sm:$0xff] }
 0x432   :  { %2606 = vmatprep.mubr.f32.mxu0 %v2452_v47  ;;  %v2806_v47 = vld [vmem:[#allocation9 + $0x58] sm:$0xff] }
 0x435   :  { %2607 = vmatmul.mubr.f32.vlgmr.msra.gmra.mxu0 %v2451_v44 }
 0x436   :  { %2611 = vmatprep.mubr.f32.mxu0 %v2456_v3  ;;  %10002 = vmatpush3.msra.mxu0 %v2806_v47 }
 0x437   :  { %10003 = vmatprep.subr.mxu0 %v15202_v35 }
 0x439   :  { %2612 = vmatmul.mubr.f32.gmra.mxu0 %v2455_v51 }
 0x43a   :  { %2616 = vmatprep.mubr.f32.mxu0 %v2460_v24 }
 0x43d   :  { %2617 = vmatmul.mubr.f32.gmra.mxu0 %v2459_v22 }
 0x43e   :  { %2621 = vmatprep.mubr.f32.mxu0 %v2464_v13 }
 0x441   :  { %2622 = vmatmul.mubr.f32.gmra.mxu0 %v2463_v21  ;;  %v2805_v21 = vld [vmem:[#allocation9 + $0x50] sm:$0xff] }
 0x442   :  { %2626 = vmatprep.mubr.f32.mxu0 %v2468_v27  ;;  %10004 = vmatpush3.msra.mxu0 %v2805_v21 }
 0x443   :  { %10005 = vmatprep.subr.mxu0 %v15202_v35 }
 0x445   :  { %2627 = vmatmul.mubr.f32.gmra.mxu0 %v2467_v16 }
 0x446   :  { %2631 = vmatprep.mubr.f32.mxu0 %v2472_v50 }
 0x449   :  { %2632 = vmatmul.mubr.f32.gmra.mxu0 %v2471_v46 }
 0x44a   :  { %2636 = vmatprep.mubr.f32.mxu0 %v2476_v48 }
 0x44d   :  { %2637 = vmatmul.mubr.f32.gmra.mxu0 %v2475_v7  ;;  %v2804_v7 = vld [vmem:[#allocation9 + $0x48] sm:$0xff] }
 0x44e   :  { %2641 = vmatprep.mubr.f32.mxu0 %v2480_v63  ;;  %v2803_v63 = vld [vmem:[#allocation9 + $0x40] sm:$0xff]  ;;  %10006 = vmatpush3.msra.mxu0 %v2804_v7 }
 0x44f   :  { %10007 = vmatprep.subr.mxu0 %v15202_v35 }
 0x450   :  { %10008 = vmatpush3.msra.mxu0 %v2803_v63 }
 0x451   :  { %2642 = vmatmul.mubr.f32.gmra.mxu0 %v2479_v36  ;;  %3211 = vmatprep.subr.mxu0 %v15202_v35 }
 0x452   :  { %2646 = vmatprep.mubr.f32.mxu0 %v2484_v43 }
 0x455   :  { %2647 = vmatmul.mubr.f32.gmra.mxu0 %v2483_v1 }
 0x456   :  { %2651 = vmatprep.mubr.f32.mxu0 %v2488_v26 }
 0x459   :  { %v13006_v28 = vpop.f32.mrf.mxu1  ;;  %2652 = vmatmul.mubr.f32.gmra.mxu0 %v2487_v6 }
 0x45a   :  { %2656 = vmatprep.mubr.f32.mxu0 %v2492_v33 }
 0x45b   :  { %v9964_v4 = vpop.f32.mrf.mxu1 }
 0x45d   :  { %v13008_v9 = vpop.f32.mrf.mxu1  ;;  %2657 = vmatmul.mubr.f32.gmra.mxu0 %v2491_v61 }
 0x45e   :  { %2661 = vmatprep.mubr.f32.mxu0 %v2496_v2 }
 0x45f   :  { %v9967_v31 = vpop.f32.mrf.mxu1 }
 0x461   :  { %v13010_v38 = vpop.f32.mrf.mxu1  ;;  %2662 = vmatmul.mubr.f32.gmra.mxu0 %v2495_v59 }
 0x462   :  { %15277 = vst [vmem:[#allocation47_spill] sm:$0xff] %v13010_v38  ;;  %2666 = vmatprep.mubr.f32.mxu0 %v2500_v23 }
 0x463   :  { %v9970_v30 = vpop.f32.mrf.mxu1 }
 0x465   :  { %v13013_v44 = vpop.f32.mrf.mxu1  ;;  %2667 = vmatmul.mubr.f32.gmra.mxu0 %v2499_v54 }
 0x466   :  { %15278 = vst [vmem:[#allocation48_spill] sm:$0xff] %v13013_v44  ;;  %10009 = vmatprep.mubr.msk.f32.mxu0 %vm11200_vm0, %v15202_v35 }
 0x467   :  { %v9973_v3 = vpop.f32.mrf.mxu1 }
 0x469   :  { %v13017_v51 = vpop.f32.mrf.mxu1 }
 0x46a   :  { %15279 = vst [vmem:[#allocation49_spill] sm:$0xff] %v13017_v51 }
 0x46b   :  { %v9976_v24 = vpop.f32.mrf.mxu1 }
 0x46d   :  { %v13019_v22 = vpop.f32.mrf.mxu1 }
 0x46e   :  { %15280 = vst [vmem:[#allocation50_spill] sm:$0xff] %v13019_v22  ;;  %v3031_v22 = vld [vmem:[#allocation7 + $0x628] sm:$0xff] }
 0x46f   :  { %v9979_v13 = vpop.f32.mrf.mxu1 }
 0x471   :  { %v13021_v27 = vpop.f32.mrf.mxu1 }
 0x472   :  { %15281 = vst [vmem:[#allocation29_spill] sm:$0xff] %v13021_v27 }
 0x473   :  { %v9982_v16 = vpop.f32.mrf.mxu1 }
 0x475   :  { %v13024_v50 = vpop.f32.mrf.mxu1 }
 0x476   :  { %15282 = vst [vmem:[#allocation44_spill] sm:$0xff] %v13024_v50 }
 0x477   :  { %v9985_v46 = vpop.f32.mrf.mxu1 }
 0x479   :  { %v13026_v48 = vpop.f32.mrf.mxu1 }
 0x47a   :  { %15283 = vst [vmem:[#allocation85_spill] sm:$0xff] %v13026_v48 }
 0x47b   :  { %v9988_v36 = vpop.f32.mrf.mxu1 }
 0x47d   :  { %v13029_v43 = vpop.f32.mrf.mxu1 }
 0x47e   :  { %15284 = vst [vmem:[#allocation86_spill] sm:$0xff] %v13029_v43 }
 0x47f   :  { %v9991_v1 = vpop.f32.mrf.mxu1 }
 0x480   :  { %v2991_v1 = vld [vmem:[#allocation7 + $0x4e8] sm:$0xff] }
 0x481   :  { %v13032_v26 = vpop.f32.mrf.mxu1  ;;  %3145 = vmatprep.mubr.f32.mxu1 %v2991_v1  ;;  %v3002_v1 = vld [vmem:[#allocation7 + $0x540] sm:$0xff] }
 0x482   :  { %15285 = vst [vmem:[#allocation87_spill] sm:$0xff] %v13032_v26 }
 0x483   :  { %v9994_v6 = vpop.f32.mrf.mxu1 }
 0x484   :  { %v2990_v6 = vld [vmem:[#allocation7 + $0x4e0] sm:$0xff] }
 0x485   :  { %v13034_v33 = vpop.f32.mrf.mxu1  ;;  %3146 = vmatmul.mubr.f32.vlgmr.msra.gmra.mxu1 %v2990_v6 }
 0x486   :  { %15286 = vst [vmem:[#allocation88_spill] sm:$0xff] %v13034_v33  ;;  %v3003_v33 = vld [vmem:[#allocation7 + $0x548] sm:$0xff] }
 0x487   :  { %v9997_v61 = vpop.f32.mrf.mxu1 }
 0x489   :  { %v13036_v4 = vpop.f32.mrf.mxu1 }
 0x48a   :  { %15287 = vst [vmem:[#allocation89_spill] sm:$0xff] %v13036_v4 }
 0x48b   :  { %v10000_v2 = vpop.f32.mrf.mxu1 }
 0x48d   :  { %v13038_v59 = vpop.f32.mrf.mxu1 }
 0x48f   :  { %v2740_v31 = vpop.f32.mrf.mxu1 }
 0x490   :  { %v2995_v31 = vld [vmem:[#allocation7 + $0x508] sm:$0xff] }
 0x491   :  { %v13040_v23 = vpop.f32.mrf.mxu1  ;;  %3150 = vmatprep.mubr.f32.mxu1 %v2995_v31  ;;  %v3007_v31 = vld [vmem:[#allocation7 + $0x568] sm:$0xff] }
 0x493   :  { %v2745_v54 = vpop.f32.mrf.mxu1 }
 0x494   :  { %v2994_v54 = vld [vmem:[#allocation7 + $0x500] sm:$0xff] }
 0x495   :  { %v13042_v47 = vpop.f32.mrf.mxu1  ;;  %3151 = vmatmul.mubr.f32.gmra.mxu1 %v2994_v54 }
 0x497   :  { %v2750_v30 = vpop.f32.mrf.mxu1 }
 0x499   :  { %v13044_v3 = vpop.f32.mrf.mxu1 }
 0x49b   :  { %v2755_v24 = vpop.f32.mrf.mxu1 }
 0x49d   :  { %v13046_v13 = vpop.f32.mrf.mxu1 }
 0x49f   :  { %v2760_v21 = vpop.f32.mrf.mxu1 }
 0x4a0   :  { %v2999_v21 = vld [vmem:[#allocation7 + $0x528] sm:$0xff] }
 0x4a1   :  { %v13048_v16 = vpop.f32.mrf.mxu1  ;;  %3155 = vmatprep.mubr.f32.mxu1 %v2999_v21  ;;  %v3011_v21 = vld [vmem:[#allocation7 + $0x588] sm:$0xff] }
 0x4a3   :  { %v2765_v46 = vpop.f32.mrf.mxu1 }
 0x4a4   :  { %v2998_v46 = vld [vmem:[#allocation7 + $0x520] sm:$0xff] }
 0x4a5   :  { %v13050_v7 = vpop.f32.mrf.mxu1  ;;  %3156 = vmatmul.mubr.f32.gmra.mxu1 %v2998_v46 }
 0x4a6   :  { %3160 = vmatprep.mubr.f32.mxu1 %v3003_v33  ;;  %v3015_v33 = vld [vmem:[#allocation7 + $0x5a8] sm:$0xff] }
 0x4a7   :  { %v2770_v63 = vpop.f32.mrf.mxu1 }
 0x4a9   :  { %v13052_v36 = vpop.f32.mrf.mxu1  ;;  %3161 = vmatmul.mubr.f32.gmra.mxu1 %v3002_v1 }
 0x4aa   :  { %3165 = vmatprep.mubr.f32.mxu1 %v3007_v31  ;;  %v3019_v31 = vld [vmem:[#allocation7 + $0x5c8] sm:$0xff] }
 0x4ab   :  { %v2775_v61 = vpop.f32.mrf.mxu1 }
 0x4ad   :  { %v13054_v2 = vpop.f32.mrf.mxu1 }
 0x4af   :  { %v2780_v30 = vpop.f32.mrf.mxu1 }
 0x4b0   :  { %v3006_v30 = vld [vmem:[#allocation7 + $0x560] sm:$0xff] }
 0x4b1   :  { %v13056_v24 = vpop.f32.mrf.mxu1  ;;  %3166 = vmatmul.mubr.f32.gmra.mxu1 %v3006_v30 }
 0x4b2   :  { %3170 = vmatprep.mubr.f32.mxu1 %v3011_v21  ;;  %v3023_v21 = vld [vmem:[#allocation7 + $0x5e8] sm:$0xff] }
 0x4b3   :  { %v2785_v63 = vpop.f32.mrf.mxu1 }
 0x4b4   :  { %v3010_v63 = vld [vmem:[#allocation7 + $0x580] sm:$0xff] }
 0x4b5   :  { %v13058_v4 = vpop.f32.mrf.mxu1  ;;  %3171 = vmatmul.mubr.f32.gmra.mxu1 %v3010_v63 }
 0x4b6   :  { %3175 = vmatprep.mubr.f32.mxu1 %v3015_v33  ;;  %v3027_v33 = vld [vmem:[#allocation7 + $0x608] sm:$0xff] }
 0x4b7   :  { %v2790_v6 = vpop.f32.mrf.mxu1 }
 0x4b8   :  { %v3014_v6 = vld [vmem:[#allocation7 + $0x5a0] sm:$0xff] }
 0x4b9   :  { %v13060_v61 = vpop.f32.mrf.mxu1  ;;  %3176 = vmatmul.mubr.f32.gmra.mxu1 %v3014_v6 }
 0x4ba   :  { %3180 = vmatprep.mubr.f32.mxu1 %v3019_v31  ;;  %v3030_v31 = vld [vmem:[#allocation7 + $0x620] sm:$0xff] }
 0x4bb   :  { %v2795_v54 = vpop.f32.mrf.mxu1 }
 0x4bc   :  { %v3018_v54 = vld [vmem:[#allocation7 + $0x5c0] sm:$0xff] }
 0x4bd   :  { %v13062_v26 = vpop.f32.mrf.mxu1  ;;  %3181 = vmatmul.mubr.f32.gmra.mxu1 %v3018_v54 }
 0x4be   :  { %3185 = vmatprep.mubr.f32.mxu1 %v3023_v21  ;;  %v3034_v21 = vld [vmem:[#allocation7 + $0x640] sm:$0xff] }
 0x4bf   :  { %v2800_v46 = vpop.f32.mrf.mxu1 }
 0x4c0   :  { %v3022_v46 = vld [vmem:[#allocation7 + $0x5e0] sm:$0xff] }
 0x4c1   :  { %v13064_v43 = vpop.f32.mrf.mxu0  ;;  %3186 = vmatmul.mubr.f32.gmra.mxu1 %v3022_v46 }
 0x4c2   :  { %3190 = vmatprep.mubr.f32.mxu1 %v3027_v33  ;;  %v3038_v33 = vld [vmem:[#allocation7 + $0x660] sm:$0xff] }
 0x4c3   :  { %v9917_v1 = vpop.f32.mrf.mxu0 }
 0x4c4   :  { %v3026_v1 = vld [vmem:[#allocation7 + $0x600] sm:$0xff] }
 0x4c5   :  { %v13066_v48 = vpop.f32.mrf.mxu0  ;;  %3191 = vmatmul.mubr.f32.gmra.mxu1 %v3026_v1 }
 0x4c6   :  { %3195 = vmatprep.mubr.f32.mxu1 %v3031_v22 }
 0x4c7   :  { %v9920_v30 = vpop.f32.mrf.mxu0 }
 0x4c8   :  { %v3035_v30 = vld [vmem:[#allocation7 + $0x648] sm:$0xff] }
 0x4c9   :  { %v13068_v50 = vpop.f32.mrf.mxu0  ;;  %3196 = vmatmul.mubr.f32.gmra.mxu1 %v3030_v31 }
 0x4ca   :  { %15288 = vst [vmem:[#allocation90_spill] sm:$0xff] %v13068_v50  ;;  %3200 = vmatprep.mubr.f32.mxu1 %v3035_v30 }
 0x4cb   :  { %v9923_v63 = vpop.f32.mrf.mxu0 }
 0x4cc   :  { %v3039_v63 = vld [vmem:[#allocation7 + $0x668] sm:$0xff] }
 0x4cd   :  { %v13070_v27 = vpop.f32.mrf.mxu0  ;;  %3201 = vmatmul.mubr.f32.gmra.mxu1 %v3034_v21 }
 0x4ce   :  { %15289 = vst [vmem:[#allocation91_spill] sm:$0xff] %v13070_v27  ;;  %3205 = vmatprep.mubr.f32.mxu1 %v3039_v63 }
 0x4cf   :  { %v9926_v6 = vpop.f32.mrf.mxu0 }
 0x4d1   :  { %v13072_v51 = vpop.f32.mrf.mxu0  ;;  %3206 = vmatmul.mubr.f32.gmra.mxu1 %v3038_v33 }
 0x4d2   :  { %15290 = vst [vmem:[#allocation92_spill] sm:$0xff] %v13072_v51  ;;  %10056 = vmatprep.mubr.msk.f32.mxu1 %vm11200_vm0, %v15202_v35 }
 0x4d3   :  { %v9929_v54 = vpop.f32.mrf.mxu0 }
 0x4d5   :  { %v13074_v44 = vpop.f32.mrf.mxu0 }
 0x4d6   :  { %15291 = vst [vmem:[#allocation93_spill] sm:$0xff] %v13074_v44 }
 0x4d7   :  { %v9932_v46 = vpop.f32.mrf.mxu0 }
 0x4d9   :  { %v13076_v27 = vpop.f32.mrf.mxu0 }
 0x4da   :  { %15292 = vst [vmem:[#allocation94_spill] sm:$0xff] %v13076_v27 }
 0x4db   :  { %v9935_v1 = vpop.f32.mrf.mxu0 }
 0x4dd   :  { %v13078_v6 = vpop.f32.mrf.mxu0 }
 0x4de   :  { %15293 = vst [vmem:[#allocation95_spill] sm:$0xff] %v13078_v6 }
 0x4df   :  { %v9938_v22 = vpop.f32.mrf.mxu0 }
 0x4e1   :  { %v13082_v31 = vpop.f32.mrf.mxu0 }
 0x4e2   :  { %15294 = vst [vmem:[#allocation96_spill] sm:$0xff] %v13082_v31 }
 0x4e3   :  { %v9941_v54 = vpop.f32.mrf.mxu0 }
 0x4e5   :  { %v13084_v30 = vpop.f32.mrf.mxu0 }
 0x4e7   :  { %v9944_v46 = vpop.f32.mrf.mxu0 }
 0x4e8   :  { %v15296_v46 = vld [vmem:[#allocation39_spill] sm:$0xff] }
 0x4e9   :  { %v13086_v21 = vpop.f32.mrf.mxu0 }
 0x4ea   :  { %15295 = vst [vmem:[#allocation97_spill] sm:$0xff] %v13086_v21 }
 0x4eb   :  { %v9947_v44 = vpop.f32.mrf.mxu0 }
 0x4ed   :  { %v13088_v27 = vpop.f32.mrf.mxu0 }
 0x4ef   :  { %v9950_v63 = vpop.f32.mrf.mxu0 }
 0x4f0   :  { %v15297_v63 = vld [vmem:[#allocation38_spill] sm:$0xff] }
 0x4f1   :  { %v13090_v1 = vpop.f32.mrf.mxu0 }
 0x4f3   :  { %v9953_v33 = vpop.f32.mrf.mxu0 }
 0x4f5   :  { %v8901_v6 = vpop.f32.mrf.mxu0 }
 0x4f7   :  { %v8902_v51 = vpop.f32.mrf.mxu0 }
 0x4f8   :  { %v8903_v38 = vadd.f32 %v8902_v51, %v8901_v6 }
 0x4f9   :  { %v8904_v50 = vpop.f32.mrf.mxu0 }
 0x4fa   :  { %v2739_v22 = vadd.f32 %v8903_v38, %v13038_v59  ;;  %v15298_v38 = vld [vmem:[#allocation37_spill] sm:$0xff] }
 0x4fb   :  { %v8905_v31 = vpop.f32.mrf.mxu0 }
 0x4fc   :  { %v8906_v54 = vadd.f32 %v8905_v31, %v8904_v50  ;;  %10010 = vmatmul.mubr.msk.f32.vlgmr.msra.gmra.mxu0 %vm796_vm3, %v2739_v22 }
 0x4fd   :  { %3212 = vmatpush1.msra.mxu0 %v15296_v46  ;;  %v8907_v21 = vpop.f32.mrf.mxu0  ;;  %10012 = vmatprep.mubr.msk.f32.mxu0 %vm11200_vm0, %v15202_v35 }
 0x4fe   :  { %v2744_v44 = vadd.f32 %v8906_v54, %v13040_v23  ;;  %3213 = vmatprep.subr.mxu0 %v15202_v35  ;;  %v15299_v23 = vld [vmem:[#allocation36_spill] sm:$0xff] }
 0x4ff   :  { %3214 = vmatpush1.msra.mxu0 %v15297_v63  ;;  %v8908_v51 = vpop.f32.mrf.mxu0 }
 0x500   :  { %v8909_v6 = vadd.f32 %v8908_v51, %v8907_v21  ;;  %3215 = vmatprep.subr.mxu0 %v15202_v35  ;;  %10013 = vmatmul.mubr.msk.f32.gmra.mxu0 %vm796_vm3, %v2744_v44  ;;  %v15300_v21 = vld [vmem:[#allocation35_spill] sm:$0xff] }
 0x501   :  { %3216 = vmatpush1.msra.mxu0 %v15298_v38  ;;  %v8910_v50 = vpop.f32.mrf.mxu0  ;;  %10015 = vmatprep.mubr.msk.f32.mxu0 %vm11200_vm0, %v15202_v35 }
 0x502   :  { %v2749_v59 = vadd.f32 %v8909_v6, %v13042_v47  ;;  %3217 = vmatprep.subr.mxu0 %v15202_v35  ;;  %v15301_v47 = vld [vmem:[#allocation34_spill] sm:$0xff]  ;;  %v15302_v6 = vld [vmem:[#allocation33_spill] sm:$0xff] }
 0x503   :  { %3218 = vmatpush1.msra.mxu0 %v15299_v23  ;;  %v8911_v31 = vpop.f32.mrf.mxu0 }
 0x504   :  { %v8912_v33 = vadd.f32 %v8911_v31, %v8910_v50  ;;  %3219 = vmatprep.subr.mxu0 %v15202_v35  ;;  %10016 = vmatmul.mubr.msk.f32.gmra.mxu0 %vm796_vm3, %v2749_v59 }
 0x505   :  { %3220 = vmatpush1.msra.mxu0 %v15300_v21  ;;  %v8913_v22 = vpop.f32.mrf.mxu0  ;;  %10018 = vmatprep.mubr.msk.f32.mxu0 %vm11200_vm0, %v15202_v35 }
 0x506   :  { %v2754_v54 = vadd.f32 %v8912_v33, %v13044_v3  ;;  %3221 = vmatprep.subr.mxu0 %v15202_v35  ;;  %v15303_v3 = vld [vmem:[#allocation32_spill] sm:$0xff] }
 0x507   :  { %3222 = vmatpush1.msra.mxu0 %v15301_v47  ;;  %v8914_v44 = vpop.f32.mrf.mxu0 }
 0x508   :  { %v8915_v51 = vadd.f32 %v8914_v44, %v8913_v22  ;;  %3223 = vmatprep.subr.mxu0 %v15202_v35  ;;  %10019 = vmatmul.mubr.msk.f32.gmra.mxu0 %vm796_vm3, %v2754_v54  ;;  %v15304_v22 = vld [vmem:[#allocation31_spill] sm:$0xff] }
 0x509   :  { %3224 = vmatpush1.msra.mxu0 %v15302_v6  ;;  %v8916_v50 = vpop.f32.mrf.mxu0  ;;  %10021 = vmatprep.mubr.msk.f32.mxu0 %vm11200_vm0, %v15202_v35 }
 0x50a   :  { %v2759_v59 = vadd.f32 %v8915_v51, %v13046_v13  ;;  %3225 = vmatprep.subr.mxu0 %v15202_v35  ;;  %v15305_v13 = vld [vmem:[#allocation30_spill] sm:$0xff] }
 0x50b   :  { %3226 = vmatpush1.msra.mxu0 %v15303_v3  ;;  %v8917_v31 = vpop.f32.mrf.mxu0 }
 0x50c   :  { %v8918_v33 = vadd.f32 %v8917_v31, %v8916_v50  ;;  %3227 = vmatprep.subr.mxu0 %v15202_v35  ;;  %10022 = vmatmul.mubr.msk.f32.gmra.mxu0 %vm796_vm3, %v2759_v59  ;;  %v15306_v50 = vld [vmem:[#allocation70_spill] sm:$0xff] }
 0x50d   :  { %3228 = vmatpush1.msra.mxu0 %v15304_v22  ;;  %v8919_v54 = vpop.f32.mrf.mxu0  ;;  %10024 = vmatprep.mubr.msk.f32.mxu0 %vm11200_vm0, %v15202_v35 }
 0x50e   :  { %v2764_v44 = vadd.f32 %v8918_v33, %v13048_v16  ;;  %3229 = vmatprep.subr.mxu0 %v15202_v35  ;;  %v15307_v16 = vld [vmem:[#allocation71_spill] sm:$0xff] }
 0x50f   :  { %3230 = vmatpush1.msra.mxu0 %v15305_v13  ;;  %v8920_v51 = vpop.f32.mrf.mxu0 }
 0x510   :  { %v8921_v3 = vadd.f32 %v8920_v51, %v8919_v54  ;;  %3231 = vmatprep.subr.mxu0 %v15202_v35  ;;  %10025 = vmatmul.mubr.msk.f32.gmra.mxu0 %vm796_vm3, %v2764_v44  ;;  %v15308_v54 = vld [vmem:[#allocation72_spill] sm:$0xff] }
 0x511   :  { %3232 = vmatpush1.msra.mxu0 %v15306_v50  ;;  %v8922_v59 = vpop.f32.mrf.mxu0  ;;  %10027 = vmatprep.mubr.msk.f32.mxu0 %vm11200_vm0, %v15202_v35 }
 0x512   :  { %v2769_v31 = vadd.f32 %v8921_v3, %v13050_v7  ;;  %3233 = vmatprep.subr.mxu0 %v15202_v35  ;;  %v15309_v7 = vld [vmem:[#allocation73_spill] sm:$0xff] }
 0x513   :  { %3234 = vmatpush1.msra.mxu0 %v15307_v16  ;;  %v8923_v33 = vpop.f32.mrf.mxu0 }
 0x514   :  { %v8924_v13 = vadd.f32 %v8923_v33, %v8922_v59  ;;  %3235 = vmatprep.subr.mxu0 %v15202_v35  ;;  %10028 = vmatmul.mubr.msk.f32.gmra.mxu0 %vm796_vm3, %v2769_v31  ;;  %v15310_v59 = vld [vmem:[#allocation74_spill] sm:$0xff] }
 0x515   :  { %3236 = vmatpush1.msra.mxu0 %v15308_v54  ;;  %v8925_v44 = vpop.f32.mrf.mxu0  ;;  %10030 = vmatprep.mubr.msk.f32.mxu0 %vm11200_vm0, %v15202_v35 }
 0x516   :  { %v2774_v51 = vadd.f32 %v8924_v13, %v13052_v36  ;;  %3237 = vmatprep.subr.mxu0 %v15202_v35  ;;  %v15311_v36 = vld [vmem:[#allocation75_spill] sm:$0xff] }
 0x517   :  { %3238 = vmatpush1.msra.mxu0 %v15309_v7  ;;  %v8926_v3 = vpop.f32.mrf.mxu0 }
 0x518   :  { %v8927_v16 = vadd.f32 %v8926_v3, %v8925_v44  ;;  %3239 = vmatprep.subr.mxu0 %v15202_v35  ;;  %10031 = vmatmul.mubr.msk.f32.gmra.mxu0 %vm796_vm3, %v2774_v51  ;;  %v15312_v44 = vld [vmem:[#allocation76_spill] sm:$0xff] }
 0x519   :  { %3240 = vmatpush1.msra.mxu0 %v15310_v59  ;;  %v8928_v31 = vpop.f32.mrf.mxu0  ;;  %10033 = vmatprep.mubr.msk.f32.mxu0 %vm11200_vm0, %v15202_v35 }
 0x51a   :  { %v2779_v33 = vadd.f32 %v8927_v16, %v13054_v2  ;;  %3241 = vmatprep.subr.mxu0 %v15202_v35  ;;  %v15313_v2 = vld [vmem:[#allocation77_spill] sm:$0xff] }
 0x51b   :  { %3242 = vmatpush1.msra.mxu0 %v15311_v36  ;;  %v8929_v13 = vpop.f32.mrf.mxu0 }
 0x51c   :  { %v8930_v7 = vadd.f32 %v8929_v13, %v8928_v31  ;;  %3257 = vmatprep.subr.mxu0 %v15202_v35  ;;  %10034 = vmatmul.mubr.msk.f32.gmra.mxu0 %vm796_vm3, %v2779_v33  ;;  %v15314_v31 = vld [vmem:[#allocation78_spill] sm:$0xff] }
 0x51d   :  { %3258 = vmatpush2.msra.mxu0 %v15312_v44  ;;  %v8931_v51 = vpop.f32.mrf.mxu0  ;;  %10036 = vmatprep.mubr.msk.f32.mxu0 %vm11200_vm0, %v15202_v35 }
 0x51e   :  { %v2784_v3 = vadd.f32 %v8930_v7, %v13056_v24  ;;  %3259 = vmatprep.subr.mxu0 %v15202_v35  ;;  %v15315_v24 = vld [vmem:[#allocation79_spill] sm:$0xff] }
 0x51f   :  { %3260 = vmatpush2.msra.mxu0 %v15313_v2  ;;  %v8932_v16 = vpop.f32.mrf.mxu0 }
 0x520   :  { %v8933_v36 = vadd.f32 %v8932_v16, %v8931_v51  ;;  %3261 = vmatprep.subr.mxu0 %v15202_v35  ;;  %10037 = vmatmul.mubr.msk.f32.gmra.mxu0 %vm796_vm3, %v2784_v3  ;;  %v15316_v51 = vld [vmem:[#allocation80_spill] sm:$0xff] }
 0x521   :  { %3262 = vmatpush2.msra.mxu0 %v15314_v31  ;;  %v8934_v33 = vpop.f32.mrf.mxu0  ;;  %10039 = vmatprep.mubr.msk.f32.mxu0 %vm11200_vm0, %v15202_v35 }
 0x522   :  { %v2789_v13 = vadd.f32 %v8933_v36, %v13058_v4  ;;  %3263 = vmatprep.subr.mxu0 %v15202_v35  ;;  %v15317_v4 = vld [vmem:[#allocation81_spill] sm:$0xff] }
 0x523   :  { %3264 = vmatpush2.msra.mxu0 %v15315_v24  ;;  %v8935_v7 = vpop.f32.mrf.mxu0 }
 0x524   :  { %v8936_v2 = vadd.f32 %v8935_v7, %v8934_v33  ;;  %3265 = vmatprep.subr.mxu0 %v15202_v35  ;;  %10040 = vmatmul.mubr.msk.f32.gmra.mxu0 %vm796_vm3, %v2789_v13  ;;  %v15318_v33 = vld [vmem:[#allocation82_spill] sm:$0xff]  ;;  %v15320_v7 = vld [vmem:[#allocation84_spill] sm:$0xff] }
 0x525   :  { %3266 = vmatpush2.msra.mxu0 %v15316_v51  ;;  %v8937_v3 = vpop.f32.mrf.mxu0  ;;  %10042 = vmatprep.mubr.msk.f32.mxu0 %vm11200_vm0, %v15202_v35 }
 0x526   :  { %v2794_v16 = vadd.f32 %v8936_v2, %v13060_v61  ;;  %3267 = vmatprep.subr.mxu0 %v15202_v35  ;;  %v2993_v61 = vld [vmem:[#allocation7 + $0x4f8] sm:$0xff]  ;;  %v15319_v2 = vld [vmem:[#allocation83_spill] sm:$0xff] }
 0x527   :  { %3268 = vmatpush2.msra.mxu0 %v15317_v4  ;;  %v8938_v36 = vpop.f32.mrf.mxu0 }
 0x528   :  { %v8939_v24 = vadd.f32 %v8938_v36, %v8937_v3  ;;  %3269 = vmatprep.subr.mxu0 %v15202_v35  ;;  %10043 = vmatmul.mubr.msk.f32.gmra.mxu0 %vm796_vm3, %v2794_v16  ;;  %v2992_v3 = vld [vmem:[#allocation7 + $0x4f0] sm:$0xff]  ;;  %v15321_v16 = vld [vmem:[#allocation46_spill] sm:$0xff]  ;;  %v2997_v36 = vld [vmem:[#allocation7 + $0x518] sm:$0xff] }
 0x529   :  { %3270 = vmatpush2.msra.mxu0 %v15318_v33  ;;  %10045 = vmatprep.mubr.msk.f32.mxu0 %vm11200_vm0, %v15202_v35 }
 0x52a   :  { %v2799_v13 = vadd.f32 %v8939_v24, %v13062_v26  ;;  %3271 = vmatprep.subr.mxu0 %v15202_v35  ;;  %v2996_v26 = vld [vmem:[#allocation7 + $0x510] sm:$0xff]  ;;  %v3001_v24 = vld [vmem:[#allocation7 + $0x538] sm:$0xff] }
 0x52b   :  { %3272 = vmatpush2.msra.mxu0 %v15319_v2 }
 0x52c   :  { %3273 = vmatprep.subr.mxu0 %v15202_v35  ;;  %10046 = vmatmul.mubr.msk.f32.gmra.mxu0 %vm796_vm3, %v2799_v13  ;;  %v3000_v13 = vld [vmem:[#allocation7 + $0x530] sm:$0xff] }
 0x52d   :  { %3274 = vmatpush2.msra.mxu0 %v15320_v7  ;;  %8422 = vmatprep.mubr.msk.f32.mxu0 %vm1451_vm5, %v2993_v61  ;;  %v3005_v61 = vld [vmem:[#allocation7 + $0x558] sm:$0xff] }
 0x52e   :  { %9045 = vmatprep.subr.mxu0 %v15321_v16 }
 0x530   :  { %3276 = vmatmul.mubr.f32.vlgmr.msra.gmra.mxu0 %v2992_v3  ;;  %v3004_v3 = vld [vmem:[#allocation7 + $0x550] sm:$0xff] }
 0x531   :  { %9046 = vmatpush3.msra.mxu0 %v12227_v12  ;;  %8423 = vmatprep.mubr.msk.f32.mxu0 %vm1451_vm5, %v2997_v36  ;;  %v3009_v36 = vld [vmem:[#allocation7 + $0x578] sm:$0xff] }
 0x532   :  { %9047 = vmatprep.subr.mxu0 %v12243_v10 }
 0x533   :  { %9048 = vmatpush3.msra.mxu0 %v15244_v56 }
 0x534   :  { %9049 = vmatprep.subr.mxu0 %v15245_v14  ;;  %3281 = vmatmul.mubr.f32.gmra.mxu0 %v2996_v26  ;;  %v3008_v26 = vld [vmem:[#allocation7 + $0x570] sm:$0xff] }
 0x535   :  { %9050 = vmatpush3.msra.mxu0 %v15246_v49  ;;  %8424 = vmatprep.mubr.msk.f32.mxu0 %vm1451_vm5, %v3001_v24  ;;  %v3013_v24 = vld [vmem:[#allocation7 + $0x598] sm:$0xff] }
 0x536   :  { %9051 = vmatprep.subr.mxu0 %v15247_v32 }
 0x537   :  { %9052 = vmatpush3.msra.mxu0 %v15248_v8 }
 0x538   :  { %9053 = vmatprep.subr.mxu0 %v15249_v60  ;;  %3286 = vmatmul.mubr.f32.gmra.mxu0 %v3000_v13  ;;  %v3012_v13 = vld [vmem:[#allocation7 + $0x590] sm:$0xff] }
 0x539   :  { %9054 = vmatpush3.msra.mxu0 %v15250_v41  ;;  %8425 = vmatprep.mubr.msk.f32.mxu0 %vm1451_vm5, %v3005_v61  ;;  %v3017_v61 = vld [vmem:[#allocation7 + $0x5b8] sm:$0xff] }
 0x53a   :  { %9055 = vmatprep.subr.mxu0 %v15251_v20 }
 0x53b   :  { %9056 = vmatpush3.msra.mxu0 %v15252_v37 }
 0x53c   :  { %9057 = vmatprep.subr.mxu0 %v15253_v34  ;;  %3291 = vmatmul.mubr.f32.gmra.mxu0 %v3004_v3  ;;  %v3016_v3 = vld [vmem:[#allocation7 + $0x5b0] sm:$0xff] }
 0x53d   :  { %9058 = vmatpush3.msra.mxu0 %v15254_v15  ;;  %8426 = vmatprep.mubr.msk.f32.mxu0 %vm1451_vm5, %v3009_v36  ;;  %v3021_v36 = vld [vmem:[#allocation7 + $0x5d8] sm:$0xff] }
 0x53e   :  { %9059 = vmatprep.subr.mxu0 %v15255_v45 }
 0x53f   :  { %9060 = vmatpush3.msra.mxu0 %v15256_v11 }
 0x540   :  { %9061 = vmatprep.subr.mxu0 %v15257_v58  ;;  %3296 = vmatmul.mubr.f32.gmra.mxu0 %v3008_v26  ;;  %v3020_v26 = vld [vmem:[#allocation7 + $0x5d0] sm:$0xff] }
 0x541   :  { %9062 = vmatpush3.msra.mxu0 %v15258_v29  ;;  %8427 = vmatprep.mubr.msk.f32.mxu0 %vm1451_vm5, %v3013_v24  ;;  %v3025_v24 = vld [vmem:[#allocation7 + $0x5f8] sm:$0xff] }
 0x542   :  { %9063 = vmatprep.subr.mxu0 %v15259_v62 }
 0x543   :  { %9064 = vmatpush3.msra.mxu0 %v15260_v40  ;;  %v15337_v40 = vld [vmem:[#allocation29_spill] sm:$0xff] }
 0x544   :  { %9065 = vmatprep.subr.mxu0 %v15261_v25  ;;  %3301 = vmatmul.mubr.f32.gmra.mxu0 %v3012_v13  ;;  %v3024_v13 = vld [vmem:[#allocation7 + $0x5f0] sm:$0xff]  ;;  %v15334_v25 = vld [vmem:[#allocation50_spill] sm:$0xff] }
 0x545   :  { %9066 = vmatpush3.msra.mxu0 %v15262_v0  ;;  %8428 = vmatprep.mubr.msk.f32.mxu0 %vm1451_vm5, %v3017_v61  ;;  %v3029_v61 = vld [vmem:[#allocation7 + $0x618] sm:$0xff]  ;;  %v15331_v0 = vld [vmem:[#allocation49_spill] sm:$0xff] }
 0x546   :  { %9067 = vmatprep.subr.mxu0 %v15263_v18  ;;  %v15328_v18 = vld [vmem:[#allocation48_spill] sm:$0xff] }
 0x547   :  { %9068 = vmatpush3.msra.mxu0 %v15264_v5  ;;  %v15325_v5 = vld [vmem:[#allocation47_spill] sm:$0xff] }
 0x548   :  { %9069 = vmatprep.subr.mxu0 %v15265_v57  ;;  %3306 = vmatmul.mubr.f32.gmra.mxu0 %v3016_v3  ;;  %v3028_v3 = vld [vmem:[#allocation7 + $0x610] sm:$0xff] }
 0x549   :  { %9070 = vmatpush3.msra.mxu0 %v15266_v39  ;;  %8429 = vmatprep.mubr.msk.f32.mxu0 %vm1451_vm5, %v3021_v36  ;;  %v3033_v36 = vld [vmem:[#allocation7 + $0x638] sm:$0xff]  ;;  %v3562_v39 = vld [vmem:[#allocation7 + $0x788] sm:$0xff] }
 0x54a   :  { %9071 = vmatprep.subr.mxu0 %v15267_v53 }
 0x54b   :  { %9072 = vmatpush3.msra.mxu0 %v15268_v17  ;;  %v3550_v17 = vld [vmem:[#allocation7 + $0x728] sm:$0xff] }
 0x54c   :  { %9073 = vmatprep.subr.mxu0 %v15269_v55  ;;  %3311 = vmatmul.mubr.f32.gmra.mxu0 %v3020_v26  ;;  %v3032_v26 = vld [vmem:[#allocation7 + $0x630] sm:$0xff]  ;;  %v3041_v55 = vld [vmem:[#allocation7 + $0x678] sm:$0xff] }
 0x54d   :  { %9074 = vmatpush3.msra.mxu0 %v15270_v42  ;;  %8430 = vmatprep.mubr.msk.f32.mxu0 %vm1451_vm5, %v3025_v24  ;;  %v3037_v42 = vld [vmem:[#allocation7 + $0x658] sm:$0xff]  ;;  %v3036_v24 = vld [vmem:[#allocation7 + $0x650] sm:$0xff] }
 0x54e   :  { %9075 = vmatprep.subr.mxu0 %v15271_v19  ;;  %v3345_v19 = vld [vmem:[#allocation9 + $0x78] sm:$0xff] }
 0x54f   :  { %9076 = vmatpush3.msra.mxu0 %v15272_v52  ;;  %10049 = vmatpush3.msra.mxu1 %v3345_v19  ;;  %v3530_v19 = vld [vmem:[#allocation7 + $0x688] sm:$0xff] }
 0x550   :  { %3316 = vmatmul.mubr.f32.gmra.mxu0 %v3024_v13  ;;  %10095 = vmatprep.subr.mxu0 %v15202_v35  ;;  %v3040_v13 = vld [vmem:[#allocation7 + $0x670] sm:$0xff]  ;;  %v3546_v52 = vld [vmem:[#allocation7 + $0x708] sm:$0xff] }
 0x551   :  { %8431 = vmatprep.mubr.msk.f32.mxu0 %vm1451_vm5, %v3029_v61  ;;  %10050 = vmatprep.subr.mxu1 %v15202_v35  ;;  %v3344_v61 = vld [vmem:[#allocation9 + $0x70] sm:$0xff] }
 0x552   :  { %10051 = vmatpush3.msra.mxu1 %v3344_v61  ;;  %v3542_v61 = vld [vmem:[#allocation7 + $0x6e8] sm:$0xff] }
 0x553   :  { %10052 = vmatprep.subr.mxu1 %v15202_v35 }
 0x554   :  { %3321 = vmatmul.mubr.f32.gmra.mxu0 %v3028_v3  ;;  %v3343_v3 = vld [vmem:[#allocation9 + $0x68] sm:$0xff] }
 0x555   :  { %8432 = vmatprep.mubr.msk.f32.mxu0 %vm1451_vm5, %v3033_v36  ;;  %10053 = vmatpush3.msra.mxu1 %v3343_v3  ;;  %v3529_v36 = vld [vmem:[#allocation7 + $0x680] sm:$0xff] }
 0x556   :  { %10054 = vmatprep.subr.mxu1 %v15202_v35  ;;  %v3541_v3 = vld [vmem:[#allocation7 + $0x6e0] sm:$0xff] }
 0x558   :  { %3326 = vmatmul.mubr.f32.gmra.mxu0 %v3032_v26  ;;  %v3534_v26 = vld [vmem:[#allocation7 + $0x6a8] sm:$0xff] }
 0x559   :  { %8433 = vmatprep.mubr.msk.f32.mxu0 %vm1451_vm5, %v3037_v42  ;;  %v3342_v42 = vld [vmem:[#allocation9 + $0x60] sm:$0xff] }
 0x55a   :  { %10055 = vmatpush3.msra.mxu1 %v3342_v42  ;;  %v3545_v42 = vld [vmem:[#allocation7 + $0x700] sm:$0xff] }
 0x55b   :  { %3750 = vmatprep.subr.mxu1 %v15202_v35 }
 0x55c   :  { %3331 = vmatmul.mubr.f32.gmra.mxu0 %v3036_v24  ;;  %v3538_v24 = vld [vmem:[#allocation7 + $0x6c8] sm:$0xff] }
 0x55d   :  { %8434 = vmatprep.mubr.msk.f32.mxu0 %vm1451_vm5, %v3041_v55  ;;  %v3533_v55 = vld [vmem:[#allocation7 + $0x6a0] sm:$0xff] }
 0x560   :  { %3336 = vmatmul.mubr.f32.gmra.mxu0 %v3040_v13  ;;  %v3537_v13 = vld [vmem:[#allocation7 + $0x6c0] sm:$0xff] }
 0x561   :  { %3684 = vmatprep.mubr.f32.mxu0 %v3530_v19  ;;  %v3549_v19 = vld [vmem:[#allocation7 + $0x720] sm:$0xff] }
 0x564   :  { %3685 = vmatmul.mubr.f32.vlgmr.msra.gmra.mxu0 %v3529_v36  ;;  %v13241_v36 = vpop.f32.mrf.mxu1 }
 0x565   :  { %3689 = vmatprep.mubr.f32.mxu0 %v3534_v26  ;;  %v3554_v26 = vld [vmem:[#allocation7 + $0x748] sm:$0xff] }
 0x568   :  { %3690 = vmatmul.mubr.f32.gmra.mxu0 %v3533_v55  ;;  %v3553_v55 = vld [vmem:[#allocation7 + $0x740] sm:$0xff] }
 0x569   :  { %3694 = vmatprep.mubr.f32.mxu0 %v3538_v24  ;;  %v2387_v24 = vadd.f32 %v13006_v28, %v13064_v43  ;;  %v3561_v28 = vld [vmem:[#allocation7 + $0x780] sm:$0xff] }
 0x56c   :  { %3695 = vmatmul.mubr.f32.gmra.mxu0 %v3537_v13 }
 0x56d   :  { %3699 = vmatprep.mubr.f32.mxu0 %v3542_v61  ;;  %v13245_v61 = vpop.f32.mrf.mxu1 }
 0x570   :  { %3700 = vmatmul.mubr.f32.gmra.mxu0 %v3541_v3  ;;  %v3558_v3 = vld [vmem:[#allocation7 + $0x768] sm:$0xff] }
 0x571   :  { %3704 = vmatprep.mubr.f32.mxu0 %v3546_v52 }
 0x574   :  { %3705 = vmatmul.mubr.f32.gmra.mxu0 %v3545_v42  ;;  %v3557_v42 = vld [vmem:[#allocation7 + $0x760] sm:$0xff] }
 0x575   :  { %3709 = vmatprep.mubr.f32.mxu0 %v3550_v17 }
 0x578   :  { %3710 = vmatmul.mubr.f32.gmra.mxu0 %v3549_v19  ;;  %v2392_v19 = vadd.f32 %v13008_v9, %v13066_v48  ;;  %v3565_v9 = vld [vmem:[#allocation7 + $0x7a0] sm:$0xff] }
 0x579   :  { %3714 = vmatprep.mubr.f32.mxu0 %v3554_v26  ;;  %v13251_v26 = vpop.f32.mrf.mxu1 }
 0x57c   :  { %3715 = vmatmul.mubr.f32.gmra.mxu0 %v3553_v55  ;;  %v15324_v55 = vld [vmem:[#allocation90_spill] sm:$0xff] }
 0x57d   :  { %3719 = vmatprep.mubr.f32.mxu0 %v3558_v3  ;;  %v13257_v3 = vpop.f32.mrf.mxu1 }
 0x580   :  { %3720 = vmatmul.mubr.f32.gmra.mxu0 %v3557_v42  ;;  %v15327_v42 = vld [vmem:[#allocation91_spill] sm:$0xff] }
 0x581   :  { %3724 = vmatprep.mubr.f32.mxu0 %v3562_v39  ;;  %v3570_v39 = vld [vmem:[#allocation7 + $0x7c8] sm:$0xff] }
 0x584   :  { %3725 = vmatmul.mubr.f32.gmra.mxu0 %v3561_v28 }
 0x5bc   :  { %v2912_v13 = vpop.f32.mrf.mxu0 }
 0x5bd   :  { %v13247_v52 = vadd.f32 %v2912_v13, %v2387_v24  ;;  %v2397_v24 = vadd.f32 %v15325_v5, %v15324_v55  ;;  %v3569_v5 = vld [vmem:[#allocation7 + $0x7c0] sm:$0xff] }
 0x5be   :  { %v10011_v17 = vpop.f32.mrf.mxu0 }
 0x5bf   :  { %15322 = vst [vmem:[#allocation39_spill] sm:$0xff] %v13247_v52  ;;  %v3566_v17 = vld [vmem:[#allocation7 + $0x7a8] sm:$0xff] }
 0x5c0   :  { %v2917_v53 = vpop.f32.mrf.mxu0  ;;  %3729 = vmatprep.mubr.f32.mxu0 %v3566_v17 }
 0x5c1   :  { %v13253_v57 = vadd.f32 %v2917_v53, %v2392_v19  ;;  %v2402_v53 = vadd.f32 %v15328_v18, %v15327_v42  ;;  %3730 = vmatmul.mubr.f32.gmra.mxu0 %v3565_v9  ;;  %v3573_v18 = vld [vmem:[#allocation7 + $0x7e0] sm:$0xff] }
 0x5c2   :  { %v10014_v43 = vpop.f32.mrf.mxu0  ;;  %3734 = vmatprep.mubr.f32.mxu0 %v3570_v39 }
 0x5c3   :  { %15323 = vst [vmem:[#allocation38_spill] sm:$0xff] %v13253_v57  ;;  %v13263_v43 = vpop.f32.mrf.mxu1  ;;  %v15330_v57 = vld [vmem:[#allocation92_spill] sm:$0xff] }
 0x5c4   :  { %v2922_v13 = vpop.f32.mrf.mxu0 }
 0x5c5   :  { %v13259_v52 = vadd.f32 %v2922_v13, %v2397_v24  ;;  %v2407_v24 = vadd.f32 %v15331_v0, %v15330_v57  ;;  %3735 = vmatmul.mubr.f32.gmra.mxu0 %v3569_v5  ;;  %v3574_v13 = vld [vmem:[#allocation7 + $0x7e8] sm:$0xff]  ;;  %v3577_v57 = vld [vmem:[#allocation7 + $0x800] sm:$0xff] }
 0x5c6   :  { %v10017_v48 = vpop.f32.mrf.mxu0  ;;  %3739 = vmatprep.mubr.f32.mxu0 %v3574_v13 }
 0x5c7   :  { %15326 = vst [vmem:[#allocation37_spill] sm:$0xff] %v13259_v52  ;;  %v13269_v48 = vpop.f32.mrf.mxu1  ;;  %v15333_v52 = vld [vmem:[#allocation93_spill] sm:$0xff] }
 0x5c8   :  { %v2927_v19 = vpop.f32.mrf.mxu0  ;;  %v2412_v39 = vadd.f32 %v15334_v25, %v15333_v52 }
 0x5c9   :  { %v13265_v28 = vadd.f32 %v2927_v19, %v2402_v53  ;;  %3740 = vmatmul.mubr.f32.gmra.mxu0 %v3573_v18  ;;  %v3578_v53 = vld [vmem:[#allocation7 + $0x808] sm:$0xff]  ;;  %v15339_v18 = vld [vmem:[#allocation95_spill] sm:$0xff] }
 0x5ca   :  { %v10020_v55 = vpop.f32.mrf.mxu0  ;;  %3744 = vmatprep.mubr.f32.mxu0 %v3578_v53 }
 0x5cb   :  { %15329 = vst [vmem:[#allocation36_spill] sm:$0xff] %v13265_v28  ;;  %v13275_v55 = vpop.f32.mrf.mxu1  ;;  %v15336_v28 = vld [vmem:[#allocation94_spill] sm:$0xff] }
 0x5cc   :  { %v2932_v17 = vpop.f32.mrf.mxu0  ;;  %v2417_v13 = vadd.f32 %v15337_v40, %v15336_v28  ;;  %v15343_v40 = vld [vmem:[#allocation85_spill] sm:$0xff] }
 0x5cd   :  { %v13271_v9 = vadd.f32 %v2932_v17, %v2407_v24  ;;  %3745 = vmatmul.mubr.f32.gmra.mxu0 %v3577_v57  ;;  %v8999_v17 = vpop.f32.mrf.mxu1 }
 0x5ce   :  { %v10023_v42 = vpop.f32.mrf.mxu0  ;;  %10103 = vmatprep.mubr.msk.f32.mxu0 %vm11200_vm0, %v15202_v35 }
 0x5cf   :  { %15332 = vst [vmem:[#allocation35_spill] sm:$0xff] %v13271_v9  ;;  %v15340_v42 = vld [vmem:[#allocation44_spill] sm:$0xff]  ;;  %v13287_v62 = vpop.f32.mrf.mxu1 }
 0x5d0   :  { %v2937_v19 = vpop.f32.mrf.mxu0  ;;  %v2422_v9 = vadd.f32 %v15340_v42, %v15339_v18 }
 0x5d1   :  { %v13277_v0 = vadd.f32 %v2937_v19, %v2412_v39 }
 0x5d2   :  { %v10026_v5 = vpop.f32.mrf.mxu0 }
 0x5d3   :  { %15335 = vst [vmem:[#allocation34_spill] sm:$0xff] %v13277_v0  ;;  %v15342_v5 = vld [vmem:[#allocation96_spill] sm:$0xff]  ;;  %v9002_v0 = vpop.f32.mrf.mxu1 }
 0x5d4   :  { %v2942_v24 = vpop.f32.mrf.mxu0  ;;  %v2427_v28 = vadd.f32 %v15343_v40, %v15342_v5 }
 0x5d5   :  { %v13283_v25 = vadd.f32 %v2942_v24, %v2417_v13  ;;  %v15345_v13 = vld [vmem:[#allocation86_spill] sm:$0xff] }
 0x5d6   :  { %v10029_v52 = vpop.f32.mrf.mxu0  ;;  %v2432_v24 = vadd.f32 %v15345_v13, %v13084_v30 }
 0x5d7   :  { %15338 = vst [vmem:[#allocation33_spill] sm:$0xff] %v13283_v25  ;;  %v13297_v25 = vpop.f32.mrf.mxu1 }
 0x5d8   :  { %v2947_v53 = vpop.f32.mrf.mxu0 }
 0x5d9   :  { %v13289_v39 = vadd.f32 %v2947_v53, %v2422_v9  ;;  %v15347_v9 = vld [vmem:[#allocation97_spill] sm:$0xff]  ;;  %v15348_v53 = vld [vmem:[#allocation87_spill] sm:$0xff]  ;;  %v9005_v11 = vpop.f32.mrf.mxu1 }
 0x5da   :  { %v10032_v19 = vpop.f32.mrf.mxu0 }
 0x5db   :  { %15341 = vst [vmem:[#allocation31_spill] sm:$0xff] %v13289_v39  ;;  %v2437_v19 = vadd.f32 %v15348_v53, %v15347_v9 }
 0x5dc   :  { %v2952_v57 = vpop.f32.mrf.mxu0 }
 0x5dd   :  { %v13293_v29 = vadd.f32 %v2952_v57, %v2427_v28  ;;  %v15349_v28 = vld [vmem:[#allocation88_spill] sm:$0xff] }
 0x5de   :  { %v10035_v58 = vpop.f32.mrf.mxu0 }
 0x5df   :  { %15344 = vst [vmem:[#allocation70_spill] sm:$0xff] %v13293_v29  ;;  %v2442_v58 = vadd.f32 %v15349_v28, %v13088_v27  ;;  %v13307_v29 = vpop.f32.mrf.mxu1 }
 0x5e0   :  { %v2957_v52 = vpop.f32.mrf.mxu0 }
 0x5e1   :  { %v13299_v18 = vadd.f32 %v2957_v52, %v2432_v24  ;;  %v15350_v24 = vld [vmem:[#allocation89_spill] sm:$0xff] }
 0x5e2   :  { %v10038_v42 = vpop.f32.mrf.mxu0  ;;  %v2447_v52 = vadd.f32 %v15350_v24, %v13090_v1 }
 0x5e3   :  { %15346 = vst [vmem:[#allocation72_spill] sm:$0xff] %v13299_v18  ;;  %v9008_v18 = vpop.f32.mrf.mxu1 }
 0x5e4   :  { %v2962_v39 = vpop.f32.mrf.mxu0 }
 0x5e5   :  { %v13303_v5 = vadd.f32 %v2962_v39, %v2437_v19  ;;  %v8991_v39 = vadd.f32 %v13245_v61, %v13241_v36  ;;  %v8997_v61 = vadd.f32 %v13269_v48, %v13263_v43 }
 0x5e6   :  { %v10041_v40 = vpop.f32.mrf.mxu0 }
 0x5e7   :  { %v13317_v40 = vpop.f32.mrf.mxu1 }
 0x5e8   :  { %v2967_v57 = vpop.f32.mrf.mxu0 }
 0x5e9   :  { %v13309_v30 = vadd.f32 %v2967_v57, %v2442_v58  ;;  %v8994_v58 = vadd.f32 %v13257_v3, %v13251_v26  ;;  %v9011_v57 = vpop.f32.mrf.mxu1 }
 0x5ea   :  { %v10044_v13 = vpop.f32.mrf.mxu0 }
 0x5eb   :  { %v9013_v3 = vpop.f32.mrf.mxu1 }
 0x5ec   :  { %v2972_v42 = vpop.f32.mrf.mxu0 }
 0x5ed   :  { %v13313_v9 = vadd.f32 %v2972_v42, %v2447_v52  ;;  %v9000_v42 = vadd.f32 %v8999_v17, %v13275_v55  ;;  %v9014_v48 = vpop.f32.mrf.mxu1 }
 0x5ee   :  { %v10047_v53 = vpop.f32.mrf.mxu0 }
 0x5ef   :  { %v9016_v17 = vpop.f32.mrf.mxu1 }
 0x5f0   :  { %v3277_v19 = vpop.f32.mrf.mxu0 }
 0x5f1   :  { %v3278_v27 = vadd.f32 %v8991_v39, %v3277_v19  ;;  %v9003_v19 = vadd.f32 %v9002_v0, %v13287_v62  ;;  %v9017_v0 = vpop.f32.mrf.mxu1 }
 0x5f2   :  { %v3279_v28 = vpop.f32.mrf.mxu0 }
 0x5f3   :  { %10057 = vmatmul.mubr.msk.f32.vlgmr.msra.gmra.mxu1 %vm796_vm3, %v3278_v27  ;;  %v15351_v28 = vld [vmem:[#allocation32_spill] sm:$0xff] }
 0x5f4   :  { %3751 = vmatpush1.msra.mxu1 %v15296_v46  ;;  %v3282_v1 = vpop.f32.mrf.mxu0  ;;  %10059 = vmatprep.mubr.msk.f32.mxu1 %vm11200_vm0, %v15202_v35 }
 0x5f5   :  { %v3283_v13 = vadd.f32 %v8994_v58, %v3282_v1  ;;  %3752 = vmatprep.subr.mxu1 %v15202_v35  ;;  %v9006_v1 = vadd.f32 %v9005_v11, %v13297_v25  ;;  %v9019_v25 = vpop.f32.mrf.mxu1 }
 0x5f6   :  { %3753 = vmatpush1.msra.mxu1 %v15297_v63  ;;  %v3284_v36 = vpop.f32.mrf.mxu0 }
 0x5f7   :  { %3754 = vmatprep.subr.mxu1 %v15202_v35  ;;  %10060 = vmatmul.mubr.msk.f32.gmra.mxu1 %vm796_vm3, %v3283_v13  ;;  %v15352_v36 = vld [vmem:[#allocation30_spill] sm:$0xff] }
 0x5f8   :  { %3755 = vmatpush1.msra.mxu1 %v15298_v38  ;;  %v3287_v26 = vpop.f32.mrf.mxu0  ;;  %10062 = vmatprep.mubr.msk.f32.mxu1 %vm11200_vm0, %v15202_v35 }
 0x5f9   :  { %v3288_v24 = vadd.f32 %v8997_v61, %v3287_v26  ;;  %3756 = vmatprep.subr.mxu1 %v15202_v35  ;;  %v9009_v26 = vadd.f32 %v9008_v18, %v13307_v29  ;;  %v9020_v18 = vpop.f32.mrf.mxu1 }
 0x5fa   :  { %3757 = vmatpush1.msra.mxu1 %v15299_v23  ;;  %v3289_v52 = vpop.f32.mrf.mxu0 }
 0x5fb   :  { %3758 = vmatprep.subr.mxu1 %v15202_v35  ;;  %10063 = vmatmul.mubr.msk.f32.gmra.mxu1 %vm796_vm3, %v3288_v24  ;;  %v15353_v52 = vld [vmem:[#allocation71_spill] sm:$0xff] }
 0x5fc   :  { %3759 = vmatpush1.msra.mxu1 %v15300_v21  ;;  %v3292_v43 = vpop.f32.mrf.mxu0  ;;  %10065 = vmatprep.mubr.msk.f32.mxu1 %vm11200_vm0, %v15202_v35 }
 0x5fd   :  { %v3293_v53 = vadd.f32 %v9000_v42, %v3292_v43  ;;  %3760 = vmatprep.subr.mxu1 %v15202_v35  ;;  %v9012_v43 = vadd.f32 %v9011_v57, %v13317_v40  ;;  %v9022_v57 = vpop.f32.mrf.mxu1 }
 0x5fe   :  { %3761 = vmatpush1.msra.mxu1 %v15301_v47  ;;  %v3294_v39 = vpop.f32.mrf.mxu0 }
 0x5ff   :  { %3762 = vmatprep.subr.mxu1 %v15202_v35  ;;  %10066 = vmatmul.mubr.msk.f32.gmra.mxu1 %vm796_vm3, %v3293_v53  ;;  %v15354_v39 = vld [vmem:[#allocation73_spill] sm:$0xff] }
 0x600   :  { %3763 = vmatpush1.msra.mxu1 %v15302_v6  ;;  %v3297_v55 = vpop.f32.mrf.mxu0  ;;  %10068 = vmatprep.mubr.msk.f32.mxu1 %vm11200_vm0, %v15202_v35 }
 0x601   :  { %v3298_v27 = vadd.f32 %v9003_v19, %v3297_v55  ;;  %3764 = vmatprep.subr.mxu1 %v15202_v35  ;;  %v9015_v55 = vadd.f32 %v9014_v48, %v9013_v3  ;;  %v9023_v48 = vpop.f32.mrf.mxu1 }
 0x602   :  { %3765 = vmatpush1.msra.mxu1 %v15351_v28  ;;  %v3299_v58 = vpop.f32.mrf.mxu0 }
 0x603   :  { %3766 = vmatprep.subr.mxu1 %v15202_v35  ;;  %10069 = vmatmul.mubr.msk.f32.gmra.mxu1 %vm796_vm3, %v3298_v27  ;;  %v15355_v58 = vld [vmem:[#allocation75_spill] sm:$0xff] }
 0x604   :  { %3767 = vmatpush1.msra.mxu1 %v15304_v22  ;;  %v3302_v62 = vpop.f32.mrf.mxu0  ;;  %10071 = vmatprep.mubr.msk.f32.mxu1 %vm11200_vm0, %v15202_v35 }
 0x605   :  { %v3303_v13 = vadd.f32 %v9006_v1, %v3302_v62  ;;  %3768 = vmatprep.subr.mxu1 %v15202_v35  ;;  %v9018_v62 = vadd.f32 %v9017_v0, %v9016_v17  ;;  %v9025_v0 = vpop.f32.mrf.mxu1 }
 0x606   :  { %3769 = vmatpush1.msra.mxu1 %v15352_v36  ;;  %v3304_v61 = vpop.f32.mrf.mxu0 }
 0x607   :  { %3770 = vmatprep.subr.mxu1 %v15202_v35  ;;  %10072 = vmatmul.mubr.msk.f32.gmra.mxu1 %vm796_vm3, %v3303_v13  ;;  %v15356_v61 = vld [vmem:[#allocation77_spill] sm:$0xff] }
 0x608   :  { %3771 = vmatpush1.msra.mxu1 %v15306_v50  ;;  %v3307_v11 = vpop.f32.mrf.mxu0  ;;  %10074 = vmatprep.mubr.msk.f32.mxu1 %vm11200_vm0, %v15202_v35 }
 0x609   :  { %v3308_v24 = vadd.f32 %v9009_v26, %v3307_v11  ;;  %3772 = vmatprep.subr.mxu1 %v15202_v35  ;;  %v9021_v11 = vadd.f32 %v9020_v18, %v9019_v25  ;;  %v9026_v25 = vpop.f32.mrf.mxu1 }
 0x60a   :  { %3773 = vmatpush1.msra.mxu1 %v15353_v52  ;;  %v3309_v42 = vpop.f32.mrf.mxu0 }
 0x60b   :  { %3774 = vmatprep.subr.mxu1 %v15202_v35  ;;  %10075 = vmatmul.mubr.msk.f32.gmra.mxu1 %vm796_vm3, %v3308_v24  ;;  %v15357_v42 = vld [vmem:[#allocation79_spill] sm:$0xff] }
 0x60c   :  { %3775 = vmatpush1.msra.mxu1 %v15308_v54  ;;  %v3312_v29 = vpop.f32.mrf.mxu0  ;;  %10077 = vmatprep.mubr.msk.f32.mxu1 %vm11200_vm0, %v15202_v35 }
 0x60d   :  { %v3313_v53 = vadd.f32 %v9012_v43, %v3312_v29  ;;  %3776 = vmatprep.subr.mxu1 %v15202_v35  ;;  %v9024_v29 = vadd.f32 %v9023_v48, %v9022_v57  ;;  %v3535_v48 = vld [vmem:[#allocation7 + $0x6b0] sm:$0xff] }
 0x60e   :  { %3777 = vmatpush1.msra.mxu1 %v15354_v39  ;;  %v3314_v19 = vpop.f32.mrf.mxu0 }
 0x60f   :  { %3778 = vmatprep.subr.mxu1 %v15202_v35  ;;  %10078 = vmatmul.mubr.msk.f32.gmra.mxu1 %vm796_vm3, %v3313_v53 }
 0x610   :  { %3779 = vmatpush1.msra.mxu1 %v15310_v59  ;;  %v3317_v40 = vpop.f32.mrf.mxu0  ;;  %10080 = vmatprep.mubr.msk.f32.mxu1 %vm11200_vm0, %v15202_v35 }
 0x611   :  { %v3318_v27 = vadd.f32 %v9015_v55, %v3317_v40  ;;  %3780 = vmatprep.subr.mxu1 %v15202_v35  ;;  %v9027_v55 = vadd.f32 %v9026_v25, %v9025_v0  ;;  %v3548_v0 = vld [vmem:[#allocation7 + $0x718] sm:$0xff]  ;;  %v15359_v25 = vld [vmem:[#allocation58_spill] sm:$0xff] }
 0x612   :  { %3781 = vmatpush1.msra.mxu1 %v15355_v58  ;;  %v3319_v1 = vpop.f32.mrf.mxu0 }
 0x613   :  { %3796 = vmatprep.subr.mxu1 %v15202_v35  ;;  %10081 = vmatmul.mubr.msk.f32.gmra.mxu1 %vm796_vm3, %v3318_v27  ;;  %v3532_v27 = vld [vmem:[#allocation7 + $0x698] sm:$0xff] }
 0x614   :  { %3797 = vmatpush2.msra.mxu1 %v15312_v44  ;;  %v3322_v3 = vpop.f32.mrf.mxu0  ;;  %10083 = vmatprep.mubr.msk.f32.mxu1 %vm11200_vm0, %v15202_v35 }
 0x615   :  { %v3323_v13 = vadd.f32 %v9018_v62, %v3322_v3  ;;  %3798 = vmatprep.subr.mxu1 %v15202_v35  ;;  %v3531_v62 = vld [vmem:[#allocation7 + $0x690] sm:$0xff]  ;;  %v3536_v3 = vld [vmem:[#allocation7 + $0x6b8] sm:$0xff] }
 0x616   :  { %3799 = vmatpush2.msra.mxu1 %v15356_v61  ;;  %v3324_v26 = vpop.f32.mrf.mxu0 }
 0x617   :  { %3800 = vmatprep.subr.mxu1 %v15202_v35  ;;  %10084 = vmatmul.mubr.msk.f32.gmra.mxu1 %vm796_vm3, %v3323_v13  ;;  %v3540_v13 = vld [vmem:[#allocation7 + $0x6d8] sm:$0xff]  ;;  %v3539_v26 = vld [vmem:[#allocation7 + $0x6d0] sm:$0xff] }
 0x618   :  { %3801 = vmatpush2.msra.mxu1 %v15314_v31  ;;  %v3327_v17 = vpop.f32.mrf.mxu0  ;;  %10086 = vmatprep.mubr.msk.f32.mxu1 %vm11200_vm0, %v15202_v35 }
 0x619   :  { %v3328_v24 = vadd.f32 %v9021_v11, %v3327_v17  ;;  %3802 = vmatprep.subr.mxu1 %v15202_v35  ;;  %v3544_v11 = vld [vmem:[#allocation7 + $0x6f8] sm:$0xff]  ;;  %v3543_v17 = vld [vmem:[#allocation7 + $0x6f0] sm:$0xff] }
 0x61a   :  { %3803 = vmatpush2.msra.mxu1 %v15357_v42  ;;  %v3329_v43 = vpop.f32.mrf.mxu0 }
 0x61b   :  { %3804 = vmatprep.subr.mxu1 %v15202_v35  ;;  %10087 = vmatmul.mubr.msk.f32.gmra.mxu1 %vm796_vm3, %v3328_v24  ;;  %v3547_v24 = vld [vmem:[#allocation7 + $0x710] sm:$0xff]  ;;  %v3552_v43 = vld [vmem:[#allocation7 + $0x738] sm:$0xff] }
 0x61c   :  { %3805 = vmatpush2.msra.mxu1 %v15316_v51  ;;  %v3332_v18 = vpop.f32.mrf.mxu0  ;;  %10089 = vmatprep.mubr.msk.f32.mxu1 %vm11200_vm0, %v15202_v35 }
 0x61d   :  { %v3333_v53 = vadd.f32 %v9024_v29, %v3332_v18  ;;  %3806 = vmatprep.subr.mxu1 %v15202_v35  ;;  %v15358_v29 = vld [vmem:[#allocation57_spill] sm:$0xff]  ;;  %v15360_v18 = vld [vmem:[#allocation59_spill] sm:$0xff] }
 0x61e   :  { %3807 = vmatpush2.msra.mxu1 %v15317_v4  ;;  %v3334_v19 = vpop.f32.mrf.mxu0 }
 0x61f   :  { %3808 = vmatprep.subr.mxu1 %v15202_v35  ;;  %10090 = vmatmul.mubr.msk.f32.gmra.mxu1 %vm796_vm3, %v3333_v53  ;;  %v3551_v53 = vld [vmem:[#allocation7 + $0x730] sm:$0xff]  ;;  %v15361_v19 = vld [vmem:[#allocation60_spill] sm:$0xff] }
 0x620   :  { %3809 = vmatpush2.msra.mxu1 %v15318_v33  ;;  %v3337_v40 = vpop.f32.mrf.mxu0  ;;  %10092 = vmatprep.mubr.msk.f32.mxu1 %vm11200_vm0, %v15202_v35 }
 0x621   :  { %v3338_v57 = vadd.f32 %v9027_v55, %v3337_v40  ;;  %3810 = vmatprep.subr.mxu1 %v15202_v35  ;;  %v3556_v55 = vld [vmem:[#allocation7 + $0x758] sm:$0xff]  ;;  %v15362_v40 = vld [vmem:[#allocation61_spill] sm:$0xff] }
 0x622   :  { %3811 = vmatpush2.msra.mxu1 %v15319_v2  ;;  %v3339_v1 = vpop.f32.mrf.mxu0 }
 0x623   :  { %3812 = vmatprep.subr.mxu1 %v15202_v35  ;;  %10093 = vmatmul.mubr.msk.f32.gmra.mxu1 %vm796_vm3, %v3338_v57  ;;  %v15363_v57 = vld [vmem:[#allocation62_spill] sm:$0xff]  ;;  %v3555_v1 = vld [vmem:[#allocation7 + $0x750] sm:$0xff] }
 0x624   :  { %3813 = vmatpush2.msra.mxu1 %v15320_v7  ;;  %8448 = vmatprep.mubr.msk.f32.mxu1 %vm1451_vm5, %v3532_v27  ;;  %v15364_v27 = vld [vmem:[#allocation63_spill] sm:$0xff] }
 0x625   :  { %9133 = vmatprep.subr.mxu1 %v15321_v16 }
 0x627   :  { %3815 = vmatmul.mubr.f32.vlgmr.msra.gmra.mxu1 %v3531_v62  ;;  %v15365_v62 = vld [vmem:[#allocation64_spill] sm:$0xff] }
 0x628   :  { %9134 = vmatpush3.msra.mxu1 %v12227_v12  ;;  %8449 = vmatprep.mubr.msk.f32.mxu1 %vm1451_vm5, %v3536_v3  ;;  %v3560_v3 = vld [vmem:[#allocation7 + $0x778] sm:$0xff] }
 0x629   :  { %9135 = vmatprep.subr.mxu1 %v12243_v10 }
 0x62a   :  { %9136 = vmatpush3.msra.mxu1 %v15244_v56 }
 0x62b   :  { %9137 = vmatprep.subr.mxu1 %v15245_v14  ;;  %3820 = vmatmul.mubr.f32.gmra.mxu1 %v3535_v48  ;;  %v15366_v48 = vld [vmem:[#allocation65_spill] sm:$0xff] }
 0x62c   :  { %9138 = vmatpush3.msra.mxu1 %v15246_v49  ;;  %8450 = vmatprep.mubr.msk.f32.mxu1 %vm1451_vm5, %v3540_v13  ;;  %v15367_v13 = vld [vmem:[#allocation43_spill] sm:$0xff] }
 0x62d   :  { %9139 = vmatprep.subr.mxu1 %v15247_v32 }
 0x62e   :  { %9140 = vmatpush3.msra.mxu1 %v15248_v8 }
 0x62f   :  { %9141 = vmatprep.subr.mxu1 %v15249_v60  ;;  %3825 = vmatmul.mubr.f32.gmra.mxu1 %v3539_v26  ;;  %v15368_v26 = vld [vmem:[#allocation66_spill] sm:$0xff] }
 0x630   :  { %9142 = vmatpush3.msra.mxu1 %v15250_v41  ;;  %8451 = vmatprep.mubr.msk.f32.mxu1 %vm1451_vm5, %v3544_v11  ;;  %v3559_v11 = vld [vmem:[#allocation7 + $0x770] sm:$0xff] }
 0x631   :  { %9143 = vmatprep.subr.mxu1 %v15251_v20  ;;  %v15393_v20 = vld [vmem:[#allocation72_spill] sm:$0xff] }
 0x632   :  { %9144 = vmatpush3.msra.mxu1 %v15252_v37 }
 0x633   :  { %9145 = vmatprep.subr.mxu1 %v15253_v34  ;;  %3830 = vmatmul.mubr.f32.gmra.mxu1 %v3543_v17  ;;  %v15369_v17 = vld [vmem:[#allocation42_spill] sm:$0xff] }
 0x634   :  { %9146 = vmatpush3.msra.mxu1 %v15254_v15  ;;  %8452 = vmatprep.mubr.msk.f32.mxu1 %vm1451_vm5, %v3548_v0  ;;  %v3564_v0 = vld [vmem:[#allocation7 + $0x798] sm:$0xff]  ;;  %v15385_v15 = vld [vmem:[#allocation34_spill] sm:$0xff] }
 0x635   :  { %9147 = vmatprep.subr.mxu1 %v15255_v45 }
 0x636   :  { %9148 = vmatpush3.msra.mxu1 %v15358_v29 }
 0x637   :  { %9149 = vmatprep.subr.mxu1 %v15359_v25  ;;  %3835 = vmatmul.mubr.f32.gmra.mxu1 %v3547_v24  ;;  %v15370_v24 = vld [vmem:[#allocation67_spill] sm:$0xff] }
 0x638   :  { %9150 = vmatpush3.msra.mxu1 %v15360_v18  ;;  %8453 = vmatprep.mubr.msk.f32.mxu1 %vm1451_vm5, %v3552_v43  ;;  %v15371_v43 = vld [vmem:[#allocation68_spill] sm:$0xff] }
 0x639   :  { %9151 = vmatprep.subr.mxu1 %v15361_v19 }
 0x63a   :  { %9152 = vmatpush3.msra.mxu1 %v15362_v40 }
 0x63b   :  { %9153 = vmatprep.subr.mxu1 %v15363_v57  ;;  %3840 = vmatmul.mubr.f32.gmra.mxu1 %v3551_v53  ;;  %v15372_v53 = vld [vmem:[#allocation41_spill] sm:$0xff] }
 0x63c   :  { %9154 = vmatpush3.msra.mxu1 %v15364_v27  ;;  %8454 = vmatprep.mubr.msk.f32.mxu1 %vm1451_vm5, %v3556_v55  ;;  %v3563_v55 = vld [vmem:[#allocation7 + $0x790] sm:$0xff]  ;;  %v15377_v27 = vld [vmem:[#allocation38_spill] sm:$0xff] }
 0x63d   :  { %9155 = vmatprep.subr.mxu1 %v15365_v62 }
 0x63e   :  { %9156 = vmatpush3.msra.mxu1 %v15366_v48  ;;  %v15375_v48 = vld [vmem:[#allocation39_spill] sm:$0xff] }
 0x63f   :  { %9157 = vmatprep.subr.mxu1 %v15367_v13  ;;  %3845 = vmatmul.mubr.f32.gmra.mxu1 %v3555_v1  ;;  %v15373_v13 = vld [vmem:[#allocation69_spill] sm:$0xff]  ;;  %v3568_v1 = vld [vmem:[#allocation7 + $0x7b8] sm:$0xff] }
 0x640   :  { %9158 = vmatpush3.msra.mxu1 %v15368_v26  ;;  %8455 = vmatprep.mubr.msk.f32.mxu1 %vm1451_vm5, %v3560_v3  ;;  %v15374_v26 = vld [vmem:[#allocation40_spill] sm:$0xff]  ;;  %v3567_v3 = vld [vmem:[#allocation7 + $0x7b0] sm:$0xff] }
 0x641   :  { %9159 = vmatprep.subr.mxu1 %v15369_v17  ;;  %v4089_v17 = vld [vmem:[#allocation7 + $0x8c8] sm:$0xff] }
 0x642   :  { %9160 = vmatpush3.msra.mxu1 %v15370_v24  ;;  %v3572_v24 = vld [vmem:[#allocation7 + $0x7d8] sm:$0xff] }
 0x643   :  { %9161 = vmatprep.subr.mxu1 %v15371_v43  ;;  %3850 = vmatmul.mubr.f32.gmra.mxu1 %v3559_v11  ;;  %v3571_v11 = vld [vmem:[#allocation7 + $0x7d0] sm:$0xff]  ;;  %v3580_v43 = vld [vmem:[#allocation7 + $0x818] sm:$0xff] }
 0x644   :  { %9162 = vmatpush3.msra.mxu1 %v15372_v53  ;;  %8456 = vmatprep.mubr.msk.f32.mxu1 %vm1451_vm5, %v3564_v0  ;;  %v3576_v53 = vld [vmem:[#allocation7 + $0x7f8] sm:$0xff]  ;;  %v3575_v0 = vld [vmem:[#allocation7 + $0x7f0] sm:$0xff] }
 0x645   :  { %9163 = vmatprep.subr.mxu1 %v15373_v13  ;;  %v3884_v13 = vld [vmem:[#allocation9 + $0x98] sm:$0xff] }
 0x646   :  { %9164 = vmatpush3.msra.mxu1 %v15374_v26  ;;  %10096 = vmatpush3.msra.mxu0 %v3884_v13  ;;  %v4069_v13 = vld [vmem:[#allocation7 + $0x828] sm:$0xff] }
 0x647   :  { %3855 = vmatmul.mubr.f32.gmra.mxu1 %v3563_v55  ;;  %10142 = vmatprep.subr.mxu1 %v15202_v35  ;;  %v3579_v55 = vld [vmem:[#allocation7 + $0x810] sm:$0xff]  ;;  %v4085_v26 = vld [vmem:[#allocation7 + $0x8a8] sm:$0xff] }
 0x648   :  { %8457 = vmatprep.mubr.msk.f32.mxu1 %vm1451_vm5, %v3568_v1  ;;  %10097 = vmatprep.subr.mxu0 %v15202_v35  ;;  %v3883_v1 = vld [vmem:[#allocation9 + $0x90] sm:$0xff] }
 0x649   :  { %10098 = vmatpush3.msra.mxu0 %v3883_v1  ;;  %v4081_v1 = vld [vmem:[#allocation7 + $0x888] sm:$0xff] }
 0x64a   :  { %10099 = vmatprep.subr.mxu0 %v15202_v35 }
 0x64b   :  { %3860 = vmatmul.mubr.f32.gmra.mxu1 %v3567_v3  ;;  %v4068_v3 = vld [vmem:[#allocation7 + $0x820] sm:$0xff] }
 0x64c   :  { %8458 = vmatprep.mubr.msk.f32.mxu1 %vm1451_vm5, %v3572_v24  ;;  %v3882_v24 = vld [vmem:[#allocation9 + $0x88] sm:$0xff] }
 0x64d   :  { %10100 = vmatpush3.msra.mxu0 %v3882_v24  ;;  %v4080_v24 = vld [vmem:[#allocation7 + $0x880] sm:$0xff] }
 0x64e   :  { %10101 = vmatprep.subr.mxu0 %v15202_v35 }
 0x64f   :  { %3865 = vmatmul.mubr.f32.gmra.mxu1 %v3571_v11  ;;  %v4073_v11 = vld [vmem:[#allocation7 + $0x848] sm:$0xff] }
 0x650   :  { %8459 = vmatprep.mubr.msk.f32.mxu1 %vm1451_vm5, %v3576_v53  ;;  %v3881_v53 = vld [vmem:[#allocation9 + $0x80] sm:$0xff] }
 0x651   :  { %10102 = vmatpush3.msra.mxu0 %v3881_v53  ;;  %v4084_v53 = vld [vmem:[#allocation7 + $0x8a0] sm:$0xff] }
 0x652   :  { %4289 = vmatprep.subr.mxu0 %v15202_v35 }
 0x653   :  { %3870 = vmatmul.mubr.f32.gmra.mxu1 %v3575_v0  ;;  %v4077_v0 = vld [vmem:[#allocation7 + $0x868] sm:$0xff] }
 0x654   :  { %8460 = vmatprep.mubr.msk.f32.mxu1 %vm1451_vm5, %v3580_v43  ;;  %v4072_v43 = vld [vmem:[#allocation7 + $0x840] sm:$0xff] }
 0x657   :  { %3875 = vmatmul.mubr.f32.gmra.mxu1 %v3579_v55  ;;  %v4076_v55 = vld [vmem:[#allocation7 + $0x860] sm:$0xff] }
 0x658   :  { %4223 = vmatprep.mubr.f32.mxu1 %v4069_v13  ;;  %v4088_v13 = vld [vmem:[#allocation7 + $0x8c0] sm:$0xff] }
 0x65b   :  { %4224 = vmatmul.mubr.f32.vlgmr.msra.gmra.mxu1 %v4068_v3  ;;  %v13464_v3 = vpop.f32.mrf.mxu0 }
 0x65c   :  { %4228 = vmatprep.mubr.f32.mxu1 %v4073_v11  ;;  %v4093_v11 = vld [vmem:[#allocation7 + $0x8e8] sm:$0xff] }
 0x65f   :  { %4229 = vmatmul.mubr.f32.gmra.mxu1 %v4072_v43  ;;  %v4092_v43 = vld [vmem:[#allocation7 + $0x8e0] sm:$0xff] }
 0x660   :  { %4233 = vmatprep.mubr.f32.mxu1 %v4077_v0 }
 0x663   :  { %4234 = vmatmul.mubr.f32.gmra.mxu1 %v4076_v55  ;;  %v13466_v55 = vpop.f32.mrf.mxu0 }
 0x664   :  { %4238 = vmatprep.mubr.f32.mxu1 %v4081_v1  ;;  %v4097_v1 = vld [vmem:[#allocation7 + $0x908] sm:$0xff] }
 0x665   :  { %v13471_v62 = vpop.f32.mrf.mxu0 }
 0x667   :  { %4239 = vmatmul.mubr.f32.gmra.mxu1 %v4080_v24  ;;  %v13476_v19 = vpop.f32.mrf.mxu0 }
 0x668   :  { %4243 = vmatprep.mubr.f32.mxu1 %v4085_v26  ;;  %v4096_v26 = vld [vmem:[#allocation7 + $0x900] sm:$0xff] }
 0x669   :  { %v13481_v25 = vpop.f32.mrf.mxu0 }
 0x66b   :  { %4244 = vmatmul.mubr.f32.gmra.mxu1 %v4084_v53  ;;  %v9084_v29 = vpop.f32.mrf.mxu0 }
 0x66c   :  { %4248 = vmatprep.mubr.f32.mxu1 %v4089_v17 }
 0x66d   :  { %v9086_v45 = vpop.f32.mrf.mxu0 }
 0x66f   :  { %4249 = vmatmul.mubr.f32.gmra.mxu1 %v4088_v13  ;;  %v4101_v13 = vld [vmem:[#allocation7 + $0x928] sm:$0xff] }
 0x670   :  { %4253 = vmatprep.mubr.f32.mxu1 %v4093_v11  ;;  %v4100_v11 = vld [vmem:[#allocation7 + $0x920] sm:$0xff] }
 0x673   :  { %4254 = vmatmul.mubr.f32.gmra.mxu1 %v4092_v43 }
 0x674   :  { %4258 = vmatprep.mubr.f32.mxu1 %v4097_v1 }
 0x677   :  { %4259 = vmatmul.mubr.f32.gmra.mxu1 %v4096_v26  ;;  %v4104_v26 = vld [vmem:[#allocation7 + $0x940] sm:$0xff] }
 0x678   :  { %4263 = vmatprep.mubr.f32.mxu1 %v4101_v13 }
 0x67b   :  { %4264 = vmatmul.mubr.f32.gmra.mxu1 %v4100_v11 }
 0x6b3   :  { %v3451_v0 = vpop.f32.mrf.mxu1 }
 0x6b4   :  { %v13469_v24 = vadd.f32 %v3451_v0, %v15375_v48  ;;  %v4105_v48 = vld [vmem:[#allocation7 + $0x948] sm:$0xff]  ;;  %v15379_v0 = vld [vmem:[#allocation37_spill] sm:$0xff] }
 0x6b5   :  { %v10058_v53 = vpop.f32.mrf.mxu1  ;;  %4268 = vmatprep.mubr.f32.mxu1 %v4105_v48  ;;  %v15383_v48 = vld [vmem:[#allocation35_spill] sm:$0xff] }
 0x6b6   :  { %15376 = vst [vmem:[#allocation74_spill] sm:$0xff] %v13469_v24  ;;  %4269 = vmatmul.mubr.f32.gmra.mxu1 %v4104_v26  ;;  %v4109_v24 = vld [vmem:[#allocation7 + $0x968] sm:$0xff] }
 0x6b7   :  { %v3456_v17 = vpop.f32.mrf.mxu1  ;;  %4273 = vmatprep.mubr.f32.mxu1 %v4109_v24  ;;  %v4116_v24 = vld [vmem:[#allocation7 + $0x9a0] sm:$0xff] }
 0x6b8   :  { %v13474_v57 = vadd.f32 %v3456_v17, %v15377_v27  ;;  %v4108_v27 = vld [vmem:[#allocation7 + $0x960] sm:$0xff]  ;;  %v15381_v17 = vld [vmem:[#allocation36_spill] sm:$0xff] }
 0x6b9   :  { %v10061_v43 = vpop.f32.mrf.mxu1 }
 0x6ba   :  { %15378 = vst [vmem:[#allocation76_spill] sm:$0xff] %v13474_v57  ;;  %4274 = vmatmul.mubr.f32.gmra.mxu1 %v4108_v27  ;;  %v4113_v43 = vld [vmem:[#allocation7 + $0x988] sm:$0xff] }
 0x6bb   :  { %v3461_v40 = vpop.f32.mrf.mxu1  ;;  %4278 = vmatprep.mubr.f32.mxu1 %v4113_v43  ;;  %v15387_v43 = vld [vmem:[#allocation33_spill] sm:$0xff] }
 0x6bc   :  { %v13479_v1 = vadd.f32 %v3461_v40, %v15379_v0  ;;  %v4112_v40 = vld [vmem:[#allocation7 + $0x980] sm:$0xff] }
 0x6bd   :  { %v10064_v53 = vpop.f32.mrf.mxu1 }
 0x6be   :  { %15380 = vst [vmem:[#allocation78_spill] sm:$0xff] %v13479_v1  ;;  %4279 = vmatmul.mubr.f32.gmra.mxu1 %v4112_v40  ;;  %v4117_v53 = vld [vmem:[#allocation7 + $0x9a8] sm:$0xff] }
 0x6bf   :  { %v3466_v18 = vpop.f32.mrf.mxu1  ;;  %4283 = vmatprep.mubr.f32.mxu1 %v4117_v53 }
 0x6c0   :  { %v13484_v13 = vadd.f32 %v3466_v18, %v15381_v17 }
 0x6c1   :  { %v10067_v11 = vpop.f32.mrf.mxu1 }
 0x6c2   :  { %15382 = vst [vmem:[#allocation80_spill] sm:$0xff] %v13484_v13  ;;  %4284 = vmatmul.mubr.f32.gmra.mxu1 %v4116_v24  ;;  %v9087_v11 = vpop.f32.mrf.mxu0 }
 0x6c3   :  { %v3471_v57 = vpop.f32.mrf.mxu1  ;;  %10150 = vmatprep.mubr.msk.f32.mxu1 %vm11200_vm0, %v15202_v35 }
 0x6c4   :  { %v13487_v0 = vadd.f32 %v3471_v57, %v15383_v48 }
 0x6c5   :  { %v10070_v26 = vpop.f32.mrf.mxu1 }
 0x6c6   :  { %15384 = vst [vmem:[#allocation81_spill] sm:$0xff] %v13487_v0  ;;  %v9089_v26 = vpop.f32.mrf.mxu0  ;;  %v15389_v0 = vld [vmem:[#allocation31_spill] sm:$0xff] }
 0x6c7   :  { %v3476_v1 = vpop.f32.mrf.mxu1 }
 0x6c8   :  { %v13490_v18 = vadd.f32 %v3476_v1, %v15385_v15  ;;  %v9090_v15 = vpop.f32.mrf.mxu0  ;;  %v15391_v1 = vld [vmem:[#allocation70_spill] sm:$0xff] }
 0x6c9   :  { %v10073_v17 = vpop.f32.mrf.mxu1 }
 0x6ca   :  { %15386 = vst [vmem:[#allocation82_spill] sm:$0xff] %v13490_v18  ;;  %v13503_v37 = vpop.f32.mrf.mxu0 }
 0x6cb   :  { %v3481_v27 = vpop.f32.mrf.mxu1 }
 0x6cc   :  { %v13495_v57 = vadd.f32 %v3481_v27, %v15387_v43 }
 0x6cd   :  { %v10076_v48 = vpop.f32.mrf.mxu1 }
 0x6ce   :  { %15388 = vst [vmem:[#allocation83_spill] sm:$0xff] %v13495_v57  ;;  %v9093_v48 = vpop.f32.mrf.mxu0 }
 0x6cf   :  { %v3486_v40 = vpop.f32.mrf.mxu1 }
 0x6d0   :  { %v13498_v13 = vadd.f32 %v3486_v40, %v15389_v0 }
 0x6d1   :  { %v10079_v53 = vpop.f32.mrf.mxu1 }
 0x6d2   :  { %15390 = vst [vmem:[#allocation84_spill] sm:$0xff] %v13498_v13  ;;  %v13511_v53 = vpop.f32.mrf.mxu0 }
 0x6d3   :  { %v3491_v34 = vpop.f32.mrf.mxu1 }
 0x6d4   :  { %v13501_v17 = vadd.f32 %v3491_v34, %v15391_v1 }
 0x6d5   :  { %v10082_v24 = vpop.f32.mrf.mxu1 }
 0x6d6   :  { %15392 = vst [vmem:[#allocation46_spill] sm:$0xff] %v13501_v17  ;;  %v9096_v17 = vpop.f32.mrf.mxu0 }
 0x6d7   :  { %v3496_v18 = vpop.f32.mrf.mxu1 }
 0x6d8   :  { %v13506_v41 = vadd.f32 %v3496_v18, %v15393_v20  ;;  %v9079_v18 = vadd.f32 %v13466_v55, %v13464_v3  ;;  %v9085_v55 = vadd.f32 %v9084_v29, %v13481_v25 }
 0x6d9   :  { %v10085_v27 = vpop.f32.mrf.mxu1 }
 0x6db   :  { %v3501_v43 = vpop.f32.mrf.mxu1 }
 0x6dc   :  { %v13509_v57 = vadd.f32 %v3501_v43, %v13303_v5  ;;  %v13521_v5 = vpop.f32.mrf.mxu0 }
 0x6dd   :  { %v10088_v0 = vpop.f32.mrf.mxu1 }
 0x6de   :  { %15394 = vst [vmem:[#allocation90_spill] sm:$0xff] %v13509_v57  ;;  %v9082_v57 = vadd.f32 %v13476_v19, %v13471_v62 }
 0x6df   :  { %v3506_v40 = vpop.f32.mrf.mxu1 }
 0x6e0   :  { %v13514_v34 = vadd.f32 %v3506_v40, %v13309_v30 }
 0x6e1   :  { %v10091_v1 = vpop.f32.mrf.mxu1 }
 0x6e3   :  { %v3511_v24 = vpop.f32.mrf.mxu1 }
 0x6e4   :  { %v13517_v13 = vadd.f32 %v3511_v24, %v13313_v9  ;;  %v9099_v9 = vpop.f32.mrf.mxu0  ;;  %v9088_v24 = vadd.f32 %v9087_v11, %v9086_v45 }
 0x6e5   :  { %v10094_v20 = vpop.f32.mrf.mxu1 }
 0x6e6   :  { %v9101_v62 = vpop.f32.mrf.mxu0 }
 0x6e7   :  { %v3816_v27 = vpop.f32.mrf.mxu1 }
 0x6e8   :  { %v3817_v43 = vadd.f32 %v9079_v18, %v3816_v27  ;;  %v9102_v25 = vpop.f32.mrf.mxu0  ;;  %v9091_v27 = vadd.f32 %v9090_v15, %v9089_v26 }
 0x6e9   :  { %v3818_v0 = vpop.f32.mrf.mxu1 }
 0x6ea   :  { %10104 = vmatmul.mubr.msk.f32.vlgmr.msra.gmra.mxu0 %vm796_vm3, %v3817_v43  ;;  %v9104_v11 = vpop.f32.mrf.mxu0 }
 0x6eb   :  { %4290 = vmatpush1.msra.mxu0 %v15296_v46  ;;  %v3821_v30 = vpop.f32.mrf.mxu1  ;;  %10106 = vmatprep.mubr.msk.f32.mxu0 %vm11200_vm0, %v15202_v35 }
 0x6ec   :  { %v3822_v40 = vadd.f32 %v9082_v57, %v3821_v30  ;;  %4291 = vmatprep.subr.mxu0 %v15202_v35  ;;  %v9094_v30 = vadd.f32 %v9093_v48, %v13503_v37  ;;  %v9105_v15 = vpop.f32.mrf.mxu0 }
 0x6ed   :  { %4292 = vmatpush1.msra.mxu0 %v15297_v63  ;;  %v3823_v3 = vpop.f32.mrf.mxu1 }
 0x6ee   :  { %4293 = vmatprep.subr.mxu0 %v15202_v35  ;;  %10107 = vmatmul.mubr.msk.f32.gmra.mxu0 %vm796_vm3, %v3822_v40  ;;  %v9107_v48 = vpop.f32.mrf.mxu0 }
 0x6ef   :  { %4294 = vmatpush1.msra.mxu0 %v15298_v38  ;;  %v3826_v19 = vpop.f32.mrf.mxu1  ;;  %10109 = vmatprep.mubr.msk.f32.mxu0 %vm11200_vm0, %v15202_v35 }
 0x6f0   :  { %v3827_v1 = vadd.f32 %v9085_v55, %v3826_v19  ;;  %4295 = vmatprep.subr.mxu0 %v15202_v35  ;;  %v9097_v55 = vadd.f32 %v9096_v17, %v13511_v53  ;;  %v9108_v53 = vpop.f32.mrf.mxu0 }
 0x6f1   :  { %4296 = vmatpush1.msra.mxu0 %v15299_v23  ;;  %v3828_v57 = vpop.f32.mrf.mxu1 }
 0x6f2   :  { %4297 = vmatprep.subr.mxu0 %v15202_v35  ;;  %10110 = vmatmul.mubr.msk.f32.gmra.mxu0 %vm796_vm3, %v3827_v1  ;;  %v9100_v57 = vadd.f32 %v9099_v9, %v13521_v5  ;;  %v9110_v9 = vpop.f32.mrf.mxu0 }
 0x6f3   :  { %4298 = vmatpush1.msra.mxu0 %v15300_v21  ;;  %v3831_v29 = vpop.f32.mrf.mxu1  ;;  %10112 = vmatprep.mubr.msk.f32.mxu0 %vm11200_vm0, %v15202_v35 }
 0x6f4   :  { %v3832_v20 = vadd.f32 %v9088_v24, %v3831_v29  ;;  %4299 = vmatprep.subr.mxu0 %v15202_v35 }
 0x6f5   :  { %4300 = vmatpush1.msra.mxu0 %v15301_v47  ;;  %v3833_v18 = vpop.f32.mrf.mxu1 }
 0x6f6   :  { %4301 = vmatprep.subr.mxu0 %v15202_v35  ;;  %10113 = vmatmul.mubr.msk.f32.gmra.mxu0 %vm796_vm3, %v3832_v20  ;;  %v9103_v20 = vadd.f32 %v9102_v25, %v9101_v62  ;;  %v9111_v25 = vpop.f32.mrf.mxu0 }
 0x6f7   :  { %4302 = vmatpush1.msra.mxu0 %v15302_v6  ;;  %v3836_v45 = vpop.f32.mrf.mxu1  ;;  %10115 = vmatprep.mubr.msk.f32.mxu0 %vm11200_vm0, %v15202_v35 }
 0x6f8   :  { %v3837_v43 = vadd.f32 %v9091_v27, %v3836_v45  ;;  %4303 = vmatprep.subr.mxu0 %v15202_v35  ;;  %v9106_v45 = vadd.f32 %v9105_v15, %v9104_v11 }
 0x6f9   :  { %4304 = vmatpush1.msra.mxu0 %v15351_v28  ;;  %v3838_v0 = vpop.f32.mrf.mxu1 }
 0x6fa   :  { %4305 = vmatprep.subr.mxu0 %v15202_v35  ;;  %10116 = vmatmul.mubr.msk.f32.gmra.mxu0 %vm796_vm3, %v3837_v43 }
 0x6fb   :  { %4306 = vmatpush1.msra.mxu0 %v15304_v22  ;;  %v3841_v26 = vpop.f32.mrf.mxu1  ;;  %10118 = vmatprep.mubr.msk.f32.mxu0 %vm11200_vm0, %v15202_v35 }
 0x6fc   :  { %v3842_v40 = vadd.f32 %v9094_v30, %v3841_v26  ;;  %4307 = vmatprep.subr.mxu0 %v15202_v35  ;;  %v9109_v30 = vadd.f32 %v9108_v53, %v9107_v48  ;;  %v9113_v26 = vpop.f32.mrf.mxu0  ;;  %v4071_v53 = vld [vmem:[#allocation7 + $0x838] sm:$0xff] }
 0x6fd   :  { %4308 = vmatpush1.msra.mxu0 %v15352_v36  ;;  %v3843_v3 = vpop.f32.mrf.mxu1 }
 0x6fe   :  { %4309 = vmatprep.subr.mxu0 %v15202_v35  ;;  %10119 = vmatmul.mubr.msk.f32.gmra.mxu0 %vm796_vm3, %v3842_v40  ;;  %v9112_v3 = vadd.f32 %v9111_v25, %v9110_v9  ;;  %v4079_v9 = vld [vmem:[#allocation7 + $0x878] sm:$0xff] }
 0x6ff   :  { %4310 = vmatpush1.msra.mxu0 %v15306_v50  ;;  %v3846_v37 = vpop.f32.mrf.mxu1  ;;  %10121 = vmatprep.mubr.msk.f32.mxu0 %vm11200_vm0, %v15202_v35  ;;  %v15396_v25 = vld [vmem:[#allocation52_spill] sm:$0xff] }
 0x700   :  { %v3847_v19 = vadd.f32 %v9097_v55, %v3846_v37  ;;  %4311 = vmatprep.subr.mxu0 %v15202_v35  ;;  %v9114_v55 = vpop.f32.mrf.mxu0 }
 0x701   :  { %4312 = vmatpush1.msra.mxu0 %v15353_v52  ;;  %v3848_v1 = vpop.f32.mrf.mxu1 }
 0x702   :  { %4313 = vmatprep.subr.mxu0 %v15202_v35  ;;  %10122 = vmatmul.mubr.msk.f32.gmra.mxu0 %vm796_vm3, %v3847_v19  ;;  %v9115_v1 = vadd.f32 %v9114_v55, %v9113_v26  ;;  %v4086_v26 = vld [vmem:[#allocation7 + $0x8b0] sm:$0xff]  ;;  %v15402_v55 = vld [vmem:[#allocation58_spill] sm:$0xff] }
 0x703   :  { %4314 = vmatpush1.msra.mxu0 %v15308_v54  ;;  %v3851_v17 = vpop.f32.mrf.mxu1  ;;  %10124 = vmatprep.mubr.msk.f32.mxu0 %vm11200_vm0, %v15202_v35 }
 0x704   :  { %v3852_v24 = vadd.f32 %v9100_v57, %v3851_v17  ;;  %4315 = vmatprep.subr.mxu0 %v15202_v35 }
 0x705   :  { %4316 = vmatpush1.msra.mxu0 %v15354_v39  ;;  %v3853_v29 = vpop.f32.mrf.mxu1 }
 0x706   :  { %4317 = vmatprep.subr.mxu0 %v15202_v35  ;;  %10125 = vmatmul.mubr.msk.f32.gmra.mxu0 %vm796_vm3, %v3852_v24  ;;  %v4070_v29 = vld [vmem:[#allocation7 + $0x830] sm:$0xff] }
 0x707   :  { %4318 = vmatpush1.msra.mxu0 %v15310_v59  ;;  %v3856_v5 = vpop.f32.mrf.mxu1  ;;  %10127 = vmatprep.mubr.msk.f32.mxu0 %vm11200_vm0, %v15202_v35 }
 0x708   :  { %v3857_v18 = vadd.f32 %v9103_v20, %v3856_v5  ;;  %4319 = vmatprep.subr.mxu0 %v15202_v35  ;;  %v4075_v20 = vld [vmem:[#allocation7 + $0x858] sm:$0xff]  ;;  %v4074_v5 = vld [vmem:[#allocation7 + $0x850] sm:$0xff] }
 0x709   :  { %4320 = vmatpush1.msra.mxu0 %v15355_v58  ;;  %v3858_v27 = vpop.f32.mrf.mxu1 }
 0x70a   :  { %4335 = vmatprep.subr.mxu0 %v15202_v35  ;;  %10128 = vmatmul.mubr.msk.f32.gmra.mxu0 %vm796_vm3, %v3857_v18  ;;  %v4078_v18 = vld [vmem:[#allocation7 + $0x870] sm:$0xff]  ;;  %v4083_v27 = vld [vmem:[#allocation7 + $0x898] sm:$0xff] }
 0x70b   :  { %4336 = vmatpush2.msra.mxu0 %v15312_v44  ;;  %v3861_v62 = vpop.f32.mrf.mxu1  ;;  %10130 = vmatprep.mubr.msk.f32.mxu0 %vm11200_vm0, %v15202_v35 }
 0x70c   :  { %v3862_v43 = vadd.f32 %v9106_v45, %v3861_v62  ;;  %4337 = vmatprep.subr.mxu0 %v15202_v35  ;;  %v15395_v45 = vld [vmem:[#allocation51_spill] sm:$0xff] }
 0x70d   :  { %4338 = vmatpush2.msra.mxu0 %v15356_v61  ;;  %v3863_v0 = vpop.f32.mrf.mxu1  ;;  %v4082_v62 = vld [vmem:[#allocation7 + $0x890] sm:$0xff] }
 0x70e   :  { %4339 = vmatprep.subr.mxu0 %v15202_v35  ;;  %10131 = vmatmul.mubr.msk.f32.gmra.mxu0 %vm796_vm3, %v3862_v43  ;;  %v4087_v43 = vld [vmem:[#allocation7 + $0x8b8] sm:$0xff]  ;;  %v15397_v0 = vld [vmem:[#allocation53_spill] sm:$0xff] }
 0x70f   :  { %4340 = vmatpush2.msra.mxu0 %v15314_v31  ;;  %v3866_v11 = vpop.f32.mrf.mxu1  ;;  %10133 = vmatprep.mubr.msk.f32.mxu0 %vm11200_vm0, %v15202_v35 }
 0x710   :  { %v3867_v15 = vadd.f32 %v9109_v30, %v3866_v11  ;;  %4341 = vmatprep.subr.mxu0 %v15202_v35  ;;  %v15398_v30 = vld [vmem:[#allocation54_spill] sm:$0xff]  ;;  %v15399_v11 = vld [vmem:[#allocation55_spill] sm:$0xff] }
 0x711   :  { %4342 = vmatpush2.msra.mxu0 %v15357_v42  ;;  %v3868_v40 = vpop.f32.mrf.mxu1 }
 0x712   :  { %4343 = vmatprep.subr.mxu0 %v15202_v35  ;;  %10134 = vmatmul.mubr.msk.f32.gmra.mxu0 %vm796_vm3, %v3867_v15  ;;  %v15400_v15 = vld [vmem:[#allocation56_spill] sm:$0xff] }
 0x713   :  { %4344 = vmatpush2.msra.mxu0 %v15316_v51  ;;  %v3871_v37 = vpop.f32.mrf.mxu1  ;;  %10136 = vmatprep.mubr.msk.f32.mxu0 %vm11200_vm0, %v15202_v35  ;;  %v4091_v40 = vld [vmem:[#allocation7 + $0x8d8] sm:$0xff] }
 0x714   :  { %v3872_v48 = vadd.f32 %v9112_v3, %v3871_v37  ;;  %4345 = vmatprep.subr.mxu0 %v15202_v35  ;;  %v15401_v3 = vld [vmem:[#allocation57_spill] sm:$0xff]  ;;  %v15403_v37 = vld [vmem:[#allocation59_spill] sm:$0xff] }
 0x715   :  { %4346 = vmatpush2.msra.mxu0 %v15317_v4  ;;  %v3873_v19 = vpop.f32.mrf.mxu1 }
 0x716   :  { %4347 = vmatprep.subr.mxu0 %v15202_v35  ;;  %10137 = vmatmul.mubr.msk.f32.gmra.mxu0 %vm796_vm3, %v3872_v48  ;;  %v4090_v48 = vld [vmem:[#allocation7 + $0x8d0] sm:$0xff]  ;;  %v15404_v19 = vld [vmem:[#allocation60_spill] sm:$0xff] }
 0x717   :  { %4348 = vmatpush2.msra.mxu0 %v15318_v33  ;;  %v3876_v57 = vpop.f32.mrf.mxu1  ;;  %10139 = vmatprep.mubr.msk.f32.mxu0 %vm11200_vm0, %v15202_v35 }
 0x718   :  { %v3877_v17 = vadd.f32 %v9115_v1, %v3876_v57  ;;  %4349 = vmatprep.subr.mxu0 %v15202_v35  ;;  %v4095_v1 = vld [vmem:[#allocation7 + $0x8f8] sm:$0xff]  ;;  %v15405_v57 = vld [vmem:[#allocation61_spill] sm:$0xff] }
 0x719   :  { %4350 = vmatpush2.msra.mxu0 %v15319_v2  ;;  %v3878_v24 = vpop.f32.mrf.mxu1 }
 0x71a   :  { %4351 = vmatprep.subr.mxu0 %v15202_v35  ;;  %10140 = vmatmul.mubr.msk.f32.gmra.mxu0 %vm796_vm3, %v3877_v17  ;;  %v15406_v17 = vld [vmem:[#allocation62_spill] sm:$0xff]  ;;  %v4094_v24 = vld [vmem:[#allocation7 + $0x8f0] sm:$0xff] }
 0x71b   :  { %4352 = vmatpush2.msra.mxu0 %v15320_v7  ;;  %8474 = vmatprep.mubr.msk.f32.mxu0 %vm1451_vm5, %v4071_v53  ;;  %v15407_v53 = vld [vmem:[#allocation63_spill] sm:$0xff] }
 0x71c   :  { %9221 = vmatprep.subr.mxu0 %v15321_v16 }
 0x71e   :  { %4354 = vmatmul.mubr.f32.vlgmr.msra.gmra.mxu0 %v4070_v29  ;;  %v15408_v29 = vld [vmem:[#allocation64_spill] sm:$0xff] }
 0x71f   :  { %9222 = vmatpush3.msra.mxu0 %v12227_v12  ;;  %8475 = vmatprep.mubr.msk.f32.mxu0 %vm1451_vm5, %v4075_v20  ;;  %v4099_v20 = vld [vmem:[#allocation7 + $0x918] sm:$0xff] }
 0x720   :  { %9223 = vmatprep.subr.mxu0 %v12243_v10 }
 0x721   :  { %9224 = vmatpush3.msra.mxu0 %v15244_v56 }
 0x722   :  { %9225 = vmatprep.subr.mxu0 %v15245_v14  ;;  %4359 = vmatmul.mubr.f32.gmra.mxu0 %v4074_v5  ;;  %v15409_v5 = vld [vmem:[#allocation65_spill] sm:$0xff] }
 0x723   :  { %9226 = vmatpush3.msra.mxu0 %v15246_v49  ;;  %8476 = vmatprep.mubr.msk.f32.mxu0 %vm1451_vm5, %v4079_v9  ;;  %v15410_v9 = vld [vmem:[#allocation43_spill] sm:$0xff] }
 0x724   :  { %9227 = vmatprep.subr.mxu0 %v15247_v32 }
 0x725   :  { %9228 = vmatpush3.msra.mxu0 %v15248_v8 }
 0x726   :  { %9229 = vmatprep.subr.mxu0 %v15249_v60  ;;  %4364 = vmatmul.mubr.f32.gmra.mxu0 %v4078_v18  ;;  %v15411_v18 = vld [vmem:[#allocation66_spill] sm:$0xff] }
 0x727   :  { %9230 = vmatpush3.msra.mxu0 %v15395_v45  ;;  %8477 = vmatprep.mubr.msk.f32.mxu0 %vm1451_vm5, %v4083_v27  ;;  %v4098_v27 = vld [vmem:[#allocation7 + $0x910] sm:$0xff] }
 0x728   :  { %9231 = vmatprep.subr.mxu0 %v15396_v25 }
 0x729   :  { %9232 = vmatpush3.msra.mxu0 %v15397_v0 }
 0x72a   :  { %9233 = vmatprep.subr.mxu0 %v15398_v30  ;;  %4369 = vmatmul.mubr.f32.gmra.mxu0 %v4082_v62  ;;  %v15412_v62 = vld [vmem:[#allocation42_spill] sm:$0xff] }
 0x72b   :  { %9234 = vmatpush3.msra.mxu0 %v15399_v11  ;;  %8478 = vmatprep.mubr.msk.f32.mxu0 %vm1451_vm5, %v4087_v43  ;;  %v4103_v43 = vld [vmem:[#allocation7 + $0x938] sm:$0xff]  ;;  %v15428_v11 = vld [vmem:[#allocation82_spill] sm:$0xff] }
 0x72c   :  { %9235 = vmatprep.subr.mxu0 %v15400_v15 }
 0x72d   :  { %9236 = vmatpush3.msra.mxu0 %v15401_v3 }
 0x72e   :  { %9237 = vmatprep.subr.mxu0 %v15402_v55  ;;  %4374 = vmatmul.mubr.f32.gmra.mxu0 %v4086_v26  ;;  %v15413_v26 = vld [vmem:[#allocation67_spill] sm:$0xff] }
 0x72f   :  { %9238 = vmatpush3.msra.mxu0 %v15403_v37  ;;  %8479 = vmatprep.mubr.msk.f32.mxu0 %vm1451_vm5, %v4091_v40  ;;  %v15414_v40 = vld [vmem:[#allocation68_spill] sm:$0xff] }
 0x730   :  { %9239 = vmatprep.subr.mxu0 %v15404_v19 }
 0x731   :  { %9240 = vmatpush3.msra.mxu0 %v15405_v57 }
 0x732   :  { %9241 = vmatprep.subr.mxu0 %v15406_v17  ;;  %4379 = vmatmul.mubr.f32.gmra.mxu0 %v4090_v48  ;;  %v15415_v48 = vld [vmem:[#allocation41_spill] sm:$0xff] }
 0x733   :  { %9242 = vmatpush3.msra.mxu0 %v15407_v53  ;;  %8480 = vmatprep.mubr.msk.f32.mxu0 %vm1451_vm5, %v4095_v1  ;;  %v4102_v1 = vld [vmem:[#allocation7 + $0x930] sm:$0xff]  ;;  %v15420_v53 = vld [vmem:[#allocation76_spill] sm:$0xff] }
 0x734   :  { %9243 = vmatprep.subr.mxu0 %v15408_v29 }
 0x735   :  { %9244 = vmatpush3.msra.mxu0 %v15409_v5  ;;  %v15418_v5 = vld [vmem:[#allocation74_spill] sm:$0xff] }
 0x736   :  { %9245 = vmatprep.subr.mxu0 %v15410_v9  ;;  %4384 = vmatmul.mubr.f32.gmra.mxu0 %v4094_v24  ;;  %v15416_v9 = vld [vmem:[#allocation69_spill] sm:$0xff]  ;;  %v4107_v24 = vld [vmem:[#allocation7 + $0x958] sm:$0xff] }
 0x737   :  { %9246 = vmatpush3.msra.mxu0 %v15411_v18  ;;  %8481 = vmatprep.mubr.msk.f32.mxu0 %vm1451_vm5, %v4099_v20  ;;  %v15417_v18 = vld [vmem:[#allocation40_spill] sm:$0xff]  ;;  %v4106_v20 = vld [vmem:[#allocation7 + $0x950] sm:$0xff] }
 0x738   :  { %9247 = vmatprep.subr.mxu0 %v15412_v62  ;;  %v4628_v62 = vld [vmem:[#allocation7 + $0xa68] sm:$0xff] }
 0x739   :  { %9248 = vmatpush3.msra.mxu0 %v15413_v26  ;;  %v4111_v26 = vld [vmem:[#allocation7 + $0x978] sm:$0xff] }
 0x73a   :  { %9249 = vmatprep.subr.mxu0 %v15414_v40  ;;  %4389 = vmatmul.mubr.f32.gmra.mxu0 %v4098_v27  ;;  %v4110_v27 = vld [vmem:[#allocation7 + $0x970] sm:$0xff]  ;;  %v4119_v40 = vld [vmem:[#allocation7 + $0x9b8] sm:$0xff] }
 0x73b   :  { %9250 = vmatpush3.msra.mxu0 %v15415_v48  ;;  %8482 = vmatprep.mubr.msk.f32.mxu0 %vm1451_vm5, %v4103_v43  ;;  %v4115_v48 = vld [vmem:[#allocation7 + $0x998] sm:$0xff]  ;;  %v4114_v43 = vld [vmem:[#allocation7 + $0x990] sm:$0xff] }
 0x73c   :  { %9251 = vmatprep.subr.mxu0 %v15416_v9  ;;  %v4423_v9 = vld [vmem:[#allocation9 + $0xb8] sm:$0xff] }
 0x73d   :  { %9252 = vmatpush3.msra.mxu0 %v15417_v18  ;;  %10143 = vmatpush3.msra.mxu1 %v4423_v9  ;;  %v4608_v9 = vld [vmem:[#allocation7 + $0x9c8] sm:$0xff] }
 0x73e   :  { %4394 = vmatmul.mubr.f32.gmra.mxu0 %v4102_v1  ;;  %10189 = vmatprep.subr.mxu0 %v15202_v35  ;;  %v4118_v1 = vld [vmem:[#allocation7 + $0x9b0] sm:$0xff]  ;;  %v4624_v18 = vld [vmem:[#allocation7 + $0xa48] sm:$0xff] }
 0x73f   :  { %8483 = vmatprep.mubr.msk.f32.mxu0 %vm1451_vm5, %v4107_v24  ;;  %10144 = vmatprep.subr.mxu1 %v15202_v35  ;;  %v4422_v24 = vld [vmem:[#allocation9 + $0xb0] sm:$0xff] }
 0x740   :  { %10145 = vmatpush3.msra.mxu1 %v4422_v24  ;;  %v4620_v24 = vld [vmem:[#allocation7 + $0xa28] sm:$0xff] }
 0x741   :  { %10146 = vmatprep.subr.mxu1 %v15202_v35 }
 0x742   :  { %4399 = vmatmul.mubr.f32.gmra.mxu0 %v4106_v20  ;;  %v4607_v20 = vld [vmem:[#allocation7 + $0x9c0] sm:$0xff] }
 0x743   :  { %8484 = vmatprep.mubr.msk.f32.mxu0 %vm1451_vm5, %v4111_v26  ;;  %v4421_v26 = vld [vmem:[#allocation9 + $0xa8] sm:$0xff] }
 0x744   :  { %10147 = vmatpush3.msra.mxu1 %v4421_v26  ;;  %v4619_v26 = vld [vmem:[#allocation7 + $0xa20] sm:$0xff] }
 0x745   :  { %10148 = vmatprep.subr.mxu1 %v15202_v35 }
 0x746   :  { %4404 = vmatmul.mubr.f32.gmra.mxu0 %v4110_v27  ;;  %v4612_v27 = vld [vmem:[#allocation7 + $0x9e8] sm:$0xff] }
 0x747   :  { %8485 = vmatprep.mubr.msk.f32.mxu0 %vm1451_vm5, %v4115_v48  ;;  %v4420_v48 = vld [vmem:[#allocation9 + $0xa0] sm:$0xff] }
 0x748   :  { %10149 = vmatpush3.msra.mxu1 %v4420_v48  ;;  %v4623_v48 = vld [vmem:[#allocation7 + $0xa40] sm:$0xff] }
 0x749   :  { %4828 = vmatprep.subr.mxu1 %v15202_v35 }
 0x74a   :  { %4409 = vmatmul.mubr.f32.gmra.mxu0 %v4114_v43  ;;  %v4616_v43 = vld [vmem:[#allocation7 + $0xa08] sm:$0xff] }
 0x74b   :  { %8486 = vmatprep.mubr.msk.f32.mxu0 %vm1451_vm5, %v4119_v40  ;;  %v4611_v40 = vld [vmem:[#allocation7 + $0x9e0] sm:$0xff] }
 0x74e   :  { %4414 = vmatmul.mubr.f32.gmra.mxu0 %v4118_v1  ;;  %v4615_v1 = vld [vmem:[#allocation7 + $0xa00] sm:$0xff] }
 0x74f   :  { %4762 = vmatprep.mubr.f32.mxu0 %v4608_v9  ;;  %v4627_v9 = vld [vmem:[#allocation7 + $0xa60] sm:$0xff] }
 0x752   :  { %4763 = vmatmul.mubr.f32.vlgmr.msra.gmra.mxu0 %v4607_v20  ;;  %v13665_v20 = vpop.f32.mrf.mxu1 }
 0x753   :  { %4767 = vmatprep.mubr.f32.mxu0 %v4612_v27  ;;  %v4632_v27 = vld [vmem:[#allocation7 + $0xa88] sm:$0xff] }
 0x756   :  { %4768 = vmatmul.mubr.f32.gmra.mxu0 %v4611_v40  ;;  %v4631_v40 = vld [vmem:[#allocation7 + $0xa80] sm:$0xff] }
 0x757   :  { %4772 = vmatprep.mubr.f32.mxu0 %v4616_v43 }
 0x75a   :  { %4773 = vmatmul.mubr.f32.gmra.mxu0 %v4615_v1  ;;  %v13667_v1 = vpop.f32.mrf.mxu1 }
 0x75b   :  { %4777 = vmatprep.mubr.f32.mxu0 %v4620_v24  ;;  %v4636_v24 = vld [vmem:[#allocation7 + $0xaa8] sm:$0xff] }
 0x75c   :  { %v13672_v29 = vpop.f32.mrf.mxu1 }
 0x75e   :  { %4778 = vmatmul.mubr.f32.gmra.mxu0 %v4619_v26  ;;  %v13677_v19 = vpop.f32.mrf.mxu1 }
 0x75f   :  { %4782 = vmatprep.mubr.f32.mxu0 %v4624_v18  ;;  %v4635_v18 = vld [vmem:[#allocation7 + $0xaa0] sm:$0xff] }
 0x760   :  { %v13682_v55 = vpop.f32.mrf.mxu1 }
 0x762   :  { %4783 = vmatmul.mubr.f32.gmra.mxu0 %v4623_v48  ;;  %v9172_v3 = vpop.f32.mrf.mxu1 }
 0x763   :  { %4787 = vmatprep.mubr.f32.mxu0 %v4628_v62 }
 0x764   :  { %v9174_v15 = vpop.f32.mrf.mxu1 }
 0x766   :  { %4788 = vmatmul.mubr.f32.gmra.mxu0 %v4627_v9  ;;  %v4640_v9 = vld [vmem:[#allocation7 + $0xac8] sm:$0xff] }
 0x767   :  { %4792 = vmatprep.mubr.f32.mxu0 %v4632_v27  ;;  %v4639_v27 = vld [vmem:[#allocation7 + $0xac0] sm:$0xff] }
 0x76a   :  { %4793 = vmatmul.mubr.f32.gmra.mxu0 %v4631_v40 }
 0x76b   :  { %4797 = vmatprep.mubr.f32.mxu0 %v4636_v24 }
 0x76e   :  { %4798 = vmatmul.mubr.f32.gmra.mxu0 %v4635_v18  ;;  %v4643_v18 = vld [vmem:[#allocation7 + $0xae0] sm:$0xff] }
 0x76f   :  { %4802 = vmatprep.mubr.f32.mxu0 %v4640_v9 }
 0x772   :  { %4803 = vmatmul.mubr.f32.gmra.mxu0 %v4639_v27 }
 0x7aa   :  { %v3990_v43 = vpop.f32.mrf.mxu0 }
 0x7ab   :  { %v13670_v26 = vadd.f32 %v3990_v43, %v15418_v5  ;;  %v4644_v5 = vld [vmem:[#allocation7 + $0xae8] sm:$0xff] }
 0x7ac   :  { %v10105_v48 = vpop.f32.mrf.mxu0  ;;  %v15422_v43 = vld [vmem:[#allocation78_spill] sm:$0xff]  ;;  %4807 = vmatprep.mubr.f32.mxu0 %v4644_v5  ;;  %v15426_v5 = vld [vmem:[#allocation81_spill] sm:$0xff] }
 0x7ad   :  { %15419 = vst [vmem:[#allocation47_spill] sm:$0xff] %v13670_v26  ;;  %4808 = vmatmul.mubr.f32.gmra.mxu0 %v4643_v18  ;;  %v4648_v26 = vld [vmem:[#allocation7 + $0xb08] sm:$0xff] }
 0x7ae   :  { %v3995_v62 = vpop.f32.mrf.mxu0  ;;  %4812 = vmatprep.mubr.f32.mxu0 %v4648_v26  ;;  %v4655_v26 = vld [vmem:[#allocation7 + $0xb40] sm:$0xff] }
 0x7af   :  { %v13675_v17 = vadd.f32 %v3995_v62, %v15420_v53  ;;  %v4647_v53 = vld [vmem:[#allocation7 + $0xb00] sm:$0xff]  ;;  %v15424_v62 = vld [vmem:[#allocation80_spill] sm:$0xff] }
 0x7b0   :  { %v10108_v40 = vpop.f32.mrf.mxu0 }
 0x7b1   :  { %15421 = vst [vmem:[#allocation91_spill] sm:$0xff] %v13675_v17  ;;  %4813 = vmatmul.mubr.f32.gmra.mxu0 %v4647_v53  ;;  %v4652_v40 = vld [vmem:[#allocation7 + $0xb28] sm:$0xff] }
 0x7b2   :  { %v4000_v57 = vpop.f32.mrf.mxu0  ;;  %4817 = vmatprep.mubr.f32.mxu0 %v4652_v40  ;;  %v15430_v40 = vld [vmem:[#allocation83_spill] sm:$0xff] }
 0x7b3   :  { %v13680_v24 = vadd.f32 %v4000_v57, %v15422_v43  ;;  %v4651_v57 = vld [vmem:[#allocation7 + $0xb20] sm:$0xff] }
 0x7b4   :  { %v10111_v48 = vpop.f32.mrf.mxu0 }
 0x7b5   :  { %15423 = vst [vmem:[#allocation48_spill] sm:$0xff] %v13680_v24  ;;  %4818 = vmatmul.mubr.f32.gmra.mxu0 %v4651_v57  ;;  %v4656_v48 = vld [vmem:[#allocation7 + $0xb48] sm:$0xff] }
 0x7b6   :  { %v4005_v37 = vpop.f32.mrf.mxu0  ;;  %4822 = vmatprep.mubr.f32.mxu0 %v4656_v48 }
 0x7b7   :  { %v13685_v9 = vadd.f32 %v4005_v37, %v15424_v62 }
 0x7b8   :  { %v10114_v27 = vpop.f32.mrf.mxu0 }
 0x7b9   :  { %15425 = vst [vmem:[#allocation92_spill] sm:$0xff] %v13685_v9  ;;  %4823 = vmatmul.mubr.f32.gmra.mxu0 %v4655_v26  ;;  %v9175_v27 = vpop.f32.mrf.mxu1 }
 0x7ba   :  { %v4010_v17 = vpop.f32.mrf.mxu0  ;;  %10197 = vmatprep.mubr.msk.f32.mxu0 %vm11200_vm0, %v15202_v35 }
 0x7bb   :  { %v13688_v43 = vadd.f32 %v4010_v17, %v15426_v5 }
 0x7bc   :  { %v10117_v18 = vpop.f32.mrf.mxu0 }
 0x7bd   :  { %15427 = vst [vmem:[#allocation49_spill] sm:$0xff] %v13688_v43  ;;  %v9177_v18 = vpop.f32.mrf.mxu1  ;;  %v15432_v43 = vld [vmem:[#allocation84_spill] sm:$0xff] }
 0x7be   :  { %v4015_v24 = vpop.f32.mrf.mxu0 }
 0x7bf   :  { %v13691_v37 = vadd.f32 %v4015_v24, %v15428_v11  ;;  %v9178_v11 = vpop.f32.mrf.mxu1  ;;  %v15434_v24 = vld [vmem:[#allocation46_spill] sm:$0xff] }
 0x7c0   :  { %v10120_v62 = vpop.f32.mrf.mxu0 }
 0x7c1   :  { %15429 = vst [vmem:[#allocation93_spill] sm:$0xff] %v13691_v37  ;;  %v13704_v0 = vpop.f32.mrf.mxu1 }
 0x7c2   :  { %v4020_v53 = vpop.f32.mrf.mxu0 }
 0x7c3   :  { %v13696_v17 = vadd.f32 %v4020_v53, %v15430_v40 }
 0x7c4   :  { %v10123_v5 = vpop.f32.mrf.mxu0 }
 0x7c5   :  { %15431 = vst [vmem:[#allocation50_spill] sm:$0xff] %v13696_v17  ;;  %v9181_v5 = vpop.f32.mrf.mxu1  ;;  %v15436_v17 = vld [vmem:[#allocation90_spill] sm:$0xff] }
 0x7c6   :  { %v4025_v57 = vpop.f32.mrf.mxu0 }
 0x7c7   :  { %v13699_v9 = vadd.f32 %v4025_v57, %v15432_v43 }
 0x7c8   :  { %v10126_v48 = vpop.f32.mrf.mxu0 }
 0x7c9   :  { %15433 = vst [vmem:[#allocation94_spill] sm:$0xff] %v13699_v9  ;;  %v13712_v48 = vpop.f32.mrf.mxu1 }
 0x7ca   :  { %v4030_v30 = vpop.f32.mrf.mxu0 }
 0x7cb   :  { %v13702_v62 = vadd.f32 %v4030_v30, %v15434_v24 }
 0x7cc   :  { %v10129_v26 = vpop.f32.mrf.mxu0 }
 0x7cd   :  { %15435 = vst [vmem:[#allocation29_spill] sm:$0xff] %v13702_v62  ;;  %v9184_v62 = vpop.f32.mrf.mxu1 }
 0x7ce   :  { %v4035_v37 = vpop.f32.mrf.mxu0 }
 0x7cf   :  { %v13707_v25 = vadd.f32 %v4035_v37, %v13506_v41  ;;  %v9167_v37 = vadd.f32 %v13667_v1, %v13665_v20  ;;  %v9173_v1 = vadd.f32 %v9172_v3, %v13682_v55 }
 0x7d0   :  { %v10132_v53 = vpop.f32.mrf.mxu0 }
 0x7d2   :  { %v4040_v40 = vpop.f32.mrf.mxu0 }
 0x7d3   :  { %v13710_v45 = vadd.f32 %v4040_v40, %v15436_v17  ;;  %v13722_v17 = vpop.f32.mrf.mxu1 }
 0x7d4   :  { %v10135_v43 = vpop.f32.mrf.mxu0 }
 0x7d5   :  { %15437 = vst [vmem:[#allocation95_spill] sm:$0xff] %v13710_v45  ;;  %v9170_v45 = vadd.f32 %v13677_v19, %v13672_v29 }
 0x7d6   :  { %v4045_v57 = vpop.f32.mrf.mxu0 }
 0x7d7   :  { %v13715_v30 = vadd.f32 %v4045_v57, %v13514_v34 }
 0x7d8   :  { %v10138_v24 = vpop.f32.mrf.mxu0 }
 0x7da   :  { %v4050_v26 = vpop.f32.mrf.mxu0 }
 0x7db   :  { %v13718_v9 = vadd.f32 %v4050_v26, %v13517_v13  ;;  %v9187_v13 = vpop.f32.mrf.mxu1  ;;  %v9176_v26 = vadd.f32 %v9175_v27, %v9174_v15 }
 0x7dc   :  { %v10141_v41 = vpop.f32.mrf.mxu0 }
 0x7dd   :  { %v9189_v29 = vpop.f32.mrf.mxu1 }
 0x7de   :  { %v4355_v53 = vpop.f32.mrf.mxu0 }
 0x7df   :  { %v4356_v40 = vadd.f32 %v9167_v37, %v4355_v53  ;;  %v9190_v55 = vpop.f32.mrf.mxu1  ;;  %v9179_v53 = vadd.f32 %v9178_v11, %v9177_v18 }
 0x7e0   :  { %v4357_v43 = vpop.f32.mrf.mxu0 }
 0x7e1   :  { %10151 = vmatmul.mubr.msk.f32.vlgmr.msra.gmra.mxu1 %vm796_vm3, %v4356_v40  ;;  %v9192_v27 = vpop.f32.mrf.mxu1 }
 0x7e2   :  { %4829 = vmatpush1.msra.mxu1 %v15296_v46  ;;  %v4360_v34 = vpop.f32.mrf.mxu0  ;;  %10153 = vmatprep.mubr.msk.f32.mxu1 %vm11200_vm0, %v15202_v35 }
 0x7e3   :  { %v4361_v57 = vadd.f32 %v9170_v45, %v4360_v34  ;;  %4830 = vmatprep.subr.mxu1 %v15202_v35  ;;  %v9182_v34 = vadd.f32 %v9181_v5, %v13704_v0  ;;  %v9193_v11 = vpop.f32.mrf.mxu1 }
 0x7e4   :  { %4831 = vmatpush1.msra.mxu1 %v15297_v63  ;;  %v4362_v20 = vpop.f32.mrf.mxu0 }
 0x7e5   :  { %4832 = vmatprep.subr.mxu1 %v15202_v35  ;;  %10154 = vmatmul.mubr.msk.f32.gmra.mxu1 %vm796_vm3, %v4361_v57  ;;  %v9195_v5 = vpop.f32.mrf.mxu1 }
 0x7e6   :  { %4833 = vmatpush1.msra.mxu1 %v15298_v38  ;;  %v4365_v19 = vpop.f32.mrf.mxu0  ;;  %10156 = vmatprep.mubr.msk.f32.mxu1 %vm11200_vm0, %v15202_v35 }
 0x7e7   :  { %v4366_v24 = vadd.f32 %v9173_v1, %v4365_v19  ;;  %4834 = vmatprep.subr.mxu1 %v15202_v35  ;;  %v9185_v1 = vadd.f32 %v9184_v62, %v13712_v48  ;;  %v9196_v48 = vpop.f32.mrf.mxu1 }
 0x7e8   :  { %4835 = vmatpush1.msra.mxu1 %v15299_v23  ;;  %v4367_v45 = vpop.f32.mrf.mxu0 }
 0x7e9   :  { %4836 = vmatprep.subr.mxu1 %v15202_v35  ;;  %10157 = vmatmul.mubr.msk.f32.gmra.mxu1 %vm796_vm3, %v4366_v24  ;;  %v9188_v45 = vadd.f32 %v9187_v13, %v13722_v17  ;;  %v9198_v13 = vpop.f32.mrf.mxu1 }
 0x7ea   :  { %4837 = vmatpush1.msra.mxu1 %v15300_v21  ;;  %v4370_v3 = vpop.f32.mrf.mxu0  ;;  %10159 = vmatprep.mubr.msk.f32.mxu1 %vm11200_vm0, %v15202_v35 }
 0x7eb   :  { %v4371_v41 = vadd.f32 %v9176_v26, %v4370_v3  ;;  %4838 = vmatprep.subr.mxu1 %v15202_v35 }
 0x7ec   :  { %4839 = vmatpush1.msra.mxu1 %v15301_v47  ;;  %v4372_v37 = vpop.f32.mrf.mxu0 }
 0x7ed   :  { %4840 = vmatprep.subr.mxu1 %v15202_v35  ;;  %10160 = vmatmul.mubr.msk.f32.gmra.mxu1 %vm796_vm3, %v4371_v41  ;;  %v9191_v41 = vadd.f32 %v9190_v55, %v9189_v29  ;;  %v9199_v55 = vpop.f32.mrf.mxu1 }
 0x7ee   :  { %4841 = vmatpush1.msra.mxu1 %v15302_v6  ;;  %v4375_v15 = vpop.f32.mrf.mxu0  ;;  %10162 = vmatprep.mubr.msk.f32.mxu1 %vm11200_vm0, %v15202_v35 }
 0x7ef   :  { %v4376_v40 = vadd.f32 %v9179_v53, %v4375_v15  ;;  %4842 = vmatprep.subr.mxu1 %v15202_v35  ;;  %v9194_v15 = vadd.f32 %v9193_v11, %v9192_v27 }
 0x7f0   :  { %4843 = vmatpush1.msra.mxu1 %v15351_v28  ;;  %v4377_v43 = vpop.f32.mrf.mxu0 }
 0x7f1   :  { %4844 = vmatprep.subr.mxu1 %v15202_v35  ;;  %10163 = vmatmul.mubr.msk.f32.gmra.mxu1 %vm796_vm3, %v4376_v40 }
 0x7f2   :  { %4845 = vmatpush1.msra.mxu1 %v15304_v22  ;;  %v4380_v18 = vpop.f32.mrf.mxu0  ;;  %10165 = vmatprep.mubr.msk.f32.mxu1 %vm11200_vm0, %v15202_v35 }
 0x7f3   :  { %v4381_v57 = vadd.f32 %v9182_v34, %v4380_v18  ;;  %4846 = vmatprep.subr.mxu1 %v15202_v35  ;;  %v9197_v34 = vadd.f32 %v9196_v48, %v9195_v5  ;;  %v9201_v18 = vpop.f32.mrf.mxu1  ;;  %v4610_v48 = vld [vmem:[#allocation7 + $0x9d8] sm:$0xff] }
 0x7f4   :  { %4847 = vmatpush1.msra.mxu1 %v15352_v36  ;;  %v4382_v20 = vpop.f32.mrf.mxu0 }
 0x7f5   :  { %4848 = vmatprep.subr.mxu1 %v15202_v35  ;;  %10166 = vmatmul.mubr.msk.f32.gmra.mxu1 %vm796_vm3, %v4381_v57  ;;  %v9200_v20 = vadd.f32 %v9199_v55, %v9198_v13  ;;  %v4618_v13 = vld [vmem:[#allocation7 + $0xa18] sm:$0xff] }
 0x7f6   :  { %4849 = vmatpush1.msra.mxu1 %v15306_v50  ;;  %v4385_v0 = vpop.f32.mrf.mxu0  ;;  %10168 = vmatprep.mubr.msk.f32.mxu1 %vm11200_vm0, %v15202_v35  ;;  %v15439_v55 = vld [vmem:[#allocation52_spill] sm:$0xff] }
 0x7f7   :  { %v4386_v19 = vadd.f32 %v9185_v1, %v4385_v0  ;;  %4850 = vmatprep.subr.mxu1 %v15202_v35  ;;  %v9202_v1 = vpop.f32.mrf.mxu1 }
 0x7f8   :  { %4851 = vmatpush1.msra.mxu1 %v15353_v52  ;;  %v4387_v24 = vpop.f32.mrf.mxu0 }
 0x7f9   :  { %4852 = vmatprep.subr.mxu1 %v15202_v35  ;;  %10169 = vmatmul.mubr.msk.f32.gmra.mxu1 %vm796_vm3, %v4386_v19  ;;  %v9203_v24 = vadd.f32 %v9202_v1, %v9201_v18  ;;  %v4625_v18 = vld [vmem:[#allocation7 + $0xa50] sm:$0xff]  ;;  %v15445_v1 = vld [vmem:[#allocation58_spill] sm:$0xff] }
 0x7fa   :  { %4853 = vmatpush1.msra.mxu1 %v15308_v54  ;;  %v4390_v62 = vpop.f32.mrf.mxu0  ;;  %10171 = vmatprep.mubr.msk.f32.mxu1 %vm11200_vm0, %v15202_v35 }
 0x7fb   :  { %v4391_v26 = vadd.f32 %v9188_v45, %v4390_v62  ;;  %4854 = vmatprep.subr.mxu1 %v15202_v35 }
 0x7fc   :  { %4855 = vmatpush1.msra.mxu1 %v15354_v39  ;;  %v4392_v3 = vpop.f32.mrf.mxu0 }
 0x7fd   :  { %4856 = vmatprep.subr.mxu1 %v15202_v35  ;;  %10172 = vmatmul.mubr.msk.f32.gmra.mxu1 %vm796_vm3, %v4391_v26  ;;  %v4609_v3 = vld [vmem:[#allocation7 + $0x9d0] sm:$0xff] }
 0x7fe   :  { %4857 = vmatpush1.msra.mxu1 %v15310_v59  ;;  %v4395_v17 = vpop.f32.mrf.mxu0  ;;  %10174 = vmatprep.mubr.msk.f32.mxu1 %vm11200_vm0, %v15202_v35 }
 0x7ff   :  { %v4396_v37 = vadd.f32 %v9191_v41, %v4395_v17  ;;  %4858 = vmatprep.subr.mxu1 %v15202_v35  ;;  %v4614_v41 = vld [vmem:[#allocation7 + $0x9f8] sm:$0xff]  ;;  %v4613_v17 = vld [vmem:[#allocation7 + $0x9f0] sm:$0xff] }
 0x800   :  { %4859 = vmatpush1.msra.mxu1 %v15355_v58  ;;  %v4397_v53 = vpop.f32.mrf.mxu0 }
 0x801   :  { %4874 = vmatprep.subr.mxu1 %v15202_v35  ;;  %10175 = vmatmul.mubr.msk.f32.gmra.mxu1 %vm796_vm3, %v4396_v37  ;;  %v4617_v37 = vld [vmem:[#allocation7 + $0xa10] sm:$0xff]  ;;  %v4622_v53 = vld [vmem:[#allocation7 + $0xa38] sm:$0xff] }
 0x802   :  { %4875 = vmatpush2.msra.mxu1 %v15312_v44  ;;  %v4400_v29 = vpop.f32.mrf.mxu0  ;;  %10177 = vmatprep.mubr.msk.f32.mxu1 %vm11200_vm0, %v15202_v35 }
 0x803   :  { %v4401_v40 = vadd.f32 %v9194_v15, %v4400_v29  ;;  %4876 = vmatprep.subr.mxu1 %v15202_v35  ;;  %v15438_v15 = vld [vmem:[#allocation51_spill] sm:$0xff] }
 0x804   :  { %4877 = vmatpush2.msra.mxu1 %v15356_v61  ;;  %v4402_v43 = vpop.f32.mrf.mxu0  ;;  %v4621_v29 = vld [vmem:[#allocation7 + $0xa30] sm:$0xff] }
 0x805   :  { %4878 = vmatprep.subr.mxu1 %v15202_v35  ;;  %10178 = vmatmul.mubr.msk.f32.gmra.mxu1 %vm796_vm3, %v4401_v40  ;;  %v4626_v40 = vld [vmem:[#allocation7 + $0xa58] sm:$0xff]  ;;  %v15440_v43 = vld [vmem:[#allocation53_spill] sm:$0xff] }
 0x806   :  { %4879 = vmatpush2.msra.mxu1 %v15314_v31  ;;  %v4405_v27 = vpop.f32.mrf.mxu0  ;;  %10180 = vmatprep.mubr.msk.f32.mxu1 %vm11200_vm0, %v15202_v35 }
 0x807   :  { %v4406_v11 = vadd.f32 %v9197_v34, %v4405_v27  ;;  %4880 = vmatprep.subr.mxu1 %v15202_v35  ;;  %v15441_v34 = vld [vmem:[#allocation54_spill] sm:$0xff]  ;;  %v15442_v27 = vld [vmem:[#allocation55_spill] sm:$0xff] }
 0x808   :  { %4881 = vmatpush2.msra.mxu1 %v15357_v42  ;;  %v4407_v57 = vpop.f32.mrf.mxu0 }
 0x809   :  { %4882 = vmatprep.subr.mxu1 %v15202_v35  ;;  %10181 = vmatmul.mubr.msk.f32.gmra.mxu1 %vm796_vm3, %v4406_v11  ;;  %v15443_v11 = vld [vmem:[#allocation56_spill] sm:$0xff] }
 0x80a   :  { %4883 = vmatpush2.msra.mxu1 %v15316_v51  ;;  %v4410_v0 = vpop.f32.mrf.mxu0  ;;  %10183 = vmatprep.mubr.msk.f32.mxu1 %vm11200_vm0, %v15202_v35  ;;  %v4630_v57 = vld [vmem:[#allocation7 + $0xa78] sm:$0xff] }
 0x80b   :  { %v4411_v5 = vadd.f32 %v9200_v20, %v4410_v0  ;;  %4884 = vmatprep.subr.mxu1 %v15202_v35  ;;  %v15444_v20 = vld [vmem:[#allocation57_spill] sm:$0xff]  ;;  %v15446_v0 = vld [vmem:[#allocation59_spill] sm:$0xff] }
 0x80c   :  { %4885 = vmatpush2.msra.mxu1 %v15317_v4  ;;  %v4412_v19 = vpop.f32.mrf.mxu0 }
 0x80d   :  { %4886 = vmatprep.subr.mxu1 %v15202_v35  ;;  %10184 = vmatmul.mubr.msk.f32.gmra.mxu1 %vm796_vm3, %v4411_v5  ;;  %v4629_v5 = vld [vmem:[#allocation7 + $0xa70] sm:$0xff]  ;;  %v15447_v19 = vld [vmem:[#allocation60_spill] sm:$0xff] }
 0x80e   :  { %4887 = vmatpush2.msra.mxu1 %v15318_v33  ;;  %v4415_v45 = vpop.f32.mrf.mxu0  ;;  %10186 = vmatprep.mubr.msk.f32.mxu1 %vm11200_vm0, %v15202_v35 }
 0x80f   :  { %v4416_v62 = vadd.f32 %v9203_v24, %v4415_v45  ;;  %4888 = vmatprep.subr.mxu1 %v15202_v35  ;;  %v4634_v24 = vld [vmem:[#allocation7 + $0xa98] sm:$0xff]  ;;  %v15448_v45 = vld [vmem:[#allocation61_spill] sm:$0xff] }
 0x810   :  { %4889 = vmatpush2.msra.mxu1 %v15319_v2  ;;  %v4417_v26 = vpop.f32.mrf.mxu0 }
 0x811   :  { %4890 = vmatprep.subr.mxu1 %v15202_v35  ;;  %10187 = vmatmul.mubr.msk.f32.gmra.mxu1 %vm796_vm3, %v4416_v62  ;;  %v15449_v62 = vld [vmem:[#allocation62_spill] sm:$0xff]  ;;  %v4633_v26 = vld [vmem:[#allocation7 + $0xa90] sm:$0xff] }
 0x812   :  { %4891 = vmatpush2.msra.mxu1 %v15320_v7  ;;  %8500 = vmatprep.mubr.msk.f32.mxu1 %vm1451_vm5, %v4610_v48  ;;  %v15450_v48 = vld [vmem:[#allocation63_spill] sm:$0xff] }
 0x813   :  { %9309 = vmatprep.subr.mxu1 %v15321_v16 }
 0x815   :  { %4893 = vmatmul.mubr.f32.vlgmr.msra.gmra.mxu1 %v4609_v3  ;;  %v15451_v3 = vld [vmem:[#allocation64_spill] sm:$0xff] }
 0x816   :  { %9310 = vmatpush3.msra.mxu1 %v12227_v12  ;;  %8501 = vmatprep.mubr.msk.f32.mxu1 %vm1451_vm5, %v4614_v41  ;;  %v4638_v41 = vld [vmem:[#allocation7 + $0xab8] sm:$0xff] }
 0x817   :  { %9311 = vmatprep.subr.mxu1 %v12243_v10 }
 0x818   :  { %9312 = vmatpush3.msra.mxu1 %v15244_v56 }
 0x819   :  { %9313 = vmatprep.subr.mxu1 %v15245_v14  ;;  %4898 = vmatmul.mubr.f32.gmra.mxu1 %v4613_v17  ;;  %v15452_v17 = vld [vmem:[#allocation65_spill] sm:$0xff] }
 0x81a   :  { %9314 = vmatpush3.msra.mxu1 %v15246_v49  ;;  %8502 = vmatprep.mubr.msk.f32.mxu1 %vm1451_vm5, %v4618_v13  ;;  %v15453_v13 = vld [vmem:[#allocation43_spill] sm:$0xff] }
 0x81b   :  { %9315 = vmatprep.subr.mxu1 %v15247_v32 }
 0x81c   :  { %9316 = vmatpush3.msra.mxu1 %v15248_v8 }
 0x81d   :  { %9317 = vmatprep.subr.mxu1 %v15249_v60  ;;  %4903 = vmatmul.mubr.f32.gmra.mxu1 %v4617_v37  ;;  %v15454_v37 = vld [vmem:[#allocation66_spill] sm:$0xff] }
 0x81e   :  { %9318 = vmatpush3.msra.mxu1 %v15438_v15  ;;  %8503 = vmatprep.mubr.msk.f32.mxu1 %vm1451_vm5, %v4622_v53  ;;  %v4637_v53 = vld [vmem:[#allocation7 + $0xab0] sm:$0xff] }
 0x81f   :  { %9319 = vmatprep.subr.mxu1 %v15439_v55 }
 0x820   :  { %9320 = vmatpush3.msra.mxu1 %v15440_v43 }
 0x821   :  { %9321 = vmatprep.subr.mxu1 %v15441_v34  ;;  %4908 = vmatmul.mubr.f32.gmra.mxu1 %v4621_v29  ;;  %v15455_v29 = vld [vmem:[#allocation42_spill] sm:$0xff] }
 0x822   :  { %9322 = vmatpush3.msra.mxu1 %v15442_v27  ;;  %8504 = vmatprep.mubr.msk.f32.mxu1 %vm1451_vm5, %v4626_v40  ;;  %v4642_v40 = vld [vmem:[#allocation7 + $0xad8] sm:$0xff]  ;;  %v15471_v27 = vld [vmem:[#allocation93_spill] sm:$0xff] }
 0x823   :  { %9323 = vmatprep.subr.mxu1 %v15443_v11 }
 0x824   :  { %9324 = vmatpush3.msra.mxu1 %v15444_v20 }
 0x825   :  { %9325 = vmatprep.subr.mxu1 %v15445_v1  ;;  %4913 = vmatmul.mubr.f32.gmra.mxu1 %v4625_v18  ;;  %v15456_v18 = vld [vmem:[#allocation67_spill] sm:$0xff] }
 0x826   :  { %9326 = vmatpush3.msra.mxu1 %v15446_v0  ;;  %8505 = vmatprep.mubr.msk.f32.mxu1 %vm1451_vm5, %v4630_v57  ;;  %v15457_v57 = vld [vmem:[#allocation68_spill] sm:$0xff] }
 0x827   :  { %9327 = vmatprep.subr.mxu1 %v15447_v19 }
 0x828   :  { %9328 = vmatpush3.msra.mxu1 %v15448_v45 }
 0x829   :  { %9329 = vmatprep.subr.mxu1 %v15449_v62  ;;  %4918 = vmatmul.mubr.f32.gmra.mxu1 %v4629_v5  ;;  %v15458_v5 = vld [vmem:[#allocation41_spill] sm:$0xff] }
 0x82a   :  { %9330 = vmatpush3.msra.mxu1 %v15450_v48  ;;  %8506 = vmatprep.mubr.msk.f32.mxu1 %vm1451_vm5, %v4634_v24  ;;  %v4641_v24 = vld [vmem:[#allocation7 + $0xad0] sm:$0xff] }
 0x82b   :  { %9331 = vmatprep.subr.mxu1 %v15451_v3  ;;  %v15463_v48 = vld [vmem:[#allocation91_spill] sm:$0xff] }
 0x82c   :  { %9332 = vmatpush3.msra.mxu1 %v15452_v17  ;;  %v15461_v17 = vld [vmem:[#allocation47_spill] sm:$0xff] }
 0x82d   :  { %9333 = vmatprep.subr.mxu1 %v15453_v13  ;;  %4923 = vmatmul.mubr.f32.gmra.mxu1 %v4633_v26  ;;  %v15459_v13 = vld [vmem:[#allocation69_spill] sm:$0xff]  ;;  %v4646_v26 = vld [vmem:[#allocation7 + $0xaf8] sm:$0xff] }
 0x82e   :  { %9334 = vmatpush3.msra.mxu1 %v15454_v37  ;;  %8507 = vmatprep.mubr.msk.f32.mxu1 %vm1451_vm5, %v4638_v41  ;;  %v15460_v37 = vld [vmem:[#allocation40_spill] sm:$0xff]  ;;  %v4645_v41 = vld [vmem:[#allocation7 + $0xaf0] sm:$0xff] }
 0x82f   :  { %9335 = vmatprep.subr.mxu1 %v15455_v29  ;;  %v5167_v29 = vld [vmem:[#allocation7 + $0xc08] sm:$0xff] }
 0x830   :  { %9336 = vmatpush3.msra.mxu1 %v15456_v18  ;;  %v4650_v18 = vld [vmem:[#allocation7 + $0xb18] sm:$0xff] }
 0x831   :  { %9337 = vmatprep.subr.mxu1 %v15457_v57  ;;  %4928 = vmatmul.mubr.f32.gmra.mxu1 %v4637_v53  ;;  %v4649_v53 = vld [vmem:[#allocation7 + $0xb10] sm:$0xff]  ;;  %v4658_v57 = vld [vmem:[#allocation7 + $0xb58] sm:$0xff] }
 0x832   :  { %9338 = vmatpush3.msra.mxu1 %v15458_v5  ;;  %8508 = vmatprep.mubr.msk.f32.mxu1 %vm1451_vm5, %v4642_v40  ;;  %v4654_v5 = vld [vmem:[#allocation7 + $0xb38] sm:$0xff]  ;;  %v4653_v40 = vld [vmem:[#allocation7 + $0xb30] sm:$0xff] }
 0x833   :  { %9339 = vmatprep.subr.mxu1 %v15459_v13  ;;  %v4962_v13 = vld [vmem:[#allocation9 + $0xd8] sm:$0xff] }
 0x834   :  { %9340 = vmatpush3.msra.mxu1 %v15460_v37  ;;  %10190 = vmatpush3.msra.mxu0 %v4962_v13  ;;  %v5147_v13 = vld [vmem:[#allocation7 + $0xb68] sm:$0xff] }
 0x835   :  { %4933 = vmatmul.mubr.f32.gmra.mxu1 %v4641_v24  ;;  %10236 = vmatprep.subr.mxu1 %v15202_v35  ;;  %v4657_v24 = vld [vmem:[#allocation7 + $0xb50] sm:$0xff]  ;;  %v5163_v37 = vld [vmem:[#allocation7 + $0xbe8] sm:$0xff] }
 0x836   :  { %8509 = vmatprep.mubr.msk.f32.mxu1 %vm1451_vm5, %v4646_v26  ;;  %10191 = vmatprep.subr.mxu0 %v15202_v35  ;;  %v4961_v26 = vld [vmem:[#allocation9 + $0xd0] sm:$0xff] }
 0x837   :  { %10192 = vmatpush3.msra.mxu0 %v4961_v26  ;;  %v5159_v26 = vld [vmem:[#allocation7 + $0xbc8] sm:$0xff] }
 0x838   :  { %10193 = vmatprep.subr.mxu0 %v15202_v35 }
 0x839   :  { %4938 = vmatmul.mubr.f32.gmra.mxu1 %v4645_v41  ;;  %v5146_v41 = vld [vmem:[#allocation7 + $0xb60] sm:$0xff] }
 0x83a   :  { %8510 = vmatprep.mubr.msk.f32.mxu1 %vm1451_vm5, %v4650_v18  ;;  %v4960_v18 = vld [vmem:[#allocation9 + $0xc8] sm:$0xff] }
 0x83b   :  { %10194 = vmatpush3.msra.mxu0 %v4960_v18  ;;  %v5158_v18 = vld [vmem:[#allocation7 + $0xbc0] sm:$0xff] }
 0x83c   :  { %10195 = vmatprep.subr.mxu0 %v15202_v35 }
 0x83d   :  { %4943 = vmatmul.mubr.f32.gmra.mxu1 %v4649_v53  ;;  %v5151_v53 = vld [vmem:[#allocation7 + $0xb88] sm:$0xff] }
 0x83e   :  { %8511 = vmatprep.mubr.msk.f32.mxu1 %vm1451_vm5, %v4654_v5  ;;  %v4959_v5 = vld [vmem:[#allocation9 + $0xc0] sm:$0xff] }
 0x83f   :  { %10196 = vmatpush3.msra.mxu0 %v4959_v5  ;;  %v5162_v5 = vld [vmem:[#allocation7 + $0xbe0] sm:$0xff] }
 0x840   :  { %5367 = vmatprep.subr.mxu0 %v15202_v35 }
 0x841   :  { %4948 = vmatmul.mubr.f32.gmra.mxu1 %v4653_v40  ;;  %v5155_v40 = vld [vmem:[#allocation7 + $0xba8] sm:$0xff] }
 0x842   :  { %8512 = vmatprep.mubr.msk.f32.mxu1 %vm1451_vm5, %v4658_v57  ;;  %v5150_v57 = vld [vmem:[#allocation7 + $0xb80] sm:$0xff] }
 0x845   :  { %4953 = vmatmul.mubr.f32.gmra.mxu1 %v4657_v24  ;;  %v5154_v24 = vld [vmem:[#allocation7 + $0xba0] sm:$0xff] }
 0x846   :  { %5301 = vmatprep.mubr.f32.mxu1 %v5147_v13  ;;  %v5166_v13 = vld [vmem:[#allocation7 + $0xc00] sm:$0xff] }
 0x849   :  { %5302 = vmatmul.mubr.f32.vlgmr.msra.gmra.mxu1 %v5146_v41  ;;  %v13866_v41 = vpop.f32.mrf.mxu0 }
 0x84a   :  { %5306 = vmatprep.mubr.f32.mxu1 %v5151_v53  ;;  %v5171_v53 = vld [vmem:[#allocation7 + $0xc28] sm:$0xff] }
 0x84d   :  { %5307 = vmatmul.mubr.f32.gmra.mxu1 %v5150_v57  ;;  %v5170_v57 = vld [vmem:[#allocation7 + $0xc20] sm:$0xff] }
 0x84e   :  { %5311 = vmatprep.mubr.f32.mxu1 %v5155_v40 }
 0x851   :  { %5312 = vmatmul.mubr.f32.gmra.mxu1 %v5154_v24  ;;  %v13868_v24 = vpop.f32.mrf.mxu0 }
 0x852   :  { %5316 = vmatprep.mubr.f32.mxu1 %v5159_v26  ;;  %v5175_v26 = vld [vmem:[#allocation7 + $0xc48] sm:$0xff] }
 0x853   :  { %v13873_v3 = vpop.f32.mrf.mxu0 }
 0x855   :  { %5317 = vmatmul.mubr.f32.gmra.mxu1 %v5158_v18  ;;  %v13878_v19 = vpop.f32.mrf.mxu0 }
 0x856   :  { %5321 = vmatprep.mubr.f32.mxu1 %v5163_v37  ;;  %v5174_v37 = vld [vmem:[#allocation7 + $0xc40] sm:$0xff] }
 0x857   :  { %v13883_v1 = vpop.f32.mrf.mxu0 }
 0x859   :  { %5322 = vmatmul.mubr.f32.gmra.mxu1 %v5162_v5  ;;  %v9260_v20 = vpop.f32.mrf.mxu0 }
 0x85a   :  { %5326 = vmatprep.mubr.f32.mxu1 %v5167_v29 }
 0x85b   :  { %v9262_v11 = vpop.f32.mrf.mxu0 }
 0x85d   :  { %5327 = vmatmul.mubr.f32.gmra.mxu1 %v5166_v13  ;;  %v5179_v13 = vld [vmem:[#allocation7 + $0xc68] sm:$0xff] }
 0x85e   :  { %5331 = vmatprep.mubr.f32.mxu1 %v5171_v53  ;;  %v5178_v53 = vld [vmem:[#allocation7 + $0xc60] sm:$0xff] }
 0x861   :  { %5332 = vmatmul.mubr.f32.gmra.mxu1 %v5170_v57 }
 0x862   :  { %5336 = vmatprep.mubr.f32.mxu1 %v5175_v26 }
 0x865   :  { %5337 = vmatmul.mubr.f32.gmra.mxu1 %v5174_v37  ;;  %v5182_v37 = vld [vmem:[#allocation7 + $0xc80] sm:$0xff] }
 0x866   :  { %5341 = vmatprep.mubr.f32.mxu1 %v5179_v13 }
 0x869   :  { %5342 = vmatmul.mubr.f32.gmra.mxu1 %v5178_v53 }
 0x8a1   :  { %v4529_v40 = vpop.f32.mrf.mxu1 }
 0x8a2   :  { %v13871_v18 = vadd.f32 %v4529_v40, %v15461_v17  ;;  %v5183_v17 = vld [vmem:[#allocation7 + $0xc88] sm:$0xff]  ;;  %v15465_v40 = vld [vmem:[#allocation48_spill] sm:$0xff] }
 0x8a3   :  { %v10152_v5 = vpop.f32.mrf.mxu1  ;;  %5346 = vmatprep.mubr.f32.mxu1 %v5183_v17  ;;  %v15469_v17 = vld [vmem:[#allocation49_spill] sm:$0xff] }
 0x8a4   :  { %15462 = vst [vmem:[#allocation44_spill] sm:$0xff] %v13871_v18  ;;  %5347 = vmatmul.mubr.f32.gmra.mxu1 %v5182_v37  ;;  %v5187_v18 = vld [vmem:[#allocation7 + $0xca8] sm:$0xff] }
 0x8a5   :  { %v4534_v29 = vpop.f32.mrf.mxu1  ;;  %5351 = vmatprep.mubr.f32.mxu1 %v5187_v18  ;;  %v5194_v18 = vld [vmem:[#allocation7 + $0xce0] sm:$0xff] }
 0x8a6   :  { %v13876_v62 = vadd.f32 %v4534_v29, %v15463_v48  ;;  %v5186_v48 = vld [vmem:[#allocation7 + $0xca0] sm:$0xff]  ;;  %v15467_v29 = vld [vmem:[#allocation92_spill] sm:$0xff] }
 0x8a7   :  { %v10155_v57 = vpop.f32.mrf.mxu1 }
 0x8a8   :  { %15464 = vst [vmem:[#allocation96_spill] sm:$0xff] %v13876_v62  ;;  %5352 = vmatmul.mubr.f32.gmra.mxu1 %v5186_v48  ;;  %v5191_v57 = vld [vmem:[#allocation7 + $0xcc8] sm:$0xff] }
 0x8a9   :  { %v4539_v45 = vpop.f32.mrf.mxu1  ;;  %5356 = vmatprep.mubr.f32.mxu1 %v5191_v57  ;;  %v15473_v57 = vld [vmem:[#allocation50_spill] sm:$0xff] }
 0x8aa   :  { %v13881_v26 = vadd.f32 %v4539_v45, %v15465_v40  ;;  %v5190_v45 = vld [vmem:[#allocation7 + $0xcc0] sm:$0xff] }
 0x8ab   :  { %v10158_v5 = vpop.f32.mrf.mxu1 }
 0x8ac   :  { %15466 = vst [vmem:[#allocation85_spill] sm:$0xff] %v13881_v26  ;;  %5357 = vmatmul.mubr.f32.gmra.mxu1 %v5190_v45  ;;  %v5195_v5 = vld [vmem:[#allocation7 + $0xce8] sm:$0xff] }
 0x8ad   :  { %v4544_v0 = vpop.f32.mrf.mxu1  ;;  %5361 = vmatprep.mubr.f32.mxu1 %v5195_v5 }
 0x8ae   :  { %v13886_v13 = vadd.f32 %v4544_v0, %v15467_v29 }
 0x8af   :  { %v10161_v53 = vpop.f32.mrf.mxu1 }
 0x8b0   :  { %15468 = vst [vmem:[#allocation86_spill] sm:$0xff] %v13886_v13  ;;  %5362 = vmatmul.mubr.f32.gmra.mxu1 %v5194_v18  ;;  %v9263_v53 = vpop.f32.mrf.mxu0 }
 0x8b1   :  { %v4549_v62 = vpop.f32.mrf.mxu1  ;;  %10244 = vmatprep.mubr.msk.f32.mxu1 %vm11200_vm0, %v15202_v35 }
 0x8b2   :  { %v13889_v40 = vadd.f32 %v4549_v62, %v15469_v17 }
 0x8b3   :  { %v10164_v37 = vpop.f32.mrf.mxu1 }
 0x8b4   :  { %15470 = vst [vmem:[#allocation97_spill] sm:$0xff] %v13889_v40  ;;  %v9265_v37 = vpop.f32.mrf.mxu0  ;;  %v15475_v40 = vld [vmem:[#allocation94_spill] sm:$0xff] }
 0x8b5   :  { %v4554_v26 = vpop.f32.mrf.mxu1 }
 0x8b6   :  { %v13892_v0 = vadd.f32 %v4554_v26, %v15471_v27  ;;  %v9266_v27 = vpop.f32.mrf.mxu0  ;;  %v15477_v26 = vld [vmem:[#allocation29_spill] sm:$0xff] }
 0x8b7   :  { %v10167_v29 = vpop.f32.mrf.mxu1 }
 0x8b8   :  { %15472 = vst [vmem:[#allocation87_spill] sm:$0xff] %v13892_v0  ;;  %v13905_v43 = vpop.f32.mrf.mxu0 }
 0x8b9   :  { %v4559_v48 = vpop.f32.mrf.mxu1 }
 0x8ba   :  { %v13897_v62 = vadd.f32 %v4559_v48, %v15473_v57 }
 0x8bb   :  { %v10170_v17 = vpop.f32.mrf.mxu1 }
 0x8bc   :  { %15474 = vst [vmem:[#allocation88_spill] sm:$0xff] %v13897_v62  ;;  %v9269_v17 = vpop.f32.mrf.mxu0  ;;  %v15479_v62 = vld [vmem:[#allocation95_spill] sm:$0xff] }
 0x8bd   :  { %v4564_v45 = vpop.f32.mrf.mxu1 }
 0x8be   :  { %v13900_v13 = vadd.f32 %v4564_v45, %v15475_v40 }
 0x8bf   :  { %v10173_v5 = vpop.f32.mrf.mxu1 }
 0x8c0   :  { %15476 = vst [vmem:[#allocation89_spill] sm:$0xff] %v13900_v13  ;;  %v13913_v5 = vpop.f32.mrf.mxu0 }
 0x8c1   :  { %v4569_v34 = vpop.f32.mrf.mxu1 }
 0x8c2   :  { %v13903_v29 = vadd.f32 %v4569_v34, %v15477_v26 }
 0x8c3   :  { %v10176_v18 = vpop.f32.mrf.mxu1 }
 0x8c4   :  { %15478 = vst [vmem:[#allocation32_spill] sm:$0xff] %v13903_v29  ;;  %v9272_v29 = vpop.f32.mrf.mxu0 }
 0x8c5   :  { %v4574_v0 = vpop.f32.mrf.mxu1 }
 0x8c6   :  { %v13908_v55 = vadd.f32 %v4574_v0, %v13707_v25  ;;  %v9255_v0 = vadd.f32 %v13868_v24, %v13866_v41  ;;  %v9261_v24 = vadd.f32 %v9260_v20, %v13883_v1 }
 0x8c7   :  { %v10179_v48 = vpop.f32.mrf.mxu1 }
 0x8c9   :  { %v4579_v57 = vpop.f32.mrf.mxu1 }
 0x8ca   :  { %v13911_v15 = vadd.f32 %v4579_v57, %v15479_v62  ;;  %v13923_v62 = vpop.f32.mrf.mxu0 }
 0x8cb   :  { %v10182_v40 = vpop.f32.mrf.mxu1 }
 0x8cc   :  { %15480 = vst [vmem:[#allocation30_spill] sm:$0xff] %v13911_v15  ;;  %v9258_v15 = vadd.f32 %v13878_v19, %v13873_v3 }
 0x8cd   :  { %v4584_v45 = vpop.f32.mrf.mxu1 }
 0x8ce   :  { %v13916_v34 = vadd.f32 %v4584_v45, %v13715_v30 }
 0x8cf   :  { %v10185_v26 = vpop.f32.mrf.mxu1 }
 0x8d1   :  { %v4589_v18 = vpop.f32.mrf.mxu1 }
 0x8d2   :  { %v13919_v13 = vadd.f32 %v4589_v18, %v13718_v9  ;;  %v9275_v9 = vpop.f32.mrf.mxu0  ;;  %v9264_v18 = vadd.f32 %v9263_v53, %v9262_v11 }
 0x8d3   :  { %v10188_v25 = vpop.f32.mrf.mxu1 }
 0x8d4   :  { %v9277_v3 = vpop.f32.mrf.mxu0 }
 0x8d5   :  { %v4894_v48 = vpop.f32.mrf.mxu1 }
 0x8d6   :  { %v4895_v57 = vadd.f32 %v9255_v0, %v4894_v48  ;;  %v9278_v1 = vpop.f32.mrf.mxu0  ;;  %v9267_v48 = vadd.f32 %v9266_v27, %v9265_v37 }
 0x8d7   :  { %v4896_v40 = vpop.f32.mrf.mxu1 }
 0x8d8   :  { %10198 = vmatmul.mubr.msk.f32.vlgmr.msra.gmra.mxu0 %vm796_vm3, %v4895_v57  ;;  %v9280_v53 = vpop.f32.mrf.mxu0 }
 0x8d9   :  { %5368 = vmatpush1.msra.mxu0 %v15296_v46  ;;  %v4899_v30 = vpop.f32.mrf.mxu1  ;;  %10200 = vmatprep.mubr.msk.f32.mxu0 %vm11200_vm0, %v15202_v35 }
 0x8da   :  { %v4900_v45 = vadd.f32 %v9258_v15, %v4899_v30  ;;  %5369 = vmatprep.subr.mxu0 %v15202_v35  ;;  %v9270_v30 = vadd.f32 %v9269_v17, %v13905_v43  ;;  %v9281_v27 = vpop.f32.mrf.mxu0 }
 0x8db   :  { %5370 = vmatpush1.msra.mxu0 %v15297_v63  ;;  %v4901_v41 = vpop.f32.mrf.mxu1 }
 0x8dc   :  { %5371 = vmatprep.subr.mxu0 %v15202_v35  ;;  %10201 = vmatmul.mubr.msk.f32.gmra.mxu0 %vm796_vm3, %v4900_v45  ;;  %v9283_v17 = vpop.f32.mrf.mxu0 }
 0x8dd   :  { %5372 = vmatpush1.msra.mxu0 %v15298_v38  ;;  %v4904_v19 = vpop.f32.mrf.mxu1  ;;  %10203 = vmatprep.mubr.msk.f32.mxu0 %vm11200_vm0, %v15202_v35 }
 0x8de   :  { %v4905_v26 = vadd.f32 %v9261_v24, %v4904_v19  ;;  %5373 = vmatprep.subr.mxu0 %v15202_v35  ;;  %v9273_v24 = vadd.f32 %v9272_v29, %v13913_v5  ;;  %v9284_v5 = vpop.f32.mrf.mxu0 }
 0x8df   :  { %5374 = vmatpush1.msra.mxu0 %v15299_v23  ;;  %v4906_v15 = vpop.f32.mrf.mxu1 }
 0x8e0   :  { %5375 = vmatprep.subr.mxu0 %v15202_v35  ;;  %10204 = vmatmul.mubr.msk.f32.gmra.mxu0 %vm796_vm3, %v4905_v26  ;;  %v9276_v15 = vadd.f32 %v9275_v9, %v13923_v62  ;;  %v9286_v9 = vpop.f32.mrf.mxu0 }
 0x8e1   :  { %5376 = vmatpush1.msra.mxu0 %v15300_v21  ;;  %v4909_v20 = vpop.f32.mrf.mxu1  ;;  %10206 = vmatprep.mubr.msk.f32.mxu0 %vm11200_vm0, %v15202_v35 }
 0x8e2   :  { %v4910_v25 = vadd.f32 %v9264_v18, %v4909_v20  ;;  %5377 = vmatprep.subr.mxu0 %v15202_v35 }
 0x8e3   :  { %5378 = vmatpush1.msra.mxu0 %v15301_v47  ;;  %v4911_v0 = vpop.f32.mrf.mxu1 }
 0x8e4   :  { %5379 = vmatprep.subr.mxu0 %v15202_v35  ;;  %10207 = vmatmul.mubr.msk.f32.gmra.mxu0 %vm796_vm3, %v4910_v25  ;;  %v9279_v25 = vadd.f32 %v9278_v1, %v9277_v3  ;;  %v9287_v1 = vpop.f32.mrf.mxu0 }
 0x8e5   :  { %5380 = vmatpush1.msra.mxu0 %v15302_v6  ;;  %v4914_v11 = vpop.f32.mrf.mxu1  ;;  %10209 = vmatprep.mubr.msk.f32.mxu0 %vm11200_vm0, %v15202_v35 }
 0x8e6   :  { %v4915_v57 = vadd.f32 %v9267_v48, %v4914_v11  ;;  %5381 = vmatprep.subr.mxu0 %v15202_v35  ;;  %v9282_v11 = vadd.f32 %v9281_v27, %v9280_v53 }
 0x8e7   :  { %5382 = vmatpush1.msra.mxu0 %v15351_v28  ;;  %v4916_v40 = vpop.f32.mrf.mxu1 }
 0x8e8   :  { %5383 = vmatprep.subr.mxu0 %v15202_v35  ;;  %10210 = vmatmul.mubr.msk.f32.gmra.mxu0 %vm796_vm3, %v4915_v57 }
 0x8e9   :  { %5384 = vmatpush1.msra.mxu0 %v15304_v22  ;;  %v4919_v37 = vpop.f32.mrf.mxu1  ;;  %10212 = vmatprep.mubr.msk.f32.mxu0 %vm11200_vm0, %v15202_v35 }
 0x8ea   :  { %v4920_v45 = vadd.f32 %v9270_v30, %v4919_v37  ;;  %5385 = vmatprep.subr.mxu0 %v15202_v35  ;;  %v9285_v30 = vadd.f32 %v9284_v5, %v9283_v17  ;;  %v9289_v37 = vpop.f32.mrf.mxu0  ;;  %v5149_v5 = vld [vmem:[#allocation7 + $0xb78] sm:$0xff] }
 0x8eb   :  { %5386 = vmatpush1.msra.mxu0 %v15352_v36  ;;  %v4921_v41 = vpop.f32.mrf.mxu1 }
 0x8ec   :  { %5387 = vmatprep.subr.mxu0 %v15202_v35  ;;  %10213 = vmatmul.mubr.msk.f32.gmra.mxu0 %vm796_vm3, %v4920_v45  ;;  %v9288_v41 = vadd.f32 %v9287_v1, %v9286_v9  ;;  %v5157_v9 = vld [vmem:[#allocation7 + $0xbb8] sm:$0xff]  ;;  %v15488_v1 = vld [vmem:[#allocation58_spill] sm:$0xff] }
 0x8ed   :  { %5388 = vmatpush1.msra.mxu0 %v15306_v50  ;;  %v4924_v43 = vpop.f32.mrf.mxu1  ;;  %10215 = vmatprep.mubr.msk.f32.mxu0 %vm11200_vm0, %v15202_v35 }
 0x8ee   :  { %v4925_v19 = vadd.f32 %v9273_v24, %v4924_v43  ;;  %5389 = vmatprep.subr.mxu0 %v15202_v35  ;;  %v9290_v24 = vpop.f32.mrf.mxu0 }
 0x8ef   :  { %5390 = vmatpush1.msra.mxu0 %v15353_v52  ;;  %v4926_v26 = vpop.f32.mrf.mxu1 }
 0x8f0   :  { %5391 = vmatprep.subr.mxu0 %v15202_v35  ;;  %10216 = vmatmul.mubr.msk.f32.gmra.mxu0 %vm796_vm3, %v4925_v19  ;;  %v9291_v26 = vadd.f32 %v9290_v24, %v9289_v37  ;;  %v15491_v37 = vld [vmem:[#allocation61_spill] sm:$0xff]  ;;  %v15494_v24 = vld [vmem:[#allocation64_spill] sm:$0xff] }
 0x8f1   :  { %5392 = vmatpush1.msra.mxu0 %v15308_v54  ;;  %v4929_v29 = vpop.f32.mrf.mxu1  ;;  %10218 = vmatprep.mubr.msk.f32.mxu0 %vm11200_vm0, %v15202_v35 }
 0x8f2   :  { %v4930_v18 = vadd.f32 %v9276_v15, %v4929_v29  ;;  %5393 = vmatprep.subr.mxu0 %v15202_v35 }
 0x8f3   :  { %5394 = vmatpush1.msra.mxu0 %v15354_v39  ;;  %v4931_v20 = vpop.f32.mrf.mxu1 }
 0x8f4   :  { %5395 = vmatprep.subr.mxu0 %v15202_v35  ;;  %10219 = vmatmul.mubr.msk.f32.gmra.mxu0 %vm796_vm3, %v4930_v18  ;;  %v5148_v20 = vld [vmem:[#allocation7 + $0xb70] sm:$0xff] }
 0x8f5   :  { %5396 = vmatpush1.msra.mxu0 %v15310_v59  ;;  %v4934_v62 = vpop.f32.mrf.mxu1  ;;  %10221 = vmatprep.mubr.msk.f32.mxu0 %vm11200_vm0, %v15202_v35 }
 0x8f6   :  { %v4935_v0 = vadd.f32 %v9279_v25, %v4934_v62  ;;  %5397 = vmatprep.subr.mxu0 %v15202_v35  ;;  %v5153_v25 = vld [vmem:[#allocation7 + $0xb98] sm:$0xff]  ;;  %v5152_v62 = vld [vmem:[#allocation7 + $0xb90] sm:$0xff] }
 0x8f7   :  { %5398 = vmatpush1.msra.mxu0 %v15355_v58  ;;  %v4936_v48 = vpop.f32.mrf.mxu1 }
 0x8f8   :  { %5413 = vmatprep.subr.mxu0 %v15202_v35  ;;  %10222 = vmatmul.mubr.msk.f32.gmra.mxu0 %vm796_vm3, %v4935_v0  ;;  %v5161_v0 = vld [vmem:[#allocation7 + $0xbd8] sm:$0xff]  ;;  %v15484_v48 = vld [vmem:[#allocation54_spill] sm:$0xff] }
 0x8f9   :  { %5414 = vmatpush2.msra.mxu0 %v15312_v44  ;;  %v4939_v3 = vpop.f32.mrf.mxu1  ;;  %10224 = vmatprep.mubr.msk.f32.mxu0 %vm11200_vm0, %v15202_v35 }
 0x8fa   :  { %v4940_v57 = vadd.f32 %v9282_v11, %v4939_v3  ;;  %5415 = vmatprep.subr.mxu0 %v15202_v35  ;;  %v5169_v11 = vld [vmem:[#allocation7 + $0xc18] sm:$0xff]  ;;  %v15487_v3 = vld [vmem:[#allocation57_spill] sm:$0xff] }
 0x8fb   :  { %5416 = vmatpush2.msra.mxu0 %v15356_v61  ;;  %v4941_v40 = vpop.f32.mrf.mxu1 }
 0x8fc   :  { %5417 = vmatprep.subr.mxu0 %v15202_v35  ;;  %10225 = vmatmul.mubr.msk.f32.gmra.mxu0 %vm796_vm3, %v4940_v57  ;;  %v15489_v57 = vld [vmem:[#allocation59_spill] sm:$0xff] }
 0x8fd   :  { %5418 = vmatpush2.msra.mxu0 %v15314_v31  ;;  %v4944_v53 = vpop.f32.mrf.mxu1  ;;  %10227 = vmatprep.mubr.msk.f32.mxu0 %vm11200_vm0, %v15202_v35  ;;  %v5168_v40 = vld [vmem:[#allocation7 + $0xc10] sm:$0xff] }
 0x8fe   :  { %v4945_v27 = vadd.f32 %v9285_v30, %v4944_v53  ;;  %5419 = vmatprep.subr.mxu0 %v15202_v35  ;;  %v15490_v30 = vld [vmem:[#allocation60_spill] sm:$0xff] }
 0x8ff   :  { %5420 = vmatpush2.msra.mxu0 %v15357_v42  ;;  %v4946_v45 = vpop.f32.mrf.mxu1  ;;  %v5173_v53 = vld [vmem:[#allocation7 + $0xc38] sm:$0xff] }
 0x900   :  { %5421 = vmatprep.subr.mxu0 %v15202_v35  ;;  %10228 = vmatmul.mubr.msk.f32.gmra.mxu0 %vm796_vm3, %v4945_v27  ;;  %v15492_v27 = vld [vmem:[#allocation62_spill] sm:$0xff]  ;;  %v15493_v45 = vld [vmem:[#allocation63_spill] sm:$0xff] }
 0x901   :  { %5422 = vmatpush2.msra.mxu0 %v15316_v51  ;;  %v4949_v43 = vpop.f32.mrf.mxu1  ;;  %10230 = vmatprep.mubr.msk.f32.mxu0 %vm11200_vm0, %v15202_v35 }
 0x902   :  { %v4950_v17 = vadd.f32 %v9288_v41, %v4949_v43  ;;  %5423 = vmatprep.subr.mxu0 %v15202_v35  ;;  %v5172_v41 = vld [vmem:[#allocation7 + $0xc30] sm:$0xff]  ;;  %v5177_v43 = vld [vmem:[#allocation7 + $0xc58] sm:$0xff] }
 0x903   :  { %5424 = vmatpush2.msra.mxu0 %v15317_v4  ;;  %v4951_v19 = vpop.f32.mrf.mxu1 }
 0x904   :  { %5425 = vmatprep.subr.mxu0 %v15202_v35  ;;  %10231 = vmatmul.mubr.msk.f32.gmra.mxu0 %vm796_vm3, %v4950_v17  ;;  %v15495_v17 = vld [vmem:[#allocation65_spill] sm:$0xff]  ;;  %v15496_v19 = vld [vmem:[#allocation43_spill] sm:$0xff] }
 0x905   :  { %5426 = vmatpush2.msra.mxu0 %v15318_v33  ;;  %v4954_v15 = vpop.f32.mrf.mxu1  ;;  %10233 = vmatprep.mubr.msk.f32.mxu0 %vm11200_vm0, %v15202_v35 }
 0x906   :  { %v4955_v29 = vadd.f32 %v9291_v26, %v4954_v15  ;;  %5427 = vmatprep.subr.mxu0 %v15202_v35  ;;  %v15497_v26 = vld [vmem:[#allocation66_spill] sm:$0xff]  ;;  %v5176_v15 = vld [vmem:[#allocation7 + $0xc50] sm:$0xff] }
 0x907   :  { %5428 = vmatpush2.msra.mxu0 %v15319_v2  ;;  %v4956_v18 = vpop.f32.mrf.mxu1 }
 0x908   :  { %5429 = vmatprep.subr.mxu0 %v15202_v35  ;;  %10234 = vmatmul.mubr.msk.f32.gmra.mxu0 %vm796_vm3, %v4955_v29  ;;  %v15498_v29 = vld [vmem:[#allocation42_spill] sm:$0xff]  ;;  %v15499_v18 = vld [vmem:[#allocation67_spill] sm:$0xff] }
 0x909   :  { %5430 = vmatpush2.msra.mxu0 %v15320_v7  ;;  %8526 = vmatprep.mubr.msk.f32.mxu0 %vm1451_vm5, %v5149_v5  ;;  %v5181_v5 = vld [vmem:[#allocation7 + $0xc78] sm:$0xff] }
 0x90a   :  { %9397 = vmatprep.subr.mxu0 %v15321_v16  ;;  %v5156_v16 = vld [vmem:[#allocation7 + $0xbb0] sm:$0xff] }
 0x90c   :  { %5432 = vmatmul.mubr.f32.vlgmr.msra.gmra.mxu0 %v5148_v20  ;;  %v15500_v20 = vld [vmem:[#allocation68_spill] sm:$0xff] }
 0x90d   :  { %9398 = vmatpush3.msra.mxu0 %v12227_v12  ;;  %8527 = vmatprep.mubr.msk.f32.mxu0 %vm1451_vm5, %v5153_v25  ;;  %v15481_v12 = vld [vmem:[#allocation51_spill] sm:$0xff]  ;;  %v15501_v25 = vld [vmem:[#allocation41_spill] sm:$0xff] }
 0x90e   :  { %9399 = vmatprep.subr.mxu0 %v12243_v10  ;;  %v5160_v10 = vld [vmem:[#allocation7 + $0xbd0] sm:$0xff] }
 0x90f   :  { %9400 = vmatpush3.msra.mxu0 %v15244_v56  ;;  %v15482_v56 = vld [vmem:[#allocation52_spill] sm:$0xff] }
 0x910   :  { %9401 = vmatprep.subr.mxu0 %v15245_v14  ;;  %5437 = vmatmul.mubr.f32.gmra.mxu0 %v5152_v62  ;;  %v5165_v14 = vld [vmem:[#allocation7 + $0xbf8] sm:$0xff]  ;;  %v5180_v62 = vld [vmem:[#allocation7 + $0xc70] sm:$0xff] }
 0x911   :  { %9402 = vmatpush3.msra.mxu0 %v15246_v49  ;;  %8528 = vmatprep.mubr.msk.f32.mxu0 %vm1451_vm5, %v5157_v9  ;;  %v15483_v49 = vld [vmem:[#allocation53_spill] sm:$0xff] }
 0x912   :  { %9403 = vmatprep.subr.mxu0 %v15247_v32  ;;  %v15485_v32 = vld [vmem:[#allocation55_spill] sm:$0xff]  ;;  %v15502_v9 = vld [vmem:[#allocation69_spill] sm:$0xff] }
 0x913   :  { %9404 = vmatpush3.msra.mxu0 %v15248_v8  ;;  %v5164_v8 = vld [vmem:[#allocation7 + $0xbf0] sm:$0xff] }
 0x914   :  { %9405 = vmatprep.subr.mxu0 %v15249_v60  ;;  %5442 = vmatmul.mubr.f32.gmra.mxu0 %v5156_v16  ;;  %v15486_v60 = vld [vmem:[#allocation56_spill] sm:$0xff] }
 0x915   :  { %9406 = vmatpush3.msra.mxu0 %v15481_v12  ;;  %8529 = vmatprep.mubr.msk.f32.mxu0 %vm1451_vm5, %v5161_v0  ;;  %v5185_v16 = vld [vmem:[#allocation7 + $0xc98] sm:$0xff]  ;;  %v5184_v12 = vld [vmem:[#allocation7 + $0xc90] sm:$0xff] }
 0x916   :  { %9407 = vmatprep.subr.mxu0 %v15482_v56  ;;  %v15503_v0 = vld [vmem:[#allocation40_spill] sm:$0xff]  ;;  %v5188_v56 = vld [vmem:[#allocation7 + $0xcb0] sm:$0xff] }
 0x917   :  { %9408 = vmatpush3.msra.mxu0 %v15483_v49  ;;  %v5192_v49 = vld [vmem:[#allocation7 + $0xcd0] sm:$0xff] }
 0x918   :  { %9409 = vmatprep.subr.mxu0 %v15484_v48  ;;  %5447 = vmatmul.mubr.f32.gmra.mxu0 %v5160_v10  ;;  %v5189_v10 = vld [vmem:[#allocation7 + $0xcb8] sm:$0xff] }
 0x919   :  { %9410 = vmatpush3.msra.mxu0 %v15485_v32  ;;  %8530 = vmatprep.mubr.msk.f32.mxu0 %vm1451_vm5, %v5165_v14  ;;  %v5193_v14 = vld [vmem:[#allocation7 + $0xcd8] sm:$0xff] }
 0x91a   :  { %9411 = vmatprep.subr.mxu0 %v15486_v60  ;;  %v5501_v48 = vld [vmem:[#allocation9 + $0xf8] sm:$0xff]  ;;  %v5500_v60 = vld [vmem:[#allocation9 + $0xf0] sm:$0xff] }
 0x91b   :  { %9412 = vmatpush3.msra.mxu0 %v15487_v3  ;;  %v5197_v32 = vld [vmem:[#allocation7 + $0xcf8] sm:$0xff]  ;;  %10237 = vmatpush3.msra.mxu1 %v5501_v48  ;;  %v5498_v3 = vld [vmem:[#allocation9 + $0xe0] sm:$0xff]  ;;  %v5722_v48 = vld [vmem:[#allocation7 + $0xe28] sm:$0xff] }
 0x91c   :  { %9413 = vmatprep.subr.mxu0 %v15488_v1  ;;  %5452 = vmatmul.mubr.f32.gmra.mxu0 %v5164_v8  ;;  %v5196_v8 = vld [vmem:[#allocation7 + $0xcf0] sm:$0xff]  ;;  %v5686_v1 = vld [vmem:[#allocation7 + $0xd08] sm:$0xff] }
 0x91d   :  { %9414 = vmatpush3.msra.mxu0 %v15489_v57  ;;  %8531 = vmatprep.mubr.msk.f32.mxu0 %vm1451_vm5, %v5169_v11  ;;  %v5499_v11 = vld [vmem:[#allocation9 + $0xe8] sm:$0xff]  ;;  %v5685_v57 = vld [vmem:[#allocation7 + $0xd00] sm:$0xff] }
 0x91e   :  { %9415 = vmatprep.subr.mxu0 %v15490_v30  ;;  %10238 = vmatprep.subr.mxu1 %v15202_v35  ;;  %v5689_v30 = vld [vmem:[#allocation7 + $0xd20] sm:$0xff] }
 0x91f   :  { %9416 = vmatpush3.msra.mxu0 %v15491_v37  ;;  %10239 = vmatpush3.msra.mxu1 %v5500_v60  ;;  %v5693_v37 = vld [vmem:[#allocation7 + $0xd40] sm:$0xff] }
 0x920   :  { %9417 = vmatprep.subr.mxu0 %v15492_v27  ;;  %5457 = vmatmul.mubr.f32.gmra.mxu0 %v5168_v40  ;;  %v5690_v40 = vld [vmem:[#allocation7 + $0xd28] sm:$0xff]  ;;  %v5721_v60 = vld [vmem:[#allocation7 + $0xe20] sm:$0xff] }
 0x921   :  { %9418 = vmatpush3.msra.mxu0 %v15493_v45  ;;  %8532 = vmatprep.mubr.msk.f32.mxu0 %vm1451_vm5, %v5173_v53  ;;  %v5694_v53 = vld [vmem:[#allocation7 + $0xd48] sm:$0xff]  ;;  %v5697_v45 = vld [vmem:[#allocation7 + $0xd60] sm:$0xff] }
 0x922   :  { %9419 = vmatprep.subr.mxu0 %v15494_v24  ;;  %10240 = vmatprep.subr.mxu1 %v15202_v35  ;;  %v5698_v27 = vld [vmem:[#allocation7 + $0xd68] sm:$0xff]  ;;  %v5701_v24 = vld [vmem:[#allocation7 + $0xd80] sm:$0xff] }
 0x923   :  { %9420 = vmatpush3.msra.mxu0 %v15495_v17  ;;  %10241 = vmatpush3.msra.mxu1 %v5499_v11  ;;  %v5705_v17 = vld [vmem:[#allocation7 + $0xda0] sm:$0xff] }
 0x924   :  { %9421 = vmatprep.subr.mxu0 %v15496_v19  ;;  %5462 = vmatmul.mubr.f32.gmra.mxu0 %v5172_v41  ;;  %v5702_v41 = vld [vmem:[#allocation7 + $0xd88] sm:$0xff]  ;;  %v15506_v11 = vld [vmem:[#allocation85_spill] sm:$0xff] }
 0x925   :  { %9422 = vmatpush3.msra.mxu0 %v15497_v26  ;;  %8533 = vmatprep.mubr.msk.f32.mxu0 %vm1451_vm5, %v5177_v43  ;;  %v5706_v43 = vld [vmem:[#allocation7 + $0xda8] sm:$0xff]  ;;  %v14067_v26 = vpop.f32.mrf.mxu1 }
 0x926   :  { %9423 = vmatprep.subr.mxu0 %v15498_v29  ;;  %10242 = vmatprep.subr.mxu1 %v15202_v35  ;;  %v5710_v19 = vld [vmem:[#allocation7 + $0xdc8] sm:$0xff] }
 0x927   :  { %9424 = vmatpush3.msra.mxu0 %v15499_v18  ;;  %10243 = vmatpush3.msra.mxu1 %v5498_v3  ;;  %v5714_v29 = vld [vmem:[#allocation7 + $0xde8] sm:$0xff]  ;;  %v14069_v18 = vpop.f32.mrf.mxu1 }
 0x928   :  { %9425 = vmatprep.subr.mxu0 %v15500_v20  ;;  %5467 = vmatmul.mubr.f32.gmra.mxu0 %v5176_v15  ;;  %v5709_v15 = vld [vmem:[#allocation7 + $0xdc0] sm:$0xff] }
 0x929   :  { %9426 = vmatpush3.msra.mxu0 %v15501_v25  ;;  %8534 = vmatprep.mubr.msk.f32.mxu0 %vm1451_vm5, %v5181_v5  ;;  %v5713_v20 = vld [vmem:[#allocation7 + $0xde0] sm:$0xff]  ;;  %v15504_v25 = vld [vmem:[#allocation44_spill] sm:$0xff] }
 0x92a   :  { %9427 = vmatprep.subr.mxu0 %v15502_v9  ;;  %5906 = vmatprep.subr.mxu1 %v15202_v35 }
 0x92b   :  { %9428 = vmatpush3.msra.mxu0 %v15503_v0 }
 0x92c   :  { %5472 = vmatmul.mubr.f32.gmra.mxu0 %v5180_v62  ;;  %10283 = vmatprep.subr.mxu0 %v15202_v35 }
 0x92d   :  { %8535 = vmatprep.mubr.msk.f32.mxu0 %vm1451_vm5, %v5185_v16  ;;  %v5718_v16 = vld [vmem:[#allocation7 + $0xe08] sm:$0xff] }
 0x930   :  { %5477 = vmatmul.mubr.f32.gmra.mxu0 %v5184_v12  ;;  %v14074_v12 = vpop.f32.mrf.mxu1 }
 0x931   :  { %8536 = vmatprep.mubr.msk.f32.mxu0 %vm1451_vm5, %v5189_v10  ;;  %v5717_v10 = vld [vmem:[#allocation7 + $0xe00] sm:$0xff] }
 0x934   :  { %5482 = vmatmul.mubr.f32.gmra.mxu0 %v5188_v56  ;;  %v15505_v56 = vld [vmem:[#allocation96_spill] sm:$0xff] }
 0x935   :  { %8537 = vmatprep.mubr.msk.f32.mxu0 %vm1451_vm5, %v5193_v14 }
 0x938   :  { %5487 = vmatmul.mubr.f32.gmra.mxu0 %v5192_v49 }
 0x939   :  { %8538 = vmatprep.mubr.msk.f32.mxu0 %vm1451_vm5, %v5197_v32 }
 0x93c   :  { %5492 = vmatmul.mubr.f32.gmra.mxu0 %v5196_v8  ;;  %v14079_v8 = vpop.f32.mrf.mxu1 }
 0x93d   :  { %5840 = vmatprep.mubr.f32.mxu0 %v5686_v1 }
 0x940   :  { %5841 = vmatmul.mubr.f32.vlgmr.msra.gmra.mxu0 %v5685_v57  ;;  %v5726_v57 = vld [vmem:[#allocation7 + $0xe48] sm:$0xff] }
 0x941   :  { %5845 = vmatprep.mubr.f32.mxu0 %v5690_v40 }
 0x944   :  { %5846 = vmatmul.mubr.f32.gmra.mxu0 %v5689_v30  ;;  %v14084_v30 = vpop.f32.mrf.mxu1 }
 0x945   :  { %5850 = vmatprep.mubr.f32.mxu0 %v5694_v53  ;;  %v5725_v53 = vld [vmem:[#allocation7 + $0xe40] sm:$0xff] }
 0x948   :  { %5851 = vmatmul.mubr.f32.gmra.mxu0 %v5693_v37  ;;  %v15507_v37 = vld [vmem:[#allocation86_spill] sm:$0xff] }
 0x949   :  { %5855 = vmatprep.mubr.f32.mxu0 %v5698_v27 }
 0x94c   :  { %5856 = vmatmul.mubr.f32.gmra.mxu0 %v5697_v45 }
 0x94d   :  { %5860 = vmatprep.mubr.f32.mxu0 %v5702_v41  ;;  %v5730_v41 = vld [vmem:[#allocation7 + $0xe68] sm:$0xff] }
 0x950   :  { %5861 = vmatmul.mubr.f32.gmra.mxu0 %v5701_v24 }
 0x951   :  { %5865 = vmatprep.mubr.f32.mxu0 %v5706_v43  ;;  %v9348_v43 = vpop.f32.mrf.mxu1 }
 0x954   :  { %5866 = vmatmul.mubr.f32.gmra.mxu0 %v5705_v17  ;;  %v5729_v17 = vld [vmem:[#allocation7 + $0xe60] sm:$0xff] }
 0x955   :  { %5870 = vmatprep.mubr.f32.mxu0 %v5710_v19  ;;  %v15508_v19 = vld [vmem:[#allocation97_spill] sm:$0xff] }
 0x958   :  { %5871 = vmatmul.mubr.f32.gmra.mxu0 %v5709_v15 }
 0x959   :  { %5875 = vmatprep.mubr.f32.mxu0 %v5714_v29 }
 0x95c   :  { %5876 = vmatmul.mubr.f32.gmra.mxu0 %v5713_v20 }
 0x95d   :  { %5880 = vmatprep.mubr.f32.mxu0 %v5718_v16  ;;  %v15509_v16 = vld [vmem:[#allocation87_spill] sm:$0xff] }
 0x960   :  { %5881 = vmatmul.mubr.f32.gmra.mxu0 %v5717_v10 }
 0x961   :  { %5885 = vmatprep.mubr.f32.mxu0 %v5722_v48  ;;  %v15510_v48 = vld [vmem:[#allocation88_spill] sm:$0xff] }
 0x964   :  { %5886 = vmatmul.mubr.f32.gmra.mxu0 %v5721_v60 }
 0x965   :  { %5890 = vmatprep.mubr.f32.mxu0 %v5726_v57  ;;  %v15511_v57 = vld [vmem:[#allocation89_spill] sm:$0xff] }
 0x968   :  { %5891 = vmatmul.mubr.f32.gmra.mxu0 %v5725_v53 }
 0x969   :  { %5895 = vmatprep.mubr.f32.mxu0 %v5730_v41  ;;  %v15512_v41 = vld [vmem:[#allocation32_spill] sm:$0xff] }
 0x96c   :  { %5896 = vmatmul.mubr.f32.gmra.mxu0 %v5729_v17 }
 0x998   :  { %v5068_v5 = vpop.f32.mrf.mxu0 }
 0x999   :  { %v14072_v62 = vadd.f32 %v5068_v5, %v15504_v25  ;;  %v5734_v5 = vld [vmem:[#allocation7 + $0xe88] sm:$0xff]  ;;  %v9350_v25 = vpop.f32.mrf.mxu1 }
 0x99a   :  { %v10199_v9 = vpop.f32.mrf.mxu0  ;;  %5900 = vmatprep.mubr.f32.mxu0 %v5734_v5 }
 0x99b   :  { %v5733_v9 = vld [vmem:[#allocation7 + $0xe80] sm:$0xff] }
 0x99c   :  { %v5073_v0 = vpop.f32.mrf.mxu0  ;;  %5901 = vmatmul.mubr.f32.gmra.mxu0 %v5733_v9 }
 0x99d   :  { %v14077_v14 = vadd.f32 %v5073_v0, %v15505_v56  ;;  %10291 = vmatprep.mubr.msk.f32.mxu0 %vm11200_vm0, %v15202_v35 }
 0x99e   :  { %v10202_v49 = vpop.f32.mrf.mxu0 }
 0x99f   :  { %v9351_v49 = vpop.f32.mrf.mxu1 }
 0x9a0   :  { %v5078_v32 = vpop.f32.mrf.mxu0 }
 0x9a1   :  { %v14082_v3 = vadd.f32 %v5078_v32, %v15506_v11 }
 0x9a2   :  { %v10205_v1 = vpop.f32.mrf.mxu0 }
 0x9a3   :  { %v9353_v1 = vpop.f32.mrf.mxu1 }
 0x9a4   :  { %v5083_v40 = vpop.f32.mrf.mxu0 }
 0x9a5   :  { %v14087_v27 = vadd.f32 %v5083_v40, %v15507_v37 }
 0x9a6   :  { %v10208_v45 = vpop.f32.mrf.mxu0 }
 0x9a7   :  { %v9354_v45 = vpop.f32.mrf.mxu1 }
 0x9a8   :  { %v5088_v24 = vpop.f32.mrf.mxu0 }
 0x9a9   :  { %v14090_v15 = vadd.f32 %v5088_v24, %v15508_v19 }
 0x9aa   :  { %v10211_v29 = vpop.f32.mrf.mxu0 }
 0x9ab   :  { %v14106_v29 = vpop.f32.mrf.mxu1 }
 0x9ac   :  { %v5093_v20 = vpop.f32.mrf.mxu0 }
 0x9ad   :  { %v14093_v0 = vadd.f32 %v5093_v20, %v15509_v16  ;;  %v9357_v16 = vpop.f32.mrf.mxu1 }
 0x9ae   :  { %v10214_v10 = vpop.f32.mrf.mxu0 }
 0x9af   :  { %v15513_v10 = vld [vmem:[#allocation30_spill] sm:$0xff] }
 0x9b0   :  { %v5098_v56 = vpop.f32.mrf.mxu0 }
 0x9b1   :  { %v14098_v32 = vadd.f32 %v5098_v56, %v15510_v48 }
 0x9b2   :  { %v10217_v60 = vpop.f32.mrf.mxu0 }
 0x9b4   :  { %v5103_v11 = vpop.f32.mrf.mxu0 }
 0x9b5   :  { %v14101_v40 = vadd.f32 %v5103_v11, %v15511_v57  ;;  %v14114_v11 = vpop.f32.mrf.mxu1 }
 0x9b6   :  { %v10220_v53 = vpop.f32.mrf.mxu0 }
 0x9b8   :  { %v5108_v37 = vpop.f32.mrf.mxu0 }
 0x9b9   :  { %v14104_v24 = vadd.f32 %v5108_v37, %v15512_v41  ;;  %v9360_v41 = vpop.f32.mrf.mxu1 }
 0x9ba   :  { %v10223_v17 = vpop.f32.mrf.mxu0 }
 0x9bc   :  { %v5113_v19 = vpop.f32.mrf.mxu0 }
 0x9bd   :  { %v14109_v5 = vadd.f32 %v5113_v19, %v13908_v55  ;;  %v9343_v19 = vadd.f32 %v14069_v18, %v14067_v26  ;;  %v9349_v18 = vadd.f32 %v9348_v43, %v14084_v30 }
 0x9be   :  { %v10226_v20 = vpop.f32.mrf.mxu0 }
 0x9c0   :  { %v5118_v9 = vpop.f32.mrf.mxu0 }
 0x9c1   :  { %v14112_v56 = vadd.f32 %v5118_v9, %v15513_v10  ;;  %v14124_v9 = vpop.f32.mrf.mxu1 }
 0x9c2   :  { %v10229_v48 = vpop.f32.mrf.mxu0 }
 0x9c3   :  { %15514 = vst [vmem:[#allocation71_spill] sm:$0xff] %v14112_v56  ;;  %v9346_v56 = vadd.f32 %v14079_v8, %v14074_v12 }
 0x9c4   :  { %v5123_v60 = vpop.f32.mrf.mxu0 }
 0x9c5   :  { %v14117_v57 = vadd.f32 %v5123_v60, %v13916_v34 }
 0x9c6   :  { %v10232_v53 = vpop.f32.mrf.mxu0 }
 0x9c8   :  { %v5128_v37 = vpop.f32.mrf.mxu0 }
 0x9c9   :  { %v14120_v17 = vadd.f32 %v5128_v37, %v13919_v13  ;;  %v9363_v13 = vpop.f32.mrf.mxu1 }
 0x9ca   :  { %v10235_v55 = vpop.f32.mrf.mxu0 }
 0x9cb   :  { %v9365_v12 = vpop.f32.mrf.mxu1  ;;  %v9361_v55 = vadd.f32 %v9360_v41, %v14114_v11 }
 0x9cc   :  { %v5433_v20 = vpop.f32.mrf.mxu0 }
 0x9cd   :  { %v5434_v10 = vadd.f32 %v9343_v19, %v5433_v20  ;;  %v9364_v19 = vadd.f32 %v9363_v13, %v14124_v9 }
 0x9ce   :  { %v5435_v48 = vpop.f32.mrf.mxu0 }
 0x9cf   :  { %10245 = vmatmul.mubr.msk.f32.vlgmr.msra.gmra.mxu1 %vm796_vm3, %v5434_v10 }
 0x9d0   :  { %5907 = vmatpush1.msra.mxu1 %v15296_v46  ;;  %v5438_v34 = vpop.f32.mrf.mxu0  ;;  %10247 = vmatprep.mubr.msk.f32.mxu1 %vm11200_vm0, %v15202_v35 }
 0x9d1   :  { %v5439_v60 = vadd.f32 %v9346_v56, %v5438_v34  ;;  %5908 = vmatprep.subr.mxu1 %v15202_v35  ;;  %v9352_v56 = vadd.f32 %v9351_v49, %v9350_v25 }
 0x9d2   :  { %5909 = vmatpush1.msra.mxu1 %v15297_v63  ;;  %v5440_v26 = vpop.f32.mrf.mxu0 }
 0x9d3   :  { %5910 = vmatprep.subr.mxu1 %v15202_v35  ;;  %10248 = vmatmul.mubr.msk.f32.gmra.mxu1 %vm796_vm3, %v5439_v60 }
 0x9d4   :  { %5911 = vmatpush1.msra.mxu1 %v15298_v38  ;;  %v5443_v46 = vpop.f32.mrf.mxu0  ;;  %10250 = vmatprep.mubr.msk.f32.mxu1 %vm11200_vm0, %v15202_v35  ;;  %v9366_v38 = vpop.f32.mrf.mxu1 }
 0x9d5   :  { %v5444_v8 = vadd.f32 %v9349_v18, %v5443_v46  ;;  %5912 = vmatprep.subr.mxu1 %v15202_v35  ;;  %v9367_v20 = vadd.f32 %v9366_v38, %v9365_v12 }
 0x9d6   :  { %5913 = vmatpush1.msra.mxu1 %v15299_v23  ;;  %v5445_v63 = vpop.f32.mrf.mxu0  ;;  %v9355_v23 = vadd.f32 %v9354_v45, %v9353_v1 }
 0x9d7   :  { %5914 = vmatprep.subr.mxu1 %v15202_v35  ;;  %10251 = vmatmul.mubr.msk.f32.gmra.mxu1 %vm796_vm3, %v5444_v8 }
 0x9d8   :  { %5915 = vmatpush1.msra.mxu1 %v15300_v21  ;;  %v5448_v30 = vpop.f32.mrf.mxu0  ;;  %10253 = vmatprep.mubr.msk.f32.mxu1 %vm11200_vm0, %v15202_v35  ;;  %v9368_v21 = vpop.f32.mrf.mxu1 }
 0x9d9   :  { %v5449_v43 = vadd.f32 %v9352_v56, %v5448_v30  ;;  %5916 = vmatprep.subr.mxu1 %v15202_v35  ;;  %v5688_v30 = vld [vmem:[#allocation7 + $0xd18] sm:$0xff] }
 0x9da   :  { %5917 = vmatpush1.msra.mxu1 %v15301_v47  ;;  %v5450_v53 = vpop.f32.mrf.mxu0  ;;  %v9358_v47 = vadd.f32 %v9357_v16, %v14106_v29  ;;  %v9369_v1 = vpop.f32.mrf.mxu1 }
 0x9db   :  { %5918 = vmatprep.subr.mxu1 %v15202_v35  ;;  %10254 = vmatmul.mubr.msk.f32.gmra.mxu1 %vm796_vm3, %v5449_v43  ;;  %v5691_v43 = vld [vmem:[#allocation7 + $0xd30] sm:$0xff]  ;;  %v5696_v53 = vld [vmem:[#allocation7 + $0xd58] sm:$0xff] }
 0x9dc   :  { %5919 = vmatpush1.msra.mxu1 %v15302_v6  ;;  %v5453_v25 = vpop.f32.mrf.mxu0  ;;  %10256 = vmatprep.mubr.msk.f32.mxu1 %vm11200_vm0, %v15202_v35  ;;  %v9371_v29 = vpop.f32.mrf.mxu1 }
 0x9dd   :  { %v5454_v49 = vadd.f32 %v9355_v23, %v5453_v25  ;;  %5920 = vmatprep.subr.mxu1 %v15202_v35  ;;  %v5700_v23 = vld [vmem:[#allocation7 + $0xd78] sm:$0xff] }
 0x9de   :  { %5921 = vmatpush1.msra.mxu1 %v15351_v28  ;;  %v5455_v37 = vpop.f32.mrf.mxu0  ;;  %v9372_v11 = vpop.f32.mrf.mxu1  ;;  %v5704_v25 = vld [vmem:[#allocation7 + $0xd98] sm:$0xff] }
 0x9df   :  { %5922 = vmatprep.subr.mxu1 %v15202_v35  ;;  %10257 = vmatmul.mubr.msk.f32.gmra.mxu1 %vm796_vm3, %v5454_v49  ;;  %v5708_v49 = vld [vmem:[#allocation7 + $0xdb8] sm:$0xff]  ;;  %v5707_v37 = vld [vmem:[#allocation7 + $0xdb0] sm:$0xff] }
 0x9e0   :  { %5923 = vmatpush1.msra.mxu1 %v15304_v22  ;;  %v5458_v6 = vpop.f32.mrf.mxu0  ;;  %10259 = vmatprep.mubr.msk.f32.mxu1 %vm11200_vm0, %v15202_v35 }
 0x9e1   :  { %v5459_v45 = vadd.f32 %v9358_v47, %v5458_v6  ;;  %5924 = vmatprep.subr.mxu1 %v15202_v35  ;;  %v5712_v47 = vld [vmem:[#allocation7 + $0xdd8] sm:$0xff]  ;;  %v5711_v6 = vld [vmem:[#allocation7 + $0xdd0] sm:$0xff] }
 0x9e2   :  { %5925 = vmatpush1.msra.mxu1 %v15352_v36  ;;  %v5460_v28 = vpop.f32.mrf.mxu0 }
 0x9e3   :  { %5926 = vmatprep.subr.mxu1 %v15202_v35  ;;  %10260 = vmatmul.mubr.msk.f32.gmra.mxu1 %vm796_vm3, %v5459_v45  ;;  %v5715_v45 = vld [vmem:[#allocation7 + $0xdf0] sm:$0xff]  ;;  %v5720_v28 = vld [vmem:[#allocation7 + $0xe18] sm:$0xff] }
 0x9e4   :  { %5927 = vmatpush1.msra.mxu1 %v15306_v50  ;;  %v5463_v22 = vpop.f32.mrf.mxu0  ;;  %10262 = vmatprep.mubr.msk.f32.mxu1 %vm11200_vm0, %v15202_v35 }
 0x9e5   :  { %v5464_v16 = vadd.f32 %v9361_v55, %v5463_v22  ;;  %5928 = vmatprep.subr.mxu1 %v15202_v35  ;;  %v5719_v55 = vld [vmem:[#allocation7 + $0xe10] sm:$0xff]  ;;  %v5724_v22 = vld [vmem:[#allocation7 + $0xe38] sm:$0xff] }
 0x9e6   :  { %5929 = vmatpush1.msra.mxu1 %v15353_v52  ;;  %v5465_v36 = vpop.f32.mrf.mxu0 }
 0x9e7   :  { %5930 = vmatprep.subr.mxu1 %v15202_v35  ;;  %10263 = vmatmul.mubr.msk.f32.gmra.mxu1 %vm796_vm3, %v5464_v16  ;;  %v5728_v16 = vld [vmem:[#allocation7 + $0xe58] sm:$0xff]  ;;  %v5727_v36 = vld [vmem:[#allocation7 + $0xe50] sm:$0xff] }
 0x9e8   :  { %5931 = vmatpush1.msra.mxu1 %v15308_v54  ;;  %v5468_v50 = vpop.f32.mrf.mxu0  ;;  %10265 = vmatprep.mubr.msk.f32.mxu1 %vm11200_vm0, %v15202_v35  ;;  %v9374_v54 = vpop.f32.mrf.mxu1 }
 0x9e9   :  { %v5469_v41 = vadd.f32 %v9364_v19, %v5468_v50  ;;  %5932 = vmatprep.subr.mxu1 %v15202_v35  ;;  %v5732_v19 = vld [vmem:[#allocation7 + $0xe78] sm:$0xff]  ;;  %v5731_v50 = vld [vmem:[#allocation7 + $0xe70] sm:$0xff] }
 0x9ea   :  { %5933 = vmatpush1.msra.mxu1 %v15354_v39  ;;  %v5470_v52 = vpop.f32.mrf.mxu0  ;;  %v9370_v39 = vadd.f32 %v9369_v1, %v9368_v21  ;;  %v5703_v21 = vld [vmem:[#allocation7 + $0xd90] sm:$0xff]  ;;  %v5716_v1 = vld [vmem:[#allocation7 + $0xdf8] sm:$0xff] }
 0x9eb   :  { %5934 = vmatprep.subr.mxu1 %v15202_v35  ;;  %10266 = vmatmul.mubr.msk.f32.gmra.mxu1 %vm796_vm3, %v5469_v41  ;;  %v5736_v41 = vld [vmem:[#allocation7 + $0xe98] sm:$0xff]  ;;  %v5735_v52 = vld [vmem:[#allocation7 + $0xe90] sm:$0xff] }
 0x9ec   :  { %5935 = vmatpush1.msra.mxu1 %v15310_v59  ;;  %v5473_v9 = vpop.f32.mrf.mxu0  ;;  %10268 = vmatprep.mubr.msk.f32.mxu1 %vm11200_vm0, %v15202_v35  ;;  %v9375_v59 = vpop.f32.mrf.mxu1 }
 0x9ed   :  { %v5474_v10 = vadd.f32 %v9367_v20, %v5473_v9  ;;  %5936 = vmatprep.subr.mxu1 %v15202_v35  ;;  %v6039_v20 = vld [vmem:[#allocation9 + $0x110] sm:$0xff]  ;;  %v6038_v9 = vld [vmem:[#allocation9 + $0x108] sm:$0xff] }
 0x9ee   :  { %5937 = vmatpush1.msra.mxu1 %v15355_v58  ;;  %v5475_v48 = vpop.f32.mrf.mxu0  ;;  %v9373_v58 = vadd.f32 %v9372_v11, %v9371_v29  ;;  %v5723_v29 = vld [vmem:[#allocation7 + $0xe30] sm:$0xff]  ;;  %v6040_v11 = vld [vmem:[#allocation9 + $0x118] sm:$0xff] }
 0x9ef   :  { %5952 = vmatprep.subr.mxu1 %v15202_v35  ;;  %10269 = vmatmul.mubr.msk.f32.gmra.mxu1 %vm796_vm3, %v5474_v10 }
 0x9f0   :  { %5953 = vmatpush2.msra.mxu1 %v15312_v44  ;;  %v5478_v34 = vpop.f32.mrf.mxu0  ;;  %10271 = vmatprep.mubr.msk.f32.mxu1 %vm11200_vm0, %v15202_v35  ;;  %v9377_v44 = vpop.f32.mrf.mxu1 }
 0x9f1   :  { %v5479_v13 = vadd.f32 %v9370_v39, %v5478_v34  ;;  %5954 = vmatprep.subr.mxu1 %v15202_v35  ;;  %10284 = vmatpush3.msra.mxu0 %v6040_v11 }
 0x9f2   :  { %5955 = vmatpush2.msra.mxu1 %v15356_v61  ;;  %v5480_v60 = vpop.f32.mrf.mxu0  ;;  %v9376_v61 = vadd.f32 %v9375_v59, %v9374_v54  ;;  %v9378_v12 = vpop.f32.mrf.mxu1  ;;  %10285 = vmatprep.subr.mxu0 %v15202_v35  ;;  %v6037_v54 = vld [vmem:[#allocation9 + $0x100] sm:$0xff] }
 0x9f3   :  { %5956 = vmatprep.subr.mxu1 %v15202_v35  ;;  %10272 = vmatmul.mubr.msk.f32.gmra.mxu1 %vm796_vm3, %v5479_v13 }
 0x9f4   :  { %5957 = vmatpush2.msra.mxu1 %v15314_v31  ;;  %v5483_v26 = vpop.f32.mrf.mxu0  ;;  %10274 = vmatprep.mubr.msk.f32.mxu1 %vm11200_vm0, %v15202_v35 }
 0x9f5   :  { %v5484_v18 = vadd.f32 %v9373_v58, %v5483_v26  ;;  %5958 = vmatprep.subr.mxu1 %v15202_v35  ;;  %10286 = vmatpush3.msra.mxu0 %v6039_v20 }
 0x9f6   :  { %5959 = vmatpush2.msra.mxu1 %v15357_v42  ;;  %v5485_v46 = vpop.f32.mrf.mxu0  ;;  %v9379_v42 = vadd.f32 %v9378_v12, %v9377_v44  ;;  %10287 = vmatprep.subr.mxu0 %v15202_v35 }
 0x9f7   :  { %5960 = vmatprep.subr.mxu1 %v15202_v35  ;;  %10275 = vmatmul.mubr.msk.f32.gmra.mxu1 %vm796_vm3, %v5484_v18 }
 0x9f8   :  { %5961 = vmatpush2.msra.mxu1 %v15316_v51  ;;  %v5488_v31 = vpop.f32.mrf.mxu0  ;;  %10277 = vmatprep.mubr.msk.f32.mxu1 %vm11200_vm0, %v15202_v35 }
 0x9f9   :  { %v5489_v8 = vadd.f32 %v9376_v61, %v5488_v31  ;;  %5962 = vmatprep.subr.mxu1 %v15202_v35  ;;  %10288 = vmatpush3.msra.mxu0 %v6038_v9 }
 0x9fa   :  { %5963 = vmatpush2.msra.mxu1 %v15317_v4  ;;  %v5490_v63 = vpop.f32.mrf.mxu0  ;;  %v5687_v4 = vld [vmem:[#allocation7 + $0xd10] sm:$0xff]  ;;  %10289 = vmatprep.subr.mxu0 %v15202_v35 }
 0x9fb   :  { %5964 = vmatprep.subr.mxu1 %v15202_v35  ;;  %10278 = vmatmul.mubr.msk.f32.gmra.mxu1 %vm796_vm3, %v5489_v8 }
 0x9fc   :  { %5965 = vmatpush2.msra.mxu1 %v15318_v33  ;;  %v5493_v56 = vpop.f32.mrf.mxu0  ;;  %10280 = vmatprep.mubr.msk.f32.mxu1 %vm11200_vm0, %v15202_v35  ;;  %v5692_v33 = vld [vmem:[#allocation7 + $0xd38] sm:$0xff] }
 0x9fd   :  { %v5494_v51 = vadd.f32 %v9379_v42, %v5493_v56  ;;  %5966 = vmatprep.subr.mxu1 %v15202_v35  ;;  %10290 = vmatpush3.msra.mxu0 %v6037_v54 }
 0x9fe   :  { %5967 = vmatpush2.msra.mxu1 %v15319_v2  ;;  %v5495_v38 = vpop.f32.mrf.mxu0  ;;  %v5695_v2 = vld [vmem:[#allocation7 + $0xd50] sm:$0xff]  ;;  %10425 = vmatprep.subr.mxu0 %v15202_v35 }
 0x9ff   :  { %5968 = vmatprep.subr.mxu1 %v15202_v35  ;;  %10281 = vmatmul.mubr.msk.f32.gmra.mxu1 %vm796_vm3, %v5494_v51 }
 0xa00   :  { %5969 = vmatpush2.msra.mxu1 %v15320_v7  ;;  %8552 = vmatprep.mubr.msk.f32.mxu1 %vm1451_vm5, %v5688_v30  ;;  %v5699_v7 = vld [vmem:[#allocation7 + $0xd70] sm:$0xff]  ;;  %v9429_v10 = vpop.f32.mrf.mxu0 }
 0xa01   :  { %10330 = vmatprep.subr.mxu1 %v15202_v35 }
 0xa02   :  { %v9430_v39 = vpop.f32.mrf.mxu0 }
 0xa03   :  { %5971 = vmatmul.mubr.f32.vlgmr.msra.gmra.mxu1 %v5687_v4 }
 0xa04   :  { %8553 = vmatprep.mubr.msk.f32.mxu1 %vm1451_vm5, %v5692_v33  ;;  %v9432_v60 = vpop.f32.mrf.mxu0 }
 0xa06   :  { %v9433_v18 = vpop.f32.mrf.mxu0 }
 0xa07   :  { %5976 = vmatmul.mubr.f32.gmra.mxu1 %v5691_v43  ;;  %v9434_v9 = vadd.f32 %v9433_v18, %v9432_v60 }
 0xa08   :  { %8554 = vmatprep.mubr.msk.f32.mxu1 %vm1451_vm5, %v5696_v53  ;;  %v9435_v31 = vpop.f32.mrf.mxu0 }
 0xa0a   :  { %v9436_v42 = vpop.f32.mrf.mxu0 }
 0xa0b   :  { %5981 = vmatmul.mubr.f32.gmra.mxu1 %v5695_v2 }
 0xa0c   :  { %8555 = vmatprep.mubr.msk.f32.mxu1 %vm1451_vm5, %v5700_v23  ;;  %v9438_v30 = vpop.f32.mrf.mxu0 }
 0xa0e   :  { %v9439_v33 = vpop.f32.mrf.mxu0 }
 0xa0f   :  { %5986 = vmatmul.mubr.f32.gmra.mxu1 %v5699_v7  ;;  %v9440_v60 = vadd.f32 %v9439_v33, %v9438_v30 }
 0xa10   :  { %8556 = vmatprep.mubr.msk.f32.mxu1 %vm1451_vm5, %v5704_v25  ;;  %v9441_v2 = vpop.f32.mrf.mxu0 }
 0xa12   :  { %v9442_v25 = vpop.f32.mrf.mxu0 }
 0xa13   :  { %5991 = vmatmul.mubr.f32.gmra.mxu1 %v5703_v21 }
 0xa14   :  { %8557 = vmatprep.mubr.msk.f32.mxu1 %vm1451_vm5, %v5708_v49 }
 0xa17   :  { %5996 = vmatmul.mubr.f32.gmra.mxu1 %v5707_v37  ;;  %v9444_v37 = vpop.f32.mrf.mxu0 }
 0xa18   :  { %8558 = vmatprep.mubr.msk.f32.mxu1 %vm1451_vm5, %v5712_v47 }
 0xa1b   :  { %6001 = vmatmul.mubr.f32.gmra.mxu1 %v5711_v6 }
 0xa1c   :  { %8559 = vmatprep.mubr.msk.f32.mxu1 %vm1451_vm5, %v5716_v1  ;;  %v9445_v1 = vpop.f32.mrf.mxu0 }
 0xa1f   :  { %6006 = vmatmul.mubr.f32.gmra.mxu1 %v5715_v45  ;;  %v15515_v45 = vld [vmem:[#allocation71_spill] sm:$0xff] }
 0xa20   :  { %8560 = vmatprep.mubr.msk.f32.mxu1 %vm1451_vm5, %v5720_v28 }
 0xa23   :  { %6011 = vmatmul.mubr.f32.gmra.mxu1 %v5719_v55 }
 0xa24   :  { %8561 = vmatprep.mubr.msk.f32.mxu1 %vm1451_vm5, %v5724_v22  ;;  %v9447_v22 = vpop.f32.mrf.mxu0 }
 0xa27   :  { %6016 = vmatmul.mubr.f32.gmra.mxu1 %v5723_v29 }
 0xa28   :  { %8562 = vmatprep.mubr.msk.f32.mxu1 %vm1451_vm5, %v5728_v16 }
 0xa2b   :  { %6021 = vmatmul.mubr.f32.gmra.mxu1 %v5727_v36  ;;  %v9448_v36 = vpop.f32.mrf.mxu0 }
 0xa2c   :  { %8563 = vmatprep.mubr.msk.f32.mxu1 %vm1451_vm5, %v5732_v19 }
 0xa2f   :  { %6026 = vmatmul.mubr.f32.gmra.mxu1 %v5731_v50  ;;  %v9431_v50 = vadd.f32 %v9430_v39, %v9429_v10 }
 0xa30   :  { %8564 = vmatprep.mubr.msk.f32.mxu1 %vm1451_vm5, %v5736_v41  ;;  %v9450_v41 = vpop.f32.mrf.mxu0  ;;  %vm6391_vm5 = vcmask 850944  }
 0xa33   :  { %6031 = vmatmul.mubr.f32.gmra.mxu1 %v5735_v52 }
 0xa34   :  { %10356 = vmatprep.mubr.msk.f32.mxu1 %vm11200_vm0, %v15202_v35 }
 0xa8f   :  { %v5607_v48 = vpop.f32.mrf.mxu1 }
 0xa90   :  { %v14239_v34 = vadd.f32 %v5607_v48, %v14072_v62 }
 0xa91   :  { %v10246_v59 = vpop.f32.mrf.mxu1 }
 0xa93   :  { %v5612_v13 = vpop.f32.mrf.mxu1 }
 0xa94   :  { %v14242_v58 = vadd.f32 %v5612_v13, %v14077_v14  ;;  %v9437_v13 = vadd.f32 %v9436_v42, %v9435_v31  ;;  %v9443_v31 = vadd.f32 %v9442_v25, %v9441_v2 }
 0xa95   :  { %v10249_v26 = vpop.f32.mrf.mxu1 }
 0xa97   :  { %v5617_v44 = vpop.f32.mrf.mxu1 }
 0xa98   :  { %v14245_v46 = vadd.f32 %v5617_v44, %v14082_v3 }
 0xa99   :  { %v10252_v61 = vpop.f32.mrf.mxu1 }
 0xa9b   :  { %v5622_v12 = vpop.f32.mrf.mxu1 }
 0xa9c   :  { %v14248_v8 = vadd.f32 %v5622_v12, %v14087_v27 }
 0xa9d   :  { %v10255_v62 = vpop.f32.mrf.mxu1 }
 0xa9f   :  { %v5627_v63 = vpop.f32.mrf.mxu1 }
 0xaa0   :  { %v14251_v56 = vadd.f32 %v5627_v63, %v14090_v15 }
 0xaa1   :  { %v10258_v14 = vpop.f32.mrf.mxu1 }
 0xaa3   :  { %v5632_v51 = vpop.f32.mrf.mxu1 }
 0xaa4   :  { %v14254_v38 = vadd.f32 %v5632_v51, %v14093_v0  ;;  %v9446_v51 = vadd.f32 %v9445_v1, %v9444_v37 }
 0xaa5   :  { %v10261_v3 = vpop.f32.mrf.mxu1 }
 0xaa7   :  { %v5637_v4 = vpop.f32.mrf.mxu1 }
 0xaa8   :  { %v14257_v43 = vadd.f32 %v5637_v4, %v14098_v32 }
 0xaa9   :  { %v10264_v27 = vpop.f32.mrf.mxu1 }
 0xaaa   :  { %v9449_v27 = vadd.f32 %v9448_v36, %v9447_v22 }
 0xaab   :  { %v5642_v53 = vpop.f32.mrf.mxu1 }
 0xaac   :  { %v14260_v23 = vadd.f32 %v5642_v53, %v14101_v40 }
 0xaad   :  { %v10267_v15 = vpop.f32.mrf.mxu1 }
 0xaaf   :  { %v5647_v7 = vpop.f32.mrf.mxu1 }
 0xab0   :  { %v14263_v21 = vadd.f32 %v5647_v7, %v14104_v24 }
 0xab1   :  { %v10270_v0 = vpop.f32.mrf.mxu1 }
 0xab3   :  { %v5652_v49 = vpop.f32.mrf.mxu1 }
 0xab4   :  { %v14266_v47 = vadd.f32 %v5652_v49, %v14109_v5 }
 0xab5   :  { %v10273_v32 = vpop.f32.mrf.mxu1 }
 0xab7   :  { %v5657_v6 = vpop.f32.mrf.mxu1 }
 0xab8   :  { %v14269_v28 = vadd.f32 %v5657_v6, %v15515_v45 }
 0xab9   :  { %v10276_v40 = vpop.f32.mrf.mxu1 }
 0xabb   :  { %v5662_v55 = vpop.f32.mrf.mxu1 }
 0xabc   :  { %v14272_v29 = vadd.f32 %v5662_v55, %v14117_v57  ;;  %v9451_v57 = vpop.f32.mrf.mxu0 }
 0xabd   :  { %v10279_v24 = vpop.f32.mrf.mxu1  ;;  %v9452_v25 = vadd.f32 %v9451_v57, %v9450_v41 }
 0xabe   :  { %v9453_v10 = vpop.f32.mrf.mxu0 }
 0xabf   :  { %v5667_v16 = vpop.f32.mrf.mxu1 }
 0xac0   :  { %v14275_v19 = vadd.f32 %v5667_v16, %v14120_v17  ;;  %v9454_v18 = vpop.f32.mrf.mxu0 }
 0xac1   :  { %v10282_v5 = vpop.f32.mrf.mxu1  ;;  %v9455_v6 = vadd.f32 %v9454_v18, %v9453_v10 }
 0xac2   :  { %v9456_v63 = vpop.f32.mrf.mxu0 }
 0xac3   :  { %v5972_v11 = vpop.f32.mrf.mxu1 }
 0xac4   :  { %v5973_v52 = vadd.f32 %v9431_v50, %v5972_v11  ;;  %v9457_v3 = vpop.f32.mrf.mxu0 }
 0xac5   :  { %v5974_v20 = vpop.f32.mrf.mxu1  ;;  %v9458_v22 = vadd.f32 %v9457_v3, %v9456_v63 }
 0xac6   :  { %10292 = vmatmul.mubr.msk.f32.vlgmr.msra.gmra.mxu0 %vm796_vm3, %v5973_v52  ;;  %v9459_v2 = vpop.f32.mrf.mxu0 }
 0xac7   :  { %v5977_v54 = vpop.f32.mrf.mxu1  ;;  %10294 = vmatprep.mubr.msk.f32.mxu0 %vm11200_vm0, %v15202_v35 }
 0xac8   :  { %v5978_v48 = vadd.f32 %v9434_v9, %v5977_v54  ;;  %v9460_v49 = vpop.f32.mrf.mxu0 }
 0xac9   :  { %v5979_v59 = vpop.f32.mrf.mxu1  ;;  %v9461_v50 = vadd.f32 %v9460_v49, %v9459_v2 }
 0xaca   :  { %10295 = vmatmul.mubr.msk.f32.gmra.mxu0 %vm796_vm3, %v5978_v48  ;;  %v9462_v45 = vpop.f32.mrf.mxu0 }
 0xacb   :  { %v5982_v17 = vpop.f32.mrf.mxu1  ;;  %10297 = vmatprep.mubr.msk.f32.mxu0 %vm11200_vm0, %v15202_v35 }
 0xacc   :  { %v5983_v39 = vadd.f32 %v9437_v13, %v5982_v17  ;;  %v9463_v16 = vpop.f32.mrf.mxu0 }
 0xacd   :  { %v5984_v26 = vpop.f32.mrf.mxu1  ;;  %v9464_v9 = vadd.f32 %v9463_v16, %v9462_v45 }
 0xace   :  { %10298 = vmatmul.mubr.msk.f32.gmra.mxu0 %vm796_vm3, %v5983_v39  ;;  %v9465_v41 = vpop.f32.mrf.mxu0 }
 0xacf   :  { %v5987_v44 = vpop.f32.mrf.mxu1  ;;  %10300 = vmatprep.mubr.msk.f32.mxu0 %vm11200_vm0, %v15202_v35 }
 0xad0   :  { %v5988_v61 = vadd.f32 %v9440_v60, %v5987_v44  ;;  %v9466_v54 = vpop.f32.mrf.mxu0 }
 0xad1   :  { %v5989_v12 = vpop.f32.mrf.mxu1  ;;  %v9467_v13 = vadd.f32 %v9466_v54, %v9465_v41 }
 0xad2   :  { %10301 = vmatmul.mubr.msk.f32.gmra.mxu0 %vm796_vm3, %v5988_v61 }
 0xad3   :  { %v5992_v62 = vpop.f32.mrf.mxu1  ;;  %10303 = vmatprep.mubr.msk.f32.mxu0 %vm11200_vm0, %v15202_v35 }
 0xad4   :  { %v5993_v42 = vadd.f32 %v9443_v31, %v5992_v62 }
 0xad5   :  { %v5994_v14 = vpop.f32.mrf.mxu1 }
 0xad6   :  { %10304 = vmatmul.mubr.msk.f32.gmra.mxu0 %vm796_vm3, %v5993_v42 }
 0xad7   :  { %v5997_v30 = vpop.f32.mrf.mxu1  ;;  %10306 = vmatprep.mubr.msk.f32.mxu0 %vm11200_vm0, %v15202_v35 }
 0xad8   :  { %v5998_v4 = vadd.f32 %v9446_v51, %v5997_v30 }
 0xad9   :  { %v5999_v33 = vpop.f32.mrf.mxu1 }
 0xada   :  { %10307 = vmatmul.mubr.msk.f32.gmra.mxu0 %vm796_vm3, %v5998_v4 }
 0xadb   :  { %v6002_v53 = vpop.f32.mrf.mxu1  ;;  %10309 = vmatprep.mubr.msk.f32.mxu0 %vm11200_vm0, %v15202_v35 }
 0xadc   :  { %v6003_v15 = vadd.f32 %v9449_v27, %v6002_v53 }
 0xadd   :  { %v6004_v7 = vpop.f32.mrf.mxu1 }
 0xade   :  { %10310 = vmatmul.mubr.msk.f32.gmra.mxu0 %vm796_vm3, %v6003_v15 }
 0xadf   :  { %v6007_v0 = vpop.f32.mrf.mxu1  ;;  %10312 = vmatprep.mubr.msk.f32.mxu0 %vm11200_vm0, %v15202_v35 }
 0xae0   :  { %v6008_v37 = vadd.f32 %v9452_v25, %v6007_v0 }
 0xae1   :  { %v6009_v32 = vpop.f32.mrf.mxu1 }
 0xae2   :  { %10313 = vmatmul.mubr.msk.f32.gmra.mxu0 %vm796_vm3, %v6008_v37 }
 0xae3   :  { %v6012_v1 = vpop.f32.mrf.mxu1  ;;  %10315 = vmatprep.mubr.msk.f32.mxu0 %vm11200_vm0, %v15202_v35 }
 0xae4   :  { %v6013_v40 = vadd.f32 %v9455_v6, %v6012_v1 }
 0xae5   :  { %v6014_v55 = vpop.f32.mrf.mxu1 }
 0xae6   :  { %10316 = vmatmul.mubr.msk.f32.gmra.mxu0 %vm796_vm3, %v6013_v40 }
 0xae7   :  { %v6017_v24 = vpop.f32.mrf.mxu1  ;;  %10318 = vmatprep.mubr.msk.f32.mxu0 %vm11200_vm0, %v15202_v35 }
 0xae8   :  { %v6018_v36 = vadd.f32 %v9458_v22, %v6017_v24 }
 0xae9   :  { %v6019_v5 = vpop.f32.mrf.mxu1 }
 0xaea   :  { %10319 = vmatmul.mubr.msk.f32.gmra.mxu0 %vm796_vm3, %v6018_v36 }
 0xaeb   :  { %v6022_v11 = vpop.f32.mrf.mxu1  ;;  %10321 = vmatprep.mubr.msk.f32.mxu0 %vm11200_vm0, %v15202_v35 }
 0xaec   :  { %v6023_v52 = vadd.f32 %v9461_v50, %v6022_v11 }
 0xaed   :  { %v6024_v20 = vpop.f32.mrf.mxu1 }
 0xaee   :  { %10322 = vmatmul.mubr.msk.f32.gmra.mxu0 %vm796_vm3, %v6023_v52 }
 0xaef   :  { %v6027_v57 = vpop.f32.mrf.mxu1  ;;  %10324 = vmatprep.mubr.msk.f32.mxu0 %vm11200_vm0, %v15202_v35 }
 0xaf0   :  { %v6028_v48 = vadd.f32 %v9464_v9, %v6027_v57 }
 0xaf1   :  { %v6029_v59 = vpop.f32.mrf.mxu1 }
 0xaf2   :  { %10325 = vmatmul.mubr.msk.f32.gmra.mxu0 %vm796_vm3, %v6028_v48 }
 0xaf3   :  { %v6032_v17 = vpop.f32.mrf.mxu1  ;;  %10327 = vmatprep.mubr.msk.f32.mxu0 %vm11200_vm0, %v15202_v35 }
 0xaf4   :  { %v6033_v10 = vadd.f32 %v9467_v13, %v6032_v17 }
 0xaf5   :  { %v6034_v39 = vpop.f32.mrf.mxu1 }
 0xaf6   :  { %10328 = vmatmul.mubr.msk.f32.gmra.mxu0 %vm796_vm3, %v6033_v10  ;;  %vm6225_vm3 = vcmask 523264  }
 0xaf7   :  { %10441 = vmatprep.mubr.msk.f32.mxu0 %vm11200_vm0, %v15202_v35 }
 0xb86   :  { %v6146_v26 = vpop.f32.mrf.mxu0 }
 0xb87   :  { %v14320_v42 = vadd.f32 %v6146_v26, %v14239_v34 }
 0xb88   :  { %v10293_v60 = vpop.f32.mrf.mxu0 }
 0xb89   :  { %v6226_v27 = vsel %vm6225_vm3, %v14320_v42, 0.0 }
 0xb8a   :  { %v6151_v44 = vpop.f32.mrf.mxu0 }
 0xb8b   :  { %v14317_v62 = vadd.f32 %v6151_v44, %v14242_v58  ;;  %v6258_v58 = vmul.f32 %v14320_v42, %v14320_v42 }
 0xb8c   :  { %v10296_v18 = vpop.f32.mrf.mxu0 }
 0xb8d   :  { %v6259_v30 = vmul.f32 %v14317_v62, %v14317_v62  ;;  %v6227_v33 = vsel %vm6225_vm3, %v14317_v62, 0.0 }
 0xb8e   :  { %v6156_v61 = vpop.f32.mrf.mxu0  ;;  %v6228_v25 = vadd.f32 %v6227_v33, %v6226_v27 }
 0xb8f   :  { %v14323_v14 = vadd.f32 %v6156_v61, %v14245_v46 }
 0xb90   :  { %v10299_v12 = vpop.f32.mrf.mxu0 }
 0xb91   :  { %v6260_v34 = vmul.f32 %v14323_v14, %v14323_v14  ;;  %v6229_v2 = vsel %vm6225_vm3, %v14323_v14, 0.0 }
 0xb92   :  { %v6161_v31 = vpop.f32.mrf.mxu0  ;;  %v6230_v1 = vadd.f32 %v6229_v2, %v6228_v25  ;;  %v6485_v2 = vld [vmem:[#allocation15 + $0x20] sm:$0xff] }
 0xb93   :  { %v14328_v3 = vadd.f32 %v6161_v31, %v14248_v8  ;;  %v6272_v8 = vsel %vm6225_vm3, %v6259_v30, 0.0  ;;  %v6274_v49 = vsel %vm6225_vm3, %v6260_v34, 0.0  ;;  %v6488_v31 = vld [vmem:[#allocation15 + $0x38] sm:$0xff]  ;;  %v6486_v34 = vld [vmem:[#allocation15 + $0x28] sm:$0xff] }
 0xb94   :  { %v10302_v63 = vpop.f32.mrf.mxu0  ;;  %10426 = vmatpush3.msra.mxu0 %v6488_v31 }
 0xb95   :  { %v6261_v15 = vmul.f32 %v14328_v3, %v14328_v3  ;;  %v6231_v37 = vsel %vm6225_vm3, %v14328_v3, 0.0  ;;  %v6487_v63 = vld [vmem:[#allocation15 + $0x30] sm:$0xff]  ;;  %10427 = vmatprep.subr.mxu0 %v15202_v35 }
 0xb96   :  { %v6166_v51 = vpop.f32.mrf.mxu0  ;;  %v6232_v16 = vadd.f32 %v6231_v37, %v6230_v1  ;;  %10428 = vmatpush3.msra.mxu0 %v6487_v63 }
 0xb97   :  { %v14337_v46 = vadd.f32 %v6166_v51, %v14251_v56  ;;  %v6271_v56 = vsel %vm6225_vm3, %v6258_v58, 0.0  ;;  %v6276_v40 = vsel %vm6225_vm3, %v6261_v15, 0.0  ;;  %10429 = vmatprep.subr.mxu0 %v15202_v35 }
 0xb98   :  { %v10305_v4 = vpop.f32.mrf.mxu0  ;;  %v6273_v6 = vadd.f32 %v6272_v8, %v6271_v56  ;;  %10430 = vmatpush3.msra.mxu0 %v6486_v34  ;;  %v6223_v34 = vld [vmem:[#allocation10] sm:$0x1] }
 0xb99   :  { %v6262_v32 = vmul.f32 %v14337_v46, %v14337_v46  ;;  %10431 = vmatprep.subr.mxu0 %v15202_v35 }
 0xb9a   :  { %v6171_v53 = vpop.f32.mrf.mxu0  ;;  %v6275_v24 = vadd.f32 %v6274_v49, %v6273_v6  ;;  %v6484_v49 = vld [vmem:[#allocation15 + $0x18] sm:$0xff]  ;;  %10432 = vmatpush3.msra.mxu0 %v6485_v2 }
 0xb9b   :  { %v14347_v7 = vadd.f32 %v6171_v53, %v14254_v38  ;;  %v6233_v38 = vsel %vm6225_vm3, %v14337_v46, 0.0  ;;  %v6278_v5 = vsel %vm6225_vm3, %v6262_v32, 0.0  ;;  %10433 = vmatprep.subr.mxu0 %v15202_v35 }
 0xb9c   :  { %v10308_v0 = vpop.f32.mrf.mxu0  ;;  %v6277_v41 = vadd.f32 %v6276_v40, %v6275_v24  ;;  %v6234_v52 = vadd.f32 %v6233_v38, %v6232_v16  ;;  %10434 = vmatpush3.msra.mxu0 %v6484_v49 }
 0xb9d   :  { %v6263_v55 = vmul.f32 %v14347_v7, %v14347_v7  ;;  %v6235_v50 = vsel %vm6225_vm3, %v14347_v7, 0.0  ;;  %10435 = vmatprep.subr.mxu0 %v15202_v35 }
 0xb9e   :  { %v6176_v45 = vpop.f32.mrf.mxu0  ;;  %v6279_v57 = vadd.f32 %v6278_v5, %v6277_v41  ;;  %v6236_v48 = vadd.f32 %v6235_v50, %v6234_v52 }
 0xb9f   :  { %v14361_v22 = vadd.f32 %v6176_v45, %v14257_v43  ;;  %v6280_v9 = vsel %vm6225_vm3, %v6263_v55, 0.0 }
 0xba0   :  { %v10311_v36 = vpop.f32.mrf.mxu0  ;;  %v6281_v39 = vadd.f32 %v6280_v9, %v6279_v57 }
 0xba1   :  { %v6264_v11 = vmul.f32 %v14361_v22, %v14361_v22  ;;  %v6237_v43 = vsel %vm6225_vm3, %v14361_v22, 0.0 }
 0xba2   :  { %v6181_v20 = vpop.f32.mrf.mxu0  ;;  %v6238_v26 = vadd.f32 %v6237_v43, %v6236_v48 }
 0xba3   :  { %v14372_v54 = vadd.f32 %v6181_v20, %v14260_v23  ;;  %v6282_v13 = vsel %vm6225_vm3, %v6264_v11, 0.0 }
 0xba4   :  { %v10314_v59 = vpop.f32.mrf.mxu0  ;;  %v6283_v23 = vadd.f32 %v6282_v13, %v6281_v39 }
 0xba5   :  { %v6239_v17 = vsel %vm6225_vm3, %v14372_v54, 0.0  ;;  %v6265_v10 = vmul.f32 %v14372_v54, %v14372_v54 }
 0xba6   :  { %v6186_v60 = vpop.f32.mrf.mxu0  ;;  %v6240_v61 = vadd.f32 %v6239_v17, %v6238_v26 }
 0xba7   :  { %v6284_v44 = vsel %vm6225_vm3, %v6265_v10, 0.0  ;;  %v14381_v18 = vadd.f32 %v6186_v60, %v14263_v21 }
 0xba8   :  { %v10317_v12 = vpop.f32.mrf.mxu0  ;;  %v6285_v4 = vadd.f32 %v6284_v44, %v6283_v23 }
 0xba9   :  { %v6241_v51 = vsel %vm6225_vm3, %v14381_v18, 0.0  ;;  %v6266_v30 = vmul.f32 %v14381_v18, %v14381_v18 }
 0xbaa   :  { %v6242_v58 = vadd.f32 %v6241_v51, %v6240_v61  ;;  %v6191_v33 = vpop.f32.mrf.mxu0 }
 0xbab   :  { %v6286_v21 = vsel %vm6225_vm3, %v6266_v30, 0.0  ;;  %v14390_v27 = vadd.f32 %v6191_v33, %v14266_v47 }
 0xbac   :  { %v6287_v53 = vadd.f32 %v6286_v21, %v6285_v4  ;;  %v10320_v8 = vpop.f32.mrf.mxu0 }
 0xbad   :  { %v6243_v15 = vsel %vm6225_vm3, %v14390_v27, 0.0  ;;  %v6267_v25 = vmul.f32 %v14390_v27, %v14390_v27  ;;  %v6224_v8 = vld [vmem:[#allocation12] sm:$0x1] }
 0xbae   :  { %v6244_v0 = vadd.f32 %v6243_v15, %v6242_v58  ;;  %v6196_v56 = vpop.f32.mrf.mxu0  ;;  %v15516_v15 = vld [vmem:[#allocation45_spill] sm:$0xff] }
 0xbaf   :  { %v6288_v47 = vsel %vm6225_vm3, %v6267_v25, 0.0  ;;  %v6220_v37 = vadd.f32 %v6196_v56, %v14269_v28 }
 0xbb0   :  { %v6289_v32 = vadd.f32 %v6288_v47, %v6287_v53  ;;  %v10323_v6 = vpop.f32.mrf.mxu0 }
 0xbb1   :  { %v6245_v1 = vsel %vm6225_vm3, %v6220_v37, 0.0  ;;  %v6268_v45 = vmul.f32 %v6220_v37, %v6220_v37 }
 0xbb2   :  { %v6246_v40 = vadd.f32 %v6245_v1, %v6244_v0  ;;  %v6201_v38 = vpop.f32.mrf.mxu0 }
 0xbb3   :  { %v6290_v55 = vsel %vm6225_vm3, %v6268_v45, 0.0  ;;  %v6221_v24 = vadd.f32 %v6201_v38, %v14272_v29 }
 0xbb4   :  { %v6291_v16 = vadd.f32 %v6290_v55, %v6289_v32  ;;  %v10326_v36 = vpop.f32.mrf.mxu0 }
 0xbb5   :  { %v6247_v28 = vsel %vm6225_vm3, %v6221_v24, 0.0  ;;  %v6269_v5 = vmul.f32 %v6221_v24, %v6221_v24 }
 0xbb6   :  { %v6248_v50 = vadd.f32 %v6247_v28, %v6246_v40  ;;  %v6206_v11 = vpop.f32.mrf.mxu0 }
 0xbb7   :  { %v6292_v41 = vsel %vm6225_vm3, %v6269_v5, 0.0  ;;  %v6222_v52 = vadd.f32 %v6206_v11, %v14275_v19 }
 0xbb8   :  { %v6293_v20 = vadd.f32 %v6292_v41, %v6291_v16  ;;  %v10329_v9 = vpop.f32.mrf.mxu0 }
 0xbb9   :  { %v6249_v43 = vsel %vm6225_vm3, %v6222_v52, 0.0  ;;  %v6270_v57 = vmul.f32 %v6222_v52, %v6222_v52 }
 0xbba   :  { %v6250_v48 = vadd.f32 %v6249_v43, %v6248_v50 }
 0xbbb   :  { %v6294_v59 = vsel %vm6225_vm3, %v6270_v57, 0.0 }
 0xbbc   :  { %v6251_v29 = vrot.slane %v6250_v48, 4  ;;  %v6295_v13 = vadd.f32 %v6294_v59, %v6293_v20 }
 0xbbe   :  { %v6252_v17 = vadd.f32 %v6251_v29, %v6250_v48  ;;  %v6296_v10 = vrot.slane %v6295_v13, 4 }
 0xbc0   :  { %v6253_v39 = vrot.slane %v6252_v17, 2  ;;  %v6297_v26 = vadd.f32 %v6296_v10, %v6295_v13 }
 0xbc2   :  { %v6254_v60 = vadd.f32 %v6253_v39, %v6252_v17  ;;  %v6298_v44 = vrot.slane %v6297_v26, 2 }
 0xbc4   :  { %v6255_v23 = vrot.slane %v6254_v60, 1  ;;  %v6299_v61 = vadd.f32 %v6298_v44, %v6297_v26 }
 0xbc6   :  { %v6256_v12 = vadd.f32 %v6255_v23, %v6254_v60  ;;  %v6300_v19 = vrot.slane %v6299_v61, 1 }
 0xbc8   :  { %v6257_v31 = vmul.f32 0.010204081, %v6256_v12  ;;  %v6301_v63 = vadd.f32 %v6300_v19, %v6299_v61 }
 0xbca   :  { %v6302_v51 = vmul.f32 0.010204081, %v6301_v63  ;;  %v6303_v30 = vmul.f32 %v6257_v31, %v6257_v31 }
 0xbcc   :  { %v6304_v4 = vsub.f32 %v6302_v51, %v6303_v30 }
 0xbce   :  { %v6305_v58 = vmax.f32 %v6304_v4, 0.0  ;;  %v6388_v4 = vld [vmem:[#allocation13] sm:$0xff] }
 0xbd0   :  { %v6306_v33 = vadd.f32 1e-05, %v6305_v58 }
 0xbd2   :  { %10900 = vrsqrt.f32 %v6306_v33  ;;  %v6389_v33 = vld [vmem:[#allocation13 + $0x8] sm:$0xff] }
 0xbdf   :  { %v10901_v21 = vpop.eup %10900 }
 0xbe0   :  { %v6308_v53 = vmul.f32 %v10901_v21, %v6223_v34  ;;  %v6390_v34 = vld [vmem:[#allocation13 + $0x10] sm:$0xff]  ;;  %v6490_v21 = vld [vmem:[#allocation13 + $0x18] sm:$0xff] }
 0xbe2   :  { %v6309_v2 = vmul.f32 %v6308_v53, %v6257_v31  ;;  %v6315_v25 = vrot.slane %v6308_v53, %v15516_v15  ;;  %v6590_v53 = vld [vmem:[#allocation15 + $0x78] sm:$0xff] }
 0xbe4   :  { %v6310_v0 = vsub.f32 %v6224_v8, %v6309_v2  ;;  %v6329_v56 = vmul.f32 %v6315_v25, %v6222_v52  ;;  %v6328_v49 = vmul.f32 %v6315_v25, %v6221_v24  ;;  %v6327_v47 = vmul.f32 %v6315_v25, %v6220_v37  ;;  %v6589_v8 = vld [vmem:[#allocation15 + $0x70] sm:$0xff]  ;;  %v6491_v2 = vld [vmem:[#allocation13 + $0x20] sm:$0xff] }
 0xbe5   :  { %v6326_v32 = vmul.f32 %v6315_v25, %v14390_v27  ;;  %v6325_v6 = vmul.f32 %v6315_v25, %v14381_v18  ;;  %v6324_v1 = vmul.f32 %v6315_v25, %v14372_v54  ;;  %v6323_v40 = vmul.f32 %v6315_v25, %v14361_v22 }
 0xbe6   :  { %v6334_v45 = vrot.slane %v6310_v0, %v15516_v15  ;;  %v6322_v38 = vmul.f32 %v6315_v25, %v14347_v7  ;;  %v6321_v7 = vmul.f32 %v6315_v25, %v14337_v46  ;;  %v6320_v22 = vmul.f32 %v6315_v25, %v14328_v3  ;;  %v6483_v0 = vld [vmem:[#allocation15 + $0x10] sm:$0xff] }
 0xbe7   :  { %v6319_v41 = vmul.f32 %v6315_v25, %v14323_v14  ;;  %v6318_v9 = vmul.f32 %v6315_v25, %v14317_v62  ;;  %v6317_v43 = vmul.f32 %v6315_v25, %v14320_v42  ;;  %v6492_v25 = vld [vmem:[#allocation13 + $0x28] sm:$0xff]  ;;  %10436 = vmatpush3.msra.mxu0 %v6483_v0 }
 0xbe8   :  { %v6348_v55 = vadd.f32 %v6334_v45, %v6329_v56  ;;  %v6347_v16 = vadd.f32 %v6334_v45, %v6328_v49  ;;  %v6346_v36 = vadd.f32 %v6334_v45, %v6327_v47  ;;  %v6345_v28 = vadd.f32 %v6334_v45, %v6326_v32  ;;  %v6588_v56 = vld [vmem:[#allocation15 + $0x68] sm:$0xff]  ;;  %10437 = vmatprep.subr.mxu0 %v15202_v35  ;;  %v6587_v47 = vld [vmem:[#allocation15 + $0x60] sm:$0xff] }
 0xbe9   :  { %v6344_v5 = vadd.f32 %v6334_v45, %v6325_v6  ;;  %v6343_v50 = vadd.f32 %v6334_v45, %v6324_v1  ;;  %v6342_v24 = vadd.f32 %v6334_v45, %v6323_v40  ;;  %v6341_v37 = vadd.f32 %v6334_v45, %v6322_v38  ;;  %v6482_v49 = vld [vmem:[#allocation15 + $0x8] sm:$0xff]  ;;  %v6481_v32 = vld [vmem:[#allocation15] sm:$0xff]  ;;  %v6586_v6 = vld [vmem:[#allocation15 + $0x58] sm:$0xff] }
 0xbea   :  { %vm6361_vm6 = vcmp.ge.f32.partialorder %v6348_v55, 0.0  ;;  %v6374_v27 = vmul.f32 0.01, %v6348_v55  ;;  %v6373_v11 = vmul.f32 0.01, %v6347_v16  ;;  %vm6360_vm7 = vcmp.ge.f32.partialorder %v6347_v16, 0.0  ;;  %10438 = vmatpush3.msra.mxu0 %v6482_v49 }
 0xbeb   :  { %v6372_v54 = vmul.f32 0.01, %v6346_v36  ;;  %vm6359_vm8 = vcmp.ge.f32.partialorder %v6346_v36, 0.0  ;;  %v6371_v20 = vmul.f32 0.01, %v6345_v28  ;;  %vm6358_vm9 = vcmp.ge.f32.partialorder %v6345_v28, 0.0  ;;  %10439 = vmatprep.subr.mxu0 %v15202_v35 }
 0xbec   :  { %v14417_v18 = vsel %vm6361_vm6, %v6348_v55, %v6374_v27  ;;  %v14424_v52 = vsel %vm6360_vm7, %v6347_v16, %v6373_v11  ;;  %v6370_v57 = vmul.f32 0.01, %v6344_v5  ;;  %v6340_v48 = vadd.f32 %v6334_v45, %v6321_v7  ;;  %10440 = vmatpush3.msra.mxu0 %v6481_v32  ;;  %v6585_v1 = vld [vmem:[#allocation15 + $0x50] sm:$0xff]  ;;  %v6583_v40 = vld [vmem:[#allocation15 + $0x40] sm:$0xff]  ;;  %v6770_v7 = vld [vmem:[#allocation13 + $0x30] sm:$0xff] }
 0xbed   :  { %10331 = vmatpush3.msra.mxu1 %v14417_v18  ;;  %v6339_v59 = vadd.f32 %v6334_v45, %v6320_v22  ;;  %v14430_v3 = vsel %vm6359_vm8, %v6346_v36, %v6372_v54  ;;  %v6338_v14 = vadd.f32 %v6334_v45, %v6319_v41  ;;  %v6337_v46 = vadd.f32 %v6334_v45, %v6318_v9  ;;  %v6771_v22 = vld [vmem:[#allocation13 + $0x38] sm:$0xff]  ;;  %v6772_v41 = vld [vmem:[#allocation13 + $0x40] sm:$0xff]  ;;  %v6869_v9 = vld [vmem:[#allocation15 + $0xb0] sm:$0xff] }
 0xbee   :  { %10332 = vmatprep.subr.mxu1 %v15202_v35  ;;  %v6336_v29 = vadd.f32 %v6334_v45, %v6317_v43  ;;  %vm6357_vm10 = vcmp.ge.f32.partialorder %v6344_v5, 0.0  ;;  %v14434_v62 = vsel %vm6358_vm9, %v6345_v28, %v6371_v20  ;;  %v6369_v42 = vmul.f32 0.01, %v6343_v50  ;;  %10485 = vmatprep.subr.mxu0 %v15202_v35  ;;  %v6584_v45 = vld [vmem:[#allocation15 + $0x48] sm:$0xff]  ;;  %v6870_v20 = vld [vmem:[#allocation15 + $0xb8] sm:$0xff]  ;;  %v6964_v32 = vld [vmem:[#allocation13 + $0x48] sm:$0xff] }
 0xbef   :  { %10333 = vmatpush3.msra.mxu1 %v14424_v52  ;;  %vm6356_vm11 = vcmp.ge.f32.partialorder %v6343_v50, 0.0  ;;  %v14438_v13 = vsel %vm6357_vm10, %v6344_v5, %v6370_v57  ;;  %v6368_v17 = vmul.f32 0.01, %v6342_v24  ;;  %vm6355_vm12 = vcmp.ge.f32.partialorder %v6342_v24, 0.0  ;;  %v6868_v43 = vld [vmem:[#allocation15 + $0xa8] sm:$0xff]  ;;  %v6867_v57 = vld [vmem:[#allocation15 + $0xa0] sm:$0xff] }
 0xbf0   :  { %10334 = vmatprep.subr.mxu1 %v15202_v35  ;;  %v14442_v10 = vsel %vm6356_vm11, %v6343_v50, %v6369_v42  ;;  %v6367_v39 = vmul.f32 0.01, %v6341_v37  ;;  %vm6354_vm13 = vcmp.ge.f32.partialorder %v6341_v37, 0.0  ;;  %v6366_v60 = vmul.f32 0.01, %v6340_v48 }
 0xbf1   :  { %10335 = vmatpush3.msra.mxu1 %v14430_v3  ;;  %v14446_v26 = vsel %vm6355_vm12, %v6342_v24, %v6368_v17  ;;  %vm6353_vm14 = vcmp.ge.f32.partialorder %v6340_v48, 0.0  ;;  %v6365_v23 = vmul.f32 0.01, %v6339_v59  ;;  %vm6352_vm15 = vcmp.ge.f32.partialorder %v6339_v59, 0.0 }
 0xbf2   :  { %10336 = vmatprep.subr.mxu1 %v15202_v35  ;;  %v14450_v44 = vsel %vm6354_vm13, %v6341_v37, %v6367_v39  ;;  %v14454_v61 = vsel %vm6353_vm14, %v6340_v48, %v6366_v60  ;;  %v6364_v12 = vmul.f32 0.01, %v6338_v14  ;;  %vm6351_vm1 = vcmp.ge.f32.partialorder %v6338_v14, 0.0  ;;  %v6866_v48 = vld [vmem:[#allocation15 + $0x98] sm:$0xff] }
 0xbf3   :  { %10337 = vmatpush3.msra.mxu1 %v14434_v62  ;;  %v14458_v19 = vsel %vm6352_vm15, %v6339_v59, %v6365_v23  ;;  %v6363_v31 = vmul.f32 0.01, %v6337_v46  ;;  %vm6350_vm2 = vcmp.ge.f32.partialorder %v6337_v46, 0.0  ;;  %v6362_v51 = vmul.f32 0.01, %v6336_v29  ;;  %v6865_v59 = vld [vmem:[#allocation15 + $0x90] sm:$0xff] }
 0xbf4   :  { %10338 = vmatprep.subr.mxu1 %v15202_v35  ;;  %v14462_v63 = vsel %vm6351_vm1, %v6338_v14, %v6364_v12  ;;  %vm6349_vm4 = vcmp.ge.f32.partialorder %v6336_v29, 0.0  ;;  %v6864_v14 = vld [vmem:[#allocation15 + $0x88] sm:$0xff]  ;;  %vm8192_vm7 = vcmask 195584  }
 0xbf5   :  { %10339 = vmatpush3.msra.mxu1 %v14438_v13  ;;  %v14466_v30 = vsel %vm6350_vm2, %v6337_v46, %v6363_v31  ;;  %v14470_v58 = vsel %vm6349_vm4, %v6336_v29, %v6362_v51  ;;  %v6863_v46 = vld [vmem:[#allocation15 + $0x80] sm:$0xff] }
 0xbf6   :  { %10340 = vmatprep.subr.mxu1 %v15202_v35 }
 0xbf7   :  { %10341 = vmatpush3.msra.mxu1 %v14442_v10 }
 0xbf8   :  { %10342 = vmatprep.subr.mxu1 %v15202_v35 }
 0xbf9   :  { %10343 = vmatpush3.msra.mxu1 %v14446_v26 }
 0xbfa   :  { %10344 = vmatprep.subr.mxu1 %v15202_v35 }
 0xbfb   :  { %10345 = vmatpush3.msra.mxu1 %v14450_v44 }
 0xbfc   :  { %10346 = vmatprep.subr.mxu1 %v15202_v35 }
 0xbfd   :  { %10347 = vmatpush3.msra.mxu1 %v14454_v61 }
 0xbfe   :  { %10348 = vmatprep.subr.mxu1 %v15202_v35 }
 0xbff   :  { %10349 = vmatpush3.msra.mxu1 %v14458_v19 }
 0xc00   :  { %10350 = vmatprep.subr.mxu1 %v15202_v35 }
 0xc01   :  { %10351 = vmatpush3.msra.mxu1 %v14462_v63 }
 0xc02   :  { %10352 = vmatprep.subr.mxu1 %v15202_v35 }
 0xc03   :  { %10353 = vmatpush3.msra.mxu1 %v14466_v30 }
 0xc04   :  { %10354 = vmatprep.subr.mxu1 %v15202_v35 }
 0xc05   :  { %10355 = vmatpush3.msra.mxu1 %v14470_v58 }
 0xc06   :  { %10365 = vmatprep.subr.mxu1 %v15202_v35  ;;  %10357 = vmatmul.mubr.msk.f32.vlgmr.msra.gmra.mxu1 %vm6391_vm5, %v6388_v4 }
 0xc07   :  { %10366 = vmatpush3.msra.mxu1 %v14417_v18  ;;  %10359 = vmatprep.mubr.msk.f32.mxu1 %vm11200_vm0, %v15202_v35 }
 0xc08   :  { %10367 = vmatprep.subr.mxu1 %v15202_v35 }
 0xc09   :  { %10368 = vmatpush3.msra.mxu1 %v14424_v52 }
 0xc0a   :  { %10369 = vmatprep.subr.mxu1 %v15202_v35  ;;  %10360 = vmatmul.mubr.msk.f32.gmra.mxu1 %vm6391_vm5, %v6389_v33 }
 0xc0b   :  { %10370 = vmatpush3.msra.mxu1 %v14430_v3  ;;  %10362 = vmatprep.mubr.msk.f32.mxu1 %vm11200_vm0, %v15202_v35 }
 0xc0c   :  { %10371 = vmatprep.subr.mxu1 %v15202_v35 }
 0xc0d   :  { %10372 = vmatpush3.msra.mxu1 %v14434_v62 }
 0xc0e   :  { %10373 = vmatprep.subr.mxu1 %v15202_v35  ;;  %10363 = vmatmul.mubr.msk.f32.gmra.mxu1 %vm6391_vm5, %v6390_v34 }
 0xc0f   :  { %10374 = vmatpush3.msra.mxu1 %v14438_v13  ;;  %10391 = vmatprep.mubr.msk.f32.mxu1 %vm11200_vm0, %v15202_v35 }
 0xc10   :  { %10375 = vmatprep.subr.mxu1 %v15202_v35 }
 0xc11   :  { %10376 = vmatpush3.msra.mxu1 %v14442_v10 }
 0xc12   :  { %10377 = vmatprep.subr.mxu1 %v15202_v35 }
 0xc13   :  { %10378 = vmatpush3.msra.mxu1 %v14446_v26 }
 0xc14   :  { %10379 = vmatprep.subr.mxu1 %v15202_v35 }
 0xc15   :  { %10380 = vmatpush3.msra.mxu1 %v14450_v44 }
 0xc16   :  { %10381 = vmatprep.subr.mxu1 %v15202_v35 }
 0xc17   :  { %10382 = vmatpush3.msra.mxu1 %v14454_v61 }
 0xc18   :  { %10383 = vmatprep.subr.mxu1 %v15202_v35 }
 0xc19   :  { %10384 = vmatpush3.msra.mxu1 %v14458_v19 }
 0xc1a   :  { %10385 = vmatprep.subr.mxu1 %v15202_v35 }
 0xc1b   :  { %10386 = vmatpush3.msra.mxu1 %v14462_v63 }
 0xc1c   :  { %10387 = vmatprep.subr.mxu1 %v15202_v35 }
 0xc1d   :  { %10388 = vmatpush3.msra.mxu1 %v14466_v30 }
 0xc1e   :  { %10389 = vmatprep.subr.mxu1 %v15202_v35 }
 0xc1f   :  { %10390 = vmatpush3.msra.mxu1 %v14470_v58 }
 0xc20   :  { %10392 = vmatmul.mubr.msk.f32.vlgmr.msra.gmra.mxu1 %vm6391_vm5, %v6490_v21  ;;  %10400 = vmatprep.subr.mxu1 %v15202_v35 }
 0xc21   :  { %10394 = vmatprep.mubr.msk.f32.mxu1 %vm11200_vm0, %v15202_v35  ;;  %10401 = vmatpush3.msra.mxu1 %v6590_v53 }
 0xc22   :  { %10402 = vmatprep.subr.mxu1 %v15202_v35 }
 0xc23   :  { %10403 = vmatpush3.msra.mxu1 %v6589_v8 }
 0xc24   :  { %10395 = vmatmul.mubr.msk.f32.gmra.mxu1 %vm6391_vm5, %v6491_v2  ;;  %10404 = vmatprep.subr.mxu1 %v15202_v35 }
 0xc25   :  { %10397 = vmatprep.mubr.msk.f32.mxu1 %vm11200_vm0, %v15202_v35  ;;  %10405 = vmatpush3.msra.mxu1 %v6588_v56 }
 0xc26   :  { %10406 = vmatprep.subr.mxu1 %v15202_v35 }
 0xc27   :  { %10407 = vmatpush3.msra.mxu1 %v6587_v47 }
 0xc28   :  { %10398 = vmatmul.mubr.msk.f32.gmra.mxu1 %vm6391_vm5, %v6492_v25  ;;  %10408 = vmatprep.subr.mxu1 %v15202_v35 }
 0xc29   :  { %10416 = vmatprep.mubr.msk.f32.mxu1 %vm11200_vm0, %v15202_v35  ;;  %10409 = vmatpush3.msra.mxu1 %v6586_v6  ;;  %v6965_v6 = vld [vmem:[#allocation13 + $0x50] sm:$0xff] }
 0xc2a   :  { %10410 = vmatprep.subr.mxu1 %v15202_v35 }
 0xc2b   :  { %10411 = vmatpush3.msra.mxu1 %v6585_v1  ;;  %v6966_v1 = vld [vmem:[#allocation13 + $0x58] sm:$0xff] }
 0xc2c   :  { %10412 = vmatprep.subr.mxu1 %v15202_v35 }
 0xc2d   :  { %10413 = vmatpush3.msra.mxu1 %v6584_v45  ;;  %v7064_v45 = vld [vmem:[#allocation15 + $0xf8] sm:$0xff] }
 0xc2e   :  { %10414 = vmatprep.subr.mxu1 %v15202_v35 }
 0xc2f   :  { %10415 = vmatpush3.msra.mxu1 %v6583_v40  ;;  %v7063_v40 = vld [vmem:[#allocation15 + $0xf0] sm:$0xff] }
 0xc30   :  { %10450 = vmatprep.subr.mxu1 %v15202_v35 }
 0xcc6   :  { %v6467_v38 = vpop.f32.mrf.mxu1 }
 0xcc7   :  { %10442 = vmatmul.mubr.msk.f32.vlgmr.msra.gmra.mxu0 %vm6225_vm3, %v6467_v38  ;;  %v7062_v38 = vld [vmem:[#allocation15 + $0xe8] sm:$0xff] }
 0xcc8   :  { %v10358_v55 = vpop.f32.mrf.mxu1  ;;  %10444 = vmatprep.mubr.msk.f32.mxu0 %vm11200_vm0, %v15202_v35  ;;  %10486 = vmatpush3.msra.mxu0 %v6870_v20 }
 0xcc9   :  { %10487 = vmatprep.subr.mxu0 %v15202_v35  ;;  %v7061_v55 = vld [vmem:[#allocation15 + $0xe0] sm:$0xff] }
 0xcca   :  { %v6472_v16 = vpop.f32.mrf.mxu1  ;;  %10488 = vmatpush3.msra.mxu0 %v6869_v9 }
 0xccb   :  { %10445 = vmatmul.mubr.msk.f32.gmra.mxu0 %vm6225_vm3, %v6472_v16  ;;  %10489 = vmatprep.subr.mxu0 %v15202_v35  ;;  %v7060_v16 = vld [vmem:[#allocation15 + $0xd8] sm:$0xff] }
 0xccc   :  { %v10361_v36 = vpop.f32.mrf.mxu1  ;;  %10447 = vmatprep.mubr.msk.f32.mxu0 %vm11200_vm0, %v15202_v35  ;;  %10490 = vmatpush3.msra.mxu0 %v6868_v43 }
 0xccd   :  { %10491 = vmatprep.subr.mxu0 %v15202_v35  ;;  %v7059_v36 = vld [vmem:[#allocation15 + $0xd0] sm:$0xff] }
 0xcce   :  { %v6477_v28 = vpop.f32.mrf.mxu1  ;;  %10492 = vmatpush3.msra.mxu0 %v6867_v57 }
 0xccf   :  { %10448 = vmatmul.mubr.msk.f32.gmra.mxu0 %vm6225_vm3, %v6477_v28  ;;  %10493 = vmatprep.subr.mxu0 %v15202_v35  ;;  %v7058_v28 = vld [vmem:[#allocation15 + $0xc8] sm:$0xff] }
 0xcd0   :  { %v10364_v5 = vpop.f32.mrf.mxu1  ;;  %10501 = vmatprep.mubr.msk.f32.mxu0 %vm11200_vm0, %v15202_v35  ;;  %10494 = vmatpush3.msra.mxu0 %v6866_v48 }
 0xcd1   :  { %10495 = vmatprep.subr.mxu0 %v15202_v35  ;;  %v7057_v5 = vld [vmem:[#allocation15 + $0xc0] sm:$0xff] }
 0xcd2   :  { %10496 = vmatpush3.msra.mxu0 %v6865_v59 }
 0xcd3   :  { %10497 = vmatprep.subr.mxu0 %v15202_v35 }
 0xcd4   :  { %10498 = vmatpush3.msra.mxu0 %v6864_v14  ;;  %v7158_v14 = vld [vmem:[#allocation13 + $0x60] sm:$0xff] }
 0xcd5   :  { %10499 = vmatprep.subr.mxu0 %v15202_v35 }
 0xcd6   :  { %10500 = vmatpush3.msra.mxu0 %v6863_v46  ;;  %v7159_v46 = vld [vmem:[#allocation13 + $0x68] sm:$0xff] }
 0xcd7   :  { %10510 = vmatprep.subr.mxu0 %v15202_v35 }
 0xce0   :  { %v6568_v50 = vpop.f32.mrf.mxu1 }
 0xce1   :  { %10417 = vmatmul.mubr.msk.f32.vlgmr.msra.gmra.mxu1 %vm6225_vm3, %v6568_v50 }
 0xce2   :  { %10451 = vmatpush3.msra.mxu1 %v14417_v18  ;;  %v10393_v24 = vpop.f32.mrf.mxu1  ;;  %10419 = vmatprep.mubr.msk.f32.mxu1 %vm11200_vm0, %v15202_v35 }
 0xce3   :  { %10452 = vmatprep.subr.mxu1 %v15202_v35 }
 0xce4   :  { %10453 = vmatpush3.msra.mxu1 %v14424_v52  ;;  %v6573_v37 = vpop.f32.mrf.mxu1 }
 0xce5   :  { %10454 = vmatprep.subr.mxu1 %v15202_v35  ;;  %10420 = vmatmul.mubr.msk.f32.gmra.mxu1 %vm6225_vm3, %v6573_v37 }
 0xce6   :  { %10455 = vmatpush3.msra.mxu1 %v14430_v3  ;;  %v10396_v27 = vpop.f32.mrf.mxu1  ;;  %10422 = vmatprep.mubr.msk.f32.mxu1 %vm11200_vm0, %v15202_v35 }
 0xce7   :  { %10456 = vmatprep.subr.mxu1 %v15202_v35 }
 0xce8   :  { %10457 = vmatpush3.msra.mxu1 %v14434_v62  ;;  %v6578_v11 = vpop.f32.mrf.mxu1 }
 0xce9   :  { %10458 = vmatprep.subr.mxu1 %v15202_v35  ;;  %10423 = vmatmul.mubr.msk.f32.gmra.mxu1 %vm6225_vm3, %v6578_v11 }
 0xcea   :  { %10459 = vmatpush3.msra.mxu1 %v14438_v13  ;;  %10476 = vmatprep.mubr.msk.f32.mxu1 %vm11200_vm0, %v15202_v35  ;;  %v10399_v54 = vpop.f32.mrf.mxu1 }
 0xceb   :  { %10460 = vmatprep.subr.mxu1 %v15202_v35 }
 0xcec   :  { %10461 = vmatpush3.msra.mxu1 %v14442_v10 }
 0xced   :  { %10462 = vmatprep.subr.mxu1 %v15202_v35 }
 0xcee   :  { %10463 = vmatpush3.msra.mxu1 %v14446_v26 }
 0xcef   :  { %10464 = vmatprep.subr.mxu1 %v15202_v35 }
 0xcf0   :  { %10465 = vmatpush3.msra.mxu1 %v14450_v44 }
 0xcf1   :  { %10466 = vmatprep.subr.mxu1 %v15202_v35 }
 0xcf2   :  { %10467 = vmatpush3.msra.mxu1 %v14454_v61 }
 0xcf3   :  { %10468 = vmatprep.subr.mxu1 %v15202_v35 }
 0xcf4   :  { %10469 = vmatpush3.msra.mxu1 %v14458_v19 }
 0xcf5   :  { %10470 = vmatprep.subr.mxu1 %v15202_v35 }
 0xcf6   :  { %10471 = vmatpush3.msra.mxu1 %v14462_v63 }
 0xcf7   :  { %10472 = vmatprep.subr.mxu1 %v15202_v35 }
 0xcf8   :  { %10473 = vmatpush3.msra.mxu1 %v14466_v30 }
 0xcf9   :  { %10474 = vmatprep.subr.mxu1 %v15202_v35 }
 0xcfa   :  { %10475 = vmatpush3.msra.mxu1 %v14470_v58 }
 0xcfb   :  { %10477 = vmatmul.mubr.msk.f32.vlgmr.msra.gmra.mxu1 %vm6391_vm5, %v6770_v7  ;;  %10545 = vmatprep.subr.mxu1 %v15202_v35 }
 0xcfc   :  { %10479 = vmatprep.mubr.msk.f32.mxu1 %vm11200_vm0, %v15202_v35  ;;  %10546 = vmatpush3.msra.mxu1 %v7064_v45  ;;  %v7352_v45 = vld [vmem:[#allocation13 + $0x78] sm:$0xff] }
 0xcfd   :  { %10547 = vmatprep.subr.mxu1 %v15202_v35 }
 0xcfe   :  { %10548 = vmatpush3.msra.mxu1 %v7063_v40  ;;  %v7353_v40 = vld [vmem:[#allocation13 + $0x80] sm:$0xff] }
 0xcff   :  { %10480 = vmatmul.mubr.msk.f32.gmra.mxu1 %vm6391_vm5, %v6771_v22  ;;  %10549 = vmatprep.subr.mxu1 %v15202_v35 }
 0xd00   :  { %10482 = vmatprep.mubr.msk.f32.mxu1 %vm11200_vm0, %v15202_v35  ;;  %10550 = vmatpush3.msra.mxu1 %v7062_v38  ;;  %v7354_v38 = vld [vmem:[#allocation13 + $0x88] sm:$0xff] }
 0xd01   :  { %10551 = vmatprep.subr.mxu1 %v15202_v35 }
 0xd02   :  { %10552 = vmatpush3.msra.mxu1 %v7061_v55  ;;  %v7452_v55 = vld [vmem:[#allocation15 + $0x178] sm:$0xff] }
 0xd03   :  { %10483 = vmatmul.mubr.msk.f32.gmra.mxu1 %vm6391_vm5, %v6772_v41  ;;  %10553 = vmatprep.subr.mxu1 %v15202_v35 }
 0xd04   :  { %10561 = vmatprep.mubr.msk.f32.mxu1 %vm11200_vm0, %v15202_v35  ;;  %10554 = vmatpush3.msra.mxu1 %v7060_v16  ;;  %v7451_v16 = vld [vmem:[#allocation15 + $0x170] sm:$0xff] }
 0xd05   :  { %10555 = vmatprep.subr.mxu1 %v15202_v35 }
 0xd06   :  { %10556 = vmatpush3.msra.mxu1 %v7059_v36  ;;  %v7450_v36 = vld [vmem:[#allocation15 + $0x168] sm:$0xff] }
 0xd07   :  { %10557 = vmatprep.subr.mxu1 %v15202_v35 }
 0xd08   :  { %10558 = vmatpush3.msra.mxu1 %v7058_v28  ;;  %v7449_v28 = vld [vmem:[#allocation15 + $0x160] sm:$0xff] }
 0xd09   :  { %10559 = vmatprep.subr.mxu1 %v15202_v35 }
 0xd0a   :  { %10560 = vmatpush3.msra.mxu1 %v7057_v5  ;;  %v7448_v5 = vld [vmem:[#allocation15 + $0x158] sm:$0xff] }
 0xd0b   :  { %10570 = vmatprep.subr.mxu1 %v15202_v35 }
 0xd87   :  { %v6755_v29 = vpop.f32.mrf.mxu0 }
 0xd89   :  { %v10443_v42 = vpop.f32.mrf.mxu0 }
 0xd8a   :  { %v7258_v42 = vld [vmem:[#allocation15 + $0x138] sm:$0xff] }
 0xd8b   :  { %v6760_v17 = vpop.f32.mrf.mxu0 }
 0xd8d   :  { %v10446_v39 = vpop.f32.mrf.mxu0 }
 0xd8e   :  { %v7256_v39 = vld [vmem:[#allocation15 + $0x128] sm:$0xff] }
 0xd8f   :  { %v6765_v60 = vpop.f32.mrf.mxu0 }
 0xd91   :  { %v10449_v23 = vpop.f32.mrf.mxu0 }
 0xd92   :  { %v7254_v23 = vld [vmem:[#allocation15 + $0x118] sm:$0xff] }
 0xda1   :  { %v6666_v12 = vpop.f32.mrf.mxu1 }
 0xda2   :  { %v14590_v31 = vadd.f32 %v6755_v29, %v6666_v12  ;;  %v7160_v29 = vld [vmem:[#allocation13 + $0x70] sm:$0xff]  ;;  %v7253_v12 = vld [vmem:[#allocation15 + $0x110] sm:$0xff] }
 0xda3   :  { %v10418_v51 = vpop.f32.mrf.mxu1 }
 0xda4   :  { %v7251_v51 = vld [vmem:[#allocation15 + $0x100] sm:$0xff] }
 0xda5   :  { %v6671_v4 = vpop.f32.mrf.mxu1 }
 0xda6   :  { %v14592_v33 = vadd.f32 %v6760_v17, %v6671_v4  ;;  %v7257_v17 = vld [vmem:[#allocation15 + $0x130] sm:$0xff] }
 0xda7   :  { %v10421_v34 = vpop.f32.mrf.mxu1 }
 0xda9   :  { %v6676_v21 = vpop.f32.mrf.mxu1 }
 0xdaa   :  { %v14594_v53 = vadd.f32 %v6765_v60, %v6676_v21  ;;  %v7255_v60 = vld [vmem:[#allocation15 + $0x120] sm:$0xff] }
 0xdab   :  { %v10424_v8 = vpop.f32.mrf.mxu1 }
 0xdbb   :  { %v6848_v2 = vpop.f32.mrf.mxu1 }
 0xdbc   :  { %10502 = vmatmul.mubr.msk.f32.vlgmr.msra.gmra.mxu0 %vm6225_vm3, %v6848_v2 }
 0xdbd   :  { %10511 = vmatpush3.msra.mxu0 %v14417_v18  ;;  %v10478_v25 = vpop.f32.mrf.mxu1  ;;  %10504 = vmatprep.mubr.msk.f32.mxu0 %vm11200_vm0, %v15202_v35 }
 0xdbe   :  { %10512 = vmatprep.subr.mxu0 %v15202_v35 }
 0xdbf   :  { %10513 = vmatpush3.msra.mxu0 %v14424_v52  ;;  %v6853_v0 = vpop.f32.mrf.mxu1 }
 0xdc0   :  { %10514 = vmatprep.subr.mxu0 %v15202_v35  ;;  %10505 = vmatmul.mubr.msk.f32.gmra.mxu0 %vm6225_vm3, %v6853_v0 }
 0xdc1   :  { %10515 = vmatpush3.msra.mxu0 %v14430_v3  ;;  %v10481_v56 = vpop.f32.mrf.mxu1  ;;  %10507 = vmatprep.mubr.msk.f32.mxu0 %vm11200_vm0, %v15202_v35 }
 0xdc2   :  { %10516 = vmatprep.subr.mxu0 %v15202_v35 }
 0xdc3   :  { %10517 = vmatpush3.msra.mxu0 %v14434_v62  ;;  %v6858_v49 = vpop.f32.mrf.mxu1 }
 0xdc4   :  { %10518 = vmatprep.subr.mxu0 %v15202_v35  ;;  %10508 = vmatmul.mubr.msk.f32.gmra.mxu0 %vm6225_vm3, %v6858_v49 }
 0xdc5   :  { %10519 = vmatpush3.msra.mxu0 %v14438_v13  ;;  %10536 = vmatprep.mubr.msk.f32.mxu0 %vm11200_vm0, %v15202_v35  ;;  %v10484_v47 = vpop.f32.mrf.mxu1 }
 0xdc6   :  { %10520 = vmatprep.subr.mxu0 %v15202_v35 }
 0xdc7   :  { %10521 = vmatpush3.msra.mxu0 %v14442_v10 }
 0xdc8   :  { %10522 = vmatprep.subr.mxu0 %v15202_v35 }
 0xdc9   :  { %10523 = vmatpush3.msra.mxu0 %v14446_v26 }
 0xdca   :  { %10524 = vmatprep.subr.mxu0 %v15202_v35 }
 0xdcb   :  { %10525 = vmatpush3.msra.mxu0 %v14450_v44 }
 0xdcc   :  { %10526 = vmatprep.subr.mxu0 %v15202_v35 }
 0xdcd   :  { %10527 = vmatpush3.msra.mxu0 %v14454_v61 }
 0xdce   :  { %10528 = vmatprep.subr.mxu0 %v15202_v35 }
 0xdcf   :  { %10529 = vmatpush3.msra.mxu0 %v14458_v19 }
 0xdd0   :  { %10530 = vmatprep.subr.mxu0 %v15202_v35 }
 0xdd1   :  { %10531 = vmatpush3.msra.mxu0 %v14462_v63 }
 0xdd2   :  { %10532 = vmatprep.subr.mxu0 %v15202_v35 }
 0xdd3   :  { %10533 = vmatpush3.msra.mxu0 %v14466_v30 }
 0xdd4   :  { %10534 = vmatprep.subr.mxu0 %v15202_v35 }
 0xdd5   :  { %10535 = vmatpush3.msra.mxu0 %v14470_v58 }
 0xdd6   :  { %10537 = vmatmul.mubr.msk.f32.vlgmr.msra.gmra.mxu0 %vm6391_vm5, %v6964_v32  ;;  %10605 = vmatprep.subr.mxu0 %v15202_v35 }
 0xdd7   :  { %10539 = vmatprep.mubr.msk.f32.mxu0 %vm11200_vm0, %v15202_v35  ;;  %10606 = vmatpush3.msra.mxu0 %v7258_v42  ;;  %v7546_v42 = vld [vmem:[#allocation13 + $0x90] sm:$0xff] }
 0xdd8   :  { %10607 = vmatprep.subr.mxu0 %v15202_v35 }
 0xdd9   :  { %10608 = vmatpush3.msra.mxu0 %v7257_v17  ;;  %v7547_v17 = vld [vmem:[#allocation13 + $0x98] sm:$0xff] }
 0xdda   :  { %10540 = vmatmul.mubr.msk.f32.gmra.mxu0 %vm6391_vm5, %v6965_v6  ;;  %10609 = vmatprep.subr.mxu0 %v15202_v35 }
 0xddb   :  { %10542 = vmatprep.mubr.msk.f32.mxu0 %vm11200_vm0, %v15202_v35  ;;  %10610 = vmatpush3.msra.mxu0 %v7256_v39  ;;  %v7548_v39 = vld [vmem:[#allocation13 + $0xa0] sm:$0xff] }
 0xddc   :  { %10611 = vmatprep.subr.mxu0 %v15202_v35 }
 0xddd   :  { %10612 = vmatpush3.msra.mxu0 %v7255_v60  ;;  %v7646_v60 = vld [vmem:[#allocation15 + $0x1b8] sm:$0xff] }
 0xdde   :  { %10543 = vmatmul.mubr.msk.f32.gmra.mxu0 %vm6391_vm5, %v6966_v1  ;;  %10613 = vmatprep.subr.mxu0 %v15202_v35 }
 0xddf   :  { %10621 = vmatprep.mubr.msk.f32.mxu0 %vm11200_vm0, %v15202_v35  ;;  %10614 = vmatpush3.msra.mxu0 %v7254_v23  ;;  %v7645_v23 = vld [vmem:[#allocation15 + $0x1b0] sm:$0xff] }
 0xde0   :  { %10615 = vmatprep.subr.mxu0 %v15202_v35 }
 0xde1   :  { %10616 = vmatpush3.msra.mxu0 %v7253_v12  ;;  %v7644_v12 = vld [vmem:[#allocation15 + $0x1a8] sm:$0xff] }
 0xde2   :  { %10617 = vmatprep.subr.mxu0 %v15202_v35 }
 0xe7c   :  { %v6946_v50 = vpop.f32.mrf.mxu0 }
 0xe7d   :  { %v14649_v24 = vadd.f32 %v6946_v50, %v14590_v31  ;;  %v7252_v31 = vld [vmem:[#allocation15 + $0x108] sm:$0xff]  ;;  %v7447_v50 = vld [vmem:[#allocation15 + $0x150] sm:$0xff] }
 0xe7e   :  { %v10503_v37 = vpop.f32.mrf.mxu0  ;;  %10618 = vmatpush3.msra.mxu0 %v7252_v31  ;;  %v7643_v31 = vld [vmem:[#allocation15 + $0x1a0] sm:$0xff] }
 0xe7f   :  { %10619 = vmatprep.subr.mxu0 %v15202_v35  ;;  %v7445_v37 = vld [vmem:[#allocation15 + $0x140] sm:$0xff] }
 0xe80   :  { %v6951_v27 = vpop.f32.mrf.mxu0  ;;  %10620 = vmatpush3.msra.mxu0 %v7251_v51  ;;  %v7642_v51 = vld [vmem:[#allocation15 + $0x198] sm:$0xff] }
 0xe81   :  { %v14652_v11 = vadd.f32 %v6951_v27, %v14592_v33  ;;  %10630 = vmatprep.subr.mxu0 %v15202_v35 }
 0xe82   :  { %v10506_v54 = vpop.f32.mrf.mxu0 }
 0xe84   :  { %v6956_v7 = vpop.f32.mrf.mxu0 }
 0xe85   :  { %v14655_v22 = vadd.f32 %v6956_v7, %v14594_v53 }
 0xe86   :  { %v10509_v41 = vpop.f32.mrf.mxu0 }
 0xe96   :  { %v7042_v20 = vpop.f32.mrf.mxu0 }
 0xe97   :  { %10562 = vmatmul.mubr.msk.f32.vlgmr.msra.gmra.mxu1 %vm6225_vm3, %v7042_v20 }
 0xe98   :  { %10571 = vmatpush3.msra.mxu1 %v14417_v18  ;;  %v10538_v9 = vpop.f32.mrf.mxu0  ;;  %10564 = vmatprep.mubr.msk.f32.mxu1 %vm11200_vm0, %v15202_v35 }
 0xe99   :  { %10572 = vmatprep.subr.mxu1 %v15202_v35 }
 0xe9a   :  { %10573 = vmatpush3.msra.mxu1 %v14424_v52  ;;  %v7047_v43 = vpop.f32.mrf.mxu0 }
 0xe9b   :  { %10574 = vmatprep.subr.mxu1 %v15202_v35  ;;  %10565 = vmatmul.mubr.msk.f32.gmra.mxu1 %vm6225_vm3, %v7047_v43 }
 0xe9c   :  { %10575 = vmatpush3.msra.mxu1 %v14430_v3  ;;  %v10541_v57 = vpop.f32.mrf.mxu0  ;;  %10567 = vmatprep.mubr.msk.f32.mxu1 %vm11200_vm0, %v15202_v35 }
 0xe9d   :  { %10576 = vmatprep.subr.mxu1 %v15202_v35 }
 0xe9e   :  { %10577 = vmatpush3.msra.mxu1 %v14434_v62  ;;  %v7052_v48 = vpop.f32.mrf.mxu0 }
 0xe9f   :  { %10578 = vmatprep.subr.mxu1 %v15202_v35  ;;  %10568 = vmatmul.mubr.msk.f32.gmra.mxu1 %vm6225_vm3, %v7052_v48 }
 0xea0   :  { %10579 = vmatpush3.msra.mxu1 %v14438_v13  ;;  %10596 = vmatprep.mubr.msk.f32.mxu1 %vm11200_vm0, %v15202_v35  ;;  %v10544_v59 = vpop.f32.mrf.mxu0 }
 0xea1   :  { %10580 = vmatprep.subr.mxu1 %v15202_v35 }
 0xea2   :  { %10581 = vmatpush3.msra.mxu1 %v14442_v10 }
 0xea3   :  { %10582 = vmatprep.subr.mxu1 %v15202_v35 }
 0xea4   :  { %10583 = vmatpush3.msra.mxu1 %v14446_v26 }
 0xea5   :  { %10584 = vmatprep.subr.mxu1 %v15202_v35 }
 0xea6   :  { %10585 = vmatpush3.msra.mxu1 %v14450_v44 }
 0xea7   :  { %10586 = vmatprep.subr.mxu1 %v15202_v35 }
 0xea8   :  { %10587 = vmatpush3.msra.mxu1 %v14454_v61 }
 0xea9   :  { %10588 = vmatprep.subr.mxu1 %v15202_v35 }
 0xeaa   :  { %10589 = vmatpush3.msra.mxu1 %v14458_v19 }
 0xeab   :  { %10590 = vmatprep.subr.mxu1 %v15202_v35 }
 0xeac   :  { %10591 = vmatpush3.msra.mxu1 %v14462_v63 }
 0xead   :  { %10592 = vmatprep.subr.mxu1 %v15202_v35 }
 0xeae   :  { %10593 = vmatpush3.msra.mxu1 %v14466_v30 }
 0xeaf   :  { %10594 = vmatprep.subr.mxu1 %v15202_v35 }
 0xeb0   :  { %10595 = vmatpush3.msra.mxu1 %v14470_v58 }
 0xeb1   :  { %10597 = vmatmul.mubr.msk.f32.vlgmr.msra.gmra.mxu1 %vm6391_vm5, %v7158_v14  ;;  %10665 = vmatprep.subr.mxu1 %v15202_v35 }
 0xeb2   :  { %10599 = vmatprep.mubr.msk.f32.mxu1 %vm11200_vm0, %v15202_v35  ;;  %10666 = vmatpush3.msra.mxu1 %v7452_v55  ;;  %v7740_v55 = vld [vmem:[#allocation13 + $0xa8] sm:$0xff] }
 0xeb3   :  { %10667 = vmatprep.subr.mxu1 %v15202_v35 }
 0xeb4   :  { %10668 = vmatpush3.msra.mxu1 %v7451_v16  ;;  %v7741_v16 = vld [vmem:[#allocation13 + $0xb0] sm:$0xff] }
 0xeb5   :  { %10600 = vmatmul.mubr.msk.f32.gmra.mxu1 %vm6391_vm5, %v7159_v46  ;;  %10669 = vmatprep.subr.mxu1 %v15202_v35 }
 0xeb6   :  { %10602 = vmatprep.mubr.msk.f32.mxu1 %vm11200_vm0, %v15202_v35  ;;  %10670 = vmatpush3.msra.mxu1 %v7450_v36  ;;  %v7742_v36 = vld [vmem:[#allocation13 + $0xb8] sm:$0xff] }
 0xeb7   :  { %10671 = vmatprep.subr.mxu1 %v15202_v35 }
 0xeb8   :  { %10672 = vmatpush3.msra.mxu1 %v7449_v28  ;;  %v7840_v28 = vld [vmem:[#allocation15 + $0x1f8] sm:$0xff] }
 0xeb9   :  { %10603 = vmatmul.mubr.msk.f32.gmra.mxu1 %vm6391_vm5, %v7160_v29  ;;  %10673 = vmatprep.subr.mxu1 %v15202_v35 }
 0xeba   :  { %10681 = vmatprep.mubr.msk.f32.mxu1 %vm11200_vm0, %v15202_v35  ;;  %10674 = vmatpush3.msra.mxu1 %v7448_v5  ;;  %v7839_v5 = vld [vmem:[#allocation15 + $0x1f0] sm:$0xff] }
 0xebb   :  { %10675 = vmatprep.subr.mxu1 %v15202_v35 }
 0xebc   :  { %10676 = vmatpush3.msra.mxu1 %v7447_v50  ;;  %v7838_v50 = vld [vmem:[#allocation15 + $0x1e8] sm:$0xff] }
 0xebd   :  { %10677 = vmatprep.subr.mxu1 %v15202_v35 }
 0xf57   :  { %v7140_v4 = vpop.f32.mrf.mxu1 }
 0xf58   :  { %v14710_v33 = vadd.f32 %v7140_v4, %v14649_v24  ;;  %v7446_v24 = vld [vmem:[#allocation15 + $0x148] sm:$0xff]  ;;  %v7641_v4 = vld [vmem:[#allocation15 + $0x190] sm:$0xff] }
 0xf59   :  { %v10563_v34 = vpop.f32.mrf.mxu1  ;;  %10678 = vmatpush3.msra.mxu1 %v7446_v24  ;;  %v7837_v24 = vld [vmem:[#allocation15 + $0x1e0] sm:$0xff] }
 0xf5a   :  { %10679 = vmatprep.subr.mxu1 %v15202_v35  ;;  %v7639_v34 = vld [vmem:[#allocation15 + $0x180] sm:$0xff] }
 0xf5b   :  { %v7145_v21 = vpop.f32.mrf.mxu1  ;;  %10680 = vmatpush3.msra.mxu1 %v7445_v37  ;;  %v7836_v37 = vld [vmem:[#allocation15 + $0x1d8] sm:$0xff] }
 0xf5c   :  { %v14713_v53 = vadd.f32 %v7145_v21, %v14652_v11  ;;  %10690 = vmatprep.subr.mxu1 %v15202_v35 }
 0xf5d   :  { %v10566_v8 = vpop.f32.mrf.mxu1 }
 0xf5f   :  { %v7150_v2 = vpop.f32.mrf.mxu1 }
 0xf60   :  { %v14716_v25 = vadd.f32 %v7150_v2, %v14655_v22 }
 0xf61   :  { %v10569_v0 = vpop.f32.mrf.mxu1 }
 0xf71   :  { %v7236_v56 = vpop.f32.mrf.mxu1 }
 0xf72   :  { %10622 = vmatmul.mubr.msk.f32.vlgmr.msra.gmra.mxu0 %vm6225_vm3, %v7236_v56 }
 0xf73   :  { %10631 = vmatpush3.msra.mxu0 %v14417_v18  ;;  %v10598_v49 = vpop.f32.mrf.mxu1  ;;  %10624 = vmatprep.mubr.msk.f32.mxu0 %vm11200_vm0, %v15202_v35 }
 0xf74   :  { %10632 = vmatprep.subr.mxu0 %v15202_v35 }
 0xf75   :  { %10633 = vmatpush3.msra.mxu0 %v14424_v52  ;;  %v7241_v47 = vpop.f32.mrf.mxu1 }
 0xf76   :  { %10634 = vmatprep.subr.mxu0 %v15202_v35  ;;  %10625 = vmatmul.mubr.msk.f32.gmra.mxu0 %vm6225_vm3, %v7241_v47 }
 0xf77   :  { %10635 = vmatpush3.msra.mxu0 %v14430_v3  ;;  %v10601_v32 = vpop.f32.mrf.mxu1  ;;  %10627 = vmatprep.mubr.msk.f32.mxu0 %vm11200_vm0, %v15202_v35 }
 0xf78   :  { %10636 = vmatprep.subr.mxu0 %v15202_v35 }
 0xf79   :  { %10637 = vmatpush3.msra.mxu0 %v14434_v62  ;;  %v7246_v6 = vpop.f32.mrf.mxu1 }
 0xf7a   :  { %10638 = vmatprep.subr.mxu0 %v15202_v35  ;;  %10628 = vmatmul.mubr.msk.f32.gmra.mxu0 %vm6225_vm3, %v7246_v6 }
 0xf7b   :  { %10639 = vmatpush3.msra.mxu0 %v14438_v13  ;;  %10656 = vmatprep.mubr.msk.f32.mxu0 %vm11200_vm0, %v15202_v35  ;;  %v10604_v1 = vpop.f32.mrf.mxu1 }
 0xf7c   :  { %10640 = vmatprep.subr.mxu0 %v15202_v35 }
 0xf7d   :  { %10641 = vmatpush3.msra.mxu0 %v14442_v10 }
 0xf7e   :  { %10642 = vmatprep.subr.mxu0 %v15202_v35 }
 0xf7f   :  { %10643 = vmatpush3.msra.mxu0 %v14446_v26 }
 0xf80   :  { %10644 = vmatprep.subr.mxu0 %v15202_v35 }
 0xf81   :  { %10645 = vmatpush3.msra.mxu0 %v14450_v44 }
 0xf82   :  { %10646 = vmatprep.subr.mxu0 %v15202_v35 }
 0xf83   :  { %10647 = vmatpush3.msra.mxu0 %v14454_v61 }
 0xf84   :  { %10648 = vmatprep.subr.mxu0 %v15202_v35 }
 0xf85   :  { %10649 = vmatpush3.msra.mxu0 %v14458_v19 }
 0xf86   :  { %10650 = vmatprep.subr.mxu0 %v15202_v35 }
 0xf87   :  { %10651 = vmatpush3.msra.mxu0 %v14462_v63 }
 0xf88   :  { %10652 = vmatprep.subr.mxu0 %v15202_v35 }
 0xf89   :  { %10653 = vmatpush3.msra.mxu0 %v14466_v30 }
 0xf8a   :  { %10654 = vmatprep.subr.mxu0 %v15202_v35 }
 0xf8b   :  { %10655 = vmatpush3.msra.mxu0 %v14470_v58 }
 0xf8c   :  { %10657 = vmatmul.mubr.msk.f32.vlgmr.msra.gmra.mxu0 %vm6391_vm5, %v7352_v45  ;;  %10725 = vmatprep.subr.mxu0 %v15202_v35 }
 0xf8d   :  { %10659 = vmatprep.mubr.msk.f32.mxu0 %vm11200_vm0, %v15202_v35  ;;  %10726 = vmatpush3.msra.mxu0 %v7646_v60 }
 0xf8e   :  { %10727 = vmatprep.subr.mxu0 %v15202_v35 }
 0xf8f   :  { %10728 = vmatpush3.msra.mxu0 %v7645_v23 }
 0xf90   :  { %10660 = vmatmul.mubr.msk.f32.gmra.mxu0 %vm6391_vm5, %v7353_v40  ;;  %10729 = vmatprep.subr.mxu0 %v15202_v35 }
 0xf91   :  { %10662 = vmatprep.mubr.msk.f32.mxu0 %vm11200_vm0, %v15202_v35  ;;  %10730 = vmatpush3.msra.mxu0 %v7644_v12 }
 0xf92   :  { %10731 = vmatprep.subr.mxu0 %v15202_v35 }
 0xf93   :  { %10732 = vmatpush3.msra.mxu0 %v7643_v31 }
 0xf94   :  { %10663 = vmatmul.mubr.msk.f32.gmra.mxu0 %vm6391_vm5, %v7354_v38  ;;  %10733 = vmatprep.subr.mxu0 %v15202_v35 }
 0xf95   :  { %10741 = vmatprep.mubr.msk.f32.mxu0 %vm11200_vm0, %v15202_v35  ;;  %10734 = vmatpush3.msra.mxu0 %v7642_v51 }
 0xf96   :  { %10735 = vmatprep.subr.mxu0 %v15202_v35 }
 0xf97   :  { %10736 = vmatpush3.msra.mxu0 %v7641_v4 }
 0xf98   :  { %10737 = vmatprep.subr.mxu0 %v15202_v35 }
0x1032   :  { %v7334_v27 = vpop.f32.mrf.mxu0 }
0x1033   :  { %v14771_v11 = vadd.f32 %v7334_v27, %v14710_v33  ;;  %v7640_v33 = vld [vmem:[#allocation15 + $0x188] sm:$0xff]  ;;  %v7835_v27 = vld [vmem:[#allocation15 + $0x1d0] sm:$0xff] }
0x1034   :  { %v10623_v54 = vpop.f32.mrf.mxu0  ;;  %10738 = vmatpush3.msra.mxu0 %v7640_v33 }
0x1035   :  { %10739 = vmatprep.subr.mxu0 %v15202_v35  ;;  %v7833_v54 = vld [vmem:[#allocation15 + $0x1c0] sm:$0xff] }
0x1036   :  { %v7339_v7 = vpop.f32.mrf.mxu0  ;;  %10740 = vmatpush3.msra.mxu0 %v7639_v34 }
0x1037   :  { %v14774_v22 = vadd.f32 %v7339_v7, %v14713_v53  ;;  %10750 = vmatprep.subr.mxu0 %v15202_v35 }
0x1038   :  { %v10626_v41 = vpop.f32.mrf.mxu0 }
0x103a   :  { %v7344_v20 = vpop.f32.mrf.mxu0 }
0x103b   :  { %v14777_v9 = vadd.f32 %v7344_v20, %v14716_v25 }
0x103c   :  { %v10629_v43 = vpop.f32.mrf.mxu0 }
0x104c   :  { %v7430_v57 = vpop.f32.mrf.mxu0 }
0x104d   :  { %10682 = vmatmul.mubr.msk.f32.vlgmr.msra.gmra.mxu1 %vm6225_vm3, %v7430_v57 }
0x104e   :  { %10691 = vmatpush3.msra.mxu1 %v14417_v18  ;;  %v10658_v48 = vpop.f32.mrf.mxu0  ;;  %10684 = vmatprep.mubr.msk.f32.mxu1 %vm11200_vm0, %v15202_v35 }
0x104f   :  { %10692 = vmatprep.subr.mxu1 %v15202_v35 }
0x1050   :  { %10693 = vmatpush3.msra.mxu1 %v14424_v52  ;;  %v7435_v59 = vpop.f32.mrf.mxu0 }
0x1051   :  { %10694 = vmatprep.subr.mxu1 %v15202_v35  ;;  %10685 = vmatmul.mubr.msk.f32.gmra.mxu1 %vm6225_vm3, %v7435_v59 }
0x1052   :  { %10695 = vmatpush3.msra.mxu1 %v14430_v3  ;;  %v10661_v14 = vpop.f32.mrf.mxu0  ;;  %10687 = vmatprep.mubr.msk.f32.mxu1 %vm11200_vm0, %v15202_v35 }
0x1053   :  { %10696 = vmatprep.subr.mxu1 %v15202_v35 }
0x1054   :  { %10697 = vmatpush3.msra.mxu1 %v14434_v62  ;;  %v7440_v46 = vpop.f32.mrf.mxu0 }
0x1055   :  { %10698 = vmatprep.subr.mxu1 %v15202_v35  ;;  %10688 = vmatmul.mubr.msk.f32.gmra.mxu1 %vm6225_vm3, %v7440_v46 }
0x1056   :  { %10699 = vmatpush3.msra.mxu1 %v14438_v13  ;;  %10716 = vmatprep.mubr.msk.f32.mxu1 %vm11200_vm0, %v15202_v35  ;;  %v10664_v29 = vpop.f32.mrf.mxu0 }
0x1057   :  { %10700 = vmatprep.subr.mxu1 %v15202_v35 }
0x1058   :  { %10701 = vmatpush3.msra.mxu1 %v14442_v10 }
0x1059   :  { %10702 = vmatprep.subr.mxu1 %v15202_v35 }
0x105a   :  { %10703 = vmatpush3.msra.mxu1 %v14446_v26 }
0x105b   :  { %10704 = vmatprep.subr.mxu1 %v15202_v35 }
0x105c   :  { %10705 = vmatpush3.msra.mxu1 %v14450_v44 }
0x105d   :  { %10706 = vmatprep.subr.mxu1 %v15202_v35 }
0x105e   :  { %10707 = vmatpush3.msra.mxu1 %v14454_v61 }
0x105f   :  { %10708 = vmatprep.subr.mxu1 %v15202_v35 }
0x1060   :  { %10709 = vmatpush3.msra.mxu1 %v14458_v19 }
0x1061   :  { %10710 = vmatprep.subr.mxu1 %v15202_v35 }
0x1062   :  { %10711 = vmatpush3.msra.mxu1 %v14462_v63 }
0x1063   :  { %10712 = vmatprep.subr.mxu1 %v15202_v35 }
0x1064   :  { %10713 = vmatpush3.msra.mxu1 %v14466_v30 }
0x1065   :  { %10714 = vmatprep.subr.mxu1 %v15202_v35 }
0x1066   :  { %10715 = vmatpush3.msra.mxu1 %v14470_v58 }
0x1067   :  { %10717 = vmatmul.mubr.msk.f32.vlgmr.msra.gmra.mxu1 %vm6391_vm5, %v7546_v42  ;;  %10785 = vmatprep.subr.mxu1 %v15202_v35 }
0x1068   :  { %10719 = vmatprep.mubr.msk.f32.mxu1 %vm11200_vm0, %v15202_v35  ;;  %10786 = vmatpush3.msra.mxu1 %v7840_v28 }
0x1069   :  { %10787 = vmatprep.subr.mxu1 %v15202_v35 }
0x106a   :  { %10788 = vmatpush3.msra.mxu1 %v7839_v5 }
0x106b   :  { %10720 = vmatmul.mubr.msk.f32.gmra.mxu1 %vm6391_vm5, %v7547_v17  ;;  %10789 = vmatprep.subr.mxu1 %v15202_v35 }
0x106c   :  { %10722 = vmatprep.mubr.msk.f32.mxu1 %vm11200_vm0, %v15202_v35  ;;  %10790 = vmatpush3.msra.mxu1 %v7838_v50 }
0x106d   :  { %10791 = vmatprep.subr.mxu1 %v15202_v35 }
0x106e   :  { %10792 = vmatpush3.msra.mxu1 %v7837_v24 }
0x106f   :  { %10723 = vmatmul.mubr.msk.f32.gmra.mxu1 %vm6391_vm5, %v7548_v39  ;;  %10793 = vmatprep.subr.mxu1 %v15202_v35 }
0x1070   :  { %10801 = vmatprep.mubr.msk.f32.mxu1 %vm11200_vm0, %v15202_v35  ;;  %10794 = vmatpush3.msra.mxu1 %v7836_v37 }
0x1071   :  { %10795 = vmatprep.subr.mxu1 %v15202_v35 }
0x1072   :  { %10796 = vmatpush3.msra.mxu1 %v7835_v27 }
0x1073   :  { %10797 = vmatprep.subr.mxu1 %v15202_v35 }
0x110d   :  { %v7528_v21 = vpop.f32.mrf.mxu1 }
0x110e   :  { %v14832_v53 = vadd.f32 %v7528_v21, %v14771_v11  ;;  %v7834_v11 = vld [vmem:[#allocation15 + $0x1c8] sm:$0xff] }
0x110f   :  { %v10683_v8 = vpop.f32.mrf.mxu1  ;;  %10798 = vmatpush3.msra.mxu1 %v7834_v11 }
0x1110   :  { %10799 = vmatprep.subr.mxu1 %v15202_v35 }
0x1111   :  { %v7533_v2 = vpop.f32.mrf.mxu1  ;;  %10800 = vmatpush3.msra.mxu1 %v7833_v54 }
0x1112   :  { %v14835_v25 = vadd.f32 %v7533_v2, %v14774_v22  ;;  %10810 = vmatprep.subr.mxu1 %v15202_v35 }
0x1113   :  { %v10686_v0 = vpop.f32.mrf.mxu1 }
0x1115   :  { %v7538_v56 = vpop.f32.mrf.mxu1 }
0x1116   :  { %v14838_v49 = vadd.f32 %v7538_v56, %v14777_v9 }
0x1117   :  { %v10689_v47 = vpop.f32.mrf.mxu1 }
0x1127   :  { %v7624_v32 = vpop.f32.mrf.mxu1 }
0x1128   :  { %10742 = vmatmul.mubr.msk.f32.vlgmr.msra.gmra.mxu0 %vm6225_vm3, %v7624_v32 }
0x1129   :  { %10751 = vmatpush3.msra.mxu0 %v14417_v18  ;;  %v10718_v6 = vpop.f32.mrf.mxu1  ;;  %10744 = vmatprep.mubr.msk.f32.mxu0 %vm11200_vm0, %v15202_v35 }
0x112a   :  { %10752 = vmatprep.subr.mxu0 %v15202_v35 }
0x112b   :  { %10753 = vmatpush3.msra.mxu0 %v14424_v52  ;;  %v7629_v1 = vpop.f32.mrf.mxu1 }
0x112c   :  { %10754 = vmatprep.subr.mxu0 %v15202_v35  ;;  %10745 = vmatmul.mubr.msk.f32.gmra.mxu0 %vm6225_vm3, %v7629_v1 }
0x112d   :  { %10755 = vmatpush3.msra.mxu0 %v14430_v3  ;;  %v10721_v45 = vpop.f32.mrf.mxu1  ;;  %10747 = vmatprep.mubr.msk.f32.mxu0 %vm11200_vm0, %v15202_v35 }
0x112e   :  { %10756 = vmatprep.subr.mxu0 %v15202_v35 }
0x112f   :  { %10757 = vmatpush3.msra.mxu0 %v14434_v62  ;;  %v7634_v40 = vpop.f32.mrf.mxu1 }
0x1130   :  { %10758 = vmatprep.subr.mxu0 %v15202_v35  ;;  %10748 = vmatmul.mubr.msk.f32.gmra.mxu0 %vm6225_vm3, %v7634_v40 }
0x1131   :  { %10759 = vmatpush3.msra.mxu0 %v14438_v13  ;;  %10776 = vmatprep.mubr.msk.f32.mxu0 %vm11200_vm0, %v15202_v35  ;;  %v10724_v38 = vpop.f32.mrf.mxu1 }
0x1132   :  { %10760 = vmatprep.subr.mxu0 %v15202_v35 }
0x1133   :  { %10761 = vmatpush3.msra.mxu0 %v14442_v10 }
0x1134   :  { %10762 = vmatprep.subr.mxu0 %v15202_v35 }
0x1135   :  { %10763 = vmatpush3.msra.mxu0 %v14446_v26 }
0x1136   :  { %10764 = vmatprep.subr.mxu0 %v15202_v35 }
0x1137   :  { %10765 = vmatpush3.msra.mxu0 %v14450_v44 }
0x1138   :  { %10766 = vmatprep.subr.mxu0 %v15202_v35 }
0x1139   :  { %10767 = vmatpush3.msra.mxu0 %v14454_v61 }
0x113a   :  { %10768 = vmatprep.subr.mxu0 %v15202_v35 }
0x113b   :  { %10769 = vmatpush3.msra.mxu0 %v14458_v19 }
0x113c   :  { %10770 = vmatprep.subr.mxu0 %v15202_v35 }
0x113d   :  { %10771 = vmatpush3.msra.mxu0 %v14462_v63 }
0x113e   :  { %10772 = vmatprep.subr.mxu0 %v15202_v35 }
0x113f   :  { %10773 = vmatpush3.msra.mxu0 %v14466_v30 }
0x1140   :  { %10774 = vmatprep.subr.mxu0 %v15202_v35 }
0x1141   :  { %10775 = vmatpush3.msra.mxu0 %v14470_v58 }
0x1142   :  { %10777 = vmatmul.mubr.msk.f32.vlgmr.msra.gmra.mxu0 %vm6391_vm5, %v7740_v55  ;;  %10845 = vmatprep.subr.mxu0 %v15202_v35 }
0x1143   :  { %10779 = vmatprep.mubr.msk.f32.mxu0 %vm11200_vm0, %v15202_v35 }
0x1146   :  { %10780 = vmatmul.mubr.msk.f32.gmra.mxu0 %vm6391_vm5, %v7741_v16 }
0x1147   :  { %10782 = vmatprep.mubr.msk.f32.mxu0 %vm11200_vm0, %v15202_v35 }
0x114a   :  { %10783 = vmatmul.mubr.msk.f32.gmra.mxu0 %vm6391_vm5, %v7742_v36 }
0x114b   :  { %10861 = vmatprep.mubr.msk.f32.mxu0 %vm11200_vm0, %v15202_v35 }
0x11e8   :  { %v7722_v7 = vpop.f32.mrf.mxu0 }
0x11e9   :  { %v14893_v22 = vadd.f32 %v7722_v7, %v14832_v53 }
0x11ea   :  { %v10743_v41 = vpop.f32.mrf.mxu0 }
0x11ec   :  { %v7727_v20 = vpop.f32.mrf.mxu0 }
0x11ed   :  { %v14896_v9 = vadd.f32 %v7727_v20, %v14835_v25 }
0x11ee   :  { %v10746_v43 = vpop.f32.mrf.mxu0 }
0x11f0   :  { %v7732_v57 = vpop.f32.mrf.mxu0 }
0x11f1   :  { %v14899_v48 = vadd.f32 %v7732_v57, %v14838_v49 }
0x11f2   :  { %v10749_v59 = vpop.f32.mrf.mxu0 }
0x1202   :  { %v7818_v14 = vpop.f32.mrf.mxu0 }
0x1203   :  { %10802 = vmatmul.mubr.msk.f32.vlgmr.msra.gmra.mxu1 %vm6225_vm3, %v7818_v14 }
0x1204   :  { %10811 = vmatpush3.msra.mxu1 %v14417_v18  ;;  %v10778_v46 = vpop.f32.mrf.mxu0  ;;  %10804 = vmatprep.mubr.msk.f32.mxu1 %vm11200_vm0, %v15202_v35 }
0x1205   :  { %10812 = vmatprep.subr.mxu1 %v15202_v35 }
0x1206   :  { %10813 = vmatpush3.msra.mxu1 %v14424_v52  ;;  %v7823_v29 = vpop.f32.mrf.mxu0 }
0x1207   :  { %10814 = vmatprep.subr.mxu1 %v15202_v35  ;;  %10805 = vmatmul.mubr.msk.f32.gmra.mxu1 %vm6225_vm3, %v7823_v29 }
0x1208   :  { %10815 = vmatpush3.msra.mxu1 %v14430_v3  ;;  %v10781_v42 = vpop.f32.mrf.mxu0  ;;  %10807 = vmatprep.mubr.msk.f32.mxu1 %vm11200_vm0, %v15202_v35  ;;  %v7934_v3 = vld [vmem:[#allocation13 + $0xc0] sm:$0xff] }
0x1209   :  { %10816 = vmatprep.subr.mxu1 %v15202_v35 }
0x120a   :  { %10817 = vmatpush3.msra.mxu1 %v14434_v62  ;;  %v7828_v18 = vpop.f32.mrf.mxu0  ;;  %v7935_v62 = vld [vmem:[#allocation13 + $0xc8] sm:$0xff] }
0x120b   :  { %10818 = vmatprep.subr.mxu1 %v15202_v35  ;;  %10808 = vmatmul.mubr.msk.f32.gmra.mxu1 %vm6225_vm3, %v7828_v18  ;;  %v8127_v18 = vld [vmem:[#allocation16] sm:$0x1] }
0x120c   :  { %10819 = vmatpush3.msra.mxu1 %v14438_v13  ;;  %10836 = vmatprep.mubr.msk.f32.mxu1 %vm11200_vm0, %v15202_v35  ;;  %v10784_v52 = vpop.f32.mrf.mxu0  ;;  %v7936_v13 = vld [vmem:[#allocation13 + $0xd0] sm:$0xff] }
0x120d   :  { %10820 = vmatprep.subr.mxu1 %v15202_v35 }
0x120e   :  { %10821 = vmatpush3.msra.mxu1 %v14442_v10  ;;  %v8034_v10 = vld [vmem:[#allocation15 + $0x238] sm:$0xff] }
0x120f   :  { %10822 = vmatprep.subr.mxu1 %v15202_v35  ;;  %10846 = vmatpush3.msra.mxu0 %v8034_v10 }
0x1210   :  { %10823 = vmatpush3.msra.mxu1 %v14446_v26  ;;  %v8033_v26 = vld [vmem:[#allocation15 + $0x230] sm:$0xff]  ;;  %10847 = vmatprep.subr.mxu0 %v15202_v35 }
0x1211   :  { %10824 = vmatprep.subr.mxu1 %v15202_v35  ;;  %10848 = vmatpush3.msra.mxu0 %v8033_v26 }
0x1212   :  { %10825 = vmatpush3.msra.mxu1 %v14450_v44  ;;  %v8032_v44 = vld [vmem:[#allocation15 + $0x228] sm:$0xff]  ;;  %10849 = vmatprep.subr.mxu0 %v15202_v35 }
0x1213   :  { %10826 = vmatprep.subr.mxu1 %v15202_v35  ;;  %10850 = vmatpush3.msra.mxu0 %v8032_v44 }
0x1214   :  { %10827 = vmatpush3.msra.mxu1 %v14454_v61  ;;  %v8031_v61 = vld [vmem:[#allocation15 + $0x220] sm:$0xff]  ;;  %10851 = vmatprep.subr.mxu0 %v15202_v35 }
0x1215   :  { %10828 = vmatprep.subr.mxu1 %v15202_v35  ;;  %10852 = vmatpush3.msra.mxu0 %v8031_v61 }
0x1216   :  { %10829 = vmatpush3.msra.mxu1 %v14458_v19  ;;  %v8030_v19 = vld [vmem:[#allocation15 + $0x218] sm:$0xff]  ;;  %10853 = vmatprep.subr.mxu0 %v15202_v35 }
0x1217   :  { %10830 = vmatprep.subr.mxu1 %v15202_v35  ;;  %10854 = vmatpush3.msra.mxu0 %v8030_v19 }
0x1218   :  { %10831 = vmatpush3.msra.mxu1 %v14462_v63  ;;  %v8029_v63 = vld [vmem:[#allocation15 + $0x210] sm:$0xff]  ;;  %10855 = vmatprep.subr.mxu0 %v15202_v35 }
0x1219   :  { %10832 = vmatprep.subr.mxu1 %v15202_v35  ;;  %10856 = vmatpush3.msra.mxu0 %v8029_v63 }
0x121a   :  { %10833 = vmatpush3.msra.mxu1 %v14466_v30  ;;  %v8028_v30 = vld [vmem:[#allocation15 + $0x208] sm:$0xff]  ;;  %10857 = vmatprep.subr.mxu0 %v15202_v35 }
0x121b   :  { %10834 = vmatprep.subr.mxu1 %v15202_v35  ;;  %10858 = vmatpush3.msra.mxu0 %v8028_v30 }
0x121c   :  { %10835 = vmatpush3.msra.mxu1 %v14470_v58  ;;  %10859 = vmatprep.subr.mxu0 %v15202_v35  ;;  %v8027_v58 = vld [vmem:[#allocation15 + $0x200] sm:$0xff] }
0x121d   :  { %10837 = vmatmul.mubr.msk.f32.vlgmr.msra.gmra.mxu1 %vm6391_vm5, %v7934_v3  ;;  %10860 = vmatpush3.msra.mxu0 %v8027_v58 }
0x121e   :  { %10839 = vmatprep.mubr.msk.f32.mxu1 %vm11200_vm0, %v15202_v35  ;;  %10870 = vmatprep.subr.mxu0 %v15202_v35 }
0x1221   :  { %10840 = vmatmul.mubr.msk.f32.gmra.mxu1 %vm6391_vm5, %v7935_v62  ;;  %v8128_v62 = vld [vmem:[#allocation18] sm:$0x1] }
0x1222   :  { %10842 = vmatprep.mubr.msk.f32.mxu1 %vm11200_vm0, %v15202_v35 }
0x1225   :  { %10843 = vmatmul.mubr.msk.f32.gmra.mxu1 %vm6391_vm5, %v7936_v13 }
0x12c3   :  { %v7916_v17 = vpop.f32.mrf.mxu1 }
0x12c4   :  { %v7930_v39 = vadd.f32 %v7916_v17, %v14893_v22 }
0x12c5   :  { %v10803_v60 = vpop.f32.mrf.mxu1 }
0x12c7   :  { %v7921_v23 = vpop.f32.mrf.mxu1 }
0x12c8   :  { %v7931_v12 = vadd.f32 %v7921_v23, %v14896_v9 }
0x12c9   :  { %v10806_v31 = vpop.f32.mrf.mxu1 }
0x12cb   :  { %v7926_v51 = vpop.f32.mrf.mxu1 }
0x12cc   :  { %v7932_v4 = vadd.f32 %v7926_v51, %v14899_v48 }
0x12cd   :  { %v10809_v33 = vpop.f32.mrf.mxu1 }
0x12dd   :  { %v8012_v34 = vpop.f32.mrf.mxu1 }
0x12de   :  { %10862 = vmatmul.mubr.msk.f32.vlgmr.msra.gmra.mxu0 %vm6225_vm3, %v8012_v34 }
0x12df   :  { %v10838_v21 = vpop.f32.mrf.mxu1  ;;  %10864 = vmatprep.mubr.msk.f32.mxu0 %vm11200_vm0, %v15202_v35 }
0x12e0   :  { %v8185_v21 = vld [vmem:[#allocation19] sm:$0xff] }
0x12e1   :  { %v8017_v53 = vpop.f32.mrf.mxu1 }
0x12e2   :  { %10865 = vmatmul.mubr.msk.f32.gmra.mxu0 %vm6225_vm3, %v8017_v53 }
0x12e3   :  { %v10841_v8 = vpop.f32.mrf.mxu1  ;;  %10867 = vmatprep.mubr.msk.f32.mxu0 %vm11200_vm0, %v15202_v35 }
0x12e4   :  { %v8191_v8 = vld [vmem:[#allocation21] sm:$0xff] }
0x12e5   :  { %v8022_v2 = vpop.f32.mrf.mxu1 }
0x12e6   :  { %10868 = vmatmul.mubr.msk.f32.gmra.mxu0 %vm6225_vm3, %v8022_v2 }
0x12e7   :  { %v10844_v25 = vpop.f32.mrf.mxu1  ;;  %10876 = vmatprep.mubr.msk.f32.mxu0 %vm11200_vm0, %v15202_v35 }
0x139e   :  { %v8110_v0 = vpop.f32.mrf.mxu0 }
0x139f   :  { %v8124_v49 = vadd.f32 %v8110_v0, %v7930_v39  ;;  %v8187_v39 = vld [vmem:[#allocation19 + $0x10] sm:$0xff] }
0x13a0   :  { %v10863_v56 = vpop.f32.mrf.mxu0 }
0x13a1   :  { %v8138_v1 = vmul.f32 %v8124_v49, %v8124_v49 }
0x13a2   :  { %v8115_v47 = vpop.f32.mrf.mxu0 }
0x13a3   :  { %v8125_v32 = vadd.f32 %v8115_v47, %v7931_v12 }
0x13a4   :  { %v10866_v6 = vpop.f32.mrf.mxu0 }
0x13a5   :  { %v8129_v45 = vadd.f32 %v8125_v32, %v8124_v49  ;;  %v8139_v40 = vmul.f32 %v8125_v32, %v8125_v32 }
0x13a6   :  { %v8120_v38 = vpop.f32.mrf.mxu0 }
0x13a7   :  { %v8141_v55 = vadd.f32 %v8139_v40, %v8138_v1  ;;  %v8126_v16 = vadd.f32 %v8120_v38, %v7932_v4  ;;  %v8186_v4 = vld [vmem:[#allocation19 + $0x8] sm:$0xff] }
0x13a8   :  { %v10869_v36 = vpop.f32.mrf.mxu0 }
0x13a9   :  { %v8130_v28 = vadd.f32 %v8129_v45, %v8126_v16  ;;  %v8140_v5 = vmul.f32 %v8126_v16, %v8126_v16 }
0x13ab   :  { %v8131_v50 = vrot.slane %v8130_v28, 4  ;;  %v8142_v24 = vadd.f32 %v8141_v55, %v8140_v5 }
0x13ad   :  { %v8132_v37 = vadd.f32 %v8131_v50, %v8130_v28  ;;  %v8143_v27 = vrot.slane %v8142_v24, 4 }
0x13af   :  { %v8133_v11 = vrot.slane %v8132_v37, 2  ;;  %v8144_v54 = vadd.f32 %v8143_v27, %v8142_v24 }
0x13b1   :  { %v8134_v7 = vadd.f32 %v8133_v11, %v8132_v37  ;;  %v8145_v22 = vrot.slane %v8144_v54, 2 }
0x13b3   :  { %v8135_v41 = vrot.slane %v8134_v7, 1  ;;  %v8146_v20 = vadd.f32 %v8145_v22, %v8144_v54 }
0x13b5   :  { %v8136_v9 = vadd.f32 %v8135_v41, %v8134_v7  ;;  %v8147_v43 = vrot.slane %v8146_v20, 1 }
0x13b7   :  { %v8137_v57 = vmul.f32 0.055555556, %v8136_v9  ;;  %v8148_v48 = vadd.f32 %v8147_v43, %v8146_v20 }
0x13b9   :  { %v8149_v59 = vmul.f32 0.055555556, %v8148_v48  ;;  %v8150_v14 = vmul.f32 %v8137_v57, %v8137_v57 }
0x13bb   :  { %v8151_v46 = vsub.f32 %v8149_v59, %v8150_v14 }
0x13bd   :  { %v8152_v29 = vmax.f32 %v8151_v46, 0.0 }
0x13bf   :  { %v8153_v42 = vadd.f32 1e-05, %v8152_v29 }
0x13c1   :  { %10902 = vrsqrt.f32 %v8153_v42 }
0x13ce   :  { %v10903_v52 = vpop.eup %10902 }
0x13cf   :  { %v8155_v3 = vmul.f32 %v10903_v52, %v8127_v18 }
0x13d1   :  { %v8156_v13 = vmul.f32 %v8155_v3, %v8137_v57  ;;  %v8162_v10 = vrot.slane %v8155_v3, %v15516_v15 }
0x13d3   :  { %v8157_v26 = vsub.f32 %v8128_v62, %v8156_v13  ;;  %v8164_v44 = vmul.f32 %v8162_v10, %v8124_v49  ;;  %v8165_v61 = vmul.f32 %v8162_v10, %v8125_v32  ;;  %v8166_v19 = vmul.f32 %v8162_v10, %v8126_v16 }
0x13d5   :  { %v8171_v63 = vrot.slane %v8157_v26, %v15516_v15 }
0x13d7   :  { %v8175_v30 = vadd.f32 %v8171_v63, %v8166_v19  ;;  %v8174_v58 = vadd.f32 %v8171_v63, %v8165_v61  ;;  %v8173_v17 = vadd.f32 %v8171_v63, %v8164_v44 }
0x13d9   :  { %v8181_v60 = vmul.f32 0.01, %v8175_v30  ;;  %vm8178_vm0 = vcmp.ge.f32.partialorder %v8175_v30, 0.0  ;;  %vm8177_vm3 = vcmp.ge.f32.partialorder %v8174_v58, 0.0  ;;  %v8180_v23 = vmul.f32 0.01, %v8174_v58 }
0x13da   :  { %vm8176_vm6 = vcmp.ge.f32.partialorder %v8173_v17, 0.0  ;;  %v8179_v12 = vmul.f32 0.01, %v8173_v17 }
0x13db   :  { %v8184_v31 = vsel %vm8178_vm0, %v8175_v30, %v8181_v60  ;;  %v8183_v51 = vsel %vm8177_vm3, %v8174_v58, %v8180_v23 }
0x13dc   :  { %v8190_v33 = vmul.f32 %v8187_v39, %v8184_v31  ;;  %v8182_v34 = vsel %vm8176_vm6, %v8173_v17, %v8179_v12  ;;  %v8189_v53 = vmul.f32 %v8186_v4, %v8183_v51 }
0x13dd   :  { %v8188_v15 = vmul.f32 %v8185_v21, %v8182_v34 }
0x13de   :  { %10871 = vmatpush3.msra.mxu0 %v8190_v33 }
0x13df   :  { %10872 = vmatprep.subr.mxu0 %v15202_v35 }
0x13e0   :  { %10873 = vmatpush3.msra.mxu0 %v8189_v53 }
0x13e1   :  { %10874 = vmatprep.subr.mxu0 %v15202_v35 }
0x13e2   :  { %10875 = vmatpush3.msra.mxu0 %v8188_v15 }
0x13e3   :  { %10877 = vmatmul.mubr.msk.f32.vlgmr.msra.gmra.mxu0 %vm8192_vm7, %v8191_v8 }
0x14a3   :  { %v8262_v2 = vpop.f32.mrf.mxu0 }
0x14a4   :  { %8266 = vadd.xlane.f32.xlu0 %v8262_v2 }
0x14a5   :  { %v10878_v25 = vpop.f32.mrf.mxu0 }
0x152d   :  { %v8267_v0 = vpop.xlane.xlu0 %8266 }
0x152e   :  { %v8633_v56 = vmul.f32 -1.442695, %v8267_v0 }
0x1530   :  { %10904 = vpow2.f32 %v8633_v56 }
0x153d   :  { %v10905_v49 = vpop.eup %10904 }
0x153e   :  { %v8271_v47 = vadd.f32 1.0, %v10905_v49 }
0x1540   :  { %10906 = vrcp.f32 %v8271_v47 }
0x154d   :  { %v10907_v32 = vpop.eup %10906 }
0x154e   :  { %8274 = vst [vmem:[%s14983_s14] sm:$0xff] %v10907_v32 }
0x154f   :  { %8279 = vsyncpa [#allocation3], 1 }
0x1550   :  { %8280 = vsyncpa [#allocation5], 1 }
0x1551   :  { %8281 = vsyncpa [#allocation8], 1 }
0x1552   :  { %8282 = vsyncpa [#allocation11], 1 }
0x1553   :  { %8283 = vsyncpa [#allocation14], 1 }
0x1554   :  { %8284 = vsyncpa [#allocation17], 1 }
0x1555   :  { %8285 = vsyncpa [#allocation20], 1 }

</bundles_post_ra>
